<compile_context>
chip_gen: v7x
topology: tpu7x:2x2x1
jax: 0.10.0
libtpu: 0.0.40
codegen_flags: <defaults>
</compile_context>

<pallas_src>
import functools
import math

import jax
import jax.numpy as jnp
from jax.experimental import pallas as pl
from jax.experimental.pallas import tpu as pltpu

F32 = jnp.float32
BF16 = jnp.bfloat16

_CPARAMS = pltpu.CompilerParams(
    dimension_semantics=("parallel",),
    vmem_limit_bytes=32 * 1024 * 1024,
)


# ----------------------------- small helpers --------------------------------
def _activate(y, act):
    if act == "relu":
        return jnp.maximum(y, 0.0)
    if act == "hardswish":
        return y * jnp.clip(y + 3.0, 0.0, 6.0) * (1.0 / 6.0)
    return y


def _const_spec(arr):
    nd = arr.ndim
    return pl.BlockSpec(arr.shape, lambda b, _nd=nd: (0,) * _nd)


def _batched_spec(tail):
    nd = len(tail)
    return pl.BlockSpec((None,) + tuple(tail),
                        lambda b, _nd=nd: (b,) + (0,) * _nd)


def _conv_geometry(h, w, k, stride, dilation):
    pad = (k - 1) // 2 * dilation
    ho = (h + 2 * pad - dilation * (k - 1) - 1) // stride + 1
    wo = (w + 2 * pad - dilation * (k - 1) - 1) // stride + 1
    hp, wp = h + 2 * pad, w + 2 * pad
    hq, wq = -(-hp // stride), -(-wp // stride)
    return dict(pad=pad, ho=ho, wo=wo, hp=hp, wp=wp,
                hq=hq, wq=wq, hp2=hq * stride, wp2=wq * stride)


def _phase_decompose(x_nhwc, k, stride, dilation):
    """Zero-pad and split the padded map into stride*stride phase planes so the
    in-kernel depthwise taps become contiguous (unstrided) VMEM slices."""
    _, h, w, _ = x_nhwc.shape
    g = _conv_geometry(h, w, k, stride, dilation)
    pad = g["pad"]
    xp = jnp.pad(x_nhwc, ((0, 0),
                          (pad, pad + g["hp2"] - g["hp"]),
                          (pad, pad + g["wp2"] - g["wp"]),
                          (0, 0)))
    planes = [xp[:, r::stride, t::stride, :]
              for r in range(stride) for t in range(stride)]
    xph = planes[0] if len(planes) == 1 else jnp.concatenate(planes, axis=1)
    return xph, g  # (B, stride*stride*Hq, Wq, C)


def _phase_mask(h, w, k, stride, dilation):
    """1.0 on the valid interior, 0.0 on the zero-pad ring, laid out exactly
    like the phase-decomposed input (used to keep the ring at 0 after the
    expand conv's bias/activation)."""
    g = _conv_geometry(h, w, k, stride, dilation)
    pad = g["pad"]
    ys = jnp.arange(g["hp2"])
    xs = jnp.arange(g["wp2"])
    m = (((ys >= pad) & (ys < pad + h))[:, None]
         & ((xs >= pad) & (xs < pad + w))[None, :]).astype(F32)[:, :, None]
    planes = [m[r::stride, t::stride, :]
              for r in range(stride) for t in range(stride)]
    return planes[0] if len(planes) == 1 else jnp.concatenate(planes, axis=0)


def _tap_offsets(k, stride, dilation, hq):
    """(row, col) start offsets of every k*k tap inside the phase-decomposed,
    row-flattened padded map."""
    taps = []
    for i in range(k):
        for j in range(k):
            ai, aj = i * dilation, j * dilation
            r0 = (((ai % stride) * stride) + (aj % stride)) * hq + ai // stride
            taps.append((r0, aj // stride))
    return tuple(taps)


# ----------------------------- Pallas kernels --------------------------------
def _stem_kernel(xph_ref, w_ref, b_ref, o_ref, *, taps, ho, wo, cin):
    """3x3 stride-2 dense conv (Cin=3) + folded BN + hardswish, tap-accumulated
    in VMEM (no im2col)."""
    cout = o_ref.shape[-1]
    acc = jnp.zeros((ho, wo, cout), jnp.float32)
    idx = 0
    for (r0, c0) in taps:
        tap = xph_ref[r0:r0 + ho, c0:c0 + wo, :]            # (Ho, Wo, Cin)
        for c in range(cin):
            acc = acc + tap[:, :, c:c + 1] * w_ref[idx]     # (Ho, Wo, Cout)
            idx += 1
    o_ref[...] = _activate(acc + b_ref[...], "hardswish")


def _ir_block_kernel(*refs, taps, ho, wo, pad, has_expand, use_se, use_res, act):
    """One fused inverted-residual block.  All intermediates stay in VMEM."""
    it = iter(refs)
    xph_ref = next(it)                   # (S2*Hq, Wq, Cin)   f32
    mask_ref = next(it)                  # (S2*Hq, Wq, 1)     f32
    if has_expand:
        we_ref = next(it)                # (Cin, Cexp)        bf16
        be_ref = next(it)                # (1, Cexp)          f32
    wd_ref = next(it)                    # (k*k, 1, Cexp)     f32 (BN folded)
    bd_ref = next(it)                    # (1, Cexp)          f32
    if use_se:
        w1_ref = next(it); b1_ref = next(it)
        w2_ref = next(it); b2_ref = next(it)
    wp_ref = next(it)                    # (Cexp, Cout)       bf16
    bp_ref = next(it)                    # (1, Cout)          f32
    o_ref = next(it)                     # (Ho, Wo, Cout)     f32
    e_ref = next(it)                     # scratch (S2*Hq, Wq, Cexp) f32

    n_rows, _, cexp = e_ref.shape

    # 1) expand 1x1 conv (+BN+act) into the padded, phase-decomposed scratch.
    for r in range(n_rows):
        xr = xph_ref[r]                                       # (Wq, Cin)
        if has_expand:
            er = jnp.dot(xr.astype(BF16), we_ref[...],
                         preferred_element_type=jnp.float32) + be_ref[...]
            er = _activate(er, act)
        else:
            er = xr
        e_ref[r] = er * mask_ref[r]      # keep the zero-pad ring at exactly 0

    # 2) depthwise conv: in-kernel k*k tap accumulation (f32, VPU).
    acc = jnp.zeros((ho, wo, cexp), jnp.float32)
    for t, (r0, c0) in enumerate(taps):
        acc = acc + e_ref[r0:r0 + ho, c0:c0 + wo, :] * wd_ref[t]
    dw = _activate(acc + bd_ref[...], act)                    # (Ho, Wo, Cexp)

    # 3) squeeze-excitation, fused (avg-pool + 2 tiny matmuls + hardsigmoid).
    if use_se:
        pooled = jnp.sum(jnp.sum(dw, axis=0), axis=0, keepdims=True)
        pooled = pooled * (1.0 / (ho * wo))                   # (1, Cexp)
        s = jnp.dot(pooled.astype(BF16), w1_ref[...],
                    preferred_element_type=jnp.float32) + b1_ref[...]
        s = jnp.maximum(s, 0.0)                               # ReLU
        s = jnp.dot(s.astype(BF16), w2_ref[...],
                    preferred_element_type=jnp.float32) + b2_ref[...]
        s = jnp.clip(s + 3.0, 0.0, 6.0) * (1.0 / 6.0)         # hardsigmoid
        dw = dw * s

    # 4) project 1x1 conv (no act) + fused residual add, written row-by-row.
    for r in range(ho):
        yr = jnp.dot(dw[r].astype(BF16), wp_ref[...],
                     preferred_element_type=jnp.float32) + bp_ref[...]
        if use_res:
            yr = yr + xph_ref[pad + r, pad:pad + wo, :]
        o_ref[r] = yr


def _head_kernel(x_ref, wl_ref, bl_ref, w1_ref, b1_ref, w2_ref, b2_ref, o_ref,
                 *, h, w):
    """Fused head: last 1x1 conv+BN+hardswish -> global avg-pool ->
    Linear+hardswish -> Linear (logits)."""
    pooled = jnp.zeros((1, wl_ref.shape[1]), jnp.float32)
    for r in range(h):
        f = jnp.dot(x_ref[r].astype(BF16), wl_ref[...],
                    preferred_element_type=jnp.float32) + bl_ref[...]
        f = _activate(f, "hardswish")
        pooled = pooled + jnp.sum(f, axis=0, keepdims=True)
    pooled = pooled * (1.0 / (h * w))
    y = jnp.dot(pooled.astype(BF16), w1_ref[...],
                preferred_element_type=jnp.float32) + b1_ref[...]
    y = _activate(y, "hardswish")
    # TODO(synk): nn.Dropout(p=0.2) is stochastic only in training; identity here.
    y = jnp.dot(y.astype(BF16), w2_ref[...],
                preferred_element_type=jnp.float32) + b2_ref[...]
    o_ref[...] = y


# ----------------------------- layer wrappers --------------------------------
def stem_conv(x_nhwc, prm):
    b, h, w, cin = x_nhwc.shape
    k, stride, dilation = 3, 2, 1
    xph, g = _phase_decompose(x_nhwc, k, stride, dilation)
    taps = _tap_offsets(k, stride, dilation, g["hq"])
    cout = prm["w"].shape[-1]
    kern = functools.partial(_stem_kernel, taps=taps, ho=g["ho"], wo=g["wo"],
                             cin=cin)
    return pl.pallas_call(
        kern,
        grid=(b,),
        out_shape=jax.ShapeDtypeStruct((b, g["ho"], g["wo"], cout), F32),
        in_specs=[_batched_spec(xph.shape[1:]),
                  _const_spec(prm["w"]), _const_spec(prm["b"])],
        out_specs=_batched_spec((g["ho"], g["wo"], cout)),
        compiler_params=_CPARAMS,
    )(xph, prm["w"], prm["b"])


def inverted_residual_block(x_nhwc, cfg, prm):
    b, h, w, _ = x_nhwc.shape
    k, dilation = cfg["k"], cfg["dilation"]
    stride = 1 if dilation > 1 else cfg["stride"]
    cexp, cout = cfg["exp"], cfg["out"]
    act = "hardswish" if cfg["hs"] else "relu"
    has_expand = cfg["exp"] != cfg["in_c"]
    use_se = cfg["se"]
    use_res = cfg["stride"] == 1 and cfg["in_c"] == cfg["out"]

    xph, g = _phase_decompose(x_nhwc, k, stride, dilation)
    mask = _phase_mask(h, w, k, stride, dilation)
    taps = _tap_offsets(k, stride, dilation, g["hq"])

    inputs = [xph, mask]
    if has_expand:
        inputs += [prm["we"], prm["be"]]
    inputs += [prm["wd"], prm["bd"]]
    if use_se:
        inputs += [prm["w1"], prm["b1"], prm["w2"], prm["b2"]]
    inputs += [prm["wp"], prm["bp"]]
    specs = ([_batched_spec(xph.shape[1:]), _const_spec(mask)]
             + [_const_spec(a) for a in inputs[2:]])

    kern = functools.partial(
        _ir_block_kernel, taps=taps, ho=g["ho"], wo=g["wo"], pad=g["pad"],
        has_expand=has_expand, use_se=use_se, use_res=use_res, act=act)
    return pl.pallas_call(
        kern,
        grid=(b,),
        out_shape=jax.ShapeDtypeStruct((b, g["ho"], g["wo"], cout), F32),
        in_specs=specs,
        out_specs=_batched_spec((g["ho"], g["wo"], cout)),
        scratch_shapes=[pltpu.VMEM((xph.shape[1], g["wq"], cexp), F32)],
        compiler_params=_CPARAMS,
    )(*inputs)


def classifier_head(x_nhwc, prm):
    b, h, w, c = x_nhwc.shape
    nclass = prm["wc2"].shape[1]
    weights = [prm["wl"], prm["bl"], prm["wc1"], prm["bc1"],
               prm["wc2"], prm["bc2"]]
    kern = functools.partial(_head_kernel, h=h, w=w)
    out = pl.pallas_call(
        kern,
        grid=(b,),
        out_shape=jax.ShapeDtypeStruct((b, 1, nclass), F32),
        in_specs=[_batched_spec((h, w, c))] + [_const_spec(a) for a in weights],
        out_specs=_batched_spec((1, nclass)),
        compiler_params=_CPARAMS,
    )(x_nhwc, *weights)
    return out.reshape(b, nclass)


# ----------------------------- model config / params -------------------------
def _make_divisible(v, divisor=8, min_value=None):
    if min_value is None:
        min_value = divisor
    new_v = max(min_value, int(v + divisor / 2) // divisor * divisor)
    if new_v < 0.9 * v:
        new_v += divisor
    return new_v


# Small inverted-residual setting (width_mult=1.0, channels already /8):
CFGS = [
    dict(in_c=16, k=3, exp=16, out=16, se=True,  hs=False, stride=2, dilation=1),
    dict(in_c=16, k=3, exp=72, out=24, se=False, hs=False, stride=2, dilation=1),
    dict(in_c=24, k=5, exp=96, out=24, se=True,  hs=True,  stride=1, dilation=1),
]
LAST_CHANNEL = 128
NUM_CLASSES = 10


def _bn_params(c):
    return dict(gamma=jnp.ones((c,), F32), beta=jnp.zeros((c,), F32),
                mean=jnp.zeros((c,), F32), var=jnp.ones((c,), F32), eps=1e-3)


def _bn_fold(bn):
    scale = bn["gamma"] / jnp.sqrt(bn["var"] + bn["eps"])
    bias = bn["beta"] - bn["mean"] * scale
    return scale, bias


def init_params(key):
    keys = iter(jax.random.split(key, 64))

    def conv_w(kh, kw, cin, cout):
        std = math.sqrt(2.0 / (kh * kw * cout))      # kaiming normal, fan_out
        return std * jax.random.normal(next(keys), (kh, kw, cin, cout), F32)

    def lin_w(cin, cout, std=0.01):
        return std * jax.random.normal(next(keys), (cin, cout), F32)

    params = {}
    first_c = CFGS[0]["in_c"]
    params["first"] = dict(w=conv_w(3, 3, 3, first_c), bn=_bn_params(first_c))

    blocks = []
    for cfg in CFGS:
        p = {}
        if cfg["exp"] != cfg["in_c"]:
            p["expand_w"] = conv_w(1, 1, cfg["in_c"], cfg["exp"]).reshape(
                cfg["in_c"], cfg["exp"])
            p["expand_bn"] = _bn_params(cfg["exp"])
        p["dw_w"] = conv_w(cfg["k"], cfg["k"], 1, cfg["exp"]).reshape(
            cfg["k"], cfg["k"], cfg["exp"])
        p["dw_bn"] = _bn_params(cfg["exp"])
        if cfg["se"]:
            sq = _make_divisible(cfg["exp"] // 4, 8)
            p["se_w1"] = conv_w(1, 1, cfg["exp"], sq).reshape(cfg["exp"], sq)
            p["se_b1"] = jnp.zeros((sq,), F32)
            p["se_w2"] = conv_w(1, 1, sq, cfg["exp"]).reshape(sq, cfg["exp"])
            p["se_b2"] = jnp.zeros((cfg["exp"],), F32)
        p["proj_w"] = conv_w(1, 1, cfg["exp"], cfg["out"]).reshape(
            cfg["exp"], cfg["out"])
        p["proj_bn"] = _bn_params(cfg["out"])
        blocks.append(p)
    params["blocks"] = blocks

    last_in = CFGS[-1]["out"]
    last_out = 6 * last_in
    params["last"] = dict(w=conv_w(1, 1, last_in, last_out).reshape(last_in, last_out),
                          bn=_bn_params(last_out))
    params["cls"] = dict(w1=lin_w(last_out, LAST_CHANNEL),
                         b1=jnp.zeros((LAST_CHANNEL,), F32),
                         w2=lin_w(LAST_CHANNEL, NUM_CLASSES),
                         b2=jnp.zeros((NUM_CLASSES,), F32))
    return params


def prepare_params(params):
    """Fold BatchNorm (inference running stats) into conv weights/biases ONCE
    and cast matmul weights to bf16.  Depthwise / elementwise params stay f32."""
    prep = {}
    scale, bias = _bn_fold(params["first"]["bn"])
    w = params["first"]["w"] * scale                       # (3,3,3,C0)
    c0 = w.shape[-1]
    prep["stem"] = dict(w=w.reshape(3 * 3 * 3, 1, c0).astype(F32),
                        b=bias.reshape(1, c0).astype(F32))
    blocks = []
    for cfg, p in zip(CFGS, params["blocks"]):
        d = {}
        if cfg["exp"] != cfg["in_c"]:
            s, bi = _bn_fold(p["expand_bn"])
            d["we"] = (p["expand_w"] * s[None, :]).astype(BF16)
            d["be"] = bi.reshape(1, -1).astype(F32)
        s, bi = _bn_fold(p["dw_bn"])
        d["wd"] = (p["dw_w"] * s).reshape(
            cfg["k"] * cfg["k"], 1, cfg["exp"]).astype(F32)
        d["bd"] = bi.reshape(1, -1).astype(F32)
        if cfg["se"]:
            d["w1"] = p["se_w1"].astype(BF16)
            d["b1"] = p["se_b1"].reshape(1, -1).astype(F32)
            d["w2"] = p["se_w2"].astype(BF16)
            d["b2"] = p["se_b2"].reshape(1, -1).astype(F32)
        s, bi = _bn_fold(p["proj_bn"])
        d["wp"] = (p["proj_w"] * s[None, :]).astype(BF16)
        d["bp"] = bi.reshape(1, -1).astype(F32)
        blocks.append(d)
    prep["blocks"] = blocks
    s, bi = _bn_fold(params["last"]["bn"])
    prep["head"] = dict(
        wl=(params["last"]["w"] * s[None, :]).astype(BF16),
        bl=bi.reshape(1, -1).astype(F32),
        wc1=params["cls"]["w1"].astype(BF16),
        bc1=params["cls"]["b1"].reshape(1, -1).astype(F32),
        wc2=params["cls"]["w2"].astype(BF16),
        bc2=params["cls"]["b2"].reshape(1, -1).astype(F32))
    return prep


# ----------------------------- forward ---------------------------------------
def mobilenetv3_forward(prep, x_nchw):
    x = jnp.transpose(x_nchw.astype(F32), (0, 2, 3, 1))      # NCHW -> NHWC
    x = stem_conv(x, prep["stem"])                           # fused conv+BN+HS
    for cfg, prm in zip(CFGS, prep["blocks"]):
        x = inverted_residual_block(x, cfg, prm)             # fused per block
    return classifier_head(x, prep["head"])                  # fused head


if __name__ == "__main__":
    key = jax.random.PRNGKey(0)
    pkey, xkey = jax.random.split(key)
    raw_params = init_params(pkey)
    prep = prepare_params(raw_params)        # BN folding + bf16 cast, done once
    x = jax.random.normal(xkey, (2, 3, 16, 16), F32)          # NCHW, PyTorch-style
    fwd = jax.jit(mobilenetv3_forward)
    out = fwd(prep, x)
    jax.block_until_ready(out)
    assert out.shape == (2, NUM_CLASSES) and out.dtype == F32
    assert bool(jnp.all(jnp.isfinite(out)))
    print("KERNEL_OK")
</pallas_src>

<mosaic_0001>
module attributes {stable_mosaic.version = 11 : i64} {
  func.func @_stem_kernel(%arg0: i32, %arg1: memref<1x36x9x3xf32, #tpu.memory_space<vmem>>, %arg2: memref<27x1x16xf32, #tpu.memory_space<vmem>>, %arg3: memref<1x16xf32, #tpu.memory_space<vmem>>, %arg4: memref<1x8x8x16xf32, #tpu.memory_space<vmem>>) attributes {dimension_semantics = [#tpu.dimension_semantics<parallel>], iteration_bounds = array<i64: 2>, scalar_prefetch = 0 : i64, scratch_operands = 0 : i64, tpu.core_type = #tpu.core_type<tc>, window_params = [{transform_indices = @transform_0, window_bounds = array<i64: 1, 36, 9, 3>}, {pipeline_mode = #tpu.pipeline_mode<synchronous>, transform_indices = @transform_1, window_bounds = array<i64: 27, 1, 16>}, {pipeline_mode = #tpu.pipeline_mode<synchronous>, transform_indices = @transform_2, window_bounds = array<i64: 1, 16>}, {transform_indices = @transform_3, window_bounds = array<i64: 1, 8, 8, 16>}]} {
    %cst = arith.constant 0.000000e+00 : f32
    %0 = vector.broadcast %cst : f32 to vector<8x8x16xf32>
    %c0 = arith.constant 0 : index
    %c0_0 = arith.constant 0 : index
    %c0_1 = arith.constant 0 : index
    %c0_2 = arith.constant 0 : index
    %1 = vector.load %arg1[%c0, %c0_0, %c0_1, %c0_2] : memref<1x36x9x3xf32, #tpu.memory_space<vmem>>, vector<1x8x8x3xf32>
    %2 = vector.shape_cast %1 : vector<1x8x8x3xf32> to vector<8x8x3xf32>
    %3 = vector.extract_strided_slice %2 {offsets = [0, 0, 0], sizes = [8, 8, 1], strides = [1, 1, 1]} : vector<8x8x3xf32> to vector<8x8x1xf32>
    %c0_3 = arith.constant 0 : index
    %c0_4 = arith.constant 0 : index
    %c0_5 = arith.constant 0 : index
    %4 = vector.load %arg2[%c0_3, %c0_4, %c0_5] : memref<27x1x16xf32, #tpu.memory_space<vmem>>, vector<1x1x16xf32>
    %5 = vector.shape_cast %4 : vector<1x1x16xf32> to vector<1x16xf32>
    %6 = vector.shape_cast %5 : vector<1x16xf32> to vector<1x1x16xf32>
    %7 = vector.broadcast %3 : vector<8x8x1xf32> to vector<8x8x16xf32>
    %8 = vector.broadcast %6 : vector<1x1x16xf32> to vector<8x8x16xf32>
    %9 = arith.mulf %7, %8 : vector<8x8x16xf32>
    %10 = arith.addf %0, %9 : vector<8x8x16xf32>
    %11 = vector.extract_strided_slice %2 {offsets = [0, 0, 1], sizes = [8, 8, 1], strides = [1, 1, 1]} : vector<8x8x3xf32> to vector<8x8x1xf32>
    %c1 = arith.constant 1 : index
    %c0_6 = arith.constant 0 : index
    %c0_7 = arith.constant 0 : index
    %12 = vector.load %arg2[%c1, %c0_6, %c0_7] : memref<27x1x16xf32, #tpu.memory_space<vmem>>, vector<1x1x16xf32>
    %13 = vector.shape_cast %12 : vector<1x1x16xf32> to vector<1x16xf32>
    %14 = vector.shape_cast %13 : vector<1x16xf32> to vector<1x1x16xf32>
    %15 = vector.broadcast %11 : vector<8x8x1xf32> to vector<8x8x16xf32>
    %16 = vector.broadcast %14 : vector<1x1x16xf32> to vector<8x8x16xf32>
    %17 = arith.mulf %15, %16 : vector<8x8x16xf32>
    %18 = arith.addf %10, %17 : vector<8x8x16xf32>
    %19 = vector.extract_strided_slice %2 {offsets = [0, 0, 2], sizes = [8, 8, 1], strides = [1, 1, 1]} : vector<8x8x3xf32> to vector<8x8x1xf32>
    %c2 = arith.constant 2 : index
    %c0_8 = arith.constant 0 : index
    %c0_9 = arith.constant 0 : index
    %20 = vector.load %arg2[%c2, %c0_8, %c0_9] : memref<27x1x16xf32, #tpu.memory_space<vmem>>, vector<1x1x16xf32>
    %21 = vector.shape_cast %20 : vector<1x1x16xf32> to vector<1x16xf32>
    %22 = vector.shape_cast %21 : vector<1x16xf32> to vector<1x1x16xf32>
    %23 = vector.broadcast %19 : vector<8x8x1xf32> to vector<8x8x16xf32>
    %24 = vector.broadcast %22 : vector<1x1x16xf32> to vector<8x8x16xf32>
    %25 = arith.mulf %23, %24 : vector<8x8x16xf32>
    %26 = arith.addf %18, %25 : vector<8x8x16xf32>
    %c0_10 = arith.constant 0 : index
    %c9 = arith.constant 9 : index
    %c0_11 = arith.constant 0 : index
    %c0_12 = arith.constant 0 : index
    %27 = vector.load %arg1[%c0_10, %c9, %c0_11, %c0_12] : memref<1x36x9x3xf32, #tpu.memory_space<vmem>>, vector<1x8x8x3xf32>
    %28 = vector.shape_cast %27 : vector<1x8x8x3xf32> to vector<8x8x3xf32>
    %29 = vector.extract_strided_slice %28 {offsets = [0, 0, 0], sizes = [8, 8, 1], strides = [1, 1, 1]} : vector<8x8x3xf32> to vector<8x8x1xf32>
    %c3 = arith.constant 3 : index
    %c0_13 = arith.constant 0 : index
    %c0_14 = arith.constant 0 : index
    %30 = vector.load %arg2[%c3, %c0_13, %c0_14] : memref<27x1x16xf32, #tpu.memory_space<vmem>>, vector<1x1x16xf32>
    %31 = vector.shape_cast %30 : vector<1x1x16xf32> to vector<1x16xf32>
    %32 = vector.shape_cast %31 : vector<1x16xf32> to vector<1x1x16xf32>
    %33 = vector.broadcast %29 : vector<8x8x1xf32> to vector<8x8x16xf32>
    %34 = vector.broadcast %32 : vector<1x1x16xf32> to vector<8x8x16xf32>
    %35 = arith.mulf %33, %34 : vector<8x8x16xf32>
    %36 = arith.addf %26, %35 : vector<8x8x16xf32>
    %37 = vector.extract_strided_slice %28 {offsets = [0, 0, 1], sizes = [8, 8, 1], strides = [1, 1, 1]} : vector<8x8x3xf32> to vector<8x8x1xf32>
    %c4 = arith.constant 4 : index
    %c0_15 = arith.constant 0 : index
    %c0_16 = arith.constant 0 : index
    %38 = vector.load %arg2[%c4, %c0_15, %c0_16] : memref<27x1x16xf32, #tpu.memory_space<vmem>>, vector<1x1x16xf32>
    %39 = vector.shape_cast %38 : vector<1x1x16xf32> to vector<1x16xf32>
    %40 = vector.shape_cast %39 : vector<1x16xf32> to vector<1x1x16xf32>
    %41 = vector.broadcast %37 : vector<8x8x1xf32> to vector<8x8x16xf32>
    %42 = vector.broadcast %40 : vector<1x1x16xf32> to vector<8x8x16xf32>
    %43 = arith.mulf %41, %42 : vector<8x8x16xf32>
    %44 = arith.addf %36, %43 : vector<8x8x16xf32>
    %45 = vector.extract_strided_slice %28 {offsets = [0, 0, 2], sizes = [8, 8, 1], strides = [1, 1, 1]} : vector<8x8x3xf32> to vector<8x8x1xf32>
    %c5 = arith.constant 5 : index
    %c0_17 = arith.constant 0 : index
    %c0_18 = arith.constant 0 : index
    %46 = vector.load %arg2[%c5, %c0_17, %c0_18] : memref<27x1x16xf32, #tpu.memory_space<vmem>>, vector<1x1x16xf32>
    %47 = vector.shape_cast %46 : vector<1x1x16xf32> to vector<1x16xf32>
    %48 = vector.shape_cast %47 : vector<1x16xf32> to vector<1x1x16xf32>
    %49 = vector.broadcast %45 : vector<8x8x1xf32> to vector<8x8x16xf32>
    %50 = vector.broadcast %48 : vector<1x1x16xf32> to vector<8x8x16xf32>
    %51 = arith.mulf %49, %50 : vector<8x8x16xf32>
    %52 = arith.addf %44, %51 : vector<8x8x16xf32>
    %c0_19 = arith.constant 0 : index
    %c0_20 = arith.constant 0 : index
    %c1_21 = arith.constant 1 : index
    %c0_22 = arith.constant 0 : index
    %53 = vector.load %arg1[%c0_19, %c0_20, %c1_21, %c0_22] : memref<1x36x9x3xf32, #tpu.memory_space<vmem>>, vector<1x8x8x3xf32>
    %54 = vector.shape_cast %53 : vector<1x8x8x3xf32> to vector<8x8x3xf32>
    %55 = vector.extract_strided_slice %54 {offsets = [0, 0, 0], sizes = [8, 8, 1], strides = [1, 1, 1]} : vector<8x8x3xf32> to vector<8x8x1xf32>
    %c6 = arith.constant 6 : index
    %c0_23 = arith.constant 0 : index
    %c0_24 = arith.constant 0 : index
    %56 = vector.load %arg2[%c6, %c0_23, %c0_24] : memref<27x1x16xf32, #tpu.memory_space<vmem>>, vector<1x1x16xf32>
    %57 = vector.shape_cast %56 : vector<1x1x16xf32> to vector<1x16xf32>
    %58 = vector.shape_cast %57 : vector<1x16xf32> to vector<1x1x16xf32>
    %59 = vector.broadcast %55 : vector<8x8x1xf32> to vector<8x8x16xf32>
    %60 = vector.broadcast %58 : vector<1x1x16xf32> to vector<8x8x16xf32>
    %61 = arith.mulf %59, %60 : vector<8x8x16xf32>
    %62 = arith.addf %52, %61 : vector<8x8x16xf32>
    %63 = vector.extract_strided_slice %54 {offsets = [0, 0, 1], sizes = [8, 8, 1], strides = [1, 1, 1]} : vector<8x8x3xf32> to vector<8x8x1xf32>
    %c7 = arith.constant 7 : index
    %c0_25 = arith.constant 0 : index
    %c0_26 = arith.constant 0 : index
    %64 = vector.load %arg2[%c7, %c0_25, %c0_26] : memref<27x1x16xf32, #tpu.memory_space<vmem>>, vector<1x1x16xf32>
    %65 = vector.shape_cast %64 : vector<1x1x16xf32> to vector<1x16xf32>
    %66 = vector.shape_cast %65 : vector<1x16xf32> to vector<1x1x16xf32>
    %67 = vector.broadcast %63 : vector<8x8x1xf32> to vector<8x8x16xf32>
    %68 = vector.broadcast %66 : vector<1x1x16xf32> to vector<8x8x16xf32>
    %69 = arith.mulf %67, %68 : vector<8x8x16xf32>
    %70 = arith.addf %62, %69 : vector<8x8x16xf32>
    %71 = vector.extract_strided_slice %54 {offsets = [0, 0, 2], sizes = [8, 8, 1], strides = [1, 1, 1]} : vector<8x8x3xf32> to vector<8x8x1xf32>
    %c8 = arith.constant 8 : index
    %c0_27 = arith.constant 0 : index
    %c0_28 = arith.constant 0 : index
    %72 = vector.load %arg2[%c8, %c0_27, %c0_28] : memref<27x1x16xf32, #tpu.memory_space<vmem>>, vector<1x1x16xf32>
    %73 = vector.shape_cast %72 : vector<1x1x16xf32> to vector<1x16xf32>
    %74 = vector.shape_cast %73 : vector<1x16xf32> to vector<1x1x16xf32>
    %75 = vector.broadcast %71 : vector<8x8x1xf32> to vector<8x8x16xf32>
    %76 = vector.broadcast %74 : vector<1x1x16xf32> to vector<8x8x16xf32>
    %77 = arith.mulf %75, %76 : vector<8x8x16xf32>
    %78 = arith.addf %70, %77 : vector<8x8x16xf32>
    %c0_29 = arith.constant 0 : index
    %c18 = arith.constant 18 : index
    %c0_30 = arith.constant 0 : index
    %c0_31 = arith.constant 0 : index
    %79 = vector.load %arg1[%c0_29, %c18, %c0_30, %c0_31] : memref<1x36x9x3xf32, #tpu.memory_space<vmem>>, vector<1x8x8x3xf32>
    %80 = vector.shape_cast %79 : vector<1x8x8x3xf32> to vector<8x8x3xf32>
    %81 = vector.extract_strided_slice %80 {offsets = [0, 0, 0], sizes = [8, 8, 1], strides = [1, 1, 1]} : vector<8x8x3xf32> to vector<8x8x1xf32>
    %c9_32 = arith.constant 9 : index
    %c0_33 = arith.constant 0 : index
    %c0_34 = arith.constant 0 : index
    %82 = vector.load %arg2[%c9_32, %c0_33, %c0_34] : memref<27x1x16xf32, #tpu.memory_space<vmem>>, vector<1x1x16xf32>
    %83 = vector.shape_cast %82 : vector<1x1x16xf32> to vector<1x16xf32>
    %84 = vector.shape_cast %83 : vector<1x16xf32> to vector<1x1x16xf32>
    %85 = vector.broadcast %81 : vector<8x8x1xf32> to vector<8x8x16xf32>
    %86 = vector.broadcast %84 : vector<1x1x16xf32> to vector<8x8x16xf32>
    %87 = arith.mulf %85, %86 : vector<8x8x16xf32>
    %88 = arith.addf %78, %87 : vector<8x8x16xf32>
    %89 = vector.extract_strided_slice %80 {offsets = [0, 0, 1], sizes = [8, 8, 1], strides = [1, 1, 1]} : vector<8x8x3xf32> to vector<8x8x1xf32>
    %c10 = arith.constant 10 : index
    %c0_35 = arith.constant 0 : index
    %c0_36 = arith.constant 0 : index
    %90 = vector.load %arg2[%c10, %c0_35, %c0_36] : memref<27x1x16xf32, #tpu.memory_space<vmem>>, vector<1x1x16xf32>
    %91 = vector.shape_cast %90 : vector<1x1x16xf32> to vector<1x16xf32>
    %92 = vector.shape_cast %91 : vector<1x16xf32> to vector<1x1x16xf32>
    %93 = vector.broadcast %89 : vector<8x8x1xf32> to vector<8x8x16xf32>
    %94 = vector.broadcast %92 : vector<1x1x16xf32> to vector<8x8x16xf32>
    %95 = arith.mulf %93, %94 : vector<8x8x16xf32>
    %96 = arith.addf %88, %95 : vector<8x8x16xf32>
    %97 = vector.extract_strided_slice %80 {offsets = [0, 0, 2], sizes = [8, 8, 1], strides = [1, 1, 1]} : vector<8x8x3xf32> to vector<8x8x1xf32>
    %c11 = arith.constant 11 : index
    %c0_37 = arith.constant 0 : index
    %c0_38 = arith.constant 0 : index
    %98 = vector.load %arg2[%c11, %c0_37, %c0_38] : memref<27x1x16xf32, #tpu.memory_space<vmem>>, vector<1x1x16xf32>
    %99 = vector.shape_cast %98 : vector<1x1x16xf32> to vector<1x16xf32>
    %100 = vector.shape_cast %99 : vector<1x16xf32> to vector<1x1x16xf32>
    %101 = vector.broadcast %97 : vector<8x8x1xf32> to vector<8x8x16xf32>
    %102 = vector.broadcast %100 : vector<1x1x16xf32> to vector<8x8x16xf32>
    %103 = arith.mulf %101, %102 : vector<8x8x16xf32>
    %104 = arith.addf %96, %103 : vector<8x8x16xf32>
    %c0_39 = arith.constant 0 : index
    %c27 = arith.constant 27 : index
    %c0_40 = arith.constant 0 : index
    %c0_41 = arith.constant 0 : index
    %105 = vector.load %arg1[%c0_39, %c27, %c0_40, %c0_41] : memref<1x36x9x3xf32, #tpu.memory_space<vmem>>, vector<1x8x8x3xf32>
    %106 = vector.shape_cast %105 : vector<1x8x8x3xf32> to vector<8x8x3xf32>
    %107 = vector.extract_strided_slice %106 {offsets = [0, 0, 0], sizes = [8, 8, 1], strides = [1, 1, 1]} : vector<8x8x3xf32> to vector<8x8x1xf32>
    %c12 = arith.constant 12 : index
    %c0_42 = arith.constant 0 : index
    %c0_43 = arith.constant 0 : index
    %108 = vector.load %arg2[%c12, %c0_42, %c0_43] : memref<27x1x16xf32, #tpu.memory_space<vmem>>, vector<1x1x16xf32>
    %109 = vector.shape_cast %108 : vector<1x1x16xf32> to vector<1x16xf32>
    %110 = vector.shape_cast %109 : vector<1x16xf32> to vector<1x1x16xf32>
    %111 = vector.broadcast %107 : vector<8x8x1xf32> to vector<8x8x16xf32>
    %112 = vector.broadcast %110 : vector<1x1x16xf32> to vector<8x8x16xf32>
    %113 = arith.mulf %111, %112 : vector<8x8x16xf32>
    %114 = arith.addf %104, %113 : vector<8x8x16xf32>
    %115 = vector.extract_strided_slice %106 {offsets = [0, 0, 1], sizes = [8, 8, 1], strides = [1, 1, 1]} : vector<8x8x3xf32> to vector<8x8x1xf32>
    %c13 = arith.constant 13 : index
    %c0_44 = arith.constant 0 : index
    %c0_45 = arith.constant 0 : index
    %116 = vector.load %arg2[%c13, %c0_44, %c0_45] : memref<27x1x16xf32, #tpu.memory_space<vmem>>, vector<1x1x16xf32>
    %117 = vector.shape_cast %116 : vector<1x1x16xf32> to vector<1x16xf32>
    %118 = vector.shape_cast %117 : vector<1x16xf32> to vector<1x1x16xf32>
    %119 = vector.broadcast %115 : vector<8x8x1xf32> to vector<8x8x16xf32>
    %120 = vector.broadcast %118 : vector<1x1x16xf32> to vector<8x8x16xf32>
    %121 = arith.mulf %119, %120 : vector<8x8x16xf32>
    %122 = arith.addf %114, %121 : vector<8x8x16xf32>
    %123 = vector.extract_strided_slice %106 {offsets = [0, 0, 2], sizes = [8, 8, 1], strides = [1, 1, 1]} : vector<8x8x3xf32> to vector<8x8x1xf32>
    %c14 = arith.constant 14 : index
    %c0_46 = arith.constant 0 : index
    %c0_47 = arith.constant 0 : index
    %124 = vector.load %arg2[%c14, %c0_46, %c0_47] : memref<27x1x16xf32, #tpu.memory_space<vmem>>, vector<1x1x16xf32>
    %125 = vector.shape_cast %124 : vector<1x1x16xf32> to vector<1x16xf32>
    %126 = vector.shape_cast %125 : vector<1x16xf32> to vector<1x1x16xf32>
    %127 = vector.broadcast %123 : vector<8x8x1xf32> to vector<8x8x16xf32>
    %128 = vector.broadcast %126 : vector<1x1x16xf32> to vector<8x8x16xf32>
    %129 = arith.mulf %127, %128 : vector<8x8x16xf32>
    %130 = arith.addf %122, %129 : vector<8x8x16xf32>
    %c0_48 = arith.constant 0 : index
    %c18_49 = arith.constant 18 : index
    %c1_50 = arith.constant 1 : index
    %c0_51 = arith.constant 0 : index
    %131 = vector.load %arg1[%c0_48, %c18_49, %c1_50, %c0_51] : memref<1x36x9x3xf32, #tpu.memory_space<vmem>>, vector<1x8x8x3xf32>
    %132 = vector.shape_cast %131 : vector<1x8x8x3xf32> to vector<8x8x3xf32>
    %133 = vector.extract_strided_slice %132 {offsets = [0, 0, 0], sizes = [8, 8, 1], strides = [1, 1, 1]} : vector<8x8x3xf32> to vector<8x8x1xf32>
    %c15 = arith.constant 15 : index
    %c0_52 = arith.constant 0 : index
    %c0_53 = arith.constant 0 : index
    %134 = vector.load %arg2[%c15, %c0_52, %c0_53] : memref<27x1x16xf32, #tpu.memory_space<vmem>>, vector<1x1x16xf32>
    %135 = vector.shape_cast %134 : vector<1x1x16xf32> to vector<1x16xf32>
    %136 = vector.shape_cast %135 : vector<1x16xf32> to vector<1x1x16xf32>
    %137 = vector.broadcast %133 : vector<8x8x1xf32> to vector<8x8x16xf32>
    %138 = vector.broadcast %136 : vector<1x1x16xf32> to vector<8x8x16xf32>
    %139 = arith.mulf %137, %138 : vector<8x8x16xf32>
    %140 = arith.addf %130, %139 : vector<8x8x16xf32>
    %141 = vector.extract_strided_slice %132 {offsets = [0, 0, 1], sizes = [8, 8, 1], strides = [1, 1, 1]} : vector<8x8x3xf32> to vector<8x8x1xf32>
    %c16 = arith.constant 16 : index
    %c0_54 = arith.constant 0 : index
    %c0_55 = arith.constant 0 : index
    %142 = vector.load %arg2[%c16, %c0_54, %c0_55] : memref<27x1x16xf32, #tpu.memory_space<vmem>>, vector<1x1x16xf32>
    %143 = vector.shape_cast %142 : vector<1x1x16xf32> to vector<1x16xf32>
    %144 = vector.shape_cast %143 : vector<1x16xf32> to vector<1x1x16xf32>
    %145 = vector.broadcast %141 : vector<8x8x1xf32> to vector<8x8x16xf32>
    %146 = vector.broadcast %144 : vector<1x1x16xf32> to vector<8x8x16xf32>
    %147 = arith.mulf %145, %146 : vector<8x8x16xf32>
    %148 = arith.addf %140, %147 : vector<8x8x16xf32>
    %149 = vector.extract_strided_slice %132 {offsets = [0, 0, 2], sizes = [8, 8, 1], strides = [1, 1, 1]} : vector<8x8x3xf32> to vector<8x8x1xf32>
    %c17 = arith.constant 17 : index
    %c0_56 = arith.constant 0 : index
    %c0_57 = arith.constant 0 : index
    %150 = vector.load %arg2[%c17, %c0_56, %c0_57] : memref<27x1x16xf32, #tpu.memory_space<vmem>>, vector<1x1x16xf32>
    %151 = vector.shape_cast %150 : vector<1x1x16xf32> to vector<1x16xf32>
    %152 = vector.shape_cast %151 : vector<1x16xf32> to vector<1x1x16xf32>
    %153 = vector.broadcast %149 : vector<8x8x1xf32> to vector<8x8x16xf32>
    %154 = vector.broadcast %152 : vector<1x1x16xf32> to vector<8x8x16xf32>
    %155 = arith.mulf %153, %154 : vector<8x8x16xf32>
    %156 = arith.addf %148, %155 : vector<8x8x16xf32>
    %c0_58 = arith.constant 0 : index
    %c1_59 = arith.constant 1 : index
    %c0_60 = arith.constant 0 : index
    %c0_61 = arith.constant 0 : index
    %157 = vector.load %arg1[%c0_58, %c1_59, %c0_60, %c0_61] : memref<1x36x9x3xf32, #tpu.memory_space<vmem>>, vector<1x8x8x3xf32>
    %158 = vector.shape_cast %157 : vector<1x8x8x3xf32> to vector<8x8x3xf32>
    %159 = vector.extract_strided_slice %158 {offsets = [0, 0, 0], sizes = [8, 8, 1], strides = [1, 1, 1]} : vector<8x8x3xf32> to vector<8x8x1xf32>
    %c18_62 = arith.constant 18 : index
    %c0_63 = arith.constant 0 : index
    %c0_64 = arith.constant 0 : index
    %160 = vector.load %arg2[%c18_62, %c0_63, %c0_64] : memref<27x1x16xf32, #tpu.memory_space<vmem>>, vector<1x1x16xf32>
    %161 = vector.shape_cast %160 : vector<1x1x16xf32> to vector<1x16xf32>
    %162 = vector.shape_cast %161 : vector<1x16xf32> to vector<1x1x16xf32>
    %163 = vector.broadcast %159 : vector<8x8x1xf32> to vector<8x8x16xf32>
    %164 = vector.broadcast %162 : vector<1x1x16xf32> to vector<8x8x16xf32>
    %165 = arith.mulf %163, %164 : vector<8x8x16xf32>
    %166 = arith.addf %156, %165 : vector<8x8x16xf32>
    %167 = vector.extract_strided_slice %158 {offsets = [0, 0, 1], sizes = [8, 8, 1], strides = [1, 1, 1]} : vector<8x8x3xf32> to vector<8x8x1xf32>
    %c19 = arith.constant 19 : index
    %c0_65 = arith.constant 0 : index
    %c0_66 = arith.constant 0 : index
    %168 = vector.load %arg2[%c19, %c0_65, %c0_66] : memref<27x1x16xf32, #tpu.memory_space<vmem>>, vector<1x1x16xf32>
    %169 = vector.shape_cast %168 : vector<1x1x16xf32> to vector<1x16xf32>
    %170 = vector.shape_cast %169 : vector<1x16xf32> to vector<1x1x16xf32>
    %171 = vector.broadcast %167 : vector<8x8x1xf32> to vector<8x8x16xf32>
    %172 = vector.broadcast %170 : vector<1x1x16xf32> to vector<8x8x16xf32>
    %173 = arith.mulf %171, %172 : vector<8x8x16xf32>
    %174 = arith.addf %166, %173 : vector<8x8x16xf32>
    %175 = vector.extract_strided_slice %158 {offsets = [0, 0, 2], sizes = [8, 8, 1], strides = [1, 1, 1]} : vector<8x8x3xf32> to vector<8x8x1xf32>
    %c20 = arith.constant 20 : index
    %c0_67 = arith.constant 0 : index
    %c0_68 = arith.constant 0 : index
    %176 = vector.load %arg2[%c20, %c0_67, %c0_68] : memref<27x1x16xf32, #tpu.memory_space<vmem>>, vector<1x1x16xf32>
    %177 = vector.shape_cast %176 : vector<1x1x16xf32> to vector<1x16xf32>
    %178 = vector.shape_cast %177 : vector<1x16xf32> to vector<1x1x16xf32>
    %179 = vector.broadcast %175 : vector<8x8x1xf32> to vector<8x8x16xf32>
    %180 = vector.broadcast %178 : vector<1x1x16xf32> to vector<8x8x16xf32>
    %181 = arith.mulf %179, %180 : vector<8x8x16xf32>
    %182 = arith.addf %174, %181 : vector<8x8x16xf32>
    %c0_69 = arith.constant 0 : index
    %c10_70 = arith.constant 10 : index
    %c0_71 = arith.constant 0 : index
    %c0_72 = arith.constant 0 : index
    %183 = vector.load %arg1[%c0_69, %c10_70, %c0_71, %c0_72] : memref<1x36x9x3xf32, #tpu.memory_space<vmem>>, vector<1x8x8x3xf32>
    %184 = vector.shape_cast %183 : vector<1x8x8x3xf32> to vector<8x8x3xf32>
    %185 = vector.extract_strided_slice %184 {offsets = [0, 0, 0], sizes = [8, 8, 1], strides = [1, 1, 1]} : vector<8x8x3xf32> to vector<8x8x1xf32>
    %c21 = arith.constant 21 : index
    %c0_73 = arith.constant 0 : index
    %c0_74 = arith.constant 0 : index
    %186 = vector.load %arg2[%c21, %c0_73, %c0_74] : memref<27x1x16xf32, #tpu.memory_space<vmem>>, vector<1x1x16xf32>
    %187 = vector.shape_cast %186 : vector<1x1x16xf32> to vector<1x16xf32>
    %188 = vector.shape_cast %187 : vector<1x16xf32> to vector<1x1x16xf32>
    %189 = vector.broadcast %185 : vector<8x8x1xf32> to vector<8x8x16xf32>
    %190 = vector.broadcast %188 : vector<1x1x16xf32> to vector<8x8x16xf32>
    %191 = arith.mulf %189, %190 : vector<8x8x16xf32>
    %192 = arith.addf %182, %191 : vector<8x8x16xf32>
    %193 = vector.extract_strided_slice %184 {offsets = [0, 0, 1], sizes = [8, 8, 1], strides = [1, 1, 1]} : vector<8x8x3xf32> to vector<8x8x1xf32>
    %c22 = arith.constant 22 : index
    %c0_75 = arith.constant 0 : index
    %c0_76 = arith.constant 0 : index
    %194 = vector.load %arg2[%c22, %c0_75, %c0_76] : memref<27x1x16xf32, #tpu.memory_space<vmem>>, vector<1x1x16xf32>
    %195 = vector.shape_cast %194 : vector<1x1x16xf32> to vector<1x16xf32>
    %196 = vector.shape_cast %195 : vector<1x16xf32> to vector<1x1x16xf32>
    %197 = vector.broadcast %193 : vector<8x8x1xf32> to vector<8x8x16xf32>
    %198 = vector.broadcast %196 : vector<1x1x16xf32> to vector<8x8x16xf32>
    %199 = arith.mulf %197, %198 : vector<8x8x16xf32>
    %200 = arith.addf %192, %199 : vector<8x8x16xf32>
    %201 = vector.extract_strided_slice %184 {offsets = [0, 0, 2], sizes = [8, 8, 1], strides = [1, 1, 1]} : vector<8x8x3xf32> to vector<8x8x1xf32>
    %c23 = arith.constant 23 : index
    %c0_77 = arith.constant 0 : index
    %c0_78 = arith.constant 0 : index
    %202 = vector.load %arg2[%c23, %c0_77, %c0_78] : memref<27x1x16xf32, #tpu.memory_space<vmem>>, vector<1x1x16xf32>
    %203 = vector.shape_cast %202 : vector<1x1x16xf32> to vector<1x16xf32>
    %204 = vector.shape_cast %203 : vector<1x16xf32> to vector<1x1x16xf32>
    %205 = vector.broadcast %201 : vector<8x8x1xf32> to vector<8x8x16xf32>
    %206 = vector.broadcast %204 : vector<1x1x16xf32> to vector<8x8x16xf32>
    %207 = arith.mulf %205, %206 : vector<8x8x16xf32>
    %208 = arith.addf %200, %207 : vector<8x8x16xf32>
    %c0_79 = arith.constant 0 : index
    %c1_80 = arith.constant 1 : index
    %c1_81 = arith.constant 1 : index
    %c0_82 = arith.constant 0 : index
    %209 = vector.load %arg1[%c0_79, %c1_80, %c1_81, %c0_82] : memref<1x36x9x3xf32, #tpu.memory_space<vmem>>, vector<1x8x8x3xf32>
    %210 = vector.shape_cast %209 : vector<1x8x8x3xf32> to vector<8x8x3xf32>
    %211 = vector.extract_strided_slice %210 {offsets = [0, 0, 0], sizes = [8, 8, 1], strides = [1, 1, 1]} : vector<8x8x3xf32> to vector<8x8x1xf32>
    %c24 = arith.constant 24 : index
    %c0_83 = arith.constant 0 : index
    %c0_84 = arith.constant 0 : index
    %212 = vector.load %arg2[%c24, %c0_83, %c0_84] : memref<27x1x16xf32, #tpu.memory_space<vmem>>, vector<1x1x16xf32>
    %213 = vector.shape_cast %212 : vector<1x1x16xf32> to vector<1x16xf32>
    %214 = vector.shape_cast %213 : vector<1x16xf32> to vector<1x1x16xf32>
    %215 = vector.broadcast %211 : vector<8x8x1xf32> to vector<8x8x16xf32>
    %216 = vector.broadcast %214 : vector<1x1x16xf32> to vector<8x8x16xf32>
    %217 = arith.mulf %215, %216 : vector<8x8x16xf32>
    %218 = arith.addf %208, %217 : vector<8x8x16xf32>
    %219 = vector.extract_strided_slice %210 {offsets = [0, 0, 1], sizes = [8, 8, 1], strides = [1, 1, 1]} : vector<8x8x3xf32> to vector<8x8x1xf32>
    %c25 = arith.constant 25 : index
    %c0_85 = arith.constant 0 : index
    %c0_86 = arith.constant 0 : index
    %220 = vector.load %arg2[%c25, %c0_85, %c0_86] : memref<27x1x16xf32, #tpu.memory_space<vmem>>, vector<1x1x16xf32>
    %221 = vector.shape_cast %220 : vector<1x1x16xf32> to vector<1x16xf32>
    %222 = vector.shape_cast %221 : vector<1x16xf32> to vector<1x1x16xf32>
    %223 = vector.broadcast %219 : vector<8x8x1xf32> to vector<8x8x16xf32>
    %224 = vector.broadcast %222 : vector<1x1x16xf32> to vector<8x8x16xf32>
    %225 = arith.mulf %223, %224 : vector<8x8x16xf32>
    %226 = arith.addf %218, %225 : vector<8x8x16xf32>
    %227 = vector.extract_strided_slice %210 {offsets = [0, 0, 2], sizes = [8, 8, 1], strides = [1, 1, 1]} : vector<8x8x3xf32> to vector<8x8x1xf32>
    %c26 = arith.constant 26 : index
    %c0_87 = arith.constant 0 : index
    %c0_88 = arith.constant 0 : index
    %228 = vector.load %arg2[%c26, %c0_87, %c0_88] : memref<27x1x16xf32, #tpu.memory_space<vmem>>, vector<1x1x16xf32>
    %229 = vector.shape_cast %228 : vector<1x1x16xf32> to vector<1x16xf32>
    %230 = vector.shape_cast %229 : vector<1x16xf32> to vector<1x1x16xf32>
    %231 = vector.broadcast %227 : vector<8x8x1xf32> to vector<8x8x16xf32>
    %232 = vector.broadcast %230 : vector<1x1x16xf32> to vector<8x8x16xf32>
    %233 = arith.mulf %231, %232 : vector<8x8x16xf32>
    %234 = arith.addf %226, %233 : vector<8x8x16xf32>
    %c0_89 = arith.constant 0 : index
    %c0_90 = arith.constant 0 : index
    %235 = vector.load %arg3[%c0_89, %c0_90] : memref<1x16xf32, #tpu.memory_space<vmem>>, vector<1x16xf32>
    %236 = vector.shape_cast %235 : vector<1x16xf32> to vector<1x1x16xf32>
    %237 = vector.broadcast %236 : vector<1x1x16xf32> to vector<8x8x16xf32>
    %238 = arith.addf %234, %237 : vector<8x8x16xf32>
    %cst_91 = arith.constant 3.000000e+00 : f32
    %239 = vector.broadcast %cst_91 : f32 to vector<8x8x16xf32>
    %240 = arith.addf %238, %239 : vector<8x8x16xf32>
    %cst_92 = arith.constant 0.000000e+00 : f32
    %cst_93 = arith.constant 6.000000e+00 : f32
    %241 = vector.broadcast %cst_92 : f32 to vector<8x8x16xf32>
    %242 = arith.maximumf %241, %240 : vector<8x8x16xf32>
    %243 = vector.broadcast %cst_93 : f32 to vector<8x8x16xf32>
    %244 = arith.minimumf %243, %242 : vector<8x8x16xf32>
    %245 = arith.mulf %238, %244 : vector<8x8x16xf32>
    %cst_94 = arith.constant 0.166666672 : f32
    %246 = vector.broadcast %cst_94 : f32 to vector<8x8x16xf32>
    %247 = arith.mulf %245, %246 : vector<8x8x16xf32>
    %c0_95 = arith.constant 0 : index
    %c0_96 = arith.constant 0 : index
    %c0_97 = arith.constant 0 : index
    %c0_98 = arith.constant 0 : index
    %248 = vector.load %arg4[%c0_95, %c0_96, %c0_97, %c0_98] : memref<1x8x8x16xf32, #tpu.memory_space<vmem>>, vector<1x8x8x16xf32>
    %249 = vector.shape_cast %248 : vector<1x8x8x16xf32> to vector<8x8x16xf32>
    %250 = vector.shape_cast %247 : vector<8x8x16xf32> to vector<1x8x8x16xf32>
    tpu.vector_store %arg4[%c0_95, %c0_96, %c0_97, %c0_98], %250 {strides = array<i32>} : memref<1x8x8x16xf32, #tpu.memory_space<vmem>>, vector<1x8x8x16xf32>,
    return
  }
  func.func @transform_0(%arg0: i32) -> (i32, i32, i32, i32) {
    %c0_i32 = arith.constant 0 : i32
    %c0_i32_0 = arith.constant 0 : i32
    %c0_i32_1 = arith.constant 0 : i32
    %c0_i32_2 = arith.constant 0 : i32
    return %arg0, %c0_i32, %c0_i32_0, %c0_i32_1 : i32, i32, i32, i32
  }
  func.func @transform_1(%arg0: i32) -> (i32, i32, i32) {
    %c0_i32 = arith.constant 0 : i32
    %c0_i32_0 = arith.constant 0 : i32
    %c0_i32_1 = arith.constant 0 : i32
    %c0_i32_2 = arith.constant 0 : i32
    return %c0_i32, %c0_i32_0, %c0_i32_1 : i32, i32, i32
  }
  func.func @transform_2(%arg0: i32) -> (i32, i32) {
    %c0_i32 = arith.constant 0 : i32
    %c0_i32_0 = arith.constant 0 : i32
    %c0_i32_1 = arith.constant 0 : i32
    return %c0_i32, %c0_i32_0 : i32, i32
  }
  func.func @transform_3(%arg0: i32) -> (i32, i32, i32, i32) {
    %c0_i32 = arith.constant 0 : i32
    %c0_i32_0 = arith.constant 0 : i32
    %c0_i32_1 = arith.constant 0 : i32
    %c0_i32_2 = arith.constant 0 : i32
    return %arg0, %c0_i32, %c0_i32_0, %c0_i32_1 : i32, i32, i32, i32
  }
}

module attributes {stable_mosaic.version = 11 : i64} {
  func.func @_ir_block_kernel(%arg0: i32, %arg1: memref<1x20x5x16xf32, #tpu.memory_space<vmem>>, %arg2: memref<20x5x1xf32, #tpu.memory_space<vmem>>, %arg3: memref<9x1x16xf32, #tpu.memory_space<vmem>>, %arg4: memref<1x16xf32, #tpu.memory_space<vmem>>, %arg5: memref<16x8xbf16, #tpu.memory_space<vmem>>, %arg6: memref<1x8xf32, #tpu.memory_space<vmem>>, %arg7: memref<8x16xbf16, #tpu.memory_space<vmem>>, %arg8: memref<1x16xf32, #tpu.memory_space<vmem>>, %arg9: memref<16x16xbf16, #tpu.memory_space<vmem>>, %arg10: memref<1x16xf32, #tpu.memory_space<vmem>>, %arg11: memref<1x4x4x16xf32, #tpu.memory_space<vmem>>, %arg12: memref<20x5x16xf32, #tpu.memory_space<vmem>>) attributes {dimension_semantics = [#tpu.dimension_semantics<parallel>], iteration_bounds = array<i64: 2>, scalar_prefetch = 0 : i64, scratch_operands = 1 : i64, tpu.core_type = #tpu.core_type<tc>, window_params = [{transform_indices = @transform_0, window_bounds = array<i64: 1, 20, 5, 16>}, {pipeline_mode = #tpu.pipeline_mode<synchronous>, transform_indices = @transform_1, window_bounds = array<i64: 20, 5, 1>}, {pipeline_mode = #tpu.pipeline_mode<synchronous>, transform_indices = @transform_2, window_bounds = array<i64: 9, 1, 16>}, {pipeline_mode = #tpu.pipeline_mode<synchronous>, transform_indices = @transform_3, window_bounds = array<i64: 1, 16>}, {pipeline_mode = #tpu.pipeline_mode<synchronous>, transform_indices = @transform_4, window_bounds = array<i64: 16, 8>}, {pipeline_mode = #tpu.pipeline_mode<synchronous>, transform_indices = @transform_5, window_bounds = array<i64: 1, 8>}, {pipeline_mode = #tpu.pipeline_mode<synchronous>, transform_indices = @transform_6, window_bounds = array<i64: 8, 16>}, {pipeline_mode = #tpu.pipeline_mode<synchronous>, transform_indices = @transform_7, window_bounds = array<i64: 1, 16>}, {pipeline_mode = #tpu.pipeline_mode<synchronous>, transform_indices = @transform_8, window_bounds = array<i64: 16, 16>}, {pipeline_mode = #tpu.pipeline_mode<synchronous>, transform_indices = @transform_9, window_bounds = array<i64: 1, 16>}, {transform_indices = @transform_10, window_bounds = array<i64: 1, 4, 4, 16>}]} {
    %c0 = arith.constant 0 : index
    %c0_0 = arith.constant 0 : index
    %c0_1 = arith.constant 0 : index
    %c0_2 = arith.constant 0 : index
    %0 = vector.load %arg1[%c0, %c0_0, %c0_1, %c0_2] : memref<1x20x5x16xf32, #tpu.memory_space<vmem>>, vector<1x1x5x16xf32>
    %1 = vector.shape_cast %0 : vector<1x1x5x16xf32> to vector<5x16xf32>
    %c0_3 = arith.constant 0 : index
    %c0_4 = arith.constant 0 : index
    %c0_5 = arith.constant 0 : index
    %2 = vector.load %arg2[%c0_3, %c0_4, %c0_5] : memref<20x5x1xf32, #tpu.memory_space<vmem>>, vector<1x5x1xf32>
    %3 = vector.shape_cast %2 : vector<1x5x1xf32> to vector<5x1xf32>
    %4 = vector.broadcast %3 : vector<5x1xf32> to vector<5x16xf32>
    %5 = arith.mulf %1, %4 : vector<5x16xf32>
    %c0_6 = arith.constant 0 : index
    %c0_7 = arith.constant 0 : index
    %c0_8 = arith.constant 0 : index
    %6 = vector.load %arg12[%c0_6, %c0_7, %c0_8] : memref<20x5x16xf32, #tpu.memory_space<vmem>>, vector<1x5x16xf32>
    %7 = vector.shape_cast %6 : vector<1x5x16xf32> to vector<5x16xf32>
    %8 = vector.shape_cast %5 : vector<5x16xf32> to vector<1x5x16xf32>
    tpu.vector_store %arg12[%c0_6, %c0_7, %c0_8], %8 {strides = array<i32>} : memref<20x5x16xf32, #tpu.memory_space<vmem>>, vector<1x5x16xf32>,
    %c0_9 = arith.constant 0 : index
    %c1 = arith.constant 1 : index
    %c0_10 = arith.constant 0 : index
    %c0_11 = arith.constant 0 : index
    %9 = vector.load %arg1[%c0_9, %c1, %c0_10, %c0_11] : memref<1x20x5x16xf32, #tpu.memory_space<vmem>>, vector<1x1x5x16xf32>
    %10 = vector.shape_cast %9 : vector<1x1x5x16xf32> to vector<5x16xf32>
    %c1_12 = arith.constant 1 : index
    %c0_13 = arith.constant 0 : index
    %c0_14 = arith.constant 0 : index
    %11 = vector.load %arg2[%c1_12, %c0_13, %c0_14] : memref<20x5x1xf32, #tpu.memory_space<vmem>>, vector<1x5x1xf32>
    %12 = vector.shape_cast %11 : vector<1x5x1xf32> to vector<5x1xf32>
    %13 = vector.broadcast %12 : vector<5x1xf32> to vector<5x16xf32>
    %14 = arith.mulf %10, %13 : vector<5x16xf32>
    %c1_15 = arith.constant 1 : index
    %c0_16 = arith.constant 0 : index
    %c0_17 = arith.constant 0 : index
    %15 = vector.load %arg12[%c1_15, %c0_16, %c0_17] : memref<20x5x16xf32, #tpu.memory_space<vmem>>, vector<1x5x16xf32>
    %16 = vector.shape_cast %15 : vector<1x5x16xf32> to vector<5x16xf32>
    %17 = vector.shape_cast %14 : vector<5x16xf32> to vector<1x5x16xf32>
    tpu.vector_store %arg12[%c1_15, %c0_16, %c0_17], %17 {strides = array<i32>} : memref<20x5x16xf32, #tpu.memory_space<vmem>>, vector<1x5x16xf32>,
    %c0_18 = arith.constant 0 : index
    %c2 = arith.constant 2 : index
    %c0_19 = arith.constant 0 : index
    %c0_20 = arith.constant 0 : index
    %18 = vector.load %arg1[%c0_18, %c2, %c0_19, %c0_20] : memref<1x20x5x16xf32, #tpu.memory_space<vmem>>, vector<1x1x5x16xf32>
    %19 = vector.shape_cast %18 : vector<1x1x5x16xf32> to vector<5x16xf32>
    %c2_21 = arith.constant 2 : index
    %c0_22 = arith.constant 0 : index
    %c0_23 = arith.constant 0 : index
    %20 = vector.load %arg2[%c2_21, %c0_22, %c0_23] : memref<20x5x1xf32, #tpu.memory_space<vmem>>, vector<1x5x1xf32>
    %21 = vector.shape_cast %20 : vector<1x5x1xf32> to vector<5x1xf32>
    %22 = vector.broadcast %21 : vector<5x1xf32> to vector<5x16xf32>
    %23 = arith.mulf %19, %22 : vector<5x16xf32>
    %c2_24 = arith.constant 2 : index
    %c0_25 = arith.constant 0 : index
    %c0_26 = arith.constant 0 : index
    %24 = vector.load %arg12[%c2_24, %c0_25, %c0_26] : memref<20x5x16xf32, #tpu.memory_space<vmem>>, vector<1x5x16xf32>
    %25 = vector.shape_cast %24 : vector<1x5x16xf32> to vector<5x16xf32>
    %26 = vector.shape_cast %23 : vector<5x16xf32> to vector<1x5x16xf32>
    tpu.vector_store %arg12[%c2_24, %c0_25, %c0_26], %26 {strides = array<i32>} : memref<20x5x16xf32, #tpu.memory_space<vmem>>, vector<1x5x16xf32>,
    %c0_27 = arith.constant 0 : index
    %c3 = arith.constant 3 : index
    %c0_28 = arith.constant 0 : index
    %c0_29 = arith.constant 0 : index
    %27 = vector.load %arg1[%c0_27, %c3, %c0_28, %c0_29] : memref<1x20x5x16xf32, #tpu.memory_space<vmem>>, vector<1x1x5x16xf32>
    %28 = vector.shape_cast %27 : vector<1x1x5x16xf32> to vector<5x16xf32>
    %c3_30 = arith.constant 3 : index
    %c0_31 = arith.constant 0 : index
    %c0_32 = arith.constant 0 : index
    %29 = vector.load %arg2[%c3_30, %c0_31, %c0_32] : memref<20x5x1xf32, #tpu.memory_space<vmem>>, vector<1x5x1xf32>
    %30 = vector.shape_cast %29 : vector<1x5x1xf32> to vector<5x1xf32>
    %31 = vector.broadcast %30 : vector<5x1xf32> to vector<5x16xf32>
    %32 = arith.mulf %28, %31 : vector<5x16xf32>
    %c3_33 = arith.constant 3 : index
    %c0_34 = arith.constant 0 : index
    %c0_35 = arith.constant 0 : index
    %33 = vector.load %arg12[%c3_33, %c0_34, %c0_35] : memref<20x5x16xf32, #tpu.memory_space<vmem>>, vector<1x5x16xf32>
    %34 = vector.shape_cast %33 : vector<1x5x16xf32> to vector<5x16xf32>
    %35 = vector.shape_cast %32 : vector<5x16xf32> to vector<1x5x16xf32>
    tpu.vector_store %arg12[%c3_33, %c0_34, %c0_35], %35 {strides = array<i32>} : memref<20x5x16xf32, #tpu.memory_space<vmem>>, vector<1x5x16xf32>,
    %c0_36 = arith.constant 0 : index
    %c4 = arith.constant 4 : index
    %c0_37 = arith.constant 0 : index
    %c0_38 = arith.constant 0 : index
    %36 = vector.load %arg1[%c0_36, %c4, %c0_37, %c0_38] : memref<1x20x5x16xf32, #tpu.memory_space<vmem>>, vector<1x1x5x16xf32>
    %37 = vector.shape_cast %36 : vector<1x1x5x16xf32> to vector<5x16xf32>
    %c4_39 = arith.constant 4 : index
    %c0_40 = arith.constant 0 : index
    %c0_41 = arith.constant 0 : index
    %38 = vector.load %arg2[%c4_39, %c0_40, %c0_41] : memref<20x5x1xf32, #tpu.memory_space<vmem>>, vector<1x5x1xf32>
    %39 = vector.shape_cast %38 : vector<1x5x1xf32> to vector<5x1xf32>
    %40 = vector.broadcast %39 : vector<5x1xf32> to vector<5x16xf32>
    %41 = arith.mulf %37, %40 : vector<5x16xf32>
    %c4_42 = arith.constant 4 : index
    %c0_43 = arith.constant 0 : index
    %c0_44 = arith.constant 0 : index
    %42 = vector.load %arg12[%c4_42, %c0_43, %c0_44] : memref<20x5x16xf32, #tpu.memory_space<vmem>>, vector<1x5x16xf32>
    %43 = vector.shape_cast %42 : vector<1x5x16xf32> to vector<5x16xf32>
    %44 = vector.shape_cast %41 : vector<5x16xf32> to vector<1x5x16xf32>
    tpu.vector_store %arg12[%c4_42, %c0_43, %c0_44], %44 {strides = array<i32>} : memref<20x5x16xf32, #tpu.memory_space<vmem>>, vector<1x5x16xf32>,
    %c0_45 = arith.constant 0 : index
    %c5 = arith.constant 5 : index
    %c0_46 = arith.constant 0 : index
    %c0_47 = arith.constant 0 : index
    %45 = vector.load %arg1[%c0_45, %c5, %c0_46, %c0_47] : memref<1x20x5x16xf32, #tpu.memory_space<vmem>>, vector<1x1x5x16xf32>
    %46 = vector.shape_cast %45 : vector<1x1x5x16xf32> to vector<5x16xf32>
    %c5_48 = arith.constant 5 : index
    %c0_49 = arith.constant 0 : index
    %c0_50 = arith.constant 0 : index
    %47 = vector.load %arg2[%c5_48, %c0_49, %c0_50] : memref<20x5x1xf32, #tpu.memory_space<vmem>>, vector<1x5x1xf32>
    %48 = vector.shape_cast %47 : vector<1x5x1xf32> to vector<5x1xf32>
    %49 = vector.broadcast %48 : vector<5x1xf32> to vector<5x16xf32>
    %50 = arith.mulf %46, %49 : vector<5x16xf32>
    %c5_51 = arith.constant 5 : index
    %c0_52 = arith.constant 0 : index
    %c0_53 = arith.constant 0 : index
    %51 = vector.load %arg12[%c5_51, %c0_52, %c0_53] : memref<20x5x16xf32, #tpu.memory_space<vmem>>, vector<1x5x16xf32>
    %52 = vector.shape_cast %51 : vector<1x5x16xf32> to vector<5x16xf32>
    %53 = vector.shape_cast %50 : vector<5x16xf32> to vector<1x5x16xf32>
    tpu.vector_store %arg12[%c5_51, %c0_52, %c0_53], %53 {strides = array<i32>} : memref<20x5x16xf32, #tpu.memory_space<vmem>>, vector<1x5x16xf32>,
    %c0_54 = arith.constant 0 : index
    %c6 = arith.constant 6 : index
    %c0_55 = arith.constant 0 : index
    %c0_56 = arith.constant 0 : index
    %54 = vector.load %arg1[%c0_54, %c6, %c0_55, %c0_56] : memref<1x20x5x16xf32, #tpu.memory_space<vmem>>, vector<1x1x5x16xf32>
    %55 = vector.shape_cast %54 : vector<1x1x5x16xf32> to vector<5x16xf32>
    %c6_57 = arith.constant 6 : index
    %c0_58 = arith.constant 0 : index
    %c0_59 = arith.constant 0 : index
    %56 = vector.load %arg2[%c6_57, %c0_58, %c0_59] : memref<20x5x1xf32, #tpu.memory_space<vmem>>, vector<1x5x1xf32>
    %57 = vector.shape_cast %56 : vector<1x5x1xf32> to vector<5x1xf32>
    %58 = vector.broadcast %57 : vector<5x1xf32> to vector<5x16xf32>
    %59 = arith.mulf %55, %58 : vector<5x16xf32>
    %c6_60 = arith.constant 6 : index
    %c0_61 = arith.constant 0 : index
    %c0_62 = arith.constant 0 : index
    %60 = vector.load %arg12[%c6_60, %c0_61, %c0_62] : memref<20x5x16xf32, #tpu.memory_space<vmem>>, vector<1x5x16xf32>
    %61 = vector.shape_cast %60 : vector<1x5x16xf32> to vector<5x16xf32>
    %62 = vector.shape_cast %59 : vector<5x16xf32> to vector<1x5x16xf32>
    tpu.vector_store %arg12[%c6_60, %c0_61, %c0_62], %62 {strides = array<i32>} : memref<20x5x16xf32, #tpu.memory_space<vmem>>, vector<1x5x16xf32>,
    %c0_63 = arith.constant 0 : index
    %c7 = arith.constant 7 : index
    %c0_64 = arith.constant 0 : index
    %c0_65 = arith.constant 0 : index
    %63 = vector.load %arg1[%c0_63, %c7, %c0_64, %c0_65] : memref<1x20x5x16xf32, #tpu.memory_space<vmem>>, vector<1x1x5x16xf32>
    %64 = vector.shape_cast %63 : vector<1x1x5x16xf32> to vector<5x16xf32>
    %c7_66 = arith.constant 7 : index
    %c0_67 = arith.constant 0 : index
    %c0_68 = arith.constant 0 : index
    %65 = vector.load %arg2[%c7_66, %c0_67, %c0_68] : memref<20x5x1xf32, #tpu.memory_space<vmem>>, vector<1x5x1xf32>
    %66 = vector.shape_cast %65 : vector<1x5x1xf32> to vector<5x1xf32>
    %67 = vector.broadcast %66 : vector<5x1xf32> to vector<5x16xf32>
    %68 = arith.mulf %64, %67 : vector<5x16xf32>
    %c7_69 = arith.constant 7 : index
    %c0_70 = arith.constant 0 : index
    %c0_71 = arith.constant 0 : index
    %69 = vector.load %arg12[%c7_69, %c0_70, %c0_71] : memref<20x5x16xf32, #tpu.memory_space<vmem>>, vector<1x5x16xf32>
    %70 = vector.shape_cast %69 : vector<1x5x16xf32> to vector<5x16xf32>
    %71 = vector.shape_cast %68 : vector<5x16xf32> to vector<1x5x16xf32>
    tpu.vector_store %arg12[%c7_69, %c0_70, %c0_71], %71 {strides = array<i32>} : memref<20x5x16xf32, #tpu.memory_space<vmem>>, vector<1x5x16xf32>,
    %c0_72 = arith.constant 0 : index
    %c8 = arith.constant 8 : index
    %c0_73 = arith.constant 0 : index
    %c0_74 = arith.constant 0 : index
    %72 = vector.load %arg1[%c0_72, %c8, %c0_73, %c0_74] : memref<1x20x5x16xf32, #tpu.memory_space<vmem>>, vector<1x1x5x16xf32>
    %73 = vector.shape_cast %72 : vector<1x1x5x16xf32> to vector<5x16xf32>
    %c8_75 = arith.constant 8 : index
    %c0_76 = arith.constant 0 : index
    %c0_77 = arith.constant 0 : index
    %74 = vector.load %arg2[%c8_75, %c0_76, %c0_77] : memref<20x5x1xf32, #tpu.memory_space<vmem>>, vector<1x5x1xf32>
    %75 = vector.shape_cast %74 : vector<1x5x1xf32> to vector<5x1xf32>
    %76 = vector.broadcast %75 : vector<5x1xf32> to vector<5x16xf32>
    %77 = arith.mulf %73, %76 : vector<5x16xf32>
    %c8_78 = arith.constant 8 : index
    %c0_79 = arith.constant 0 : index
    %c0_80 = arith.constant 0 : index
    %78 = vector.load %arg12[%c8_78, %c0_79, %c0_80] : memref<20x5x16xf32, #tpu.memory_space<vmem>>, vector<1x5x16xf32>
    %79 = vector.shape_cast %78 : vector<1x5x16xf32> to vector<5x16xf32>
    %80 = vector.shape_cast %77 : vector<5x16xf32> to vector<1x5x16xf32>
    tpu.vector_store %arg12[%c8_78, %c0_79, %c0_80], %80 {strides = array<i32>} : memref<20x5x16xf32, #tpu.memory_space<vmem>>, vector<1x5x16xf32>,
    %c0_81 = arith.constant 0 : index
    %c9 = arith.constant 9 : index
    %c0_82 = arith.constant 0 : index
    %c0_83 = arith.constant 0 : index
    %81 = vector.load %arg1[%c0_81, %c9, %c0_82, %c0_83] : memref<1x20x5x16xf32, #tpu.memory_space<vmem>>, vector<1x1x5x16xf32>
    %82 = vector.shape_cast %81 : vector<1x1x5x16xf32> to vector<5x16xf32>
    %c9_84 = arith.constant 9 : index
    %c0_85 = arith.constant 0 : index
    %c0_86 = arith.constant 0 : index
    %83 = vector.load %arg2[%c9_84, %c0_85, %c0_86] : memref<20x5x1xf32, #tpu.memory_space<vmem>>, vector<1x5x1xf32>
    %84 = vector.shape_cast %83 : vector<1x5x1xf32> to vector<5x1xf32>
    %85 = vector.broadcast %84 : vector<5x1xf32> to vector<5x16xf32>
    %86 = arith.mulf %82, %85 : vector<5x16xf32>
    %c9_87 = arith.constant 9 : index
    %c0_88 = arith.constant 0 : index
    %c0_89 = arith.constant 0 : index
    %87 = vector.load %arg12[%c9_87, %c0_88, %c0_89] : memref<20x5x16xf32, #tpu.memory_space<vmem>>, vector<1x5x16xf32>
    %88 = vector.shape_cast %87 : vector<1x5x16xf32> to vector<5x16xf32>
    %89 = vector.shape_cast %86 : vector<5x16xf32> to vector<1x5x16xf32>
    tpu.vector_store %arg12[%c9_87, %c0_88, %c0_89], %89 {strides = array<i32>} : memref<20x5x16xf32, #tpu.memory_space<vmem>>, vector<1x5x16xf32>,
    %c0_90 = arith.constant 0 : index
    %c10 = arith.constant 10 : index
    %c0_91 = arith.constant 0 : index
    %c0_92 = arith.constant 0 : index
    %90 = vector.load %arg1[%c0_90, %c10, %c0_91, %c0_92] : memref<1x20x5x16xf32, #tpu.memory_space<vmem>>, vector<1x1x5x16xf32>
    %91 = vector.shape_cast %90 : vector<1x1x5x16xf32> to vector<5x16xf32>
    %c10_93 = arith.constant 10 : index
    %c0_94 = arith.constant 0 : index
    %c0_95 = arith.constant 0 : index
    %92 = vector.load %arg2[%c10_93, %c0_94, %c0_95] : memref<20x5x1xf32, #tpu.memory_space<vmem>>, vector<1x5x1xf32>
    %93 = vector.shape_cast %92 : vector<1x5x1xf32> to vector<5x1xf32>
    %94 = vector.broadcast %93 : vector<5x1xf32> to vector<5x16xf32>
    %95 = arith.mulf %91, %94 : vector<5x16xf32>
    %c10_96 = arith.constant 10 : index
    %c0_97 = arith.constant 0 : index
    %c0_98 = arith.constant 0 : index
    %96 = vector.load %arg12[%c10_96, %c0_97, %c0_98] : memref<20x5x16xf32, #tpu.memory_space<vmem>>, vector<1x5x16xf32>
    %97 = vector.shape_cast %96 : vector<1x5x16xf32> to vector<5x16xf32>
    %98 = vector.shape_cast %95 : vector<5x16xf32> to vector<1x5x16xf32>
    tpu.vector_store %arg12[%c10_96, %c0_97, %c0_98], %98 {strides = array<i32>} : memref<20x5x16xf32, #tpu.memory_space<vmem>>, vector<1x5x16xf32>,
    %c0_99 = arith.constant 0 : index
    %c11 = arith.constant 11 : index
    %c0_100 = arith.constant 0 : index
    %c0_101 = arith.constant 0 : index
    %99 = vector.load %arg1[%c0_99, %c11, %c0_100, %c0_101] : memref<1x20x5x16xf32, #tpu.memory_space<vmem>>, vector<1x1x5x16xf32>
    %100 = vector.shape_cast %99 : vector<1x1x5x16xf32> to vector<5x16xf32>
    %c11_102 = arith.constant 11 : index
    %c0_103 = arith.constant 0 : index
    %c0_104 = arith.constant 0 : index
    %101 = vector.load %arg2[%c11_102, %c0_103, %c0_104] : memref<20x5x1xf32, #tpu.memory_space<vmem>>, vector<1x5x1xf32>
    %102 = vector.shape_cast %101 : vector<1x5x1xf32> to vector<5x1xf32>
    %103 = vector.broadcast %102 : vector<5x1xf32> to vector<5x16xf32>
    %104 = arith.mulf %100, %103 : vector<5x16xf32>
    %c11_105 = arith.constant 11 : index
    %c0_106 = arith.constant 0 : index
    %c0_107 = arith.constant 0 : index
    %105 = vector.load %arg12[%c11_105, %c0_106, %c0_107] : memref<20x5x16xf32, #tpu.memory_space<vmem>>, vector<1x5x16xf32>
    %106 = vector.shape_cast %105 : vector<1x5x16xf32> to vector<5x16xf32>
    %107 = vector.shape_cast %104 : vector<5x16xf32> to vector<1x5x16xf32>
    tpu.vector_store %arg12[%c11_105, %c0_106, %c0_107], %107 {strides = array<i32>} : memref<20x5x16xf32, #tpu.memory_space<vmem>>, vector<1x5x16xf32>,
    %c0_108 = arith.constant 0 : index
    %c12 = arith.constant 12 : index
    %c0_109 = arith.constant 0 : index
    %c0_110 = arith.constant 0 : index
    %108 = vector.load %arg1[%c0_108, %c12, %c0_109, %c0_110] : memref<1x20x5x16xf32, #tpu.memory_space<vmem>>, vector<1x1x5x16xf32>
    %109 = vector.shape_cast %108 : vector<1x1x5x16xf32> to vector<5x16xf32>
    %c12_111 = arith.constant 12 : index
    %c0_112 = arith.constant 0 : index
    %c0_113 = arith.constant 0 : index
    %110 = vector.load %arg2[%c12_111, %c0_112, %c0_113] : memref<20x5x1xf32, #tpu.memory_space<vmem>>, vector<1x5x1xf32>
    %111 = vector.shape_cast %110 : vector<1x5x1xf32> to vector<5x1xf32>
    %112 = vector.broadcast %111 : vector<5x1xf32> to vector<5x16xf32>
    %113 = arith.mulf %109, %112 : vector<5x16xf32>
    %c12_114 = arith.constant 12 : index
    %c0_115 = arith.constant 0 : index
    %c0_116 = arith.constant 0 : index
    %114 = vector.load %arg12[%c12_114, %c0_115, %c0_116] : memref<20x5x16xf32, #tpu.memory_space<vmem>>, vector<1x5x16xf32>
    %115 = vector.shape_cast %114 : vector<1x5x16xf32> to vector<5x16xf32>
    %116 = vector.shape_cast %113 : vector<5x16xf32> to vector<1x5x16xf32>
    tpu.vector_store %arg12[%c12_114, %c0_115, %c0_116], %116 {strides = array<i32>} : memref<20x5x16xf32, #tpu.memory_space<vmem>>, vector<1x5x16xf32>,
    %c0_117 = arith.constant 0 : index
    %c13 = arith.constant 13 : index
    %c0_118 = arith.constant 0 : index
    %c0_119 = arith.constant 0 : index
    %117 = vector.load %arg1[%c0_117, %c13, %c0_118, %c0_119] : memref<1x20x5x16xf32, #tpu.memory_space<vmem>>, vector<1x1x5x16xf32>
    %118 = vector.shape_cast %117 : vector<1x1x5x16xf32> to vector<5x16xf32>
    %c13_120 = arith.constant 13 : index
    %c0_121 = arith.constant 0 : index
    %c0_122 = arith.constant 0 : index
    %119 = vector.load %arg2[%c13_120, %c0_121, %c0_122] : memref<20x5x1xf32, #tpu.memory_space<vmem>>, vector<1x5x1xf32>
    %120 = vector.shape_cast %119 : vector<1x5x1xf32> to vector<5x1xf32>
    %121 = vector.broadcast %120 : vector<5x1xf32> to vector<5x16xf32>
    %122 = arith.mulf %118, %121 : vector<5x16xf32>
    %c13_123 = arith.constant 13 : index
    %c0_124 = arith.constant 0 : index
    %c0_125 = arith.constant 0 : index
    %123 = vector.load %arg12[%c13_123, %c0_124, %c0_125] : memref<20x5x16xf32, #tpu.memory_space<vmem>>, vector<1x5x16xf32>
    %124 = vector.shape_cast %123 : vector<1x5x16xf32> to vector<5x16xf32>
    %125 = vector.shape_cast %122 : vector<5x16xf32> to vector<1x5x16xf32>
    tpu.vector_store %arg12[%c13_123, %c0_124, %c0_125], %125 {strides = array<i32>} : memref<20x5x16xf32, #tpu.memory_space<vmem>>, vector<1x5x16xf32>,
    %c0_126 = arith.constant 0 : index
    %c14 = arith.constant 14 : index
    %c0_127 = arith.constant 0 : index
    %c0_128 = arith.constant 0 : index
    %126 = vector.load %arg1[%c0_126, %c14, %c0_127, %c0_128] : memref<1x20x5x16xf32, #tpu.memory_space<vmem>>, vector<1x1x5x16xf32>
    %127 = vector.shape_cast %126 : vector<1x1x5x16xf32> to vector<5x16xf32>
    %c14_129 = arith.constant 14 : index
    %c0_130 = arith.constant 0 : index
    %c0_131 = arith.constant 0 : index
    %128 = vector.load %arg2[%c14_129, %c0_130, %c0_131] : memref<20x5x1xf32, #tpu.memory_space<vmem>>, vector<1x5x1xf32>
    %129 = vector.shape_cast %128 : vector<1x5x1xf32> to vector<5x1xf32>
    %130 = vector.broadcast %129 : vector<5x1xf32> to vector<5x16xf32>
    %131 = arith.mulf %127, %130 : vector<5x16xf32>
    %c14_132 = arith.constant 14 : index
    %c0_133 = arith.constant 0 : index
    %c0_134 = arith.constant 0 : index
    %132 = vector.load %arg12[%c14_132, %c0_133, %c0_134] : memref<20x5x16xf32, #tpu.memory_space<vmem>>, vector<1x5x16xf32>
    %133 = vector.shape_cast %132 : vector<1x5x16xf32> to vector<5x16xf32>
    %134 = vector.shape_cast %131 : vector<5x16xf32> to vector<1x5x16xf32>
    tpu.vector_store %arg12[%c14_132, %c0_133, %c0_134], %134 {strides = array<i32>} : memref<20x5x16xf32, #tpu.memory_space<vmem>>, vector<1x5x16xf32>,
    %c0_135 = arith.constant 0 : index
    %c15 = arith.constant 15 : index
    %c0_136 = arith.constant 0 : index
    %c0_137 = arith.constant 0 : index
    %135 = vector.load %arg1[%c0_135, %c15, %c0_136, %c0_137] : memref<1x20x5x16xf32, #tpu.memory_space<vmem>>, vector<1x1x5x16xf32>
    %136 = vector.shape_cast %135 : vector<1x1x5x16xf32> to vector<5x16xf32>
    %c15_138 = arith.constant 15 : index
    %c0_139 = arith.constant 0 : index
    %c0_140 = arith.constant 0 : index
    %137 = vector.load %arg2[%c15_138, %c0_139, %c0_140] : memref<20x5x1xf32, #tpu.memory_space<vmem>>, vector<1x5x1xf32>
    %138 = vector.shape_cast %137 : vector<1x5x1xf32> to vector<5x1xf32>
    %139 = vector.broadcast %138 : vector<5x1xf32> to vector<5x16xf32>
    %140 = arith.mulf %136, %139 : vector<5x16xf32>
    %c15_141 = arith.constant 15 : index
    %c0_142 = arith.constant 0 : index
    %c0_143 = arith.constant 0 : index
    %141 = vector.load %arg12[%c15_141, %c0_142, %c0_143] : memref<20x5x16xf32, #tpu.memory_space<vmem>>, vector<1x5x16xf32>
    %142 = vector.shape_cast %141 : vector<1x5x16xf32> to vector<5x16xf32>
    %143 = vector.shape_cast %140 : vector<5x16xf32> to vector<1x5x16xf32>
    tpu.vector_store %arg12[%c15_141, %c0_142, %c0_143], %143 {strides = array<i32>} : memref<20x5x16xf32, #tpu.memory_space<vmem>>, vector<1x5x16xf32>,
    %c0_144 = arith.constant 0 : index
    %c16 = arith.constant 16 : index
    %c0_145 = arith.constant 0 : index
    %c0_146 = arith.constant 0 : index
    %144 = vector.load %arg1[%c0_144, %c16, %c0_145, %c0_146] : memref<1x20x5x16xf32, #tpu.memory_space<vmem>>, vector<1x1x5x16xf32>
    %145 = vector.shape_cast %144 : vector<1x1x5x16xf32> to vector<5x16xf32>
    %c16_147 = arith.constant 16 : index
    %c0_148 = arith.constant 0 : index
    %c0_149 = arith.constant 0 : index
    %146 = vector.load %arg2[%c16_147, %c0_148, %c0_149] : memref<20x5x1xf32, #tpu.memory_space<vmem>>, vector<1x5x1xf32>
    %147 = vector.shape_cast %146 : vector<1x5x1xf32> to vector<5x1xf32>
    %148 = vector.broadcast %147 : vector<5x1xf32> to vector<5x16xf32>
    %149 = arith.mulf %145, %148 : vector<5x16xf32>
    %c16_150 = arith.constant 16 : index
    %c0_151 = arith.constant 0 : index
    %c0_152 = arith.constant 0 : index
    %150 = vector.load %arg12[%c16_150, %c0_151, %c0_152] : memref<20x5x16xf32, #tpu.memory_space<vmem>>, vector<1x5x16xf32>
    %151 = vector.shape_cast %150 : vector<1x5x16xf32> to vector<5x16xf32>
    %152 = vector.shape_cast %149 : vector<5x16xf32> to vector<1x5x16xf32>
    tpu.vector_store %arg12[%c16_150, %c0_151, %c0_152], %152 {strides = array<i32>} : memref<20x5x16xf32, #tpu.memory_space<vmem>>, vector<1x5x16xf32>,
    %c0_153 = arith.constant 0 : index
    %c17 = arith.constant 17 : index
    %c0_154 = arith.constant 0 : index
    %c0_155 = arith.constant 0 : index
    %153 = vector.load %arg1[%c0_153, %c17, %c0_154, %c0_155] : memref<1x20x5x16xf32, #tpu.memory_space<vmem>>, vector<1x1x5x16xf32>
    %154 = vector.shape_cast %153 : vector<1x1x5x16xf32> to vector<5x16xf32>
    %c17_156 = arith.constant 17 : index
    %c0_157 = arith.constant 0 : index
    %c0_158 = arith.constant 0 : index
    %155 = vector.load %arg2[%c17_156, %c0_157, %c0_158] : memref<20x5x1xf32, #tpu.memory_space<vmem>>, vector<1x5x1xf32>
    %156 = vector.shape_cast %155 : vector<1x5x1xf32> to vector<5x1xf32>
    %157 = vector.broadcast %156 : vector<5x1xf32> to vector<5x16xf32>
    %158 = arith.mulf %154, %157 : vector<5x16xf32>
    %c17_159 = arith.constant 17 : index
    %c0_160 = arith.constant 0 : index
    %c0_161 = arith.constant 0 : index
    %159 = vector.load %arg12[%c17_159, %c0_160, %c0_161] : memref<20x5x16xf32, #tpu.memory_space<vmem>>, vector<1x5x16xf32>
    %160 = vector.shape_cast %159 : vector<1x5x16xf32> to vector<5x16xf32>
    %161 = vector.shape_cast %158 : vector<5x16xf32> to vector<1x5x16xf32>
    tpu.vector_store %arg12[%c17_159, %c0_160, %c0_161], %161 {strides = array<i32>} : memref<20x5x16xf32, #tpu.memory_space<vmem>>, vector<1x5x16xf32>,
    %c0_162 = arith.constant 0 : index
    %c18 = arith.constant 18 : index
    %c0_163 = arith.constant 0 : index
    %c0_164 = arith.constant 0 : index
    %162 = vector.load %arg1[%c0_162, %c18, %c0_163, %c0_164] : memref<1x20x5x16xf32, #tpu.memory_space<vmem>>, vector<1x1x5x16xf32>
    %163 = vector.shape_cast %162 : vector<1x1x5x16xf32> to vector<5x16xf32>
    %c18_165 = arith.constant 18 : index
    %c0_166 = arith.constant 0 : index
    %c0_167 = arith.constant 0 : index
    %164 = vector.load %arg2[%c18_165, %c0_166, %c0_167] : memref<20x5x1xf32, #tpu.memory_space<vmem>>, vector<1x5x1xf32>
    %165 = vector.shape_cast %164 : vector<1x5x1xf32> to vector<5x1xf32>
    %166 = vector.broadcast %165 : vector<5x1xf32> to vector<5x16xf32>
    %167 = arith.mulf %163, %166 : vector<5x16xf32>
    %c18_168 = arith.constant 18 : index
    %c0_169 = arith.constant 0 : index
    %c0_170 = arith.constant 0 : index
    %168 = vector.load %arg12[%c18_168, %c0_169, %c0_170] : memref<20x5x16xf32, #tpu.memory_space<vmem>>, vector<1x5x16xf32>
    %169 = vector.shape_cast %168 : vector<1x5x16xf32> to vector<5x16xf32>
    %170 = vector.shape_cast %167 : vector<5x16xf32> to vector<1x5x16xf32>
    tpu.vector_store %arg12[%c18_168, %c0_169, %c0_170], %170 {strides = array<i32>} : memref<20x5x16xf32, #tpu.memory_space<vmem>>, vector<1x5x16xf32>,
    %c0_171 = arith.constant 0 : index
    %c19 = arith.constant 19 : index
    %c0_172 = arith.constant 0 : index
    %c0_173 = arith.constant 0 : index
    %171 = vector.load %arg1[%c0_171, %c19, %c0_172, %c0_173] : memref<1x20x5x16xf32, #tpu.memory_space<vmem>>, vector<1x1x5x16xf32>
    %172 = vector.shape_cast %171 : vector<1x1x5x16xf32> to vector<5x16xf32>
    %c19_174 = arith.constant 19 : index
    %c0_175 = arith.constant 0 : index
    %c0_176 = arith.constant 0 : index
    %173 = vector.load %arg2[%c19_174, %c0_175, %c0_176] : memref<20x5x1xf32, #tpu.memory_space<vmem>>, vector<1x5x1xf32>
    %174 = vector.shape_cast %173 : vector<1x5x1xf32> to vector<5x1xf32>
    %175 = vector.broadcast %174 : vector<5x1xf32> to vector<5x16xf32>
    %176 = arith.mulf %172, %175 : vector<5x16xf32>
    %c19_177 = arith.constant 19 : index
    %c0_178 = arith.constant 0 : index
    %c0_179 = arith.constant 0 : index
    %177 = vector.load %arg12[%c19_177, %c0_178, %c0_179] : memref<20x5x16xf32, #tpu.memory_space<vmem>>, vector<1x5x16xf32>
    %178 = vector.shape_cast %177 : vector<1x5x16xf32> to vector<5x16xf32>
    %179 = vector.shape_cast %176 : vector<5x16xf32> to vector<1x5x16xf32>
    tpu.vector_store %arg12[%c19_177, %c0_178, %c0_179], %179 {strides = array<i32>} : memref<20x5x16xf32, #tpu.memory_space<vmem>>, vector<1x5x16xf32>,
    %cst = arith.constant 0.000000e+00 : f32
    %180 = vector.broadcast %cst : f32 to vector<4x4x16xf32>
    %c0_180 = arith.constant 0 : index
    %c0_181 = arith.constant 0 : index
    %c0_182 = arith.constant 0 : index
    %181 = vector.load %arg12[%c0_180, %c0_181, %c0_182] : memref<20x5x16xf32, #tpu.memory_space<vmem>>, vector<4x4x16xf32>
    %c0_183 = arith.constant 0 : index
    %c0_184 = arith.constant 0 : index
    %c0_185 = arith.constant 0 : index
    %182 = vector.load %arg3[%c0_183, %c0_184, %c0_185] : memref<9x1x16xf32, #tpu.memory_space<vmem>>, vector<1x1x16xf32>
    %183 = vector.shape_cast %182 : vector<1x1x16xf32> to vector<1x16xf32>
    %184 = vector.shape_cast %183 : vector<1x16xf32> to vector<1x1x16xf32>
    %185 = vector.broadcast %184 : vector<1x1x16xf32> to vector<4x4x16xf32>
    %186 = arith.mulf %181, %185 : vector<4x4x16xf32>
    %187 = arith.addf %180, %186 : vector<4x4x16xf32>
    %c5_186 = arith.constant 5 : index
    %c0_187 = arith.constant 0 : index
    %c0_188 = arith.constant 0 : index
    %188 = vector.load %arg12[%c5_186, %c0_187, %c0_188] : memref<20x5x16xf32, #tpu.memory_space<vmem>>, vector<4x4x16xf32>
    %c1_189 = arith.constant 1 : index
    %c0_190 = arith.constant 0 : index
    %c0_191 = arith.constant 0 : index
    %189 = vector.load %arg3[%c1_189, %c0_190, %c0_191] : memref<9x1x16xf32, #tpu.memory_space<vmem>>, vector<1x1x16xf32>
    %190 = vector.shape_cast %189 : vector<1x1x16xf32> to vector<1x16xf32>
    %191 = vector.shape_cast %190 : vector<1x16xf32> to vector<1x1x16xf32>
    %192 = vector.broadcast %191 : vector<1x1x16xf32> to vector<4x4x16xf32>
    %193 = arith.mulf %188, %192 : vector<4x4x16xf32>
    %194 = arith.addf %187, %193 : vector<4x4x16xf32>
    %c0_192 = arith.constant 0 : index
    %c1_193 = arith.constant 1 : index
    %c0_194 = arith.constant 0 : index
    %195 = vector.load %arg12[%c0_192, %c1_193, %c0_194] : memref<20x5x16xf32, #tpu.memory_space<vmem>>, vector<4x4x16xf32>
    %c2_195 = arith.constant 2 : index
    %c0_196 = arith.constant 0 : index
    %c0_197 = arith.constant 0 : index
    %196 = vector.load %arg3[%c2_195, %c0_196, %c0_197] : memref<9x1x16xf32, #tpu.memory_space<vmem>>, vector<1x1x16xf32>
    %197 = vector.shape_cast %196 : vector<1x1x16xf32> to vector<1x16xf32>
    %198 = vector.shape_cast %197 : vector<1x16xf32> to vector<1x1x16xf32>
    %199 = vector.broadcast %198 : vector<1x1x16xf32> to vector<4x4x16xf32>
    %200 = arith.mulf %195, %199 : vector<4x4x16xf32>
    %201 = arith.addf %194, %200 : vector<4x4x16xf32>
    %c10_198 = arith.constant 10 : index
    %c0_199 = arith.constant 0 : index
    %c0_200 = arith.constant 0 : index
    %202 = vector.load %arg12[%c10_198, %c0_199, %c0_200] : memref<20x5x16xf32, #tpu.memory_space<vmem>>, vector<4x4x16xf32>
    %c3_201 = arith.constant 3 : index
    %c0_202 = arith.constant 0 : index
    %c0_203 = arith.constant 0 : index
    %203 = vector.load %arg3[%c3_201, %c0_202, %c0_203] : memref<9x1x16xf32, #tpu.memory_space<vmem>>, vector<1x1x16xf32>
    %204 = vector.shape_cast %203 : vector<1x1x16xf32> to vector<1x16xf32>
    %205 = vector.shape_cast %204 : vector<1x16xf32> to vector<1x1x16xf32>
    %206 = vector.broadcast %205 : vector<1x1x16xf32> to vector<4x4x16xf32>
    %207 = arith.mulf %202, %206 : vector<4x4x16xf32>
    %208 = arith.addf %201, %207 : vector<4x4x16xf32>
    %c15_204 = arith.constant 15 : index
    %c0_205 = arith.constant 0 : index
    %c0_206 = arith.constant 0 : index
    %209 = vector.load %arg12[%c15_204, %c0_205, %c0_206] : memref<20x5x16xf32, #tpu.memory_space<vmem>>, vector<4x4x16xf32>
    %c4_207 = arith.constant 4 : index
    %c0_208 = arith.constant 0 : index
    %c0_209 = arith.constant 0 : index
    %210 = vector.load %arg3[%c4_207, %c0_208, %c0_209] : memref<9x1x16xf32, #tpu.memory_space<vmem>>, vector<1x1x16xf32>
    %211 = vector.shape_cast %210 : vector<1x1x16xf32> to vector<1x16xf32>
    %212 = vector.shape_cast %211 : vector<1x16xf32> to vector<1x1x16xf32>
    %213 = vector.broadcast %212 : vector<1x1x16xf32> to vector<4x4x16xf32>
    %214 = arith.mulf %209, %213 : vector<4x4x16xf32>
    %215 = arith.addf %208, %214 : vector<4x4x16xf32>
    %c10_210 = arith.constant 10 : index
    %c1_211 = arith.constant 1 : index
    %c0_212 = arith.constant 0 : index
    %216 = vector.load %arg12[%c10_210, %c1_211, %c0_212] : memref<20x5x16xf32, #tpu.memory_space<vmem>>, vector<4x4x16xf32>
    %c5_213 = arith.constant 5 : index
    %c0_214 = arith.constant 0 : index
    %c0_215 = arith.constant 0 : index
    %217 = vector.load %arg3[%c5_213, %c0_214, %c0_215] : memref<9x1x16xf32, #tpu.memory_space<vmem>>, vector<1x1x16xf32>
    %218 = vector.shape_cast %217 : vector<1x1x16xf32> to vector<1x16xf32>
    %219 = vector.shape_cast %218 : vector<1x16xf32> to vector<1x1x16xf32>
    %220 = vector.broadcast %219 : vector<1x1x16xf32> to vector<4x4x16xf32>
    %221 = arith.mulf %216, %220 : vector<4x4x16xf32>
    %222 = arith.addf %215, %221 : vector<4x4x16xf32>
    %c1_216 = arith.constant 1 : index
    %c0_217 = arith.constant 0 : index
    %c0_218 = arith.constant 0 : index
    %223 = vector.load %arg12[%c1_216, %c0_217, %c0_218] : memref<20x5x16xf32, #tpu.memory_space<vmem>>, vector<4x4x16xf32>
    %c6_219 = arith.constant 6 : index
    %c0_220 = arith.constant 0 : index
    %c0_221 = arith.constant 0 : index
    %224 = vector.load %arg3[%c6_219, %c0_220, %c0_221] : memref<9x1x16xf32, #tpu.memory_space<vmem>>, vector<1x1x16xf32>
    %225 = vector.shape_cast %224 : vector<1x1x16xf32> to vector<1x16xf32>
    %226 = vector.shape_cast %225 : vector<1x16xf32> to vector<1x1x16xf32>
    %227 = vector.broadcast %226 : vector<1x1x16xf32> to vector<4x4x16xf32>
    %228 = arith.mulf %223, %227 : vector<4x4x16xf32>
    %229 = arith.addf %222, %228 : vector<4x4x16xf32>
    %c6_222 = arith.constant 6 : index
    %c0_223 = arith.constant 0 : index
    %c0_224 = arith.constant 0 : index
    %230 = vector.load %arg12[%c6_222, %c0_223, %c0_224] : memref<20x5x16xf32, #tpu.memory_space<vmem>>, vector<4x4x16xf32>
    %c7_225 = arith.constant 7 : index
    %c0_226 = arith.constant 0 : index
    %c0_227 = arith.constant 0 : index
    %231 = vector.load %arg3[%c7_225, %c0_226, %c0_227] : memref<9x1x16xf32, #tpu.memory_space<vmem>>, vector<1x1x16xf32>
    %232 = vector.shape_cast %231 : vector<1x1x16xf32> to vector<1x16xf32>
    %233 = vector.shape_cast %232 : vector<1x16xf32> to vector<1x1x16xf32>
    %234 = vector.broadcast %233 : vector<1x1x16xf32> to vector<4x4x16xf32>
    %235 = arith.mulf %230, %234 : vector<4x4x16xf32>
    %236 = arith.addf %229, %235 : vector<4x4x16xf32>
    %c1_228 = arith.constant 1 : index
    %c1_229 = arith.constant 1 : index
    %c0_230 = arith.constant 0 : index
    %237 = vector.load %arg12[%c1_228, %c1_229, %c0_230] : memref<20x5x16xf32, #tpu.memory_space<vmem>>, vector<4x4x16xf32>
    %c8_231 = arith.constant 8 : index
    %c0_232 = arith.constant 0 : index
    %c0_233 = arith.constant 0 : index
    %238 = vector.load %arg3[%c8_231, %c0_232, %c0_233] : memref<9x1x16xf32, #tpu.memory_space<vmem>>, vector<1x1x16xf32>
    %239 = vector.shape_cast %238 : vector<1x1x16xf32> to vector<1x16xf32>
    %240 = vector.shape_cast %239 : vector<1x16xf32> to vector<1x1x16xf32>
    %241 = vector.broadcast %240 : vector<1x1x16xf32> to vector<4x4x16xf32>
    %242 = arith.mulf %237, %241 : vector<4x4x16xf32>
    %243 = arith.addf %236, %242 : vector<4x4x16xf32>
    %c0_234 = arith.constant 0 : index
    %c0_235 = arith.constant 0 : index
    %244 = vector.load %arg4[%c0_234, %c0_235] : memref<1x16xf32, #tpu.memory_space<vmem>>, vector<1x16xf32>
    %245 = vector.shape_cast %244 : vector<1x16xf32> to vector<1x1x16xf32>
    %246 = vector.broadcast %245 : vector<1x1x16xf32> to vector<4x4x16xf32>
    %247 = arith.addf %243, %246 : vector<4x4x16xf32>
    %cst_236 = arith.constant 0.000000e+00 : f32
    %248 = vector.broadcast %cst_236 : f32 to vector<4x4x16xf32>
    %249 = arith.maximumf %247, %248 : vector<4x4x16xf32>
    %cst_237 = arith.constant dense<0.000000e+00> : vector<4x16xf32>
    %250 = vector.multi_reduction <add>, %249, %cst_237 [0] : vector<4x4x16xf32> to vector<4x16xf32>
    %cst_238 = arith.constant dense<0.000000e+00> : vector<16xf32>
    %251 = vector.multi_reduction <add>, %250, %cst_238 [0] : vector<4x16xf32> to vector<16xf32>
    %252 = vector.shape_cast %251 : vector<16xf32> to vector<1x16xf32>
    %cst_239 = arith.constant 6.250000e-02 : f32
    %253 = vector.broadcast %cst_239 : f32 to vector<1x16xf32>
    %254 = arith.mulf %252, %253 : vector<1x16xf32>
    %255 = arith.truncf %254 : vector<1x16xf32> to vector<1x16xbf16>
    %c0_240 = arith.constant 0 : index
    %c0_241 = arith.constant 0 : index
    %256 = vector.load %arg5[%c0_240, %c0_241] : memref<16x8xbf16, #tpu.memory_space<vmem>>, vector<16x8xbf16>
    %cst_242 = arith.constant dense<0.000000e+00> : vector<1x8xf32>
    %257 = tpu.matmul %255, %256, %cst_242 {dimension_numbers = #tpu.dot_dimension_numbers<[1], [0], [0], [1], [0, 0, 1, 1], [], []>} : vector<1x16xbf16>, vector<16x8xbf16>, vector<1x8xf32> -> vector<1x8xf32>
    %c0_243 = arith.constant 0 : index
    %c0_244 = arith.constant 0 : index
    %258 = vector.load %arg6[%c0_243, %c0_244] : memref<1x8xf32, #tpu.memory_space<vmem>>, vector<1x8xf32>
    %259 = arith.addf %257, %258 : vector<1x8xf32>
    %cst_245 = arith.constant 0.000000e+00 : f32
    %260 = vector.broadcast %cst_245 : f32 to vector<1x8xf32>
    %261 = arith.maximumf %259, %260 : vector<1x8xf32>
    %262 = arith.truncf %261 : vector<1x8xf32> to vector<1x8xbf16>
    %c0_246 = arith.constant 0 : index
    %c0_247 = arith.constant 0 : index
    %263 = vector.load %arg7[%c0_246, %c0_247] : memref<8x16xbf16, #tpu.memory_space<vmem>>, vector<8x16xbf16>
    %cst_248 = arith.constant dense<0.000000e+00> : vector<1x16xf32>
    %264 = tpu.matmul %262, %263, %cst_248 {dimension_numbers = #tpu.dot_dimension_numbers<[1], [0], [0], [1], [0, 0, 1, 1], [], []>} : vector<1x8xbf16>, vector<8x16xbf16>, vector<1x16xf32> -> vector<1x16xf32>
    %c0_249 = arith.constant 0 : index
    %c0_250 = arith.constant 0 : index
    %265 = vector.load %arg8[%c0_249, %c0_250] : memref<1x16xf32, #tpu.memory_space<vmem>>, vector<1x16xf32>
    %266 = arith.addf %264, %265 : vector<1x16xf32>
    %cst_251 = arith.constant 3.000000e+00 : f32
    %267 = vector.broadcast %cst_251 : f32 to vector<1x16xf32>
    %268 = arith.addf %266, %267 : vector<1x16xf32>
    %cst_252 = arith.constant 0.000000e+00 : f32
    %cst_253 = arith.constant 6.000000e+00 : f32
    %269 = vector.broadcast %cst_252 : f32 to vector<1x16xf32>
    %270 = arith.maximumf %269, %268 : vector<1x16xf32>
    %271 = vector.broadcast %cst_253 : f32 to vector<1x16xf32>
    %272 = arith.minimumf %271, %270 : vector<1x16xf32>
    %cst_254 = arith.constant 0.166666672 : f32
    %273 = vector.broadcast %cst_254 : f32 to vector<1x16xf32>
    %274 = arith.mulf %272, %273 : vector<1x16xf32>
    %275 = vector.shape_cast %274 : vector<1x16xf32> to vector<1x1x16xf32>
    %276 = vector.broadcast %275 : vector<1x1x16xf32> to vector<4x4x16xf32>
    %277 = arith.mulf %249, %276 : vector<4x4x16xf32>
    %278 = vector.extract_strided_slice %277 {offsets = [0, 0, 0], sizes = [1, 4, 16], strides = [1, 1, 1]} : vector<4x4x16xf32> to vector<1x4x16xf32>
    %279 = vector.shape_cast %278 : vector<1x4x16xf32> to vector<4x16xf32>
    %280 = arith.truncf %279 : vector<4x16xf32> to vector<4x16xbf16>
    %c0_255 = arith.constant 0 : index
    %c0_256 = arith.constant 0 : index
    %281 = vector.load %arg9[%c0_255, %c0_256] : memref<16x16xbf16, #tpu.memory_space<vmem>>, vector<16x16xbf16>
    %cst_257 = arith.constant dense<0.000000e+00> : vector<4x16xf32>
    %282 = tpu.matmul %280, %281, %cst_257 {dimension_numbers = #tpu.dot_dimension_numbers<[1], [0], [0], [1], [0, 0, 1, 1], [], []>} : vector<4x16xbf16>, vector<16x16xbf16>, vector<4x16xf32> -> vector<4x16xf32>
    %c0_258 = arith.constant 0 : index
    %c0_259 = arith.constant 0 : index
    %283 = vector.load %arg10[%c0_258, %c0_259] : memref<1x16xf32, #tpu.memory_space<vmem>>, vector<1x16xf32>
    %284 = vector.broadcast %283 : vector<1x16xf32> to vector<4x16xf32>
    %285 = arith.addf %282, %284 : vector<4x16xf32>
    %c0_260 = arith.constant 0 : index
    %c0_261 = arith.constant 0 : index
    %c0_262 = arith.constant 0 : index
    %c0_263 = arith.constant 0 : index
    %286 = vector.load %arg11[%c0_260, %c0_261, %c0_262, %c0_263] : memref<1x4x4x16xf32, #tpu.memory_space<vmem>>, vector<1x1x4x16xf32>
    %287 = vector.shape_cast %286 : vector<1x1x4x16xf32> to vector<4x16xf32>
    %288 = vector.shape_cast %285 : vector<4x16xf32> to vector<1x1x4x16xf32>
    tpu.vector_store %arg11[%c0_260, %c0_261, %c0_262, %c0_263], %288 {strides = array<i32>} : memref<1x4x4x16xf32, #tpu.memory_space<vmem>>, vector<1x1x4x16xf32>,
    %289 = vector.extract_strided_slice %277 {offsets = [1, 0, 0], sizes = [1, 4, 16], strides = [1, 1, 1]} : vector<4x4x16xf32> to vector<1x4x16xf32>
    %290 = vector.shape_cast %289 : vector<1x4x16xf32> to vector<4x16xf32>
    %291 = arith.truncf %290 : vector<4x16xf32> to vector<4x16xbf16>
    %c0_264 = arith.constant 0 : index
    %c0_265 = arith.constant 0 : index
    %292 = vector.load %arg9[%c0_264, %c0_265] : memref<16x16xbf16, #tpu.memory_space<vmem>>, vector<16x16xbf16>
    %cst_266 = arith.constant dense<0.000000e+00> : vector<4x16xf32>
    %293 = tpu.matmul %291, %292, %cst_266 {dimension_numbers = #tpu.dot_dimension_numbers<[1], [0], [0], [1], [0, 0, 1, 1], [], []>} : vector<4x16xbf16>, vector<16x16xbf16>, vector<4x16xf32> -> vector<4x16xf32>
    %c0_267 = arith.constant 0 : index
    %c0_268 = arith.constant 0 : index
    %294 = vector.load %arg10[%c0_267, %c0_268] : memref<1x16xf32, #tpu.memory_space<vmem>>, vector<1x16xf32>
    %295 = vector.broadcast %294 : vector<1x16xf32> to vector<4x16xf32>
    %296 = arith.addf %293, %295 : vector<4x16xf32>
    %c0_269 = arith.constant 0 : index
    %c1_270 = arith.constant 1 : index
    %c0_271 = arith.constant 0 : index
    %c0_272 = arith.constant 0 : index
    %297 = vector.load %arg11[%c0_269, %c1_270, %c0_271, %c0_272] : memref<1x4x4x16xf32, #tpu.memory_space<vmem>>, vector<1x1x4x16xf32>
    %298 = vector.shape_cast %297 : vector<1x1x4x16xf32> to vector<4x16xf32>
    %299 = vector.shape_cast %296 : vector<4x16xf32> to vector<1x1x4x16xf32>
    tpu.vector_store %arg11[%c0_269, %c1_270, %c0_271, %c0_272], %299 {strides = array<i32>} : memref<1x4x4x16xf32, #tpu.memory_space<vmem>>, vector<1x1x4x16xf32>,
    %300 = vector.extract_strided_slice %277 {offsets = [2, 0, 0], sizes = [1, 4, 16], strides = [1, 1, 1]} : vector<4x4x16xf32> to vector<1x4x16xf32>
    %301 = vector.shape_cast %300 : vector<1x4x16xf32> to vector<4x16xf32>
    %302 = arith.truncf %301 : vector<4x16xf32> to vector<4x16xbf16>
    %c0_273 = arith.constant 0 : index
    %c0_274 = arith.constant 0 : index
    %303 = vector.load %arg9[%c0_273, %c0_274] : memref<16x16xbf16, #tpu.memory_space<vmem>>, vector<16x16xbf16>
    %cst_275 = arith.constant dense<0.000000e+00> : vector<4x16xf32>
    %304 = tpu.matmul %302, %303, %cst_275 {dimension_numbers = #tpu.dot_dimension_numbers<[1], [0], [0], [1], [0, 0, 1, 1], [], []>} : vector<4x16xbf16>, vector<16x16xbf16>, vector<4x16xf32> -> vector<4x16xf32>
    %c0_276 = arith.constant 0 : index
    %c0_277 = arith.constant 0 : index
    %305 = vector.load %arg10[%c0_276, %c0_277] : memref<1x16xf32, #tpu.memory_space<vmem>>, vector<1x16xf32>
    %306 = vector.broadcast %305 : vector<1x16xf32> to vector<4x16xf32>
    %307 = arith.addf %304, %306 : vector<4x16xf32>
    %c0_278 = arith.constant 0 : index
    %c2_279 = arith.constant 2 : index
    %c0_280 = arith.constant 0 : index
    %c0_281 = arith.constant 0 : index
    %308 = vector.load %arg11[%c0_278, %c2_279, %c0_280, %c0_281] : memref<1x4x4x16xf32, #tpu.memory_space<vmem>>, vector<1x1x4x16xf32>
    %309 = vector.shape_cast %308 : vector<1x1x4x16xf32> to vector<4x16xf32>
    %310 = vector.shape_cast %307 : vector<4x16xf32> to vector<1x1x4x16xf32>
    tpu.vector_store %arg11[%c0_278, %c2_279, %c0_280, %c0_281], %310 {strides = array<i32>} : memref<1x4x4x16xf32, #tpu.memory_space<vmem>>, vector<1x1x4x16xf32>,
    %311 = vector.extract_strided_slice %277 {offsets = [3, 0, 0], sizes = [1, 4, 16], strides = [1, 1, 1]} : vector<4x4x16xf32> to vector<1x4x16xf32>
    %312 = vector.shape_cast %311 : vector<1x4x16xf32> to vector<4x16xf32>
    %313 = arith.truncf %312 : vector<4x16xf32> to vector<4x16xbf16>
    %c0_282 = arith.constant 0 : index
    %c0_283 = arith.constant 0 : index
    %314 = vector.load %arg9[%c0_282, %c0_283] : memref<16x16xbf16, #tpu.memory_space<vmem>>, vector<16x16xbf16>
    %cst_284 = arith.constant dense<0.000000e+00> : vector<4x16xf32>
    %315 = tpu.matmul %313, %314, %cst_284 {dimension_numbers = #tpu.dot_dimension_numbers<[1], [0], [0], [1], [0, 0, 1, 1], [], []>} : vector<4x16xbf16>, vector<16x16xbf16>, vector<4x16xf32> -> vector<4x16xf32>
    %c0_285 = arith.constant 0 : index
    %c0_286 = arith.constant 0 : index
    %316 = vector.load %arg10[%c0_285, %c0_286] : memref<1x16xf32, #tpu.memory_space<vmem>>, vector<1x16xf32>
    %317 = vector.broadcast %316 : vector<1x16xf32> to vector<4x16xf32>
    %318 = arith.addf %315, %317 : vector<4x16xf32>
    %c0_287 = arith.constant 0 : index
    %c3_288 = arith.constant 3 : index
    %c0_289 = arith.constant 0 : index
    %c0_290 = arith.constant 0 : index
    %319 = vector.load %arg11[%c0_287, %c3_288, %c0_289, %c0_290] : memref<1x4x4x16xf32, #tpu.memory_space<vmem>>, vector<1x1x4x16xf32>
    %320 = vector.shape_cast %319 : vector<1x1x4x16xf32> to vector<4x16xf32>
    %321 = vector.shape_cast %318 : vector<4x16xf32> to vector<1x1x4x16xf32>
    tpu.vector_store %arg11[%c0_287, %c3_288, %c0_289, %c0_290], %321 {strides = array<i32>} : memref<1x4x4x16xf32, #tpu.memory_space<vmem>>, vector<1x1x4x16xf32>,
    return
  }
  func.func @transform_0(%arg0: i32) -> (i32, i32, i32, i32) {
    %c0_i32 = arith.constant 0 : i32
    %c0_i32_0 = arith.constant 0 : i32
    %c0_i32_1 = arith.constant 0 : i32
    %c0_i32_2 = arith.constant 0 : i32
    return %arg0, %c0_i32, %c0_i32_0, %c0_i32_1 : i32, i32, i32, i32
  }
  func.func @transform_1(%arg0: i32) -> (i32, i32, i32) {
    %c0_i32 = arith.constant 0 : i32
    %c0_i32_0 = arith.constant 0 : i32
    %c0_i32_1 = arith.constant 0 : i32
    %c0_i32_2 = arith.constant 0 : i32
    return %c0_i32, %c0_i32_0, %c0_i32_1 : i32, i32, i32
  }
  func.func @transform_2(%arg0: i32) -> (i32, i32, i32) {
    %c0_i32 = arith.constant 0 : i32
    %c0_i32_0 = arith.constant 0 : i32
    %c0_i32_1 = arith.constant 0 : i32
    %c0_i32_2 = arith.constant 0 : i32
    return %c0_i32, %c0_i32_0, %c0_i32_1 : i32, i32, i32
  }
  func.func @transform_3(%arg0: i32) -> (i32, i32) {
    %c0_i32 = arith.constant 0 : i32
    %c0_i32_0 = arith.constant 0 : i32
    %c0_i32_1 = arith.constant 0 : i32
    return %c0_i32, %c0_i32_0 : i32, i32
  }
  func.func @transform_4(%arg0: i32) -> (i32, i32) {
    %c0_i32 = arith.constant 0 : i32
    %c0_i32_0 = arith.constant 0 : i32
    %c0_i32_1 = arith.constant 0 : i32
    return %c0_i32, %c0_i32_0 : i32, i32
  }
  func.func @transform_5(%arg0: i32) -> (i32, i32) {
    %c0_i32 = arith.constant 0 : i32
    %c0_i32_0 = arith.constant 0 : i32
    %c0_i32_1 = arith.constant 0 : i32
    return %c0_i32, %c0_i32_0 : i32, i32
  }
  func.func @transform_6(%arg0: i32) -> (i32, i32) {
    %c0_i32 = arith.constant 0 : i32
    %c0_i32_0 = arith.constant 0 : i32
    %c0_i32_1 = arith.constant 0 : i32
    return %c0_i32, %c0_i32_0 : i32, i32
  }
  func.func @transform_7(%arg0: i32) -> (i32, i32) {
    %c0_i32 = arith.constant 0 : i32
    %c0_i32_0 = arith.constant 0 : i32
    %c0_i32_1 = arith.constant 0 : i32
    return %c0_i32, %c0_i32_0 : i32, i32
  }
  func.func @transform_8(%arg0: i32) -> (i32, i32) {
    %c0_i32 = arith.constant 0 : i32
    %c0_i32_0 = arith.constant 0 : i32
    %c0_i32_1 = arith.constant 0 : i32
    return %c0_i32, %c0_i32_0 : i32, i32
  }
  func.func @transform_9(%arg0: i32) -> (i32, i32) {
    %c0_i32 = arith.constant 0 : i32
    %c0_i32_0 = arith.constant 0 : i32
    %c0_i32_1 = arith.constant 0 : i32
    return %c0_i32, %c0_i32_0 : i32, i32
  }
  func.func @transform_10(%arg0: i32) -> (i32, i32, i32, i32) {
    %c0_i32 = arith.constant 0 : i32
    %c0_i32_0 = arith.constant 0 : i32
    %c0_i32_1 = arith.constant 0 : i32
    %c0_i32_2 = arith.constant 0 : i32
    return %arg0, %c0_i32, %c0_i32_0, %c0_i32_1 : i32, i32, i32, i32
  }
}

module attributes {stable_mosaic.version = 11 : i64} {
  func.func @_ir_block_kernel(%arg0: i32, %arg1: memref<1x12x3x16xf32, #tpu.memory_space<vmem>>, %arg2: memref<12x3x1xf32, #tpu.memory_space<vmem>>, %arg3: memref<16x72xbf16, #tpu.memory_space<vmem>>, %arg4: memref<1x72xf32, #tpu.memory_space<vmem>>, %arg5: memref<9x1x72xf32, #tpu.memory_space<vmem>>, %arg6: memref<1x72xf32, #tpu.memory_space<vmem>>, %arg7: memref<72x24xbf16, #tpu.memory_space<vmem>>, %arg8: memref<1x24xf32, #tpu.memory_space<vmem>>, %arg9: memref<1x2x2x24xf32, #tpu.memory_space<vmem>>, %arg10: memref<12x3x72xf32, #tpu.memory_space<vmem>>) attributes {dimension_semantics = [#tpu.dimension_semantics<parallel>], iteration_bounds = array<i64: 2>, scalar_prefetch = 0 : i64, scratch_operands = 1 : i64, tpu.core_type = #tpu.core_type<tc>, window_params = [{transform_indices = @transform_0, window_bounds = array<i64: 1, 12, 3, 16>}, {pipeline_mode = #tpu.pipeline_mode<synchronous>, transform_indices = @transform_1, window_bounds = array<i64: 12, 3, 1>}, {pipeline_mode = #tpu.pipeline_mode<synchronous>, transform_indices = @transform_2, window_bounds = array<i64: 16, 72>}, {pipeline_mode = #tpu.pipeline_mode<synchronous>, transform_indices = @transform_3, window_bounds = array<i64: 1, 72>}, {pipeline_mode = #tpu.pipeline_mode<synchronous>, transform_indices = @transform_4, window_bounds = array<i64: 9, 1, 72>}, {pipeline_mode = #tpu.pipeline_mode<synchronous>, transform_indices = @transform_5, window_bounds = array<i64: 1, 72>}, {pipeline_mode = #tpu.pipeline_mode<synchronous>, transform_indices = @transform_6, window_bounds = array<i64: 72, 24>}, {pipeline_mode = #tpu.pipeline_mode<synchronous>, transform_indices = @transform_7, window_bounds = array<i64: 1, 24>}, {transform_indices = @transform_8, window_bounds = array<i64: 1, 2, 2, 24>}]} {
    %c0 = arith.constant 0 : index
    %c0_0 = arith.constant 0 : index
    %c0_1 = arith.constant 0 : index
    %c0_2 = arith.constant 0 : index
    %0 = vector.load %arg1[%c0, %c0_0, %c0_1, %c0_2] : memref<1x12x3x16xf32, #tpu.memory_space<vmem>>, vector<1x1x3x16xf32>
    %1 = vector.shape_cast %0 : vector<1x1x3x16xf32> to vector<3x16xf32>
    %2 = arith.truncf %1 : vector<3x16xf32> to vector<3x16xbf16>
    %c0_3 = arith.constant 0 : index
    %c0_4 = arith.constant 0 : index
    %3 = vector.load %arg3[%c0_3, %c0_4] : memref<16x72xbf16, #tpu.memory_space<vmem>>, vector<16x72xbf16>
    %cst = arith.constant dense<0.000000e+00> : vector<3x72xf32>
    %4 = tpu.matmul %2, %3, %cst {dimension_numbers = #tpu.dot_dimension_numbers<[1], [0], [0], [1], [0, 0, 1, 1], [], []>} : vector<3x16xbf16>, vector<16x72xbf16>, vector<3x72xf32> -> vector<3x72xf32>
    %c0_5 = arith.constant 0 : index
    %c0_6 = arith.constant 0 : index
    %5 = vector.load %arg4[%c0_5, %c0_6] : memref<1x72xf32, #tpu.memory_space<vmem>>, vector<1x72xf32>
    %6 = vector.broadcast %5 : vector<1x72xf32> to vector<3x72xf32>
    %7 = arith.addf %4, %6 : vector<3x72xf32>
    %cst_7 = arith.constant 0.000000e+00 : f32
    %8 = vector.broadcast %cst_7 : f32 to vector<3x72xf32>
    %9 = arith.maximumf %7, %8 : vector<3x72xf32>
    %c0_8 = arith.constant 0 : index
    %c0_9 = arith.constant 0 : index
    %c0_10 = arith.constant 0 : index
    %10 = vector.load %arg2[%c0_8, %c0_9, %c0_10] : memref<12x3x1xf32, #tpu.memory_space<vmem>>, vector<1x3x1xf32>
    %11 = vector.shape_cast %10 : vector<1x3x1xf32> to vector<3x1xf32>
    %12 = vector.broadcast %11 : vector<3x1xf32> to vector<3x72xf32>
    %13 = arith.mulf %9, %12 : vector<3x72xf32>
    %c0_11 = arith.constant 0 : index
    %c0_12 = arith.constant 0 : index
    %c0_13 = arith.constant 0 : index
    %14 = vector.load %arg10[%c0_11, %c0_12, %c0_13] : memref<12x3x72xf32, #tpu.memory_space<vmem>>, vector<1x3x72xf32>
    %15 = vector.shape_cast %14 : vector<1x3x72xf32> to vector<3x72xf32>
    %16 = vector.shape_cast %13 : vector<3x72xf32> to vector<1x3x72xf32>
    tpu.vector_store %arg10[%c0_11, %c0_12, %c0_13], %16 {strides = array<i32>} : memref<12x3x72xf32, #tpu.memory_space<vmem>>, vector<1x3x72xf32>,
    %c0_14 = arith.constant 0 : index
    %c1 = arith.constant 1 : index
    %c0_15 = arith.constant 0 : index
    %c0_16 = arith.constant 0 : index
    %17 = vector.load %arg1[%c0_14, %c1, %c0_15, %c0_16] : memref<1x12x3x16xf32, #tpu.memory_space<vmem>>, vector<1x1x3x16xf32>
    %18 = vector.shape_cast %17 : vector<1x1x3x16xf32> to vector<3x16xf32>
    %19 = arith.truncf %18 : vector<3x16xf32> to vector<3x16xbf16>
    %c0_17 = arith.constant 0 : index
    %c0_18 = arith.constant 0 : index
    %20 = vector.load %arg3[%c0_17, %c0_18] : memref<16x72xbf16, #tpu.memory_space<vmem>>, vector<16x72xbf16>
    %cst_19 = arith.constant dense<0.000000e+00> : vector<3x72xf32>
    %21 = tpu.matmul %19, %20, %cst_19 {dimension_numbers = #tpu.dot_dimension_numbers<[1], [0], [0], [1], [0, 0, 1, 1], [], []>} : vector<3x16xbf16>, vector<16x72xbf16>, vector<3x72xf32> -> vector<3x72xf32>
    %c0_20 = arith.constant 0 : index
    %c0_21 = arith.constant 0 : index
    %22 = vector.load %arg4[%c0_20, %c0_21] : memref<1x72xf32, #tpu.memory_space<vmem>>, vector<1x72xf32>
    %23 = vector.broadcast %22 : vector<1x72xf32> to vector<3x72xf32>
    %24 = arith.addf %21, %23 : vector<3x72xf32>
    %cst_22 = arith.constant 0.000000e+00 : f32
    %25 = vector.broadcast %cst_22 : f32 to vector<3x72xf32>
    %26 = arith.maximumf %24, %25 : vector<3x72xf32>
    %c1_23 = arith.constant 1 : index
    %c0_24 = arith.constant 0 : index
    %c0_25 = arith.constant 0 : index
    %27 = vector.load %arg2[%c1_23, %c0_24, %c0_25] : memref<12x3x1xf32, #tpu.memory_space<vmem>>, vector<1x3x1xf32>
    %28 = vector.shape_cast %27 : vector<1x3x1xf32> to vector<3x1xf32>
    %29 = vector.broadcast %28 : vector<3x1xf32> to vector<3x72xf32>
    %30 = arith.mulf %26, %29 : vector<3x72xf32>
    %c1_26 = arith.constant 1 : index
    %c0_27 = arith.constant 0 : index
    %c0_28 = arith.constant 0 : index
    %31 = vector.load %arg10[%c1_26, %c0_27, %c0_28] : memref<12x3x72xf32, #tpu.memory_space<vmem>>, vector<1x3x72xf32>
    %32 = vector.shape_cast %31 : vector<1x3x72xf32> to vector<3x72xf32>
    %33 = vector.shape_cast %30 : vector<3x72xf32> to vector<1x3x72xf32>
    tpu.vector_store %arg10[%c1_26, %c0_27, %c0_28], %33 {strides = array<i32>} : memref<12x3x72xf32, #tpu.memory_space<vmem>>, vector<1x3x72xf32>,
    %c0_29 = arith.constant 0 : index
    %c2 = arith.constant 2 : index
    %c0_30 = arith.constant 0 : index
    %c0_31 = arith.constant 0 : index
    %34 = vector.load %arg1[%c0_29, %c2, %c0_30, %c0_31] : memref<1x12x3x16xf32, #tpu.memory_space<vmem>>, vector<1x1x3x16xf32>
    %35 = vector.shape_cast %34 : vector<1x1x3x16xf32> to vector<3x16xf32>
    %36 = arith.truncf %35 : vector<3x16xf32> to vector<3x16xbf16>
    %c0_32 = arith.constant 0 : index
    %c0_33 = arith.constant 0 : index
    %37 = vector.load %arg3[%c0_32, %c0_33] : memref<16x72xbf16, #tpu.memory_space<vmem>>, vector<16x72xbf16>
    %cst_34 = arith.constant dense<0.000000e+00> : vector<3x72xf32>
    %38 = tpu.matmul %36, %37, %cst_34 {dimension_numbers = #tpu.dot_dimension_numbers<[1], [0], [0], [1], [0, 0, 1, 1], [], []>} : vector<3x16xbf16>, vector<16x72xbf16>, vector<3x72xf32> -> vector<3x72xf32>
    %c0_35 = arith.constant 0 : index
    %c0_36 = arith.constant 0 : index
    %39 = vector.load %arg4[%c0_35, %c0_36] : memref<1x72xf32, #tpu.memory_space<vmem>>, vector<1x72xf32>
    %40 = vector.broadcast %39 : vector<1x72xf32> to vector<3x72xf32>
    %41 = arith.addf %38, %40 : vector<3x72xf32>
    %cst_37 = arith.constant 0.000000e+00 : f32
    %42 = vector.broadcast %cst_37 : f32 to vector<3x72xf32>
    %43 = arith.maximumf %41, %42 : vector<3x72xf32>
    %c2_38 = arith.constant 2 : index
    %c0_39 = arith.constant 0 : index
    %c0_40 = arith.constant 0 : index
    %44 = vector.load %arg2[%c2_38, %c0_39, %c0_40] : memref<12x3x1xf32, #tpu.memory_space<vmem>>, vector<1x3x1xf32>
    %45 = vector.shape_cast %44 : vector<1x3x1xf32> to vector<3x1xf32>
    %46 = vector.broadcast %45 : vector<3x1xf32> to vector<3x72xf32>
    %47 = arith.mulf %43, %46 : vector<3x72xf32>
    %c2_41 = arith.constant 2 : index
    %c0_42 = arith.constant 0 : index
    %c0_43 = arith.constant 0 : index
    %48 = vector.load %arg10[%c2_41, %c0_42, %c0_43] : memref<12x3x72xf32, #tpu.memory_space<vmem>>, vector<1x3x72xf32>
    %49 = vector.shape_cast %48 : vector<1x3x72xf32> to vector<3x72xf32>
    %50 = vector.shape_cast %47 : vector<3x72xf32> to vector<1x3x72xf32>
    tpu.vector_store %arg10[%c2_41, %c0_42, %c0_43], %50 {strides = array<i32>} : memref<12x3x72xf32, #tpu.memory_space<vmem>>, vector<1x3x72xf32>,
    %c0_44 = arith.constant 0 : index
    %c3 = arith.constant 3 : index
    %c0_45 = arith.constant 0 : index
    %c0_46 = arith.constant 0 : index
    %51 = vector.load %arg1[%c0_44, %c3, %c0_45, %c0_46] : memref<1x12x3x16xf32, #tpu.memory_space<vmem>>, vector<1x1x3x16xf32>
    %52 = vector.shape_cast %51 : vector<1x1x3x16xf32> to vector<3x16xf32>
    %53 = arith.truncf %52 : vector<3x16xf32> to vector<3x16xbf16>
    %c0_47 = arith.constant 0 : index
    %c0_48 = arith.constant 0 : index
    %54 = vector.load %arg3[%c0_47, %c0_48] : memref<16x72xbf16, #tpu.memory_space<vmem>>, vector<16x72xbf16>
    %cst_49 = arith.constant dense<0.000000e+00> : vector<3x72xf32>
    %55 = tpu.matmul %53, %54, %cst_49 {dimension_numbers = #tpu.dot_dimension_numbers<[1], [0], [0], [1], [0, 0, 1, 1], [], []>} : vector<3x16xbf16>, vector<16x72xbf16>, vector<3x72xf32> -> vector<3x72xf32>
    %c0_50 = arith.constant 0 : index
    %c0_51 = arith.constant 0 : index
    %56 = vector.load %arg4[%c0_50, %c0_51] : memref<1x72xf32, #tpu.memory_space<vmem>>, vector<1x72xf32>
    %57 = vector.broadcast %56 : vector<1x72xf32> to vector<3x72xf32>
    %58 = arith.addf %55, %57 : vector<3x72xf32>
    %cst_52 = arith.constant 0.000000e+00 : f32
    %59 = vector.broadcast %cst_52 : f32 to vector<3x72xf32>
    %60 = arith.maximumf %58, %59 : vector<3x72xf32>
    %c3_53 = arith.constant 3 : index
    %c0_54 = arith.constant 0 : index
    %c0_55 = arith.constant 0 : index
    %61 = vector.load %arg2[%c3_53, %c0_54, %c0_55] : memref<12x3x1xf32, #tpu.memory_space<vmem>>, vector<1x3x1xf32>
    %62 = vector.shape_cast %61 : vector<1x3x1xf32> to vector<3x1xf32>
    %63 = vector.broadcast %62 : vector<3x1xf32> to vector<3x72xf32>
    %64 = arith.mulf %60, %63 : vector<3x72xf32>
    %c3_56 = arith.constant 3 : index
    %c0_57 = arith.constant 0 : index
    %c0_58 = arith.constant 0 : index
    %65 = vector.load %arg10[%c3_56, %c0_57, %c0_58] : memref<12x3x72xf32, #tpu.memory_space<vmem>>, vector<1x3x72xf32>
    %66 = vector.shape_cast %65 : vector<1x3x72xf32> to vector<3x72xf32>
    %67 = vector.shape_cast %64 : vector<3x72xf32> to vector<1x3x72xf32>
    tpu.vector_store %arg10[%c3_56, %c0_57, %c0_58], %67 {strides = array<i32>} : memref<12x3x72xf32, #tpu.memory_space<vmem>>, vector<1x3x72xf32>,
    %c0_59 = arith.constant 0 : index
    %c4 = arith.constant 4 : index
    %c0_60 = arith.constant 0 : index
    %c0_61 = arith.constant 0 : index
    %68 = vector.load %arg1[%c0_59, %c4, %c0_60, %c0_61] : memref<1x12x3x16xf32, #tpu.memory_space<vmem>>, vector<1x1x3x16xf32>
    %69 = vector.shape_cast %68 : vector<1x1x3x16xf32> to vector<3x16xf32>
    %70 = arith.truncf %69 : vector<3x16xf32> to vector<3x16xbf16>
    %c0_62 = arith.constant 0 : index
    %c0_63 = arith.constant 0 : index
    %71 = vector.load %arg3[%c0_62, %c0_63] : memref<16x72xbf16, #tpu.memory_space<vmem>>, vector<16x72xbf16>
    %cst_64 = arith.constant dense<0.000000e+00> : vector<3x72xf32>
    %72 = tpu.matmul %70, %71, %cst_64 {dimension_numbers = #tpu.dot_dimension_numbers<[1], [0], [0], [1], [0, 0, 1, 1], [], []>} : vector<3x16xbf16>, vector<16x72xbf16>, vector<3x72xf32> -> vector<3x72xf32>
    %c0_65 = arith.constant 0 : index
    %c0_66 = arith.constant 0 : index
    %73 = vector.load %arg4[%c0_65, %c0_66] : memref<1x72xf32, #tpu.memory_space<vmem>>, vector<1x72xf32>
    %74 = vector.broadcast %73 : vector<1x72xf32> to vector<3x72xf32>
    %75 = arith.addf %72, %74 : vector<3x72xf32>
    %cst_67 = arith.constant 0.000000e+00 : f32
    %76 = vector.broadcast %cst_67 : f32 to vector<3x72xf32>
    %77 = arith.maximumf %75, %76 : vector<3x72xf32>
    %c4_68 = arith.constant 4 : index
    %c0_69 = arith.constant 0 : index
    %c0_70 = arith.constant 0 : index
    %78 = vector.load %arg2[%c4_68, %c0_69, %c0_70] : memref<12x3x1xf32, #tpu.memory_space<vmem>>, vector<1x3x1xf32>
    %79 = vector.shape_cast %78 : vector<1x3x1xf32> to vector<3x1xf32>
    %80 = vector.broadcast %79 : vector<3x1xf32> to vector<3x72xf32>
    %81 = arith.mulf %77, %80 : vector<3x72xf32>
    %c4_71 = arith.constant 4 : index
    %c0_72 = arith.constant 0 : index
    %c0_73 = arith.constant 0 : index
    %82 = vector.load %arg10[%c4_71, %c0_72, %c0_73] : memref<12x3x72xf32, #tpu.memory_space<vmem>>, vector<1x3x72xf32>
    %83 = vector.shape_cast %82 : vector<1x3x72xf32> to vector<3x72xf32>
    %84 = vector.shape_cast %81 : vector<3x72xf32> to vector<1x3x72xf32>
    tpu.vector_store %arg10[%c4_71, %c0_72, %c0_73], %84 {strides = array<i32>} : memref<12x3x72xf32, #tpu.memory_space<vmem>>, vector<1x3x72xf32>,
    %c0_74 = arith.constant 0 : index
    %c5 = arith.constant 5 : index
    %c0_75 = arith.constant 0 : index
    %c0_76 = arith.constant 0 : index
    %85 = vector.load %arg1[%c0_74, %c5, %c0_75, %c0_76] : memref<1x12x3x16xf32, #tpu.memory_space<vmem>>, vector<1x1x3x16xf32>
    %86 = vector.shape_cast %85 : vector<1x1x3x16xf32> to vector<3x16xf32>
    %87 = arith.truncf %86 : vector<3x16xf32> to vector<3x16xbf16>
    %c0_77 = arith.constant 0 : index
    %c0_78 = arith.constant 0 : index
    %88 = vector.load %arg3[%c0_77, %c0_78] : memref<16x72xbf16, #tpu.memory_space<vmem>>, vector<16x72xbf16>
    %cst_79 = arith.constant dense<0.000000e+00> : vector<3x72xf32>
    %89 = tpu.matmul %87, %88, %cst_79 {dimension_numbers = #tpu.dot_dimension_numbers<[1], [0], [0], [1], [0, 0, 1, 1], [], []>} : vector<3x16xbf16>, vector<16x72xbf16>, vector<3x72xf32> -> vector<3x72xf32>
    %c0_80 = arith.constant 0 : index
    %c0_81 = arith.constant 0 : index
    %90 = vector.load %arg4[%c0_80, %c0_81] : memref<1x72xf32, #tpu.memory_space<vmem>>, vector<1x72xf32>
    %91 = vector.broadcast %90 : vector<1x72xf32> to vector<3x72xf32>
    %92 = arith.addf %89, %91 : vector<3x72xf32>
    %cst_82 = arith.constant 0.000000e+00 : f32
    %93 = vector.broadcast %cst_82 : f32 to vector<3x72xf32>
    %94 = arith.maximumf %92, %93 : vector<3x72xf32>
    %c5_83 = arith.constant 5 : index
    %c0_84 = arith.constant 0 : index
    %c0_85 = arith.constant 0 : index
    %95 = vector.load %arg2[%c5_83, %c0_84, %c0_85] : memref<12x3x1xf32, #tpu.memory_space<vmem>>, vector<1x3x1xf32>
    %96 = vector.shape_cast %95 : vector<1x3x1xf32> to vector<3x1xf32>
    %97 = vector.broadcast %96 : vector<3x1xf32> to vector<3x72xf32>
    %98 = arith.mulf %94, %97 : vector<3x72xf32>
    %c5_86 = arith.constant 5 : index
    %c0_87 = arith.constant 0 : index
    %c0_88 = arith.constant 0 : index
    %99 = vector.load %arg10[%c5_86, %c0_87, %c0_88] : memref<12x3x72xf32, #tpu.memory_space<vmem>>, vector<1x3x72xf32>
    %100 = vector.shape_cast %99 : vector<1x3x72xf32> to vector<3x72xf32>
    %101 = vector.shape_cast %98 : vector<3x72xf32> to vector<1x3x72xf32>
    tpu.vector_store %arg10[%c5_86, %c0_87, %c0_88], %101 {strides = array<i32>} : memref<12x3x72xf32, #tpu.memory_space<vmem>>, vector<1x3x72xf32>,
    %c0_89 = arith.constant 0 : index
    %c6 = arith.constant 6 : index
    %c0_90 = arith.constant 0 : index
    %c0_91 = arith.constant 0 : index
    %102 = vector.load %arg1[%c0_89, %c6, %c0_90, %c0_91] : memref<1x12x3x16xf32, #tpu.memory_space<vmem>>, vector<1x1x3x16xf32>
    %103 = vector.shape_cast %102 : vector<1x1x3x16xf32> to vector<3x16xf32>
    %104 = arith.truncf %103 : vector<3x16xf32> to vector<3x16xbf16>
    %c0_92 = arith.constant 0 : index
    %c0_93 = arith.constant 0 : index
    %105 = vector.load %arg3[%c0_92, %c0_93] : memref<16x72xbf16, #tpu.memory_space<vmem>>, vector<16x72xbf16>
    %cst_94 = arith.constant dense<0.000000e+00> : vector<3x72xf32>
    %106 = tpu.matmul %104, %105, %cst_94 {dimension_numbers = #tpu.dot_dimension_numbers<[1], [0], [0], [1], [0, 0, 1, 1], [], []>} : vector<3x16xbf16>, vector<16x72xbf16>, vector<3x72xf32> -> vector<3x72xf32>
    %c0_95 = arith.constant 0 : index
    %c0_96 = arith.constant 0 : index
    %107 = vector.load %arg4[%c0_95, %c0_96] : memref<1x72xf32, #tpu.memory_space<vmem>>, vector<1x72xf32>
    %108 = vector.broadcast %107 : vector<1x72xf32> to vector<3x72xf32>
    %109 = arith.addf %106, %108 : vector<3x72xf32>
    %cst_97 = arith.constant 0.000000e+00 : f32
    %110 = vector.broadcast %cst_97 : f32 to vector<3x72xf32>
    %111 = arith.maximumf %109, %110 : vector<3x72xf32>
    %c6_98 = arith.constant 6 : index
    %c0_99 = arith.constant 0 : index
    %c0_100 = arith.constant 0 : index
    %112 = vector.load %arg2[%c6_98, %c0_99, %c0_100] : memref<12x3x1xf32, #tpu.memory_space<vmem>>, vector<1x3x1xf32>
    %113 = vector.shape_cast %112 : vector<1x3x1xf32> to vector<3x1xf32>
    %114 = vector.broadcast %113 : vector<3x1xf32> to vector<3x72xf32>
    %115 = arith.mulf %111, %114 : vector<3x72xf32>
    %c6_101 = arith.constant 6 : index
    %c0_102 = arith.constant 0 : index
    %c0_103 = arith.constant 0 : index
    %116 = vector.load %arg10[%c6_101, %c0_102, %c0_103] : memref<12x3x72xf32, #tpu.memory_space<vmem>>, vector<1x3x72xf32>
    %117 = vector.shape_cast %116 : vector<1x3x72xf32> to vector<3x72xf32>
    %118 = vector.shape_cast %115 : vector<3x72xf32> to vector<1x3x72xf32>
    tpu.vector_store %arg10[%c6_101, %c0_102, %c0_103], %118 {strides = array<i32>} : memref<12x3x72xf32, #tpu.memory_space<vmem>>, vector<1x3x72xf32>,
    %c0_104 = arith.constant 0 : index
    %c7 = arith.constant 7 : index
    %c0_105 = arith.constant 0 : index
    %c0_106 = arith.constant 0 : index
    %119 = vector.load %arg1[%c0_104, %c7, %c0_105, %c0_106] : memref<1x12x3x16xf32, #tpu.memory_space<vmem>>, vector<1x1x3x16xf32>
    %120 = vector.shape_cast %119 : vector<1x1x3x16xf32> to vector<3x16xf32>
    %121 = arith.truncf %120 : vector<3x16xf32> to vector<3x16xbf16>
    %c0_107 = arith.constant 0 : index
    %c0_108 = arith.constant 0 : index
    %122 = vector.load %arg3[%c0_107, %c0_108] : memref<16x72xbf16, #tpu.memory_space<vmem>>, vector<16x72xbf16>
    %cst_109 = arith.constant dense<0.000000e+00> : vector<3x72xf32>
    %123 = tpu.matmul %121, %122, %cst_109 {dimension_numbers = #tpu.dot_dimension_numbers<[1], [0], [0], [1], [0, 0, 1, 1], [], []>} : vector<3x16xbf16>, vector<16x72xbf16>, vector<3x72xf32> -> vector<3x72xf32>
    %c0_110 = arith.constant 0 : index
    %c0_111 = arith.constant 0 : index
    %124 = vector.load %arg4[%c0_110, %c0_111] : memref<1x72xf32, #tpu.memory_space<vmem>>, vector<1x72xf32>
    %125 = vector.broadcast %124 : vector<1x72xf32> to vector<3x72xf32>
    %126 = arith.addf %123, %125 : vector<3x72xf32>
    %cst_112 = arith.constant 0.000000e+00 : f32
    %127 = vector.broadcast %cst_112 : f32 to vector<3x72xf32>
    %128 = arith.maximumf %126, %127 : vector<3x72xf32>
    %c7_113 = arith.constant 7 : index
    %c0_114 = arith.constant 0 : index
    %c0_115 = arith.constant 0 : index
    %129 = vector.load %arg2[%c7_113, %c0_114, %c0_115] : memref<12x3x1xf32, #tpu.memory_space<vmem>>, vector<1x3x1xf32>
    %130 = vector.shape_cast %129 : vector<1x3x1xf32> to vector<3x1xf32>
    %131 = vector.broadcast %130 : vector<3x1xf32> to vector<3x72xf32>
    %132 = arith.mulf %128, %131 : vector<3x72xf32>
    %c7_116 = arith.constant 7 : index
    %c0_117 = arith.constant 0 : index
    %c0_118 = arith.constant 0 : index
    %133 = vector.load %arg10[%c7_116, %c0_117, %c0_118] : memref<12x3x72xf32, #tpu.memory_space<vmem>>, vector<1x3x72xf32>
    %134 = vector.shape_cast %133 : vector<1x3x72xf32> to vector<3x72xf32>
    %135 = vector.shape_cast %132 : vector<3x72xf32> to vector<1x3x72xf32>
    tpu.vector_store %arg10[%c7_116, %c0_117, %c0_118], %135 {strides = array<i32>} : memref<12x3x72xf32, #tpu.memory_space<vmem>>, vector<1x3x72xf32>,
    %c0_119 = arith.constant 0 : index
    %c8 = arith.constant 8 : index
    %c0_120 = arith.constant 0 : index
    %c0_121 = arith.constant 0 : index
    %136 = vector.load %arg1[%c0_119, %c8, %c0_120, %c0_121] : memref<1x12x3x16xf32, #tpu.memory_space<vmem>>, vector<1x1x3x16xf32>
    %137 = vector.shape_cast %136 : vector<1x1x3x16xf32> to vector<3x16xf32>
    %138 = arith.truncf %137 : vector<3x16xf32> to vector<3x16xbf16>
    %c0_122 = arith.constant 0 : index
    %c0_123 = arith.constant 0 : index
    %139 = vector.load %arg3[%c0_122, %c0_123] : memref<16x72xbf16, #tpu.memory_space<vmem>>, vector<16x72xbf16>
    %cst_124 = arith.constant dense<0.000000e+00> : vector<3x72xf32>
    %140 = tpu.matmul %138, %139, %cst_124 {dimension_numbers = #tpu.dot_dimension_numbers<[1], [0], [0], [1], [0, 0, 1, 1], [], []>} : vector<3x16xbf16>, vector<16x72xbf16>, vector<3x72xf32> -> vector<3x72xf32>
    %c0_125 = arith.constant 0 : index
    %c0_126 = arith.constant 0 : index
    %141 = vector.load %arg4[%c0_125, %c0_126] : memref<1x72xf32, #tpu.memory_space<vmem>>, vector<1x72xf32>
    %142 = vector.broadcast %141 : vector<1x72xf32> to vector<3x72xf32>
    %143 = arith.addf %140, %142 : vector<3x72xf32>
    %cst_127 = arith.constant 0.000000e+00 : f32
    %144 = vector.broadcast %cst_127 : f32 to vector<3x72xf32>
    %145 = arith.maximumf %143, %144 : vector<3x72xf32>
    %c8_128 = arith.constant 8 : index
    %c0_129 = arith.constant 0 : index
    %c0_130 = arith.constant 0 : index
    %146 = vector.load %arg2[%c8_128, %c0_129, %c0_130] : memref<12x3x1xf32, #tpu.memory_space<vmem>>, vector<1x3x1xf32>
    %147 = vector.shape_cast %146 : vector<1x3x1xf32> to vector<3x1xf32>
    %148 = vector.broadcast %147 : vector<3x1xf32> to vector<3x72xf32>
    %149 = arith.mulf %145, %148 : vector<3x72xf32>
    %c8_131 = arith.constant 8 : index
    %c0_132 = arith.constant 0 : index
    %c0_133 = arith.constant 0 : index
    %150 = vector.load %arg10[%c8_131, %c0_132, %c0_133] : memref<12x3x72xf32, #tpu.memory_space<vmem>>, vector<1x3x72xf32>
    %151 = vector.shape_cast %150 : vector<1x3x72xf32> to vector<3x72xf32>
    %152 = vector.shape_cast %149 : vector<3x72xf32> to vector<1x3x72xf32>
    tpu.vector_store %arg10[%c8_131, %c0_132, %c0_133], %152 {strides = array<i32>} : memref<12x3x72xf32, #tpu.memory_space<vmem>>, vector<1x3x72xf32>,
    %c0_134 = arith.constant 0 : index
    %c9 = arith.constant 9 : index
    %c0_135 = arith.constant 0 : index
    %c0_136 = arith.constant 0 : index
    %153 = vector.load %arg1[%c0_134, %c9, %c0_135, %c0_136] : memref<1x12x3x16xf32, #tpu.memory_space<vmem>>, vector<1x1x3x16xf32>
    %154 = vector.shape_cast %153 : vector<1x1x3x16xf32> to vector<3x16xf32>
    %155 = arith.truncf %154 : vector<3x16xf32> to vector<3x16xbf16>
    %c0_137 = arith.constant 0 : index
    %c0_138 = arith.constant 0 : index
    %156 = vector.load %arg3[%c0_137, %c0_138] : memref<16x72xbf16, #tpu.memory_space<vmem>>, vector<16x72xbf16>
    %cst_139 = arith.constant dense<0.000000e+00> : vector<3x72xf32>
    %157 = tpu.matmul %155, %156, %cst_139 {dimension_numbers = #tpu.dot_dimension_numbers<[1], [0], [0], [1], [0, 0, 1, 1], [], []>} : vector<3x16xbf16>, vector<16x72xbf16>, vector<3x72xf32> -> vector<3x72xf32>
    %c0_140 = arith.constant 0 : index
    %c0_141 = arith.constant 0 : index
    %158 = vector.load %arg4[%c0_140, %c0_141] : memref<1x72xf32, #tpu.memory_space<vmem>>, vector<1x72xf32>
    %159 = vector.broadcast %158 : vector<1x72xf32> to vector<3x72xf32>
    %160 = arith.addf %157, %159 : vector<3x72xf32>
    %cst_142 = arith.constant 0.000000e+00 : f32
    %161 = vector.broadcast %cst_142 : f32 to vector<3x72xf32>
    %162 = arith.maximumf %160, %161 : vector<3x72xf32>
    %c9_143 = arith.constant 9 : index
    %c0_144 = arith.constant 0 : index
    %c0_145 = arith.constant 0 : index
    %163 = vector.load %arg2[%c9_143, %c0_144, %c0_145] : memref<12x3x1xf32, #tpu.memory_space<vmem>>, vector<1x3x1xf32>
    %164 = vector.shape_cast %163 : vector<1x3x1xf32> to vector<3x1xf32>
    %165 = vector.broadcast %164 : vector<3x1xf32> to vector<3x72xf32>
    %166 = arith.mulf %162, %165 : vector<3x72xf32>
    %c9_146 = arith.constant 9 : index
    %c0_147 = arith.constant 0 : index
    %c0_148 = arith.constant 0 : index
    %167 = vector.load %arg10[%c9_146, %c0_147, %c0_148] : memref<12x3x72xf32, #tpu.memory_space<vmem>>, vector<1x3x72xf32>
    %168 = vector.shape_cast %167 : vector<1x3x72xf32> to vector<3x72xf32>
    %169 = vector.shape_cast %166 : vector<3x72xf32> to vector<1x3x72xf32>
    tpu.vector_store %arg10[%c9_146, %c0_147, %c0_148], %169 {strides = array<i32>} : memref<12x3x72xf32, #tpu.memory_space<vmem>>, vector<1x3x72xf32>,
    %c0_149 = arith.constant 0 : index
    %c10 = arith.constant 10 : index
    %c0_150 = arith.constant 0 : index
    %c0_151 = arith.constant 0 : index
    %170 = vector.load %arg1[%c0_149, %c10, %c0_150, %c0_151] : memref<1x12x3x16xf32, #tpu.memory_space<vmem>>, vector<1x1x3x16xf32>
    %171 = vector.shape_cast %170 : vector<1x1x3x16xf32> to vector<3x16xf32>
    %172 = arith.truncf %171 : vector<3x16xf32> to vector<3x16xbf16>
    %c0_152 = arith.constant 0 : index
    %c0_153 = arith.constant 0 : index
    %173 = vector.load %arg3[%c0_152, %c0_153] : memref<16x72xbf16, #tpu.memory_space<vmem>>, vector<16x72xbf16>
    %cst_154 = arith.constant dense<0.000000e+00> : vector<3x72xf32>
    %174 = tpu.matmul %172, %173, %cst_154 {dimension_numbers = #tpu.dot_dimension_numbers<[1], [0], [0], [1], [0, 0, 1, 1], [], []>} : vector<3x16xbf16>, vector<16x72xbf16>, vector<3x72xf32> -> vector<3x72xf32>
    %c0_155 = arith.constant 0 : index
    %c0_156 = arith.constant 0 : index
    %175 = vector.load %arg4[%c0_155, %c0_156] : memref<1x72xf32, #tpu.memory_space<vmem>>, vector<1x72xf32>
    %176 = vector.broadcast %175 : vector<1x72xf32> to vector<3x72xf32>
    %177 = arith.addf %174, %176 : vector<3x72xf32>
    %cst_157 = arith.constant 0.000000e+00 : f32
    %178 = vector.broadcast %cst_157 : f32 to vector<3x72xf32>
    %179 = arith.maximumf %177, %178 : vector<3x72xf32>
    %c10_158 = arith.constant 10 : index
    %c0_159 = arith.constant 0 : index
    %c0_160 = arith.constant 0 : index
    %180 = vector.load %arg2[%c10_158, %c0_159, %c0_160] : memref<12x3x1xf32, #tpu.memory_space<vmem>>, vector<1x3x1xf32>
    %181 = vector.shape_cast %180 : vector<1x3x1xf32> to vector<3x1xf32>
    %182 = vector.broadcast %181 : vector<3x1xf32> to vector<3x72xf32>
    %183 = arith.mulf %179, %182 : vector<3x72xf32>
    %c10_161 = arith.constant 10 : index
    %c0_162 = arith.constant 0 : index
    %c0_163 = arith.constant 0 : index
    %184 = vector.load %arg10[%c10_161, %c0_162, %c0_163] : memref<12x3x72xf32, #tpu.memory_space<vmem>>, vector<1x3x72xf32>
    %185 = vector.shape_cast %184 : vector<1x3x72xf32> to vector<3x72xf32>
    %186 = vector.shape_cast %183 : vector<3x72xf32> to vector<1x3x72xf32>
    tpu.vector_store %arg10[%c10_161, %c0_162, %c0_163], %186 {strides = array<i32>} : memref<12x3x72xf32, #tpu.memory_space<vmem>>, vector<1x3x72xf32>,
    %c0_164 = arith.constant 0 : index
    %c11 = arith.constant 11 : index
    %c0_165 = arith.constant 0 : index
    %c0_166 = arith.constant 0 : index
    %187 = vector.load %arg1[%c0_164, %c11, %c0_165, %c0_166] : memref<1x12x3x16xf32, #tpu.memory_space<vmem>>, vector<1x1x3x16xf32>
    %188 = vector.shape_cast %187 : vector<1x1x3x16xf32> to vector<3x16xf32>
    %189 = arith.truncf %188 : vector<3x16xf32> to vector<3x16xbf16>
    %c0_167 = arith.constant 0 : index
    %c0_168 = arith.constant 0 : index
    %190 = vector.load %arg3[%c0_167, %c0_168] : memref<16x72xbf16, #tpu.memory_space<vmem>>, vector<16x72xbf16>
    %cst_169 = arith.constant dense<0.000000e+00> : vector<3x72xf32>
    %191 = tpu.matmul %189, %190, %cst_169 {dimension_numbers = #tpu.dot_dimension_numbers<[1], [0], [0], [1], [0, 0, 1, 1], [], []>} : vector<3x16xbf16>, vector<16x72xbf16>, vector<3x72xf32> -> vector<3x72xf32>
    %c0_170 = arith.constant 0 : index
    %c0_171 = arith.constant 0 : index
    %192 = vector.load %arg4[%c0_170, %c0_171] : memref<1x72xf32, #tpu.memory_space<vmem>>, vector<1x72xf32>
    %193 = vector.broadcast %192 : vector<1x72xf32> to vector<3x72xf32>
    %194 = arith.addf %191, %193 : vector<3x72xf32>
    %cst_172 = arith.constant 0.000000e+00 : f32
    %195 = vector.broadcast %cst_172 : f32 to vector<3x72xf32>
    %196 = arith.maximumf %194, %195 : vector<3x72xf32>
    %c11_173 = arith.constant 11 : index
    %c0_174 = arith.constant 0 : index
    %c0_175 = arith.constant 0 : index
    %197 = vector.load %arg2[%c11_173, %c0_174, %c0_175] : memref<12x3x1xf32, #tpu.memory_space<vmem>>, vector<1x3x1xf32>
    %198 = vector.shape_cast %197 : vector<1x3x1xf32> to vector<3x1xf32>
    %199 = vector.broadcast %198 : vector<3x1xf32> to vector<3x72xf32>
    %200 = arith.mulf %196, %199 : vector<3x72xf32>
    %c11_176 = arith.constant 11 : index
    %c0_177 = arith.constant 0 : index
    %c0_178 = arith.constant 0 : index
    %201 = vector.load %arg10[%c11_176, %c0_177, %c0_178] : memref<12x3x72xf32, #tpu.memory_space<vmem>>, vector<1x3x72xf32>
    %202 = vector.shape_cast %201 : vector<1x3x72xf32> to vector<3x72xf32>
    %203 = vector.shape_cast %200 : vector<3x72xf32> to vector<1x3x72xf32>
    tpu.vector_store %arg10[%c11_176, %c0_177, %c0_178], %203 {strides = array<i32>} : memref<12x3x72xf32, #tpu.memory_space<vmem>>, vector<1x3x72xf32>,
    %cst_179 = arith.constant 0.000000e+00 : f32
    %204 = vector.broadcast %cst_179 : f32 to vector<2x2x72xf32>
    %c0_180 = arith.constant 0 : index
    %c0_181 = arith.constant 0 : index
    %c0_182 = arith.constant 0 : index
    %205 = vector.load %arg10[%c0_180, %c0_181, %c0_182] : memref<12x3x72xf32, #tpu.memory_space<vmem>>, vector<2x2x72xf32>
    %c0_183 = arith.constant 0 : index
    %c0_184 = arith.constant 0 : index
    %c0_185 = arith.constant 0 : index
    %206 = vector.load %arg5[%c0_183, %c0_184, %c0_185] : memref<9x1x72xf32, #tpu.memory_space<vmem>>, vector<1x1x72xf32>
    %207 = vector.shape_cast %206 : vector<1x1x72xf32> to vector<1x72xf32>
    %208 = vector.shape_cast %207 : vector<1x72xf32> to vector<1x1x72xf32>
    %209 = vector.broadcast %208 : vector<1x1x72xf32> to vector<2x2x72xf32>
    %210 = arith.mulf %205, %209 : vector<2x2x72xf32>
    %211 = arith.addf %204, %210 : vector<2x2x72xf32>
    %c3_186 = arith.constant 3 : index
    %c0_187 = arith.constant 0 : index
    %c0_188 = arith.constant 0 : index
    %212 = vector.load %arg10[%c3_186, %c0_187, %c0_188] : memref<12x3x72xf32, #tpu.memory_space<vmem>>, vector<2x2x72xf32>
    %c1_189 = arith.constant 1 : index
    %c0_190 = arith.constant 0 : index
    %c0_191 = arith.constant 0 : index
    %213 = vector.load %arg5[%c1_189, %c0_190, %c0_191] : memref<9x1x72xf32, #tpu.memory_space<vmem>>, vector<1x1x72xf32>
    %214 = vector.shape_cast %213 : vector<1x1x72xf32> to vector<1x72xf32>
    %215 = vector.shape_cast %214 : vector<1x72xf32> to vector<1x1x72xf32>
    %216 = vector.broadcast %215 : vector<1x1x72xf32> to vector<2x2x72xf32>
    %217 = arith.mulf %212, %216 : vector<2x2x72xf32>
    %218 = arith.addf %211, %217 : vector<2x2x72xf32>
    %c0_192 = arith.constant 0 : index
    %c1_193 = arith.constant 1 : index
    %c0_194 = arith.constant 0 : index
    %219 = vector.load %arg10[%c0_192, %c1_193, %c0_194] : memref<12x3x72xf32, #tpu.memory_space<vmem>>, vector<2x2x72xf32>
    %c2_195 = arith.constant 2 : index
    %c0_196 = arith.constant 0 : index
    %c0_197 = arith.constant 0 : index
    %220 = vector.load %arg5[%c2_195, %c0_196, %c0_197] : memref<9x1x72xf32, #tpu.memory_space<vmem>>, vector<1x1x72xf32>
    %221 = vector.shape_cast %220 : vector<1x1x72xf32> to vector<1x72xf32>
    %222 = vector.shape_cast %221 : vector<1x72xf32> to vector<1x1x72xf32>
    %223 = vector.broadcast %222 : vector<1x1x72xf32> to vector<2x2x72xf32>
    %224 = arith.mulf %219, %223 : vector<2x2x72xf32>
    %225 = arith.addf %218, %224 : vector<2x2x72xf32>
    %c6_198 = arith.constant 6 : index
    %c0_199 = arith.constant 0 : index
    %c0_200 = arith.constant 0 : index
    %226 = vector.load %arg10[%c6_198, %c0_199, %c0_200] : memref<12x3x72xf32, #tpu.memory_space<vmem>>, vector<2x2x72xf32>
    %c3_201 = arith.constant 3 : index
    %c0_202 = arith.constant 0 : index
    %c0_203 = arith.constant 0 : index
    %227 = vector.load %arg5[%c3_201, %c0_202, %c0_203] : memref<9x1x72xf32, #tpu.memory_space<vmem>>, vector<1x1x72xf32>
    %228 = vector.shape_cast %227 : vector<1x1x72xf32> to vector<1x72xf32>
    %229 = vector.shape_cast %228 : vector<1x72xf32> to vector<1x1x72xf32>
    %230 = vector.broadcast %229 : vector<1x1x72xf32> to vector<2x2x72xf32>
    %231 = arith.mulf %226, %230 : vector<2x2x72xf32>
    %232 = arith.addf %225, %231 : vector<2x2x72xf32>
    %c9_204 = arith.constant 9 : index
    %c0_205 = arith.constant 0 : index
    %c0_206 = arith.constant 0 : index
    %233 = vector.load %arg10[%c9_204, %c0_205, %c0_206] : memref<12x3x72xf32, #tpu.memory_space<vmem>>, vector<2x2x72xf32>
    %c4_207 = arith.constant 4 : index
    %c0_208 = arith.constant 0 : index
    %c0_209 = arith.constant 0 : index
    %234 = vector.load %arg5[%c4_207, %c0_208, %c0_209] : memref<9x1x72xf32, #tpu.memory_space<vmem>>, vector<1x1x72xf32>
    %235 = vector.shape_cast %234 : vector<1x1x72xf32> to vector<1x72xf32>
    %236 = vector.shape_cast %235 : vector<1x72xf32> to vector<1x1x72xf32>
    %237 = vector.broadcast %236 : vector<1x1x72xf32> to vector<2x2x72xf32>
    %238 = arith.mulf %233, %237 : vector<2x2x72xf32>
    %239 = arith.addf %232, %238 : vector<2x2x72xf32>
    %c6_210 = arith.constant 6 : index
    %c1_211 = arith.constant 1 : index
    %c0_212 = arith.constant 0 : index
    %240 = vector.load %arg10[%c6_210, %c1_211, %c0_212] : memref<12x3x72xf32, #tpu.memory_space<vmem>>, vector<2x2x72xf32>
    %c5_213 = arith.constant 5 : index
    %c0_214 = arith.constant 0 : index
    %c0_215 = arith.constant 0 : index
    %241 = vector.load %arg5[%c5_213, %c0_214, %c0_215] : memref<9x1x72xf32, #tpu.memory_space<vmem>>, vector<1x1x72xf32>
    %242 = vector.shape_cast %241 : vector<1x1x72xf32> to vector<1x72xf32>
    %243 = vector.shape_cast %242 : vector<1x72xf32> to vector<1x1x72xf32>
    %244 = vector.broadcast %243 : vector<1x1x72xf32> to vector<2x2x72xf32>
    %245 = arith.mulf %240, %244 : vector<2x2x72xf32>
    %246 = arith.addf %239, %245 : vector<2x2x72xf32>
    %c1_216 = arith.constant 1 : index
    %c0_217 = arith.constant 0 : index
    %c0_218 = arith.constant 0 : index
    %247 = vector.load %arg10[%c1_216, %c0_217, %c0_218] : memref<12x3x72xf32, #tpu.memory_space<vmem>>, vector<2x2x72xf32>
    %c6_219 = arith.constant 6 : index
    %c0_220 = arith.constant 0 : index
    %c0_221 = arith.constant 0 : index
    %248 = vector.load %arg5[%c6_219, %c0_220, %c0_221] : memref<9x1x72xf32, #tpu.memory_space<vmem>>, vector<1x1x72xf32>
    %249 = vector.shape_cast %248 : vector<1x1x72xf32> to vector<1x72xf32>
    %250 = vector.shape_cast %249 : vector<1x72xf32> to vector<1x1x72xf32>
    %251 = vector.broadcast %250 : vector<1x1x72xf32> to vector<2x2x72xf32>
    %252 = arith.mulf %247, %251 : vector<2x2x72xf32>
    %253 = arith.addf %246, %252 : vector<2x2x72xf32>
    %c4_222 = arith.constant 4 : index
    %c0_223 = arith.constant 0 : index
    %c0_224 = arith.constant 0 : index
    %254 = vector.load %arg10[%c4_222, %c0_223, %c0_224] : memref<12x3x72xf32, #tpu.memory_space<vmem>>, vector<2x2x72xf32>
    %c7_225 = arith.constant 7 : index
    %c0_226 = arith.constant 0 : index
    %c0_227 = arith.constant 0 : index
    %255 = vector.load %arg5[%c7_225, %c0_226, %c0_227] : memref<9x1x72xf32, #tpu.memory_space<vmem>>, vector<1x1x72xf32>
    %256 = vector.shape_cast %255 : vector<1x1x72xf32> to vector<1x72xf32>
    %257 = vector.shape_cast %256 : vector<1x72xf32> to vector<1x1x72xf32>
    %258 = vector.broadcast %257 : vector<1x1x72xf32> to vector<2x2x72xf32>
    %259 = arith.mulf %254, %258 : vector<2x2x72xf32>
    %260 = arith.addf %253, %259 : vector<2x2x72xf32>
    %c1_228 = arith.constant 1 : index
    %c1_229 = arith.constant 1 : index
    %c0_230 = arith.constant 0 : index
    %261 = vector.load %arg10[%c1_228, %c1_229, %c0_230] : memref<12x3x72xf32, #tpu.memory_space<vmem>>, vector<2x2x72xf32>
    %c8_231 = arith.constant 8 : index
    %c0_232 = arith.constant 0 : index
    %c0_233 = arith.constant 0 : index
    %262 = vector.load %arg5[%c8_231, %c0_232, %c0_233] : memref<9x1x72xf32, #tpu.memory_space<vmem>>, vector<1x1x72xf32>
    %263 = vector.shape_cast %262 : vector<1x1x72xf32> to vector<1x72xf32>
    %264 = vector.shape_cast %263 : vector<1x72xf32> to vector<1x1x72xf32>
    %265 = vector.broadcast %264 : vector<1x1x72xf32> to vector<2x2x72xf32>
    %266 = arith.mulf %261, %265 : vector<2x2x72xf32>
    %267 = arith.addf %260, %266 : vector<2x2x72xf32>
    %c0_234 = arith.constant 0 : index
    %c0_235 = arith.constant 0 : index
    %268 = vector.load %arg6[%c0_234, %c0_235] : memref<1x72xf32, #tpu.memory_space<vmem>>, vector<1x72xf32>
    %269 = vector.shape_cast %268 : vector<1x72xf32> to vector<1x1x72xf32>
    %270 = vector.broadcast %269 : vector<1x1x72xf32> to vector<2x2x72xf32>
    %271 = arith.addf %267, %270 : vector<2x2x72xf32>
    %cst_236 = arith.constant 0.000000e+00 : f32
    %272 = vector.broadcast %cst_236 : f32 to vector<2x2x72xf32>
    %273 = arith.maximumf %271, %272 : vector<2x2x72xf32>
    %274 = vector.extract_strided_slice %273 {offsets = [0, 0, 0], sizes = [1, 2, 72], strides = [1, 1, 1]} : vector<2x2x72xf32> to vector<1x2x72xf32>
    %275 = vector.shape_cast %274 : vector<1x2x72xf32> to vector<2x72xf32>
    %276 = arith.truncf %275 : vector<2x72xf32> to vector<2x72xbf16>
    %c0_237 = arith.constant 0 : index
    %c0_238 = arith.constant 0 : index
    %277 = vector.load %arg7[%c0_237, %c0_238] : memref<72x24xbf16, #tpu.memory_space<vmem>>, vector<72x24xbf16>
    %cst_239 = arith.constant dense<0.000000e+00> : vector<2x24xf32>
    %278 = tpu.matmul %276, %277, %cst_239 {dimension_numbers = #tpu.dot_dimension_numbers<[1], [0], [0], [1], [0, 0, 1, 1], [], []>} : vector<2x72xbf16>, vector<72x24xbf16>, vector<2x24xf32> -> vector<2x24xf32>
    %c0_240 = arith.constant 0 : index
    %c0_241 = arith.constant 0 : index
    %279 = vector.load %arg8[%c0_240, %c0_241] : memref<1x24xf32, #tpu.memory_space<vmem>>, vector<1x24xf32>
    %280 = vector.broadcast %279 : vector<1x24xf32> to vector<2x24xf32>
    %281 = arith.addf %278, %280 : vector<2x24xf32>
    %c0_242 = arith.constant 0 : index
    %c0_243 = arith.constant 0 : index
    %c0_244 = arith.constant 0 : index
    %c0_245 = arith.constant 0 : index
    %282 = vector.load %arg9[%c0_242, %c0_243, %c0_244, %c0_245] : memref<1x2x2x24xf32, #tpu.memory_space<vmem>>, vector<1x1x2x24xf32>
    %283 = vector.shape_cast %282 : vector<1x1x2x24xf32> to vector<2x24xf32>
    %284 = vector.shape_cast %281 : vector<2x24xf32> to vector<1x1x2x24xf32>
    tpu.vector_store %arg9[%c0_242, %c0_243, %c0_244, %c0_245], %284 {strides = array<i32>} : memref<1x2x2x24xf32, #tpu.memory_space<vmem>>, vector<1x1x2x24xf32>,
    %285 = vector.extract_strided_slice %273 {offsets = [1, 0, 0], sizes = [1, 2, 72], strides = [1, 1, 1]} : vector<2x2x72xf32> to vector<1x2x72xf32>
    %286 = vector.shape_cast %285 : vector<1x2x72xf32> to vector<2x72xf32>
    %287 = arith.truncf %286 : vector<2x72xf32> to vector<2x72xbf16>
    %c0_246 = arith.constant 0 : index
    %c0_247 = arith.constant 0 : index
    %288 = vector.load %arg7[%c0_246, %c0_247] : memref<72x24xbf16, #tpu.memory_space<vmem>>, vector<72x24xbf16>
    %cst_248 = arith.constant dense<0.000000e+00> : vector<2x24xf32>
    %289 = tpu.matmul %287, %288, %cst_248 {dimension_numbers = #tpu.dot_dimension_numbers<[1], [0], [0], [1], [0, 0, 1, 1], [], []>} : vector<2x72xbf16>, vector<72x24xbf16>, vector<2x24xf32> -> vector<2x24xf32>
    %c0_249 = arith.constant 0 : index
    %c0_250 = arith.constant 0 : index
    %290 = vector.load %arg8[%c0_249, %c0_250] : memref<1x24xf32, #tpu.memory_space<vmem>>, vector<1x24xf32>
    %291 = vector.broadcast %290 : vector<1x24xf32> to vector<2x24xf32>
    %292 = arith.addf %289, %291 : vector<2x24xf32>
    %c0_251 = arith.constant 0 : index
    %c1_252 = arith.constant 1 : index
    %c0_253 = arith.constant 0 : index
    %c0_254 = arith.constant 0 : index
    %293 = vector.load %arg9[%c0_251, %c1_252, %c0_253, %c0_254] : memref<1x2x2x24xf32, #tpu.memory_space<vmem>>, vector<1x1x2x24xf32>
    %294 = vector.shape_cast %293 : vector<1x1x2x24xf32> to vector<2x24xf32>
    %295 = vector.shape_cast %292 : vector<2x24xf32> to vector<1x1x2x24xf32>
    tpu.vector_store %arg9[%c0_251, %c1_252, %c0_253, %c0_254], %295 {strides = array<i32>} : memref<1x2x2x24xf32, #tpu.memory_space<vmem>>, vector<1x1x2x24xf32>,
    return
  }
  func.func @transform_0(%arg0: i32) -> (i32, i32, i32, i32) {
    %c0_i32 = arith.constant 0 : i32
    %c0_i32_0 = arith.constant 0 : i32
    %c0_i32_1 = arith.constant 0 : i32
    %c0_i32_2 = arith.constant 0 : i32
    return %arg0, %c0_i32, %c0_i32_0, %c0_i32_1 : i32, i32, i32, i32
  }
  func.func @transform_1(%arg0: i32) -> (i32, i32, i32) {
    %c0_i32 = arith.constant 0 : i32
    %c0_i32_0 = arith.constant 0 : i32
    %c0_i32_1 = arith.constant 0 : i32
    %c0_i32_2 = arith.constant 0 : i32
    return %c0_i32, %c0_i32_0, %c0_i32_1 : i32, i32, i32
  }
  func.func @transform_2(%arg0: i32) -> (i32, i32) {
    %c0_i32 = arith.constant 0 : i32
    %c0_i32_0 = arith.constant 0 : i32
    %c0_i32_1 = arith.constant 0 : i32
    return %c0_i32, %c0_i32_0 : i32, i32
  }
  func.func @transform_3(%arg0: i32) -> (i32, i32) {
    %c0_i32 = arith.constant 0 : i32
    %c0_i32_0 = arith.constant 0 : i32
    %c0_i32_1 = arith.constant 0 : i32
    return %c0_i32, %c0_i32_0 : i32, i32
  }
  func.func @transform_4(%arg0: i32) -> (i32, i32, i32) {
    %c0_i32 = arith.constant 0 : i32
    %c0_i32_0 = arith.constant 0 : i32
    %c0_i32_1 = arith.constant 0 : i32
    %c0_i32_2 = arith.constant 0 : i32
    return %c0_i32, %c0_i32_0, %c0_i32_1 : i32, i32, i32
  }
  func.func @transform_5(%arg0: i32) -> (i32, i32) {
    %c0_i32 = arith.constant 0 : i32
    %c0_i32_0 = arith.constant 0 : i32
    %c0_i32_1 = arith.constant 0 : i32
    return %c0_i32, %c0_i32_0 : i32, i32
  }
  func.func @transform_6(%arg0: i32) -> (i32, i32) {
    %c0_i32 = arith.constant 0 : i32
    %c0_i32_0 = arith.constant 0 : i32
    %c0_i32_1 = arith.constant 0 : i32
    return %c0_i32, %c0_i32_0 : i32, i32
  }
  func.func @transform_7(%arg0: i32) -> (i32, i32) {
    %c0_i32 = arith.constant 0 : i32
    %c0_i32_0 = arith.constant 0 : i32
    %c0_i32_1 = arith.constant 0 : i32
    return %c0_i32, %c0_i32_0 : i32, i32
  }
  func.func @transform_8(%arg0: i32) -> (i32, i32, i32, i32) {
    %c0_i32 = arith.constant 0 : i32
    %c0_i32_0 = arith.constant 0 : i32
    %c0_i32_1 = arith.constant 0 : i32
    %c0_i32_2 = arith.constant 0 : i32
    return %arg0, %c0_i32, %c0_i32_0, %c0_i32_1 : i32, i32, i32, i32
  }
}

module attributes {stable_mosaic.version = 11 : i64} {
  func.func @_head_kernel(%arg0: i32, %arg1: memref<1x2x2x24xf32, #tpu.memory_space<vmem>>, %arg2: memref<24x144xbf16, #tpu.memory_space<vmem>>, %arg3: memref<1x144xf32, #tpu.memory_space<vmem>>, %arg4: memref<144x128xbf16, #tpu.memory_space<vmem>>, %arg5: memref<1x128xf32, #tpu.memory_space<vmem>>, %arg6: memref<128x10xbf16, #tpu.memory_space<vmem>>, %arg7: memref<1x10xf32, #tpu.memory_space<vmem>>, %arg8: memref<1x1x10xf32, #tpu.memory_space<vmem>>) attributes {dimension_semantics = [#tpu.dimension_semantics<parallel>], iteration_bounds = array<i64: 2>, scalar_prefetch = 0 : i64, scratch_operands = 0 : i64, tpu.core_type = #tpu.core_type<tc>, window_params = [{transform_indices = @transform_0, window_bounds = array<i64: 1, 2, 2, 24>}, {pipeline_mode = #tpu.pipeline_mode<synchronous>, transform_indices = @transform_1, window_bounds = array<i64: 24, 144>}, {pipeline_mode = #tpu.pipeline_mode<synchronous>, transform_indices = @transform_2, window_bounds = array<i64: 1, 144>}, {pipeline_mode = #tpu.pipeline_mode<synchronous>, transform_indices = @transform_3, window_bounds = array<i64: 144, 128>}, {pipeline_mode = #tpu.pipeline_mode<synchronous>, transform_indices = @transform_4, window_bounds = array<i64: 1, 128>}, {pipeline_mode = #tpu.pipeline_mode<synchronous>, transform_indices = @transform_5, window_bounds = array<i64: 128, 10>}, {pipeline_mode = #tpu.pipeline_mode<synchronous>, transform_indices = @transform_6, window_bounds = array<i64: 1, 10>}, {transform_indices = @transform_7, window_bounds = array<i64: 1, 1, 10>}]} {
    %cst = arith.constant 0.000000e+00 : f32
    %0 = vector.broadcast %cst : f32 to vector<1x144xf32>
    %c0 = arith.constant 0 : index
    %c0_0 = arith.constant 0 : index
    %c0_1 = arith.constant 0 : index
    %c0_2 = arith.constant 0 : index
    %1 = vector.load %arg1[%c0, %c0_0, %c0_1, %c0_2] : memref<1x2x2x24xf32, #tpu.memory_space<vmem>>, vector<1x1x2x24xf32>
    %2 = vector.shape_cast %1 : vector<1x1x2x24xf32> to vector<2x24xf32>
    %3 = arith.truncf %2 : vector<2x24xf32> to vector<2x24xbf16>
    %c0_3 = arith.constant 0 : index
    %c0_4 = arith.constant 0 : index
    %4 = vector.load %arg2[%c0_3, %c0_4] : memref<24x144xbf16, #tpu.memory_space<vmem>>, vector<24x144xbf16>
    %cst_5 = arith.constant dense<0.000000e+00> : vector<2x144xf32>
    %5 = tpu.matmul %3, %4, %cst_5 {dimension_numbers = #tpu.dot_dimension_numbers<[1], [0], [0], [1], [0, 0, 1, 1], [], []>} : vector<2x24xbf16>, vector<24x144xbf16>, vector<2x144xf32> -> vector<2x144xf32>
    %c0_6 = arith.constant 0 : index
    %c0_7 = arith.constant 0 : index
    %6 = vector.load %arg3[%c0_6, %c0_7] : memref<1x144xf32, #tpu.memory_space<vmem>>, vector<1x144xf32>
    %7 = vector.broadcast %6 : vector<1x144xf32> to vector<2x144xf32>
    %8 = arith.addf %5, %7 : vector<2x144xf32>
    %cst_8 = arith.constant 3.000000e+00 : f32
    %9 = vector.broadcast %cst_8 : f32 to vector<2x144xf32>
    %10 = arith.addf %8, %9 : vector<2x144xf32>
    %cst_9 = arith.constant 0.000000e+00 : f32
    %cst_10 = arith.constant 6.000000e+00 : f32
    %11 = vector.broadcast %cst_9 : f32 to vector<2x144xf32>
    %12 = arith.maximumf %11, %10 : vector<2x144xf32>
    %13 = vector.broadcast %cst_10 : f32 to vector<2x144xf32>
    %14 = arith.minimumf %13, %12 : vector<2x144xf32>
    %15 = arith.mulf %8, %14 : vector<2x144xf32>
    %cst_11 = arith.constant 0.166666672 : f32
    %16 = vector.broadcast %cst_11 : f32 to vector<2x144xf32>
    %17 = arith.mulf %15, %16 : vector<2x144xf32>
    %cst_12 = arith.constant dense<0.000000e+00> : vector<144xf32>
    %18 = vector.multi_reduction <add>, %17, %cst_12 [0] : vector<2x144xf32> to vector<144xf32>
    %19 = vector.shape_cast %18 : vector<144xf32> to vector<1x144xf32>
    %20 = arith.addf %0, %19 : vector<1x144xf32>
    %c0_13 = arith.constant 0 : index
    %c1 = arith.constant 1 : index
    %c0_14 = arith.constant 0 : index
    %c0_15 = arith.constant 0 : index
    %21 = vector.load %arg1[%c0_13, %c1, %c0_14, %c0_15] : memref<1x2x2x24xf32, #tpu.memory_space<vmem>>, vector<1x1x2x24xf32>
    %22 = vector.shape_cast %21 : vector<1x1x2x24xf32> to vector<2x24xf32>
    %23 = arith.truncf %22 : vector<2x24xf32> to vector<2x24xbf16>
    %c0_16 = arith.constant 0 : index
    %c0_17 = arith.constant 0 : index
    %24 = vector.load %arg2[%c0_16, %c0_17] : memref<24x144xbf16, #tpu.memory_space<vmem>>, vector<24x144xbf16>
    %cst_18 = arith.constant dense<0.000000e+00> : vector<2x144xf32>
    %25 = tpu.matmul %23, %24, %cst_18 {dimension_numbers = #tpu.dot_dimension_numbers<[1], [0], [0], [1], [0, 0, 1, 1], [], []>} : vector<2x24xbf16>, vector<24x144xbf16>, vector<2x144xf32> -> vector<2x144xf32>
    %c0_19 = arith.constant 0 : index
    %c0_20 = arith.constant 0 : index
    %26 = vector.load %arg3[%c0_19, %c0_20] : memref<1x144xf32, #tpu.memory_space<vmem>>, vector<1x144xf32>
    %27 = vector.broadcast %26 : vector<1x144xf32> to vector<2x144xf32>
    %28 = arith.addf %25, %27 : vector<2x144xf32>
    %cst_21 = arith.constant 3.000000e+00 : f32
    %29 = vector.broadcast %cst_21 : f32 to vector<2x144xf32>
    %30 = arith.addf %28, %29 : vector<2x144xf32>
    %cst_22 = arith.constant 0.000000e+00 : f32
    %cst_23 = arith.constant 6.000000e+00 : f32
    %31 = vector.broadcast %cst_22 : f32 to vector<2x144xf32>
    %32 = arith.maximumf %31, %30 : vector<2x144xf32>
    %33 = vector.broadcast %cst_23 : f32 to vector<2x144xf32>
    %34 = arith.minimumf %33, %32 : vector<2x144xf32>
    %35 = arith.mulf %28, %34 : vector<2x144xf32>
    %cst_24 = arith.constant 0.166666672 : f32
    %36 = vector.broadcast %cst_24 : f32 to vector<2x144xf32>
    %37 = arith.mulf %35, %36 : vector<2x144xf32>
    %cst_25 = arith.constant dense<0.000000e+00> : vector<144xf32>
    %38 = vector.multi_reduction <add>, %37, %cst_25 [0] : vector<2x144xf32> to vector<144xf32>
    %39 = vector.shape_cast %38 : vector<144xf32> to vector<1x144xf32>
    %40 = arith.addf %20, %39 : vector<1x144xf32>
    %cst_26 = arith.constant 2.500000e-01 : f32
    %41 = vector.broadcast %cst_26 : f32 to vector<1x144xf32>
    %42 = arith.mulf %40, %41 : vector<1x144xf32>
    %43 = arith.truncf %42 : vector<1x144xf32> to vector<1x144xbf16>
    %c0_27 = arith.constant 0 : index
    %c0_28 = arith.constant 0 : index
    %44 = vector.load %arg4[%c0_27, %c0_28] : memref<144x128xbf16, #tpu.memory_space<vmem>>, vector<144x128xbf16>
    %cst_29 = arith.constant dense<0.000000e+00> : vector<1x128xf32>
    %45 = tpu.matmul %43, %44, %cst_29 {dimension_numbers = #tpu.dot_dimension_numbers<[1], [0], [0], [1], [0, 0, 1, 1], [], []>} : vector<1x144xbf16>, vector<144x128xbf16>, vector<1x128xf32> -> vector<1x128xf32>
    %c0_30 = arith.constant 0 : index
    %c0_31 = arith.constant 0 : index
    %46 = vector.load %arg5[%c0_30, %c0_31] : memref<1x128xf32, #tpu.memory_space<vmem>>, vector<1x128xf32>
    %47 = arith.addf %45, %46 : vector<1x128xf32>
    %cst_32 = arith.constant 3.000000e+00 : f32
    %48 = vector.broadcast %cst_32 : f32 to vector<1x128xf32>
    %49 = arith.addf %47, %48 : vector<1x128xf32>
    %cst_33 = arith.constant 0.000000e+00 : f32
    %cst_34 = arith.constant 6.000000e+00 : f32
    %50 = vector.broadcast %cst_33 : f32 to vector<1x128xf32>
    %51 = arith.maximumf %50, %49 : vector<1x128xf32>
    %52 = vector.broadcast %cst_34 : f32 to vector<1x128xf32>
    %53 = arith.minimumf %52, %51 : vector<1x128xf32>
    %54 = arith.mulf %47, %53 : vector<1x128xf32>
    %cst_35 = arith.constant 0.166666672 : f32
    %55 = vector.broadcast %cst_35 : f32 to vector<1x128xf32>
    %56 = arith.mulf %54, %55 : vector<1x128xf32>
    %57 = arith.truncf %56 : vector<1x128xf32> to vector<1x128xbf16>
    %c0_36 = arith.constant 0 : index
    %c0_37 = arith.constant 0 : index
    %58 = vector.load %arg6[%c0_36, %c0_37] : memref<128x10xbf16, #tpu.memory_space<vmem>>, vector<128x10xbf16>
    %cst_38 = arith.constant dense<0.000000e+00> : vector<1x10xf32>
    %59 = tpu.matmul %57, %58, %cst_38 {dimension_numbers = #tpu.dot_dimension_numbers<[1], [0], [0], [1], [0, 0, 1, 1], [], []>} : vector<1x128xbf16>, vector<128x10xbf16>, vector<1x10xf32> -> vector<1x10xf32>
    %c0_39 = arith.constant 0 : index
    %c0_40 = arith.constant 0 : index
    %60 = vector.load %arg7[%c0_39, %c0_40] : memref<1x10xf32, #tpu.memory_space<vmem>>, vector<1x10xf32>
    %61 = arith.addf %59, %60 : vector<1x10xf32>
    %c0_41 = arith.constant 0 : index
    %c0_42 = arith.constant 0 : index
    %c0_43 = arith.constant 0 : index
    %62 = vector.load %arg8[%c0_41, %c0_42, %c0_43] : memref<1x1x10xf32, #tpu.memory_space<vmem>>, vector<1x1x10xf32>
    %63 = vector.shape_cast %62 : vector<1x1x10xf32> to vector<1x10xf32>
    %64 = vector.shape_cast %61 : vector<1x10xf32> to vector<1x1x10xf32>
    tpu.vector_store %arg8[%c0_41, %c0_42, %c0_43], %64 {strides = array<i32>} : memref<1x1x10xf32, #tpu.memory_space<vmem>>, vector<1x1x10xf32>,
    return
  }
  func.func @transform_0(%arg0: i32) -> (i32, i32, i32, i32) {
    %c0_i32 = arith.constant 0 : i32
    %c0_i32_0 = arith.constant 0 : i32
    %c0_i32_1 = arith.constant 0 : i32
    %c0_i32_2 = arith.constant 0 : i32
    return %arg0, %c0_i32, %c0_i32_0, %c0_i32_1 : i32, i32, i32, i32
  }
  func.func @transform_1(%arg0: i32) -> (i32, i32) {
    %c0_i32 = arith.constant 0 : i32
    %c0_i32_0 = arith.constant 0 : i32
    %c0_i32_1 = arith.constant 0 : i32
    return %c0_i32, %c0_i32_0 : i32, i32
  }
  func.func @transform_2(%arg0: i32) -> (i32, i32) {
    %c0_i32 = arith.constant 0 : i32
    %c0_i32_0 = arith.constant 0 : i32
    %c0_i32_1 = arith.constant 0 : i32
    return %c0_i32, %c0_i32_0 : i32, i32
  }
  func.func @transform_3(%arg0: i32) -> (i32, i32) {
    %c0_i32 = arith.constant 0 : i32
    %c0_i32_0 = arith.constant 0 : i32
    %c0_i32_1 = arith.constant 0 : i32
    return %c0_i32, %c0_i32_0 : i32, i32
  }
  func.func @transform_4(%arg0: i32) -> (i32, i32) {
    %c0_i32 = arith.constant 0 : i32
    %c0_i32_0 = arith.constant 0 : i32
    %c0_i32_1 = arith.constant 0 : i32
    return %c0_i32, %c0_i32_0 : i32, i32
  }
  func.func @transform_5(%arg0: i32) -> (i32, i32) {
    %c0_i32 = arith.constant 0 : i32
    %c0_i32_0 = arith.constant 0 : i32
    %c0_i32_1 = arith.constant 0 : i32
    return %c0_i32, %c0_i32_0 : i32, i32
  }
  func.func @transform_6(%arg0: i32) -> (i32, i32) {
    %c0_i32 = arith.constant 0 : i32
    %c0_i32_0 = arith.constant 0 : i32
    %c0_i32_1 = arith.constant 0 : i32
    return %c0_i32, %c0_i32_0 : i32, i32
  }
  func.func @transform_7(%arg0: i32) -> (i32, i32, i32) {
    %c0_i32 = arith.constant 0 : i32
    %c0_i32_0 = arith.constant 0 : i32
    %c0_i32_1 = arith.constant 0 : i32
    return %arg0, %c0_i32, %c0_i32_0 : i32, i32, i32
  }
}

module attributes {stable_mosaic.version = 11 : i64} {
  func.func @_ir_block_kernel(%arg0: i32, %arg1: memref<1x6x6x24xf32, #tpu.memory_space<vmem>>, %arg2: memref<6x6x1xf32, #tpu.memory_space<vmem>>, %arg3: memref<24x96xbf16, #tpu.memory_space<vmem>>, %arg4: memref<1x96xf32, #tpu.memory_space<vmem>>, %arg5: memref<25x1x96xf32, #tpu.memory_space<vmem>>, %arg6: memref<1x96xf32, #tpu.memory_space<vmem>>, %arg7: memref<96x24xbf16, #tpu.memory_space<vmem>>, %arg8: memref<1x24xf32, #tpu.memory_space<vmem>>, %arg9: memref<24x96xbf16, #tpu.memory_space<vmem>>, %arg10: memref<1x96xf32, #tpu.memory_space<vmem>>, %arg11: memref<96x24xbf16, #tpu.memory_space<vmem>>, %arg12: memref<1x24xf32, #tpu.memory_space<vmem>>, %arg13: memref<1x2x2x24xf32, #tpu.memory_space<vmem>>, %arg14: memref<6x6x96xf32, #tpu.memory_space<vmem>>) attributes {dimension_semantics = [#tpu.dimension_semantics<parallel>], iteration_bounds = array<i64: 2>, scalar_prefetch = 0 : i64, scratch_operands = 1 : i64, tpu.core_type = #tpu.core_type<tc>, window_params = [{transform_indices = @transform_0, window_bounds = array<i64: 1, 6, 6, 24>}, {pipeline_mode = #tpu.pipeline_mode<synchronous>, transform_indices = @transform_1, window_bounds = array<i64: 6, 6, 1>}, {pipeline_mode = #tpu.pipeline_mode<synchronous>, transform_indices = @transform_2, window_bounds = array<i64: 24, 96>}, {pipeline_mode = #tpu.pipeline_mode<synchronous>, transform_indices = @transform_3, window_bounds = array<i64: 1, 96>}, {pipeline_mode = #tpu.pipeline_mode<synchronous>, transform_indices = @transform_4, window_bounds = array<i64: 25, 1, 96>}, {pipeline_mode = #tpu.pipeline_mode<synchronous>, transform_indices = @transform_5, window_bounds = array<i64: 1, 96>}, {pipeline_mode = #tpu.pipeline_mode<synchronous>, transform_indices = @transform_6, window_bounds = array<i64: 96, 24>}, {pipeline_mode = #tpu.pipeline_mode<synchronous>, transform_indices = @transform_7, window_bounds = array<i64: 1, 24>}, {pipeline_mode = #tpu.pipeline_mode<synchronous>, transform_indices = @transform_8, window_bounds = array<i64: 24, 96>}, {pipeline_mode = #tpu.pipeline_mode<synchronous>, transform_indices = @transform_9, window_bounds = array<i64: 1, 96>}, {pipeline_mode = #tpu.pipeline_mode<synchronous>, transform_indices = @transform_10, window_bounds = array<i64: 96, 24>}, {pipeline_mode = #tpu.pipeline_mode<synchronous>, transform_indices = @transform_11, window_bounds = array<i64: 1, 24>}, {transform_indices = @transform_12, window_bounds = array<i64: 1, 2, 2, 24>}]} {
    %c0 = arith.constant 0 : index
    %c0_0 = arith.constant 0 : index
    %c0_1 = arith.constant 0 : index
    %c0_2 = arith.constant 0 : index
    %0 = vector.load %arg1[%c0, %c0_0, %c0_1, %c0_2] : memref<1x6x6x24xf32, #tpu.memory_space<vmem>>, vector<1x1x6x24xf32>
    %1 = vector.shape_cast %0 : vector<1x1x6x24xf32> to vector<6x24xf32>
    %2 = arith.truncf %1 : vector<6x24xf32> to vector<6x24xbf16>
    %c0_3 = arith.constant 0 : index
    %c0_4 = arith.constant 0 : index
    %3 = vector.load %arg3[%c0_3, %c0_4] : memref<24x96xbf16, #tpu.memory_space<vmem>>, vector<24x96xbf16>
    %cst = arith.constant dense<0.000000e+00> : vector<6x96xf32>
    %4 = tpu.matmul %2, %3, %cst {dimension_numbers = #tpu.dot_dimension_numbers<[1], [0], [0], [1], [0, 0, 1, 1], [], []>} : vector<6x24xbf16>, vector<24x96xbf16>, vector<6x96xf32> -> vector<6x96xf32>
    %c0_5 = arith.constant 0 : index
    %c0_6 = arith.constant 0 : index
    %5 = vector.load %arg4[%c0_5, %c0_6] : memref<1x96xf32, #tpu.memory_space<vmem>>, vector<1x96xf32>
    %6 = vector.broadcast %5 : vector<1x96xf32> to vector<6x96xf32>
    %7 = arith.addf %4, %6 : vector<6x96xf32>
    %cst_7 = arith.constant 3.000000e+00 : f32
    %8 = vector.broadcast %cst_7 : f32 to vector<6x96xf32>
    %9 = arith.addf %7, %8 : vector<6x96xf32>
    %cst_8 = arith.constant 0.000000e+00 : f32
    %cst_9 = arith.constant 6.000000e+00 : f32
    %10 = vector.broadcast %cst_8 : f32 to vector<6x96xf32>
    %11 = arith.maximumf %10, %9 : vector<6x96xf32>
    %12 = vector.broadcast %cst_9 : f32 to vector<6x96xf32>
    %13 = arith.minimumf %12, %11 : vector<6x96xf32>
    %14 = arith.mulf %7, %13 : vector<6x96xf32>
    %cst_10 = arith.constant 0.166666672 : f32
    %15 = vector.broadcast %cst_10 : f32 to vector<6x96xf32>
    %16 = arith.mulf %14, %15 : vector<6x96xf32>
    %c0_11 = arith.constant 0 : index
    %c0_12 = arith.constant 0 : index
    %c0_13 = arith.constant 0 : index
    %17 = vector.load %arg2[%c0_11, %c0_12, %c0_13] : memref<6x6x1xf32, #tpu.memory_space<vmem>>, vector<1x6x1xf32>
    %18 = vector.shape_cast %17 : vector<1x6x1xf32> to vector<6x1xf32>
    %19 = vector.broadcast %18 : vector<6x1xf32> to vector<6x96xf32>
    %20 = arith.mulf %16, %19 : vector<6x96xf32>
    %c0_14 = arith.constant 0 : index
    %c0_15 = arith.constant 0 : index
    %c0_16 = arith.constant 0 : index
    %21 = vector.load %arg14[%c0_14, %c0_15, %c0_16] : memref<6x6x96xf32, #tpu.memory_space<vmem>>, vector<1x6x96xf32>
    %22 = vector.shape_cast %21 : vector<1x6x96xf32> to vector<6x96xf32>
    %23 = vector.shape_cast %20 : vector<6x96xf32> to vector<1x6x96xf32>
    tpu.vector_store %arg14[%c0_14, %c0_15, %c0_16], %23 {strides = array<i32>} : memref<6x6x96xf32, #tpu.memory_space<vmem>>, vector<1x6x96xf32>,
    %c0_17 = arith.constant 0 : index
    %c1 = arith.constant 1 : index
    %c0_18 = arith.constant 0 : index
    %c0_19 = arith.constant 0 : index
    %24 = vector.load %arg1[%c0_17, %c1, %c0_18, %c0_19] : memref<1x6x6x24xf32, #tpu.memory_space<vmem>>, vector<1x1x6x24xf32>
    %25 = vector.shape_cast %24 : vector<1x1x6x24xf32> to vector<6x24xf32>
    %26 = arith.truncf %25 : vector<6x24xf32> to vector<6x24xbf16>
    %c0_20 = arith.constant 0 : index
    %c0_21 = arith.constant 0 : index
    %27 = vector.load %arg3[%c0_20, %c0_21] : memref<24x96xbf16, #tpu.memory_space<vmem>>, vector<24x96xbf16>
    %cst_22 = arith.constant dense<0.000000e+00> : vector<6x96xf32>
    %28 = tpu.matmul %26, %27, %cst_22 {dimension_numbers = #tpu.dot_dimension_numbers<[1], [0], [0], [1], [0, 0, 1, 1], [], []>} : vector<6x24xbf16>, vector<24x96xbf16>, vector<6x96xf32> -> vector<6x96xf32>
    %c0_23 = arith.constant 0 : index
    %c0_24 = arith.constant 0 : index
    %29 = vector.load %arg4[%c0_23, %c0_24] : memref<1x96xf32, #tpu.memory_space<vmem>>, vector<1x96xf32>
    %30 = vector.broadcast %29 : vector<1x96xf32> to vector<6x96xf32>
    %31 = arith.addf %28, %30 : vector<6x96xf32>
    %cst_25 = arith.constant 3.000000e+00 : f32
    %32 = vector.broadcast %cst_25 : f32 to vector<6x96xf32>
    %33 = arith.addf %31, %32 : vector<6x96xf32>
    %cst_26 = arith.constant 0.000000e+00 : f32
    %cst_27 = arith.constant 6.000000e+00 : f32
    %34 = vector.broadcast %cst_26 : f32 to vector<6x96xf32>
    %35 = arith.maximumf %34, %33 : vector<6x96xf32>
    %36 = vector.broadcast %cst_27 : f32 to vector<6x96xf32>
    %37 = arith.minimumf %36, %35 : vector<6x96xf32>
    %38 = arith.mulf %31, %37 : vector<6x96xf32>
    %cst_28 = arith.constant 0.166666672 : f32
    %39 = vector.broadcast %cst_28 : f32 to vector<6x96xf32>
    %40 = arith.mulf %38, %39 : vector<6x96xf32>
    %c1_29 = arith.constant 1 : index
    %c0_30 = arith.constant 0 : index
    %c0_31 = arith.constant 0 : index
    %41 = vector.load %arg2[%c1_29, %c0_30, %c0_31] : memref<6x6x1xf32, #tpu.memory_space<vmem>>, vector<1x6x1xf32>
    %42 = vector.shape_cast %41 : vector<1x6x1xf32> to vector<6x1xf32>
    %43 = vector.broadcast %42 : vector<6x1xf32> to vector<6x96xf32>
    %44 = arith.mulf %40, %43 : vector<6x96xf32>
    %c1_32 = arith.constant 1 : index
    %c0_33 = arith.constant 0 : index
    %c0_34 = arith.constant 0 : index
    %45 = vector.load %arg14[%c1_32, %c0_33, %c0_34] : memref<6x6x96xf32, #tpu.memory_space<vmem>>, vector<1x6x96xf32>
    %46 = vector.shape_cast %45 : vector<1x6x96xf32> to vector<6x96xf32>
    %47 = vector.shape_cast %44 : vector<6x96xf32> to vector<1x6x96xf32>
    tpu.vector_store %arg14[%c1_32, %c0_33, %c0_34], %47 {strides = array<i32>} : memref<6x6x96xf32, #tpu.memory_space<vmem>>, vector<1x6x96xf32>,
    %c0_35 = arith.constant 0 : index
    %c2 = arith.constant 2 : index
    %c0_36 = arith.constant 0 : index
    %c0_37 = arith.constant 0 : index
    %48 = vector.load %arg1[%c0_35, %c2, %c0_36, %c0_37] : memref<1x6x6x24xf32, #tpu.memory_space<vmem>>, vector<1x1x6x24xf32>
    %49 = vector.shape_cast %48 : vector<1x1x6x24xf32> to vector<6x24xf32>
    %50 = arith.truncf %49 : vector<6x24xf32> to vector<6x24xbf16>
    %c0_38 = arith.constant 0 : index
    %c0_39 = arith.constant 0 : index
    %51 = vector.load %arg3[%c0_38, %c0_39] : memref<24x96xbf16, #tpu.memory_space<vmem>>, vector<24x96xbf16>
    %cst_40 = arith.constant dense<0.000000e+00> : vector<6x96xf32>
    %52 = tpu.matmul %50, %51, %cst_40 {dimension_numbers = #tpu.dot_dimension_numbers<[1], [0], [0], [1], [0, 0, 1, 1], [], []>} : vector<6x24xbf16>, vector<24x96xbf16>, vector<6x96xf32> -> vector<6x96xf32>
    %c0_41 = arith.constant 0 : index
    %c0_42 = arith.constant 0 : index
    %53 = vector.load %arg4[%c0_41, %c0_42] : memref<1x96xf32, #tpu.memory_space<vmem>>, vector<1x96xf32>
    %54 = vector.broadcast %53 : vector<1x96xf32> to vector<6x96xf32>
    %55 = arith.addf %52, %54 : vector<6x96xf32>
    %cst_43 = arith.constant 3.000000e+00 : f32
    %56 = vector.broadcast %cst_43 : f32 to vector<6x96xf32>
    %57 = arith.addf %55, %56 : vector<6x96xf32>
    %cst_44 = arith.constant 0.000000e+00 : f32
    %cst_45 = arith.constant 6.000000e+00 : f32
    %58 = vector.broadcast %cst_44 : f32 to vector<6x96xf32>
    %59 = arith.maximumf %58, %57 : vector<6x96xf32>
    %60 = vector.broadcast %cst_45 : f32 to vector<6x96xf32>
    %61 = arith.minimumf %60, %59 : vector<6x96xf32>
    %62 = arith.mulf %55, %61 : vector<6x96xf32>
    %cst_46 = arith.constant 0.166666672 : f32
    %63 = vector.broadcast %cst_46 : f32 to vector<6x96xf32>
    %64 = arith.mulf %62, %63 : vector<6x96xf32>
    %c2_47 = arith.constant 2 : index
    %c0_48 = arith.constant 0 : index
    %c0_49 = arith.constant 0 : index
    %65 = vector.load %arg2[%c2_47, %c0_48, %c0_49] : memref<6x6x1xf32, #tpu.memory_space<vmem>>, vector<1x6x1xf32>
    %66 = vector.shape_cast %65 : vector<1x6x1xf32> to vector<6x1xf32>
    %67 = vector.broadcast %66 : vector<6x1xf32> to vector<6x96xf32>
    %68 = arith.mulf %64, %67 : vector<6x96xf32>
    %c2_50 = arith.constant 2 : index
    %c0_51 = arith.constant 0 : index
    %c0_52 = arith.constant 0 : index
    %69 = vector.load %arg14[%c2_50, %c0_51, %c0_52] : memref<6x6x96xf32, #tpu.memory_space<vmem>>, vector<1x6x96xf32>
    %70 = vector.shape_cast %69 : vector<1x6x96xf32> to vector<6x96xf32>
    %71 = vector.shape_cast %68 : vector<6x96xf32> to vector<1x6x96xf32>
    tpu.vector_store %arg14[%c2_50, %c0_51, %c0_52], %71 {strides = array<i32>} : memref<6x6x96xf32, #tpu.memory_space<vmem>>, vector<1x6x96xf32>,
    %c0_53 = arith.constant 0 : index
    %c3 = arith.constant 3 : index
    %c0_54 = arith.constant 0 : index
    %c0_55 = arith.constant 0 : index
    %72 = vector.load %arg1[%c0_53, %c3, %c0_54, %c0_55] : memref<1x6x6x24xf32, #tpu.memory_space<vmem>>, vector<1x1x6x24xf32>
    %73 = vector.shape_cast %72 : vector<1x1x6x24xf32> to vector<6x24xf32>
    %74 = arith.truncf %73 : vector<6x24xf32> to vector<6x24xbf16>
    %c0_56 = arith.constant 0 : index
    %c0_57 = arith.constant 0 : index
    %75 = vector.load %arg3[%c0_56, %c0_57] : memref<24x96xbf16, #tpu.memory_space<vmem>>, vector<24x96xbf16>
    %cst_58 = arith.constant dense<0.000000e+00> : vector<6x96xf32>
    %76 = tpu.matmul %74, %75, %cst_58 {dimension_numbers = #tpu.dot_dimension_numbers<[1], [0], [0], [1], [0, 0, 1, 1], [], []>} : vector<6x24xbf16>, vector<24x96xbf16>, vector<6x96xf32> -> vector<6x96xf32>
    %c0_59 = arith.constant 0 : index
    %c0_60 = arith.constant 0 : index
    %77 = vector.load %arg4[%c0_59, %c0_60] : memref<1x96xf32, #tpu.memory_space<vmem>>, vector<1x96xf32>
    %78 = vector.broadcast %77 : vector<1x96xf32> to vector<6x96xf32>
    %79 = arith.addf %76, %78 : vector<6x96xf32>
    %cst_61 = arith.constant 3.000000e+00 : f32
    %80 = vector.broadcast %cst_61 : f32 to vector<6x96xf32>
    %81 = arith.addf %79, %80 : vector<6x96xf32>
    %cst_62 = arith.constant 0.000000e+00 : f32
    %cst_63 = arith.constant 6.000000e+00 : f32
    %82 = vector.broadcast %cst_62 : f32 to vector<6x96xf32>
    %83 = arith.maximumf %82, %81 : vector<6x96xf32>
    %84 = vector.broadcast %cst_63 : f32 to vector<6x96xf32>
    %85 = arith.minimumf %84, %83 : vector<6x96xf32>
    %86 = arith.mulf %79, %85 : vector<6x96xf32>
    %cst_64 = arith.constant 0.166666672 : f32
    %87 = vector.broadcast %cst_64 : f32 to vector<6x96xf32>
    %88 = arith.mulf %86, %87 : vector<6x96xf32>
    %c3_65 = arith.constant 3 : index
    %c0_66 = arith.constant 0 : index
    %c0_67 = arith.constant 0 : index
    %89 = vector.load %arg2[%c3_65, %c0_66, %c0_67] : memref<6x6x1xf32, #tpu.memory_space<vmem>>, vector<1x6x1xf32>
    %90 = vector.shape_cast %89 : vector<1x6x1xf32> to vector<6x1xf32>
    %91 = vector.broadcast %90 : vector<6x1xf32> to vector<6x96xf32>
    %92 = arith.mulf %88, %91 : vector<6x96xf32>
    %c3_68 = arith.constant 3 : index
    %c0_69 = arith.constant 0 : index
    %c0_70 = arith.constant 0 : index
    %93 = vector.load %arg14[%c3_68, %c0_69, %c0_70] : memref<6x6x96xf32, #tpu.memory_space<vmem>>, vector<1x6x96xf32>
    %94 = vector.shape_cast %93 : vector<1x6x96xf32> to vector<6x96xf32>
    %95 = vector.shape_cast %92 : vector<6x96xf32> to vector<1x6x96xf32>
    tpu.vector_store %arg14[%c3_68, %c0_69, %c0_70], %95 {strides = array<i32>} : memref<6x6x96xf32, #tpu.memory_space<vmem>>, vector<1x6x96xf32>,
    %c0_71 = arith.constant 0 : index
    %c4 = arith.constant 4 : index
    %c0_72 = arith.constant 0 : index
    %c0_73 = arith.constant 0 : index
    %96 = vector.load %arg1[%c0_71, %c4, %c0_72, %c0_73] : memref<1x6x6x24xf32, #tpu.memory_space<vmem>>, vector<1x1x6x24xf32>
    %97 = vector.shape_cast %96 : vector<1x1x6x24xf32> to vector<6x24xf32>
    %98 = arith.truncf %97 : vector<6x24xf32> to vector<6x24xbf16>
    %c0_74 = arith.constant 0 : index
    %c0_75 = arith.constant 0 : index
    %99 = vector.load %arg3[%c0_74, %c0_75] : memref<24x96xbf16, #tpu.memory_space<vmem>>, vector<24x96xbf16>
    %cst_76 = arith.constant dense<0.000000e+00> : vector<6x96xf32>
    %100 = tpu.matmul %98, %99, %cst_76 {dimension_numbers = #tpu.dot_dimension_numbers<[1], [0], [0], [1], [0, 0, 1, 1], [], []>} : vector<6x24xbf16>, vector<24x96xbf16>, vector<6x96xf32> -> vector<6x96xf32>
    %c0_77 = arith.constant 0 : index
    %c0_78 = arith.constant 0 : index
    %101 = vector.load %arg4[%c0_77, %c0_78] : memref<1x96xf32, #tpu.memory_space<vmem>>, vector<1x96xf32>
    %102 = vector.broadcast %101 : vector<1x96xf32> to vector<6x96xf32>
    %103 = arith.addf %100, %102 : vector<6x96xf32>
    %cst_79 = arith.constant 3.000000e+00 : f32
    %104 = vector.broadcast %cst_79 : f32 to vector<6x96xf32>
    %105 = arith.addf %103, %104 : vector<6x96xf32>
    %cst_80 = arith.constant 0.000000e+00 : f32
    %cst_81 = arith.constant 6.000000e+00 : f32
    %106 = vector.broadcast %cst_80 : f32 to vector<6x96xf32>
    %107 = arith.maximumf %106, %105 : vector<6x96xf32>
    %108 = vector.broadcast %cst_81 : f32 to vector<6x96xf32>
    %109 = arith.minimumf %108, %107 : vector<6x96xf32>
    %110 = arith.mulf %103, %109 : vector<6x96xf32>
    %cst_82 = arith.constant 0.166666672 : f32
    %111 = vector.broadcast %cst_82 : f32 to vector<6x96xf32>
    %112 = arith.mulf %110, %111 : vector<6x96xf32>
    %c4_83 = arith.constant 4 : index
    %c0_84 = arith.constant 0 : index
    %c0_85 = arith.constant 0 : index
    %113 = vector.load %arg2[%c4_83, %c0_84, %c0_85] : memref<6x6x1xf32, #tpu.memory_space<vmem>>, vector<1x6x1xf32>
    %114 = vector.shape_cast %113 : vector<1x6x1xf32> to vector<6x1xf32>
    %115 = vector.broadcast %114 : vector<6x1xf32> to vector<6x96xf32>
    %116 = arith.mulf %112, %115 : vector<6x96xf32>
    %c4_86 = arith.constant 4 : index
    %c0_87 = arith.constant 0 : index
    %c0_88 = arith.constant 0 : index
    %117 = vector.load %arg14[%c4_86, %c0_87, %c0_88] : memref<6x6x96xf32, #tpu.memory_space<vmem>>, vector<1x6x96xf32>
    %118 = vector.shape_cast %117 : vector<1x6x96xf32> to vector<6x96xf32>
    %119 = vector.shape_cast %116 : vector<6x96xf32> to vector<1x6x96xf32>
    tpu.vector_store %arg14[%c4_86, %c0_87, %c0_88], %119 {strides = array<i32>} : memref<6x6x96xf32, #tpu.memory_space<vmem>>, vector<1x6x96xf32>,
    %c0_89 = arith.constant 0 : index
    %c5 = arith.constant 5 : index
    %c0_90 = arith.constant 0 : index
    %c0_91 = arith.constant 0 : index
    %120 = vector.load %arg1[%c0_89, %c5, %c0_90, %c0_91] : memref<1x6x6x24xf32, #tpu.memory_space<vmem>>, vector<1x1x6x24xf32>
    %121 = vector.shape_cast %120 : vector<1x1x6x24xf32> to vector<6x24xf32>
    %122 = arith.truncf %121 : vector<6x24xf32> to vector<6x24xbf16>
    %c0_92 = arith.constant 0 : index
    %c0_93 = arith.constant 0 : index
    %123 = vector.load %arg3[%c0_92, %c0_93] : memref<24x96xbf16, #tpu.memory_space<vmem>>, vector<24x96xbf16>
    %cst_94 = arith.constant dense<0.000000e+00> : vector<6x96xf32>
    %124 = tpu.matmul %122, %123, %cst_94 {dimension_numbers = #tpu.dot_dimension_numbers<[1], [0], [0], [1], [0, 0, 1, 1], [], []>} : vector<6x24xbf16>, vector<24x96xbf16>, vector<6x96xf32> -> vector<6x96xf32>
    %c0_95 = arith.constant 0 : index
    %c0_96 = arith.constant 0 : index
    %125 = vector.load %arg4[%c0_95, %c0_96] : memref<1x96xf32, #tpu.memory_space<vmem>>, vector<1x96xf32>
    %126 = vector.broadcast %125 : vector<1x96xf32> to vector<6x96xf32>
    %127 = arith.addf %124, %126 : vector<6x96xf32>
    %cst_97 = arith.constant 3.000000e+00 : f32
    %128 = vector.broadcast %cst_97 : f32 to vector<6x96xf32>
    %129 = arith.addf %127, %128 : vector<6x96xf32>
    %cst_98 = arith.constant 0.000000e+00 : f32
    %cst_99 = arith.constant 6.000000e+00 : f32
    %130 = vector.broadcast %cst_98 : f32 to vector<6x96xf32>
    %131 = arith.maximumf %130, %129 : vector<6x96xf32>
    %132 = vector.broadcast %cst_99 : f32 to vector<6x96xf32>
    %133 = arith.minimumf %132, %131 : vector<6x96xf32>
    %134 = arith.mulf %127, %133 : vector<6x96xf32>
    %cst_100 = arith.constant 0.166666672 : f32
    %135 = vector.broadcast %cst_100 : f32 to vector<6x96xf32>
    %136 = arith.mulf %134, %135 : vector<6x96xf32>
    %c5_101 = arith.constant 5 : index
    %c0_102 = arith.constant 0 : index
    %c0_103 = arith.constant 0 : index
    %137 = vector.load %arg2[%c5_101, %c0_102, %c0_103] : memref<6x6x1xf32, #tpu.memory_space<vmem>>, vector<1x6x1xf32>
    %138 = vector.shape_cast %137 : vector<1x6x1xf32> to vector<6x1xf32>
    %139 = vector.broadcast %138 : vector<6x1xf32> to vector<6x96xf32>
    %140 = arith.mulf %136, %139 : vector<6x96xf32>
    %c5_104 = arith.constant 5 : index
    %c0_105 = arith.constant 0 : index
    %c0_106 = arith.constant 0 : index
    %141 = vector.load %arg14[%c5_104, %c0_105, %c0_106] : memref<6x6x96xf32, #tpu.memory_space<vmem>>, vector<1x6x96xf32>
    %142 = vector.shape_cast %141 : vector<1x6x96xf32> to vector<6x96xf32>
    %143 = vector.shape_cast %140 : vector<6x96xf32> to vector<1x6x96xf32>
    tpu.vector_store %arg14[%c5_104, %c0_105, %c0_106], %143 {strides = array<i32>} : memref<6x6x96xf32, #tpu.memory_space<vmem>>, vector<1x6x96xf32>,
    %cst_107 = arith.constant 0.000000e+00 : f32
    %144 = vector.broadcast %cst_107 : f32 to vector<2x2x96xf32>
    %c0_108 = arith.constant 0 : index
    %c0_109 = arith.constant 0 : index
    %c0_110 = arith.constant 0 : index
    %145 = vector.load %arg14[%c0_108, %c0_109, %c0_110] : memref<6x6x96xf32, #tpu.memory_space<vmem>>, vector<2x2x96xf32>
    %c0_111 = arith.constant 0 : index
    %c0_112 = arith.constant 0 : index
    %c0_113 = arith.constant 0 : index
    %146 = vector.load %arg5[%c0_111, %c0_112, %c0_113] : memref<25x1x96xf32, #tpu.memory_space<vmem>>, vector<1x1x96xf32>
    %147 = vector.shape_cast %146 : vector<1x1x96xf32> to vector<1x96xf32>
    %148 = vector.shape_cast %147 : vector<1x96xf32> to vector<1x1x96xf32>
    %149 = vector.broadcast %148 : vector<1x1x96xf32> to vector<2x2x96xf32>
    %150 = arith.mulf %145, %149 : vector<2x2x96xf32>
    %151 = arith.addf %144, %150 : vector<2x2x96xf32>
    %c0_114 = arith.constant 0 : index
    %c1_115 = arith.constant 1 : index
    %c0_116 = arith.constant 0 : index
    %152 = vector.load %arg14[%c0_114, %c1_115, %c0_116] : memref<6x6x96xf32, #tpu.memory_space<vmem>>, vector<2x2x96xf32>
    %c1_117 = arith.constant 1 : index
    %c0_118 = arith.constant 0 : index
    %c0_119 = arith.constant 0 : index
    %153 = vector.load %arg5[%c1_117, %c0_118, %c0_119] : memref<25x1x96xf32, #tpu.memory_space<vmem>>, vector<1x1x96xf32>
    %154 = vector.shape_cast %153 : vector<1x1x96xf32> to vector<1x96xf32>
    %155 = vector.shape_cast %154 : vector<1x96xf32> to vector<1x1x96xf32>
    %156 = vector.broadcast %155 : vector<1x1x96xf32> to vector<2x2x96xf32>
    %157 = arith.mulf %152, %156 : vector<2x2x96xf32>
    %158 = arith.addf %151, %157 : vector<2x2x96xf32>
    %c0_120 = arith.constant 0 : index
    %c2_121 = arith.constant 2 : index
    %c0_122 = arith.constant 0 : index
    %159 = vector.load %arg14[%c0_120, %c2_121, %c0_122] : memref<6x6x96xf32, #tpu.memory_space<vmem>>, vector<2x2x96xf32>
    %c2_123 = arith.constant 2 : index
    %c0_124 = arith.constant 0 : index
    %c0_125 = arith.constant 0 : index
    %160 = vector.load %arg5[%c2_123, %c0_124, %c0_125] : memref<25x1x96xf32, #tpu.memory_space<vmem>>, vector<1x1x96xf32>
    %161 = vector.shape_cast %160 : vector<1x1x96xf32> to vector<1x96xf32>
    %162 = vector.shape_cast %161 : vector<1x96xf32> to vector<1x1x96xf32>
    %163 = vector.broadcast %162 : vector<1x1x96xf32> to vector<2x2x96xf32>
    %164 = arith.mulf %159, %163 : vector<2x2x96xf32>
    %165 = arith.addf %158, %164 : vector<2x2x96xf32>
    %c0_126 = arith.constant 0 : index
    %c3_127 = arith.constant 3 : index
    %c0_128 = arith.constant 0 : index
    %166 = vector.load %arg14[%c0_126, %c3_127, %c0_128] : memref<6x6x96xf32, #tpu.memory_space<vmem>>, vector<2x2x96xf32>
    %c3_129 = arith.constant 3 : index
    %c0_130 = arith.constant 0 : index
    %c0_131 = arith.constant 0 : index
    %167 = vector.load %arg5[%c3_129, %c0_130, %c0_131] : memref<25x1x96xf32, #tpu.memory_space<vmem>>, vector<1x1x96xf32>
    %168 = vector.shape_cast %167 : vector<1x1x96xf32> to vector<1x96xf32>
    %169 = vector.shape_cast %168 : vector<1x96xf32> to vector<1x1x96xf32>
    %170 = vector.broadcast %169 : vector<1x1x96xf32> to vector<2x2x96xf32>
    %171 = arith.mulf %166, %170 : vector<2x2x96xf32>
    %172 = arith.addf %165, %171 : vector<2x2x96xf32>
    %c0_132 = arith.constant 0 : index
    %c4_133 = arith.constant 4 : index
    %c0_134 = arith.constant 0 : index
    %173 = vector.load %arg14[%c0_132, %c4_133, %c0_134] : memref<6x6x96xf32, #tpu.memory_space<vmem>>, vector<2x2x96xf32>
    %c4_135 = arith.constant 4 : index
    %c0_136 = arith.constant 0 : index
    %c0_137 = arith.constant 0 : index
    %174 = vector.load %arg5[%c4_135, %c0_136, %c0_137] : memref<25x1x96xf32, #tpu.memory_space<vmem>>, vector<1x1x96xf32>
    %175 = vector.shape_cast %174 : vector<1x1x96xf32> to vector<1x96xf32>
    %176 = vector.shape_cast %175 : vector<1x96xf32> to vector<1x1x96xf32>
    %177 = vector.broadcast %176 : vector<1x1x96xf32> to vector<2x2x96xf32>
    %178 = arith.mulf %173, %177 : vector<2x2x96xf32>
    %179 = arith.addf %172, %178 : vector<2x2x96xf32>
    %c1_138 = arith.constant 1 : index
    %c0_139 = arith.constant 0 : index
    %c0_140 = arith.constant 0 : index
    %180 = vector.load %arg14[%c1_138, %c0_139, %c0_140] : memref<6x6x96xf32, #tpu.memory_space<vmem>>, vector<2x2x96xf32>
    %c5_141 = arith.constant 5 : index
    %c0_142 = arith.constant 0 : index
    %c0_143 = arith.constant 0 : index
    %181 = vector.load %arg5[%c5_141, %c0_142, %c0_143] : memref<25x1x96xf32, #tpu.memory_space<vmem>>, vector<1x1x96xf32>
    %182 = vector.shape_cast %181 : vector<1x1x96xf32> to vector<1x96xf32>
    %183 = vector.shape_cast %182 : vector<1x96xf32> to vector<1x1x96xf32>
    %184 = vector.broadcast %183 : vector<1x1x96xf32> to vector<2x2x96xf32>
    %185 = arith.mulf %180, %184 : vector<2x2x96xf32>
    %186 = arith.addf %179, %185 : vector<2x2x96xf32>
    %c1_144 = arith.constant 1 : index
    %c1_145 = arith.constant 1 : index
    %c0_146 = arith.constant 0 : index
    %187 = vector.load %arg14[%c1_144, %c1_145, %c0_146] : memref<6x6x96xf32, #tpu.memory_space<vmem>>, vector<2x2x96xf32>
    %c6 = arith.constant 6 : index
    %c0_147 = arith.constant 0 : index
    %c0_148 = arith.constant 0 : index
    %188 = vector.load %arg5[%c6, %c0_147, %c0_148] : memref<25x1x96xf32, #tpu.memory_space<vmem>>, vector<1x1x96xf32>
    %189 = vector.shape_cast %188 : vector<1x1x96xf32> to vector<1x96xf32>
    %190 = vector.shape_cast %189 : vector<1x96xf32> to vector<1x1x96xf32>
    %191 = vector.broadcast %190 : vector<1x1x96xf32> to vector<2x2x96xf32>
    %192 = arith.mulf %187, %191 : vector<2x2x96xf32>
    %193 = arith.addf %186, %192 : vector<2x2x96xf32>
    %c1_149 = arith.constant 1 : index
    %c2_150 = arith.constant 2 : index
    %c0_151 = arith.constant 0 : index
    %194 = vector.load %arg14[%c1_149, %c2_150, %c0_151] : memref<6x6x96xf32, #tpu.memory_space<vmem>>, vector<2x2x96xf32>
    %c7 = arith.constant 7 : index
    %c0_152 = arith.constant 0 : index
    %c0_153 = arith.constant 0 : index
    %195 = vector.load %arg5[%c7, %c0_152, %c0_153] : memref<25x1x96xf32, #tpu.memory_space<vmem>>, vector<1x1x96xf32>
    %196 = vector.shape_cast %195 : vector<1x1x96xf32> to vector<1x96xf32>
    %197 = vector.shape_cast %196 : vector<1x96xf32> to vector<1x1x96xf32>
    %198 = vector.broadcast %197 : vector<1x1x96xf32> to vector<2x2x96xf32>
    %199 = arith.mulf %194, %198 : vector<2x2x96xf32>
    %200 = arith.addf %193, %199 : vector<2x2x96xf32>
    %c1_154 = arith.constant 1 : index
    %c3_155 = arith.constant 3 : index
    %c0_156 = arith.constant 0 : index
    %201 = vector.load %arg14[%c1_154, %c3_155, %c0_156] : memref<6x6x96xf32, #tpu.memory_space<vmem>>, vector<2x2x96xf32>
    %c8 = arith.constant 8 : index
    %c0_157 = arith.constant 0 : index
    %c0_158 = arith.constant 0 : index
    %202 = vector.load %arg5[%c8, %c0_157, %c0_158] : memref<25x1x96xf32, #tpu.memory_space<vmem>>, vector<1x1x96xf32>
    %203 = vector.shape_cast %202 : vector<1x1x96xf32> to vector<1x96xf32>
    %204 = vector.shape_cast %203 : vector<1x96xf32> to vector<1x1x96xf32>
    %205 = vector.broadcast %204 : vector<1x1x96xf32> to vector<2x2x96xf32>
    %206 = arith.mulf %201, %205 : vector<2x2x96xf32>
    %207 = arith.addf %200, %206 : vector<2x2x96xf32>
    %c1_159 = arith.constant 1 : index
    %c4_160 = arith.constant 4 : index
    %c0_161 = arith.constant 0 : index
    %208 = vector.load %arg14[%c1_159, %c4_160, %c0_161] : memref<6x6x96xf32, #tpu.memory_space<vmem>>, vector<2x2x96xf32>
    %c9 = arith.constant 9 : index
    %c0_162 = arith.constant 0 : index
    %c0_163 = arith.constant 0 : index
    %209 = vector.load %arg5[%c9, %c0_162, %c0_163] : memref<25x1x96xf32, #tpu.memory_space<vmem>>, vector<1x1x96xf32>
    %210 = vector.shape_cast %209 : vector<1x1x96xf32> to vector<1x96xf32>
    %211 = vector.shape_cast %210 : vector<1x96xf32> to vector<1x1x96xf32>
    %212 = vector.broadcast %211 : vector<1x1x96xf32> to vector<2x2x96xf32>
    %213 = arith.mulf %208, %212 : vector<2x2x96xf32>
    %214 = arith.addf %207, %213 : vector<2x2x96xf32>
    %c2_164 = arith.constant 2 : index
    %c0_165 = arith.constant 0 : index
    %c0_166 = arith.constant 0 : index
    %215 = vector.load %arg14[%c2_164, %c0_165, %c0_166] : memref<6x6x96xf32, #tpu.memory_space<vmem>>, vector<2x2x96xf32>
    %c10 = arith.constant 10 : index
    %c0_167 = arith.constant 0 : index
    %c0_168 = arith.constant 0 : index
    %216 = vector.load %arg5[%c10, %c0_167, %c0_168] : memref<25x1x96xf32, #tpu.memory_space<vmem>>, vector<1x1x96xf32>
    %217 = vector.shape_cast %216 : vector<1x1x96xf32> to vector<1x96xf32>
    %218 = vector.shape_cast %217 : vector<1x96xf32> to vector<1x1x96xf32>
    %219 = vector.broadcast %218 : vector<1x1x96xf32> to vector<2x2x96xf32>
    %220 = arith.mulf %215, %219 : vector<2x2x96xf32>
    %221 = arith.addf %214, %220 : vector<2x2x96xf32>
    %c2_169 = arith.constant 2 : index
    %c1_170 = arith.constant 1 : index
    %c0_171 = arith.constant 0 : index
    %222 = vector.load %arg14[%c2_169, %c1_170, %c0_171] : memref<6x6x96xf32, #tpu.memory_space<vmem>>, vector<2x2x96xf32>
    %c11 = arith.constant 11 : index
    %c0_172 = arith.constant 0 : index
    %c0_173 = arith.constant 0 : index
    %223 = vector.load %arg5[%c11, %c0_172, %c0_173] : memref<25x1x96xf32, #tpu.memory_space<vmem>>, vector<1x1x96xf32>
    %224 = vector.shape_cast %223 : vector<1x1x96xf32> to vector<1x96xf32>
    %225 = vector.shape_cast %224 : vector<1x96xf32> to vector<1x1x96xf32>
    %226 = vector.broadcast %225 : vector<1x1x96xf32> to vector<2x2x96xf32>
    %227 = arith.mulf %222, %226 : vector<2x2x96xf32>
    %228 = arith.addf %221, %227 : vector<2x2x96xf32>
    %c2_174 = arith.constant 2 : index
    %c2_175 = arith.constant 2 : index
    %c0_176 = arith.constant 0 : index
    %229 = vector.load %arg14[%c2_174, %c2_175, %c0_176] : memref<6x6x96xf32, #tpu.memory_space<vmem>>, vector<2x2x96xf32>
    %c12 = arith.constant 12 : index
    %c0_177 = arith.constant 0 : index
    %c0_178 = arith.constant 0 : index
    %230 = vector.load %arg5[%c12, %c0_177, %c0_178] : memref<25x1x96xf32, #tpu.memory_space<vmem>>, vector<1x1x96xf32>
    %231 = vector.shape_cast %230 : vector<1x1x96xf32> to vector<1x96xf32>
    %232 = vector.shape_cast %231 : vector<1x96xf32> to vector<1x1x96xf32>
    %233 = vector.broadcast %232 : vector<1x1x96xf32> to vector<2x2x96xf32>
    %234 = arith.mulf %229, %233 : vector<2x2x96xf32>
    %235 = arith.addf %228, %234 : vector<2x2x96xf32>
    %c2_179 = arith.constant 2 : index
    %c3_180 = arith.constant 3 : index
    %c0_181 = arith.constant 0 : index
    %236 = vector.load %arg14[%c2_179, %c3_180, %c0_181] : memref<6x6x96xf32, #tpu.memory_space<vmem>>, vector<2x2x96xf32>
    %c13 = arith.constant 13 : index
    %c0_182 = arith.constant 0 : index
    %c0_183 = arith.constant 0 : index
    %237 = vector.load %arg5[%c13, %c0_182, %c0_183] : memref<25x1x96xf32, #tpu.memory_space<vmem>>, vector<1x1x96xf32>
    %238 = vector.shape_cast %237 : vector<1x1x96xf32> to vector<1x96xf32>
    %239 = vector.shape_cast %238 : vector<1x96xf32> to vector<1x1x96xf32>
    %240 = vector.broadcast %239 : vector<1x1x96xf32> to vector<2x2x96xf32>
    %241 = arith.mulf %236, %240 : vector<2x2x96xf32>
    %242 = arith.addf %235, %241 : vector<2x2x96xf32>
    %c2_184 = arith.constant 2 : index
    %c4_185 = arith.constant 4 : index
    %c0_186 = arith.constant 0 : index
    %243 = vector.load %arg14[%c2_184, %c4_185, %c0_186] : memref<6x6x96xf32, #tpu.memory_space<vmem>>, vector<2x2x96xf32>
    %c14 = arith.constant 14 : index
    %c0_187 = arith.constant 0 : index
    %c0_188 = arith.constant 0 : index
    %244 = vector.load %arg5[%c14, %c0_187, %c0_188] : memref<25x1x96xf32, #tpu.memory_space<vmem>>, vector<1x1x96xf32>
    %245 = vector.shape_cast %244 : vector<1x1x96xf32> to vector<1x96xf32>
    %246 = vector.shape_cast %245 : vector<1x96xf32> to vector<1x1x96xf32>
    %247 = vector.broadcast %246 : vector<1x1x96xf32> to vector<2x2x96xf32>
    %248 = arith.mulf %243, %247 : vector<2x2x96xf32>
    %249 = arith.addf %242, %248 : vector<2x2x96xf32>
    %c3_189 = arith.constant 3 : index
    %c0_190 = arith.constant 0 : index
    %c0_191 = arith.constant 0 : index
    %250 = vector.load %arg14[%c3_189, %c0_190, %c0_191] : memref<6x6x96xf32, #tpu.memory_space<vmem>>, vector<2x2x96xf32>
    %c15 = arith.constant 15 : index
    %c0_192 = arith.constant 0 : index
    %c0_193 = arith.constant 0 : index
    %251 = vector.load %arg5[%c15, %c0_192, %c0_193] : memref<25x1x96xf32, #tpu.memory_space<vmem>>, vector<1x1x96xf32>
    %252 = vector.shape_cast %251 : vector<1x1x96xf32> to vector<1x96xf32>
    %253 = vector.shape_cast %252 : vector<1x96xf32> to vector<1x1x96xf32>
    %254 = vector.broadcast %253 : vector<1x1x96xf32> to vector<2x2x96xf32>
    %255 = arith.mulf %250, %254 : vector<2x2x96xf32>
    %256 = arith.addf %249, %255 : vector<2x2x96xf32>
    %c3_194 = arith.constant 3 : index
    %c1_195 = arith.constant 1 : index
    %c0_196 = arith.constant 0 : index
    %257 = vector.load %arg14[%c3_194, %c1_195, %c0_196] : memref<6x6x96xf32, #tpu.memory_space<vmem>>, vector<2x2x96xf32>
    %c16 = arith.constant 16 : index
    %c0_197 = arith.constant 0 : index
    %c0_198 = arith.constant 0 : index
    %258 = vector.load %arg5[%c16, %c0_197, %c0_198] : memref<25x1x96xf32, #tpu.memory_space<vmem>>, vector<1x1x96xf32>
    %259 = vector.shape_cast %258 : vector<1x1x96xf32> to vector<1x96xf32>
    %260 = vector.shape_cast %259 : vector<1x96xf32> to vector<1x1x96xf32>
    %261 = vector.broadcast %260 : vector<1x1x96xf32> to vector<2x2x96xf32>
    %262 = arith.mulf %257, %261 : vector<2x2x96xf32>
    %263 = arith.addf %256, %262 : vector<2x2x96xf32>
    %c3_199 = arith.constant 3 : index
    %c2_200 = arith.constant 2 : index
    %c0_201 = arith.constant 0 : index
    %264 = vector.load %arg14[%c3_199, %c2_200, %c0_201] : memref<6x6x96xf32, #tpu.memory_space<vmem>>, vector<2x2x96xf32>
    %c17 = arith.constant 17 : index
    %c0_202 = arith.constant 0 : index
    %c0_203 = arith.constant 0 : index
    %265 = vector.load %arg5[%c17, %c0_202, %c0_203] : memref<25x1x96xf32, #tpu.memory_space<vmem>>, vector<1x1x96xf32>
    %266 = vector.shape_cast %265 : vector<1x1x96xf32> to vector<1x96xf32>
    %267 = vector.shape_cast %266 : vector<1x96xf32> to vector<1x1x96xf32>
    %268 = vector.broadcast %267 : vector<1x1x96xf32> to vector<2x2x96xf32>
    %269 = arith.mulf %264, %268 : vector<2x2x96xf32>
    %270 = arith.addf %263, %269 : vector<2x2x96xf32>
    %c3_204 = arith.constant 3 : index
    %c3_205 = arith.constant 3 : index
    %c0_206 = arith.constant 0 : index
    %271 = vector.load %arg14[%c3_204, %c3_205, %c0_206] : memref<6x6x96xf32, #tpu.memory_space<vmem>>, vector<2x2x96xf32>
    %c18 = arith.constant 18 : index
    %c0_207 = arith.constant 0 : index
    %c0_208 = arith.constant 0 : index
    %272 = vector.load %arg5[%c18, %c0_207, %c0_208] : memref<25x1x96xf32, #tpu.memory_space<vmem>>, vector<1x1x96xf32>
    %273 = vector.shape_cast %272 : vector<1x1x96xf32> to vector<1x96xf32>
    %274 = vector.shape_cast %273 : vector<1x96xf32> to vector<1x1x96xf32>
    %275 = vector.broadcast %274 : vector<1x1x96xf32> to vector<2x2x96xf32>
    %276 = arith.mulf %271, %275 : vector<2x2x96xf32>
    %277 = arith.addf %270, %276 : vector<2x2x96xf32>
    %c3_209 = arith.constant 3 : index
    %c4_210 = arith.constant 4 : index
    %c0_211 = arith.constant 0 : index
    %278 = vector.load %arg14[%c3_209, %c4_210, %c0_211] : memref<6x6x96xf32, #tpu.memory_space<vmem>>, vector<2x2x96xf32>
    %c19 = arith.constant 19 : index
    %c0_212 = arith.constant 0 : index
    %c0_213 = arith.constant 0 : index
    %279 = vector.load %arg5[%c19, %c0_212, %c0_213] : memref<25x1x96xf32, #tpu.memory_space<vmem>>, vector<1x1x96xf32>
    %280 = vector.shape_cast %279 : vector<1x1x96xf32> to vector<1x96xf32>
    %281 = vector.shape_cast %280 : vector<1x96xf32> to vector<1x1x96xf32>
    %282 = vector.broadcast %281 : vector<1x1x96xf32> to vector<2x2x96xf32>
    %283 = arith.mulf %278, %282 : vector<2x2x96xf32>
    %284 = arith.addf %277, %283 : vector<2x2x96xf32>
    %c4_214 = arith.constant 4 : index
    %c0_215 = arith.constant 0 : index
    %c0_216 = arith.constant 0 : index
    %285 = vector.load %arg14[%c4_214, %c0_215, %c0_216] : memref<6x6x96xf32, #tpu.memory_space<vmem>>, vector<2x2x96xf32>
    %c20 = arith.constant 20 : index
    %c0_217 = arith.constant 0 : index
    %c0_218 = arith.constant 0 : index
    %286 = vector.load %arg5[%c20, %c0_217, %c0_218] : memref<25x1x96xf32, #tpu.memory_space<vmem>>, vector<1x1x96xf32>
    %287 = vector.shape_cast %286 : vector<1x1x96xf32> to vector<1x96xf32>
    %288 = vector.shape_cast %287 : vector<1x96xf32> to vector<1x1x96xf32>
    %289 = vector.broadcast %288 : vector<1x1x96xf32> to vector<2x2x96xf32>
    %290 = arith.mulf %285, %289 : vector<2x2x96xf32>
    %291 = arith.addf %284, %290 : vector<2x2x96xf32>
    %c4_219 = arith.constant 4 : index
    %c1_220 = arith.constant 1 : index
    %c0_221 = arith.constant 0 : index
    %292 = vector.load %arg14[%c4_219, %c1_220, %c0_221] : memref<6x6x96xf32, #tpu.memory_space<vmem>>, vector<2x2x96xf32>
    %c21 = arith.constant 21 : index
    %c0_222 = arith.constant 0 : index
    %c0_223 = arith.constant 0 : index
    %293 = vector.load %arg5[%c21, %c0_222, %c0_223] : memref<25x1x96xf32, #tpu.memory_space<vmem>>, vector<1x1x96xf32>
    %294 = vector.shape_cast %293 : vector<1x1x96xf32> to vector<1x96xf32>
    %295 = vector.shape_cast %294 : vector<1x96xf32> to vector<1x1x96xf32>
    %296 = vector.broadcast %295 : vector<1x1x96xf32> to vector<2x2x96xf32>
    %297 = arith.mulf %292, %296 : vector<2x2x96xf32>
    %298 = arith.addf %291, %297 : vector<2x2x96xf32>
    %c4_224 = arith.constant 4 : index
    %c2_225 = arith.constant 2 : index
    %c0_226 = arith.constant 0 : index
    %299 = vector.load %arg14[%c4_224, %c2_225, %c0_226] : memref<6x6x96xf32, #tpu.memory_space<vmem>>, vector<2x2x96xf32>
    %c22 = arith.constant 22 : index
    %c0_227 = arith.constant 0 : index
    %c0_228 = arith.constant 0 : index
    %300 = vector.load %arg5[%c22, %c0_227, %c0_228] : memref<25x1x96xf32, #tpu.memory_space<vmem>>, vector<1x1x96xf32>
    %301 = vector.shape_cast %300 : vector<1x1x96xf32> to vector<1x96xf32>
    %302 = vector.shape_cast %301 : vector<1x96xf32> to vector<1x1x96xf32>
    %303 = vector.broadcast %302 : vector<1x1x96xf32> to vector<2x2x96xf32>
    %304 = arith.mulf %299, %303 : vector<2x2x96xf32>
    %305 = arith.addf %298, %304 : vector<2x2x96xf32>
    %c4_229 = arith.constant 4 : index
    %c3_230 = arith.constant 3 : index
    %c0_231 = arith.constant 0 : index
    %306 = vector.load %arg14[%c4_229, %c3_230, %c0_231] : memref<6x6x96xf32, #tpu.memory_space<vmem>>, vector<2x2x96xf32>
    %c23 = arith.constant 23 : index
    %c0_232 = arith.constant 0 : index
    %c0_233 = arith.constant 0 : index
    %307 = vector.load %arg5[%c23, %c0_232, %c0_233] : memref<25x1x96xf32, #tpu.memory_space<vmem>>, vector<1x1x96xf32>
    %308 = vector.shape_cast %307 : vector<1x1x96xf32> to vector<1x96xf32>
    %309 = vector.shape_cast %308 : vector<1x96xf32> to vector<1x1x96xf32>
    %310 = vector.broadcast %309 : vector<1x1x96xf32> to vector<2x2x96xf32>
    %311 = arith.mulf %306, %310 : vector<2x2x96xf32>
    %312 = arith.addf %305, %311 : vector<2x2x96xf32>
    %c4_234 = arith.constant 4 : index
    %c4_235 = arith.constant 4 : index
    %c0_236 = arith.constant 0 : index
    %313 = vector.load %arg14[%c4_234, %c4_235, %c0_236] : memref<6x6x96xf32, #tpu.memory_space<vmem>>, vector<2x2x96xf32>
    %c24 = arith.constant 24 : index
    %c0_237 = arith.constant 0 : index
    %c0_238 = arith.constant 0 : index
    %314 = vector.load %arg5[%c24, %c0_237, %c0_238] : memref<25x1x96xf32, #tpu.memory_space<vmem>>, vector<1x1x96xf32>
    %315 = vector.shape_cast %314 : vector<1x1x96xf32> to vector<1x96xf32>
    %316 = vector.shape_cast %315 : vector<1x96xf32> to vector<1x1x96xf32>
    %317 = vector.broadcast %316 : vector<1x1x96xf32> to vector<2x2x96xf32>
    %318 = arith.mulf %313, %317 : vector<2x2x96xf32>
    %319 = arith.addf %312, %318 : vector<2x2x96xf32>
    %c0_239 = arith.constant 0 : index
    %c0_240 = arith.constant 0 : index
    %320 = vector.load %arg6[%c0_239, %c0_240] : memref<1x96xf32, #tpu.memory_space<vmem>>, vector<1x96xf32>
    %321 = vector.shape_cast %320 : vector<1x96xf32> to vector<1x1x96xf32>
    %322 = vector.broadcast %321 : vector<1x1x96xf32> to vector<2x2x96xf32>
    %323 = arith.addf %319, %322 : vector<2x2x96xf32>
    %cst_241 = arith.constant 3.000000e+00 : f32
    %324 = vector.broadcast %cst_241 : f32 to vector<2x2x96xf32>
    %325 = arith.addf %323, %324 : vector<2x2x96xf32>
    %cst_242 = arith.constant 0.000000e+00 : f32
    %cst_243 = arith.constant 6.000000e+00 : f32
    %326 = vector.broadcast %cst_242 : f32 to vector<2x2x96xf32>
    %327 = arith.maximumf %326, %325 : vector<2x2x96xf32>
    %328 = vector.broadcast %cst_243 : f32 to vector<2x2x96xf32>
    %329 = arith.minimumf %328, %327 : vector<2x2x96xf32>
    %330 = arith.mulf %323, %329 : vector<2x2x96xf32>
    %cst_244 = arith.constant 0.166666672 : f32
    %331 = vector.broadcast %cst_244 : f32 to vector<2x2x96xf32>
    %332 = arith.mulf %330, %331 : vector<2x2x96xf32>
    %cst_245 = arith.constant dense<0.000000e+00> : vector<2x96xf32>
    %333 = vector.multi_reduction <add>, %332, %cst_245 [0] : vector<2x2x96xf32> to vector<2x96xf32>
    %cst_246 = arith.constant dense<0.000000e+00> : vector<96xf32>
    %334 = vector.multi_reduction <add>, %333, %cst_246 [0] : vector<2x96xf32> to vector<96xf32>
    %335 = vector.shape_cast %334 : vector<96xf32> to vector<1x96xf32>
    %cst_247 = arith.constant 2.500000e-01 : f32
    %336 = vector.broadcast %cst_247 : f32 to vector<1x96xf32>
    %337 = arith.mulf %335, %336 : vector<1x96xf32>
    %338 = arith.truncf %337 : vector<1x96xf32> to vector<1x96xbf16>
    %c0_248 = arith.constant 0 : index
    %c0_249 = arith.constant 0 : index
    %339 = vector.load %arg7[%c0_248, %c0_249] : memref<96x24xbf16, #tpu.memory_space<vmem>>, vector<96x24xbf16>
    %cst_250 = arith.constant dense<0.000000e+00> : vector<1x24xf32>
    %340 = tpu.matmul %338, %339, %cst_250 {dimension_numbers = #tpu.dot_dimension_numbers<[1], [0], [0], [1], [0, 0, 1, 1], [], []>} : vector<1x96xbf16>, vector<96x24xbf16>, vector<1x24xf32> -> vector<1x24xf32>
    %c0_251 = arith.constant 0 : index
    %c0_252 = arith.constant 0 : index
    %341 = vector.load %arg8[%c0_251, %c0_252] : memref<1x24xf32, #tpu.memory_space<vmem>>, vector<1x24xf32>
    %342 = arith.addf %340, %341 : vector<1x24xf32>
    %cst_253 = arith.constant 0.000000e+00 : f32
    %343 = vector.broadcast %cst_253 : f32 to vector<1x24xf32>
    %344 = arith.maximumf %342, %343 : vector<1x24xf32>
    %345 = arith.truncf %344 : vector<1x24xf32> to vector<1x24xbf16>
    %c0_254 = arith.constant 0 : index
    %c0_255 = arith.constant 0 : index
    %346 = vector.load %arg9[%c0_254, %c0_255] : memref<24x96xbf16, #tpu.memory_space<vmem>>, vector<24x96xbf16>
    %cst_256 = arith.constant dense<0.000000e+00> : vector<1x96xf32>
    %347 = tpu.matmul %345, %346, %cst_256 {dimension_numbers = #tpu.dot_dimension_numbers<[1], [0], [0], [1], [0, 0, 1, 1], [], []>} : vector<1x24xbf16>, vector<24x96xbf16>, vector<1x96xf32> -> vector<1x96xf32>
    %c0_257 = arith.constant 0 : index
    %c0_258 = arith.constant 0 : index
    %348 = vector.load %arg10[%c0_257, %c0_258] : memref<1x96xf32, #tpu.memory_space<vmem>>, vector<1x96xf32>
    %349 = arith.addf %347, %348 : vector<1x96xf32>
    %cst_259 = arith.constant 3.000000e+00 : f32
    %350 = vector.broadcast %cst_259 : f32 to vector<1x96xf32>
    %351 = arith.addf %349, %350 : vector<1x96xf32>
    %cst_260 = arith.constant 0.000000e+00 : f32
    %cst_261 = arith.constant 6.000000e+00 : f32
    %352 = vector.broadcast %cst_260 : f32 to vector<1x96xf32>
    %353 = arith.maximumf %352, %351 : vector<1x96xf32>
    %354 = vector.broadcast %cst_261 : f32 to vector<1x96xf32>
    %355 = arith.minimumf %354, %353 : vector<1x96xf32>
    %cst_262 = arith.constant 0.166666672 : f32
    %356 = vector.broadcast %cst_262 : f32 to vector<1x96xf32>
    %357 = arith.mulf %355, %356 : vector<1x96xf32>
    %358 = vector.shape_cast %357 : vector<1x96xf32> to vector<1x1x96xf32>
    %359 = vector.broadcast %358 : vector<1x1x96xf32> to vector<2x2x96xf32>
    %360 = arith.mulf %332, %359 : vector<2x2x96xf32>
    %361 = vector.extract_strided_slice %360 {offsets = [0, 0, 0], sizes = [1, 2, 96], strides = [1, 1, 1]} : vector<2x2x96xf32> to vector<1x2x96xf32>
    %362 = vector.shape_cast %361 : vector<1x2x96xf32> to vector<2x96xf32>
    %363 = arith.truncf %362 : vector<2x96xf32> to vector<2x96xbf16>
    %c0_263 = arith.constant 0 : index
    %c0_264 = arith.constant 0 : index
    %364 = vector.load %arg11[%c0_263, %c0_264] : memref<96x24xbf16, #tpu.memory_space<vmem>>, vector<96x24xbf16>
    %cst_265 = arith.constant dense<0.000000e+00> : vector<2x24xf32>
    %365 = tpu.matmul %363, %364, %cst_265 {dimension_numbers = #tpu.dot_dimension_numbers<[1], [0], [0], [1], [0, 0, 1, 1], [], []>} : vector<2x96xbf16>, vector<96x24xbf16>, vector<2x24xf32> -> vector<2x24xf32>
    %c0_266 = arith.constant 0 : index
    %c0_267 = arith.constant 0 : index
    %366 = vector.load %arg12[%c0_266, %c0_267] : memref<1x24xf32, #tpu.memory_space<vmem>>, vector<1x24xf32>
    %367 = vector.broadcast %366 : vector<1x24xf32> to vector<2x24xf32>
    %368 = arith.addf %365, %367 : vector<2x24xf32>
    %c0_268 = arith.constant 0 : index
    %c2_269 = arith.constant 2 : index
    %c2_270 = arith.constant 2 : index
    %c0_271 = arith.constant 0 : index
    %369 = vector.load %arg1[%c0_268, %c2_269, %c2_270, %c0_271] : memref<1x6x6x24xf32, #tpu.memory_space<vmem>>, vector<1x1x2x24xf32>
    %370 = vector.shape_cast %369 : vector<1x1x2x24xf32> to vector<2x24xf32>
    %371 = arith.addf %368, %370 : vector<2x24xf32>
    %c0_272 = arith.constant 0 : index
    %c0_273 = arith.constant 0 : index
    %c0_274 = arith.constant 0 : index
    %c0_275 = arith.constant 0 : index
    %372 = vector.load %arg13[%c0_272, %c0_273, %c0_274, %c0_275] : memref<1x2x2x24xf32, #tpu.memory_space<vmem>>, vector<1x1x2x24xf32>
    %373 = vector.shape_cast %372 : vector<1x1x2x24xf32> to vector<2x24xf32>
    %374 = vector.shape_cast %371 : vector<2x24xf32> to vector<1x1x2x24xf32>
    tpu.vector_store %arg13[%c0_272, %c0_273, %c0_274, %c0_275], %374 {strides = array<i32>} : memref<1x2x2x24xf32, #tpu.memory_space<vmem>>, vector<1x1x2x24xf32>,
    %375 = vector.extract_strided_slice %360 {offsets = [1, 0, 0], sizes = [1, 2, 96], strides = [1, 1, 1]} : vector<2x2x96xf32> to vector<1x2x96xf32>
    %376 = vector.shape_cast %375 : vector<1x2x96xf32> to vector<2x96xf32>
    %377 = arith.truncf %376 : vector<2x96xf32> to vector<2x96xbf16>
    %c0_276 = arith.constant 0 : index
    %c0_277 = arith.constant 0 : index
    %378 = vector.load %arg11[%c0_276, %c0_277] : memref<96x24xbf16, #tpu.memory_space<vmem>>, vector<96x24xbf16>
    %cst_278 = arith.constant dense<0.000000e+00> : vector<2x24xf32>
    %379 = tpu.matmul %377, %378, %cst_278 {dimension_numbers = #tpu.dot_dimension_numbers<[1], [0], [0], [1], [0, 0, 1, 1], [], []>} : vector<2x96xbf16>, vector<96x24xbf16>, vector<2x24xf32> -> vector<2x24xf32>
    %c0_279 = arith.constant 0 : index
    %c0_280 = arith.constant 0 : index
    %380 = vector.load %arg12[%c0_279, %c0_280] : memref<1x24xf32, #tpu.memory_space<vmem>>, vector<1x24xf32>
    %381 = vector.broadcast %380 : vector<1x24xf32> to vector<2x24xf32>
    %382 = arith.addf %379, %381 : vector<2x24xf32>
    %c0_281 = arith.constant 0 : index
    %c3_282 = arith.constant 3 : index
    %c2_283 = arith.constant 2 : index
    %c0_284 = arith.constant 0 : index
    %383 = vector.load %arg1[%c0_281, %c3_282, %c2_283, %c0_284] : memref<1x6x6x24xf32, #tpu.memory_space<vmem>>, vector<1x1x2x24xf32>
    %384 = vector.shape_cast %383 : vector<1x1x2x24xf32> to vector<2x24xf32>
    %385 = arith.addf %382, %384 : vector<2x24xf32>
    %c0_285 = arith.constant 0 : index
    %c1_286 = arith.constant 1 : index
    %c0_287 = arith.constant 0 : index
    %c0_288 = arith.constant 0 : index
    %386 = vector.load %arg13[%c0_285, %c1_286, %c0_287, %c0_288] : memref<1x2x2x24xf32, #tpu.memory_space<vmem>>, vector<1x1x2x24xf32>
    %387 = vector.shape_cast %386 : vector<1x1x2x24xf32> to vector<2x24xf32>
    %388 = vector.shape_cast %385 : vector<2x24xf32> to vector<1x1x2x24xf32>
    tpu.vector_store %arg13[%c0_285, %c1_286, %c0_287, %c0_288], %388 {strides = array<i32>} : memref<1x2x2x24xf32, #tpu.memory_space<vmem>>, vector<1x1x2x24xf32>,
    return
  }
  func.func @transform_0(%arg0: i32) -> (i32, i32, i32, i32) {
    %c0_i32 = arith.constant 0 : i32
    %c0_i32_0 = arith.constant 0 : i32
    %c0_i32_1 = arith.constant 0 : i32
    %c0_i32_2 = arith.constant 0 : i32
    return %arg0, %c0_i32, %c0_i32_0, %c0_i32_1 : i32, i32, i32, i32
  }
  func.func @transform_1(%arg0: i32) -> (i32, i32, i32) {
    %c0_i32 = arith.constant 0 : i32
    %c0_i32_0 = arith.constant 0 : i32
    %c0_i32_1 = arith.constant 0 : i32
    %c0_i32_2 = arith.constant 0 : i32
    return %c0_i32, %c0_i32_0, %c0_i32_1 : i32, i32, i32
  }
  func.func @transform_2(%arg0: i32) -> (i32, i32) {
    %c0_i32 = arith.constant 0 : i32
    %c0_i32_0 = arith.constant 0 : i32
    %c0_i32_1 = arith.constant 0 : i32
    return %c0_i32, %c0_i32_0 : i32, i32
  }
  func.func @transform_3(%arg0: i32) -> (i32, i32) {
    %c0_i32 = arith.constant 0 : i32
    %c0_i32_0 = arith.constant 0 : i32
    %c0_i32_1 = arith.constant 0 : i32
    return %c0_i32, %c0_i32_0 : i32, i32
  }
  func.func @transform_4(%arg0: i32) -> (i32, i32, i32) {
    %c0_i32 = arith.constant 0 : i32
    %c0_i32_0 = arith.constant 0 : i32
    %c0_i32_1 = arith.constant 0 : i32
    %c0_i32_2 = arith.constant 0 : i32
    return %c0_i32, %c0_i32_0, %c0_i32_1 : i32, i32, i32
  }
  func.func @transform_5(%arg0: i32) -> (i32, i32) {
    %c0_i32 = arith.constant 0 : i32
    %c0_i32_0 = arith.constant 0 : i32
    %c0_i32_1 = arith.constant 0 : i32
    return %c0_i32, %c0_i32_0 : i32, i32
  }
  func.func @transform_6(%arg0: i32) -> (i32, i32) {
    %c0_i32 = arith.constant 0 : i32
    %c0_i32_0 = arith.constant 0 : i32
    %c0_i32_1 = arith.constant 0 : i32
    return %c0_i32, %c0_i32_0 : i32, i32
  }
  func.func @transform_7(%arg0: i32) -> (i32, i32) {
    %c0_i32 = arith.constant 0 : i32
    %c0_i32_0 = arith.constant 0 : i32
    %c0_i32_1 = arith.constant 0 : i32
    return %c0_i32, %c0_i32_0 : i32, i32
  }
  func.func @transform_8(%arg0: i32) -> (i32, i32) {
    %c0_i32 = arith.constant 0 : i32
    %c0_i32_0 = arith.constant 0 : i32
    %c0_i32_1 = arith.constant 0 : i32
    return %c0_i32, %c0_i32_0 : i32, i32
  }
  func.func @transform_9(%arg0: i32) -> (i32, i32) {
    %c0_i32 = arith.constant 0 : i32
    %c0_i32_0 = arith.constant 0 : i32
    %c0_i32_1 = arith.constant 0 : i32
    return %c0_i32, %c0_i32_0 : i32, i32
  }
  func.func @transform_10(%arg0: i32) -> (i32, i32) {
    %c0_i32 = arith.constant 0 : i32
    %c0_i32_0 = arith.constant 0 : i32
    %c0_i32_1 = arith.constant 0 : i32
    return %c0_i32, %c0_i32_0 : i32, i32
  }
  func.func @transform_11(%arg0: i32) -> (i32, i32) {
    %c0_i32 = arith.constant 0 : i32
    %c0_i32_0 = arith.constant 0 : i32
    %c0_i32_1 = arith.constant 0 : i32
    return %c0_i32, %c0_i32_0 : i32, i32
  }
  func.func @transform_12(%arg0: i32) -> (i32, i32, i32, i32) {
    %c0_i32 = arith.constant 0 : i32
    %c0_i32_0 = arith.constant 0 : i32
    %c0_i32_1 = arith.constant 0 : i32
    %c0_i32_2 = arith.constant 0 : i32
    return %arg0, %c0_i32, %c0_i32_0, %c0_i32_1 : i32, i32, i32, i32
  }
}

</mosaic_0001>

<bundles_post_ra>
// kernel: mobilenetv3_forward.5
= control target key start
LH: loop header
LB: loop body
LE: loop exit
PB: predicated region body
PF: predicated region fallthrough
CT: control target
= control target key end

     0   :  { %s2156_s12 = smov 0   ;;  %s3361_s0 = inlined_call_operand.vmem [shape: f32[2,36,9,3], index: 0, kind: input, shape index: {}]   ;;  %s3362_s1 = inlined_call_operand.vmem [shape: f32[27,1,16], index: 1, kind: input, shape index: {}]   ;;  %s3363_s2 = inlined_call_operand.vmem [shape: f32[1,16], index: 2, kind: input, shape index: {}]   ;;  %s3364_s3 = inlined_call_operand.vmem [shape: f32[2,8,8,16], index: 3, kind: output, shape index: {}]  }
   0x1 LB: > { %s1950_s13 = sadd.s32 4294967295, %s2131_s12   ;;  %p1954_p0 = scmp.ge.s32.totalorder %s2131_s12, 1  ;;  %s2131_s12 = sphi %s2156_s12, %s13_s12  }
   0x2   : > { %p137_p1 = scmp.lt.s32.totalorder %s2131_s12, 3 }
   0x4   : > { %p138_p2 = pnand %p1954_p0, %p137_p1 }
   0x6   : > { %141 = sbr.rel (%p138_p2) target bundleno = 671 (0x29f), region = 32 }
   0xd   : > { %p161_p3 = scmp.lt.s32.totalorder %s1950_s13, 1  ;;  %v3367_v0 = vmov 0   ;;  %v3369_v10 = vmov 1   ;;  %v3365_v15 = vmov 2   ;;  %vm1886_vm0 = vcmask 130048  }
   0xe   : > { %2084 = vset.pattern.permute.xlu1 %v3367_v0  ;;  %2083 = vset.pattern.permute.xlu0 %v3367_v0 }
   0xf   : > { %s3604_s13 = smov (!%p161_p3, %s1950_s13), 1 }
  0x10   : > { %s2071_s14 = smul.u32 576, %s3604_s13  ;;  %s2070_s25 = sshll.u32 %s3604_s13, 6 }
  0x11   : > { %s3323_s13 = scalar_lea.vmem %s3364_s3, %s2070_s25 }
  0x12   : > { %s2172_s17 = scalar_lea.vmem %s3361_s0, %s2071_s14 }
  0x13   : > { %v2175_v1 = vld [vmem:[%s2172_s17 + $0x20] sm:$0xff]  ;;  %v2183_v3 = vld [vmem:[%s2172_s17 + $0x30] sm:$0xff] }
  0x14   : > { %v2178_v2 = vld [vmem:[%s2172_s17] sm:$0xff]  ;;  %192 = vperm.xlu1 %2084, %v2175_v1   ;;  %v2186_v4 = vld [vmem:[%s2172_s17 + $0x10] sm:$0xff] }
  0x15   : > { %182 = vperm.xlu0 %2083, %v2178_v2   ;;  %v2191_v5 = vld [vmem:[%s2172_s17 + $0x50] sm:$0xff]  ;;  %v2194_v6 = vld [vmem:[%s2172_s17 + $0x40] sm:$0xff] }
  0x16   : > { %v2199_v7 = vld [vmem:[%s2172_s17 + $0x70] sm:$0xff]  ;;  %v2202_v8 = vld [vmem:[%s2172_s17 + $0x60] sm:$0xff] }
  0x17   : > { %v2207_v9 = vld [vmem:[%s2172_s17 + $0x90] sm:$0xff]  ;;  %v2213_v11 = vld [vmem:[%s2172_s17 + $0xc0] sm:$0xff] }
  0x18   : > { %197 = vperm.xlu1 %2084, %v2183_v3   ;;  %v2218_v12 = vld [vmem:[%s2172_s17 + $0xe0] sm:$0xff]  ;;  %v2228_v14 = vld [vmem:[%s2172_s17 + $0x11] sm:$0xff] }
  0x19   : > { %187 = vperm.xlu0 %2083, %v2186_v4   ;;  %v2223_v13 = vld [vmem:[%s2172_s17 + $0x100] sm:$0xff]  ;;  %v2248_v19 = vld [vmem:[%s2172_s17 + $0x150] sm:$0xff] }
  0x1a   : > { %v2233_v16 = vld [vmem:[%s2172_s17 + $0x41] sm:$0xff]  ;;  %v2253_v20 = vld [vmem:[%s2172_s17 + $0x170] sm:$0xff] }
  0x1b   : > { %v2238_v17 = vld [vmem:[%s2172_s17 + $0x61] sm:$0xff]  ;;  %v2261_v22 = vld [vmem:[%s2172_s17 + $0x190] sm:$0xff] }
  0x1c   : > { %207 = vperm.xlu1 %2084, %v2191_v5   ;;  %v2243_v18 = vld [vmem:[%s2172_s17 + $0x120] sm:$0xff]  ;;  %v2267_v23 = vld [vmem:[%s2172_s17 + $0xb0] sm:$0xff] }
  0x1d   : > { %202 = vperm.xlu0 %2083, %v2194_v6   ;;  %v2258_v21 = vld [vmem:[%s2172_s17 + $0xa0] sm:$0xff]  ;;  %v2275_v25 = vld [vmem:[%s2172_s17 + $0xd0] sm:$0xff] }
  0x1e   : > { %v2270_v24 = vld [vmem:[%s2172_s17 + $0x1c0] sm:$0xff]  ;;  %v2278_v26 = vld [vmem:[%s2172_s17 + $0x1f0] sm:$0xff] }
  0x1f   : > { %v2283_v27 = vld [vmem:[%s2172_s17 + $0xf0] sm:$0xff]  ;;  %v2291_v29 = vld [vmem:[%s2172_s17 + $0x121] sm:$0xff] }
  0x20   : > { %217 = vperm.xlu1 %2084, %v2199_v7   ;;  %v2286_v28 = vld [vmem:[%s2172_s17 + $0x210] sm:$0xff]  ;;  %v539_v33 = vld [vmem:[%s2172_s17 + $0x1] sm:$0xff] }
  0x21   : > { %212 = vperm.xlu0 %2083, %v2202_v8   ;;  %v2297_v30 = vld [vmem:[%s2172_s17 + $0x151] sm:$0xff]  ;;  %v2329_v35 = vld [vmem:[%s2172_s17 + $0x21] sm:$0xff] }
  0x22   : > { %v2302_v31 = vld [vmem:[%s2172_s17 + $0x171] sm:$0xff]  ;;  %v1985_v62 = vld [vmem:[%s2172_s17 + $0x140] sm:$0xff] }
  0x23   : > { %v2307_v32 = vld [vmem:[%s2172_s17 + $0x191] sm:$0xff] }
  0x24   : > { %2085 = vset.pattern.permute.xlu1 %v3369_v10  ;;  %v2326_v34 = vld [vmem:[%s2172_s17 + $0x110] sm:$0xff] }
  0x25   : > { %367 = vperm.xlu0 %2083, %v2207_v9   ;;  %249 = vperm.xlu1 %2085, %v2186_v4   ;;  %v542_v36 = vld [vmem:[%s2172_s17 + $0x31] sm:$0xff] }
  0x26   : > { %v2336_v37 = vld [vmem:[%s2172_s17 + $0x51] sm:$0xff] }
  0x27   : > { %v2340_v38 = vld [vmem:[%s2172_s17 + $0x71] sm:$0xff] }
  0x28   : > { %v1984_v59 = vld [vmem:[%s2172_s17 + $0x130] sm:$0xff] }
  0x29   : > { %382 = vperm.xlu0 %2083, %v2213_v11   ;;  %253 = vperm.xlu1 %2085, %v2175_v1  }
  0x2d   : > { %392 = vperm.xlu0 %2083, %v2218_v12   ;;  %261 = vperm.xlu1 %2085, %v2194_v6  }
  0x31   : > { %402 = vperm.xlu0 %2083, %v2223_v13   ;;  %269 = vperm.xlu1 %2085, %v2202_v8  }
  0x35   : > { %556 = vperm.xlu0 %2083, %v2228_v14   ;;  %2086 = vset.pattern.permute.xlu1 %v3365_v15 }
  0x36   : > { %301 = vperm.xlu1 %2086, %v2178_v2  }
  0x39   : > { %571 = vperm.xlu0 %2083, %v2233_v16  }
  0x3a   : > { %309 = vperm.xlu1 %2086, %v2175_v1  }
  0x3d   : > { %581 = vperm.xlu0 %2083, %v2238_v17  }
  0x3e   : > { %313 = vperm.xlu1 %2086, %v2183_v3  }
  0x41   : > { %736 = vperm.xlu0 %2083, %v2243_v18  }
  0x42   : > { %321 = vperm.xlu1 %2086, %v2191_v5  }
  0x45   : > { %751 = vperm.xlu0 %2083, %v2248_v19  }
  0x46   : > { %329 = vperm.xlu1 %2086, %v2199_v7  }
  0x49   : > { %761 = vperm.xlu0 %2083, %v2253_v20  }
  0x4a   : > { %2087 = vset.pattern.permute.xlu1 %v3367_v0 }
  0x4b   : > { %372 = vperm.xlu1 %2087, %v2258_v21  }
  0x4d   : > { %771 = vperm.xlu0 %2083, %v2261_v22  }
  0x4f   : > { %377 = vperm.xlu1 %2087, %v2267_v23  }
  0x51   : > { %926 = vperm.xlu0 %2083, %v2270_v24  }
  0x53   : > { %387 = vperm.xlu1 %2087, %v2275_v25  }
  0x55   : > { %941 = vperm.xlu0 %2083, %v2278_v26  }
  0x57   : > { %397 = vperm.xlu1 %2087, %v2283_v27  }
  0x59   : > { %951 = vperm.xlu0 %2083, %v2286_v28  }
  0x5b   : > { %2088 = vset.pattern.permute.xlu1 %v3369_v10 }
  0x5c   : > { %430 = vperm.xlu1 %2088, %v2207_v9  }
  0x5d   : > { %1105 = vperm.xlu0 %2083, %v2291_v29  }
  0x60   : > { %438 = vperm.xlu1 %2088, %v2267_v23  }
  0x61   : > { %1120 = vperm.xlu0 %2083, %v2297_v30  }
  0x64   : > { %442 = vperm.xlu1 %2088, %v2213_v11  }
  0x65   : > { %1130 = vperm.xlu0 %2083, %v2302_v31  }
  0x68   : > { %450 = vperm.xlu1 %2088, %v2218_v12  }
  0x69   : > { %1140 = vperm.xlu0 %2083, %v2307_v32  }
  0x6c   : > { %458 = vperm.xlu1 %2088, %v2223_v13  }
  0x6d   : > { %1295 = vperm.xlu0 %2083, %v2175_v1  }
  0x70   : > { %2089 = vset.pattern.permute.xlu1 %v3365_v15 }
  0x71   : > { %1310 = vperm.xlu0 %2083, %v2191_v5   ;;  %490 = vperm.xlu1 %2089, %v2258_v21  }
  0x75   : > { %1320 = vperm.xlu0 %2083, %v2199_v7   ;;  %494 = vperm.xlu1 %2089, %v2267_v23  }
  0x79   : > { %1475 = vperm.xlu0 %2083, %v2258_v21   ;;  %502 = vperm.xlu1 %2089, %v2275_v25  }
  0x7d   : > { %1490 = vperm.xlu0 %2083, %v2275_v25   ;;  %510 = vperm.xlu1 %2089, %v2283_v27  }
  0x81   : > { %1500 = vperm.xlu0 %2083, %v2283_v27   ;;  %2090 = vset.pattern.permute.xlu1 %v3367_v0 }
  0x82   : > { %551 = vperm.xlu1 %2090, %v539_v33  }
  0x85   : > { %1510 = vperm.xlu0 %2083, %v2326_v34  }
  0x86   : > { %561 = vperm.xlu1 %2090, %v2329_v35  }
  0x89   : > { %1664 = vperm.xlu0 %2083, %v2329_v35  }
  0x8a   : > { %566 = vperm.xlu1 %2090, %v542_v36  }
  0x8d   : > { %1679 = vperm.xlu0 %2083, %v2336_v37  }
  0x8e   : > { %576 = vperm.xlu1 %2090, %v2336_v37  }
  0x91   : > { %1689 = vperm.xlu0 %2083, %v2340_v38  }
  0x92   : > { %586 = vperm.xlu1 %2090, %v2340_v38  }
  0x93   : > { %v2345_v39 = vpop.permute.xlu1 %192 }
  0x94   : > { %v2347_v40 = vpop.permute.xlu0 %182 }
  0x95   : > { %2109 = vset.pattern.permute.xlu0 %v3369_v10 }
  0x96   : > { %245 = vperm.xlu0 %2109, %v2178_v2   ;;  %2091 = vset.pattern.permute.xlu1 %v3369_v10 }
  0x97   : > { %v2352_v41 = vpop.permute.xlu1 %197  ;;  %618 = vperm.xlu1 %2091, %v2228_v14  }
  0x98   : > { %v2355_v42 = vpop.permute.xlu0 %187 }
  0x9a   : > { %257 = vperm.xlu0 %2109, %v2183_v3  }
  0x9b   : > { %v2358_v43 = vpop.permute.xlu1 %207  ;;  %622 = vperm.xlu1 %2091, %v2329_v35  }
  0x9c   : > { %v2361_v44 = vpop.permute.xlu0 %202 }
  0x9e   : > { %265 = vperm.xlu0 %2109, %v2191_v5  }
  0x9f   : > { %v2364_v45 = vpop.permute.xlu1 %217  ;;  %630 = vperm.xlu1 %2091, %v2233_v16  }
  0xa0   : > { %v2367_v46 = vpop.permute.xlu0 %212 }
  0xa2   : > { %273 = vperm.xlu0 %2109, %v2199_v7  }
  0xa3   : > { %638 = vperm.xlu1 %2091, %v2238_v17  }
  0xa4   : > { %v2371_v47 = vpop.permute.xlu0 %367  ;;  %v2373_v48 = vpop.permute.xlu1 %249 }
  0xa5   : > { %3374 = vst [vmem:[#allocation2_spill] sm:$0xff] %v2371_v47 }
  0xa6   : > { %434 = vperm.xlu0 %2109, %v2258_v21  }
  0xa7   : > { %2092 = vset.pattern.permute.xlu1 %v3365_v15 }
  0xa8   : > { %v2377_v49 = vpop.permute.xlu0 %382  ;;  %v2379_v50 = vpop.permute.xlu1 %253  ;;  %670 = vperm.xlu1 %2092, %v539_v33  }
  0xa9   : > { %3375 = vst [vmem:[#allocation3_spill] sm:$0xff] %v2377_v49  ;;  %v2478_v49 = vld [vmem:[%s2172_s17 + $0x181] sm:$0xff] }
  0xaa   : > { %446 = vperm.xlu0 %2109, %v2275_v25  }
  0xac   : > { %v2382_v51 = vpop.permute.xlu0 %392  ;;  %v2384_v52 = vpop.permute.xlu1 %261  ;;  %678 = vperm.xlu1 %2092, %v2329_v35  }
  0xad   : > { %3376 = vst [vmem:[#allocation4_spill] sm:$0xff] %v2382_v51 }
  0xae   : > { %454 = vperm.xlu0 %2109, %v2283_v27  }
  0xb0   : > { %v2388_v53 = vpop.permute.xlu0 %402  ;;  %v2390_v54 = vpop.permute.xlu1 %269  ;;  %682 = vperm.xlu1 %2092, %v542_v36  }
  0xb1   : > { %3377 = vst [vmem:[#allocation5_spill] sm:$0xff] %v2388_v53  ;;  %v2469_v53 = vld [vmem:[%s2172_s17 + $0x161] sm:$0xff] }
  0xb2   : > { %614 = vperm.xlu0 %2109, %v539_v33   ;;  %v1987_v33 = vld [vmem:[%s2172_s17 + $0x160] sm:$0xff] }
  0xb4   : > { %v2392_v55 = vpop.permute.xlu0 %556  ;;  %690 = vperm.xlu1 %2092, %v2336_v37  }
  0xb5   : > { %3378 = vst [vmem:[#allocation6_spill] sm:$0xff] %v2392_v55  ;;  %v2395_v56 = vpop.permute.xlu1 %301 }
  0xb6   : > { %3379 = vst [vmem:[#allocation7_spill] sm:$0xff] %v2395_v56  ;;  %626 = vperm.xlu0 %2109, %v542_v36   ;;  %v2453_v56 = vld [vmem:[%s2172_s17 + $0x220] sm:$0xff] }
  0xb8   : > { %v2397_v57 = vpop.permute.xlu0 %571  ;;  %698 = vperm.xlu1 %2092, %v2340_v38  }
  0xb9   : > { %3380 = vst [vmem:[#allocation8_spill] sm:$0xff] %v2397_v57  ;;  %v2400_v58 = vpop.permute.xlu1 %309 }
  0xba   : > { %3381 = vst [vmem:[#allocation9_spill] sm:$0xff] %v2400_v58  ;;  %634 = vperm.xlu0 %2109, %v2336_v37  }
  0xbc   : > { %v2404_v60 = vpop.permute.xlu0 %581  ;;  %2093 = vset.pattern.permute.xlu1 %v3367_v0  ;;  %v1989_v0 = vld [vmem:[%s2172_s17 + $0x180] sm:$0xff] }
  0xbd   : > { %3382 = vst [vmem:[#allocation10_spill] sm:$0xff] %v2404_v60  ;;  %741 = vperm.xlu1 %2093, %v1984_v59   ;;  %v2407_v61 = vpop.permute.xlu1 %313  ;;  %v3391_v60 = vmov 1  }
  0xbe   : > { %3383 = vst [vmem:[#allocation11_spill] sm:$0xff] %v2407_v61  ;;  %642 = vperm.xlu0 %2109, %v2340_v38  }
  0xc0   : > { %v2411_v63 = vpop.permute.xlu0 %736 }
  0xc1   : > { %3384 = vst [vmem:[#allocation12_spill] sm:$0xff] %v2411_v63  ;;  %746 = vperm.xlu1 %2093, %v1985_v62   ;;  %v2413_v2 = vpop.permute.xlu1 %321  ;;  %v2426_v63 = vld [vmem:[%s2172_s17 + $0x1b0] sm:$0xff] }
  0xc2   : > { %3385 = vst [vmem:[#allocation13_spill] sm:$0xff] %v2413_v2  ;;  %803 = vperm.xlu0 %2109, %v1984_v59  }
  0xc4   : > { %v2416_v36 = vpop.permute.xlu0 %751 }
  0xc5   : > { %3386 = vst [vmem:[#allocation14_spill] sm:$0xff] %v2416_v36  ;;  %756 = vperm.xlu1 %2093, %v1987_v33   ;;  %v2418_v15 = vpop.permute.xlu1 %329  ;;  %v2436_v36 = vld [vmem:[%s2172_s17 + $0x1e0] sm:$0xff] }
  0xc6   : > { %3387 = vst [vmem:[#allocation15_spill] sm:$0xff] %v2418_v15  ;;  %815 = vperm.xlu0 %2109, %v1987_v33  }
  0xc8   : > { %v2421_v10 = vpop.permute.xlu0 %761 }
  0xc9   : > { %3388 = vst [vmem:[#allocation16_spill] sm:$0xff] %v2421_v10  ;;  %766 = vperm.xlu1 %2093, %v1989_v0  }
  0xca   : > { %823 = vperm.xlu0 %2109, %v1989_v0   ;;  %v2423_v61 = vpop.permute.xlu1 %372 }
  0xcb   : > { %3389 = vst [vmem:[#allocation17_spill] sm:$0xff] %v2423_v61 }
  0xcc   : > { %v2428_v2 = vpop.permute.xlu0 %771 }
  0xcd   : > { %3390 = vst [vmem:[#allocation18_spill] sm:$0xff] %v2428_v2  ;;  %2094 = vset.pattern.permute.xlu1 %v3391_v60  ;;  %v2444_v2 = vld [vmem:[%s2172_s17 + $0x200] sm:$0xff] }
  0xce   : > { %984 = vperm.xlu0 %2109, %v2426_v63   ;;  %799 = vperm.xlu1 %2094, %v2243_v18   ;;  %v2433_v15 = vpop.permute.xlu1 %377 }
  0xcf   : > { %3392 = vst [vmem:[#allocation19_spill] sm:$0xff] %v2433_v15 }
  0xd0   : > { %v2438_v10 = vpop.permute.xlu0 %926 }
  0xd1   : > { %3393 = vst [vmem:[#allocation20_spill] sm:$0xff] %v2438_v10 }
  0xd2   : > { %996 = vperm.xlu0 %2109, %v2436_v36   ;;  %807 = vperm.xlu1 %2094, %v1985_v62   ;;  %v2441_v61 = vpop.permute.xlu1 %387 }
  0xd3   : > { %3394 = vst [vmem:[#allocation21_spill] sm:$0xff] %v2441_v61  ;;  %v2460_v61 = vld [vmem:[%s2172_s17 + $0x131] sm:$0xff] }
  0xd4   : > { %v2446_v57 = vpop.permute.xlu0 %941 }
  0xd5   : > { %3395 = vst [vmem:[#allocation22_spill] sm:$0xff] %v2446_v57 }
  0xd6   : > { %1004 = vperm.xlu0 %2109, %v2444_v2   ;;  %811 = vperm.xlu1 %2094, %v2248_v19   ;;  %v2450_v15 = vpop.permute.xlu1 %397 }
  0xd7   : > { %3396 = vst [vmem:[#allocation23_spill] sm:$0xff] %v2450_v15 }
  0xd8   : > { %v2455_v10 = vpop.permute.xlu0 %951 }
  0xd9   : > { %3397 = vst [vmem:[#allocation24_spill] sm:$0xff] %v2455_v10  ;;  %v3402_v10 = vmov 2  }
  0xda   : > { %1012 = vperm.xlu0 %2109, %v2453_v56   ;;  %819 = vperm.xlu1 %2094, %v2253_v20  }
  0xdb   : > { %v2462_v55 = vpop.permute.xlu1 %430 }
  0xdc   : > { %3398 = vst [vmem:[#allocation25_spill] sm:$0xff] %v2462_v55  ;;  %v2464_v57 = vpop.permute.xlu0 %1105 }
  0xdd   : > { %3399 = vst [vmem:[#allocation26_spill] sm:$0xff] %v2464_v57 }
  0xde   : > { %1172 = vperm.xlu0 %2109, %v2460_v61   ;;  %827 = vperm.xlu1 %2094, %v2261_v22  }
  0xdf   : > { %v2471_v15 = vpop.permute.xlu1 %438 }
  0xe0   : > { %3400 = vst [vmem:[#allocation27_spill] sm:$0xff] %v2471_v15  ;;  %v2473_v51 = vpop.permute.xlu0 %1120 }
  0xe1   : > { %3401 = vst [vmem:[#allocation28_spill] sm:$0xff] %v2473_v51 }
  0xe2   : > { %1184 = vperm.xlu0 %2109, %v2469_v53   ;;  %2095 = vset.pattern.permute.xlu1 %v3402_v10 }
  0xe3   : > { %859 = vperm.xlu1 %2095, %v1984_v59   ;;  %v2480_v55 = vpop.permute.xlu1 %442 }
  0xe4   : > { %3403 = vst [vmem:[#allocation29_spill] sm:$0xff] %v2480_v55  ;;  %v2482_v57 = vpop.permute.xlu0 %1130 }
  0xe5   : > { %3404 = vst [vmem:[#allocation30_spill] sm:$0xff] %v2482_v57 }
  0xe6   : > { %1192 = vperm.xlu0 %2109, %v2478_v49  }
  0xe7   : > { %863 = vperm.xlu1 %2095, %v1985_v62   ;;  %v2485_v47 = vpop.permute.xlu1 %450  ;;  %v2501_v62 = vld [vmem:[%s2172_s17 + $0x80] sm:$0xff] }
  0xe8   : > { %3405 = vst [vmem:[#allocation31_spill] sm:$0xff] %v2485_v47  ;;  %v2487_v15 = vpop.permute.xlu0 %1140 }
  0xe9   : > { %3406 = vst [vmem:[#allocation32_spill] sm:$0xff] %v2487_v15  ;;  %v3411_v15 = vmov 0  }
  0xea   : > { %1353 = vperm.xlu0 %2109, %v2186_v4  }
  0xeb   : > { %871 = vperm.xlu1 %2095, %v1987_v33   ;;  %v2490_v51 = vpop.permute.xlu1 %458 }
  0xec   : > { %3407 = vst [vmem:[#allocation33_spill] sm:$0xff] %v2490_v51  ;;  %v2492_v58 = vpop.permute.xlu0 %1295 }
  0xed   : > { %3408 = vst [vmem:[#allocation34_spill] sm:$0xff] %v2492_v58  ;;  %v1999_v58 = vld [vmem:[%s2172_s17 + $0x1d0] sm:$0xff] }
  0xee   : > { %1365 = vperm.xlu0 %2109, %v2194_v6  }
  0xef   : > { %879 = vperm.xlu1 %2095, %v1989_v0  }
  0xf0   : > { %v2495_v59 = vpop.permute.xlu0 %1310  ;;  %v2497_v57 = vpop.permute.xlu1 %490 }
  0xf1   : > { %3409 = vst [vmem:[#allocation35_spill] sm:$0xff] %v2495_v59  ;;  %3410 = vst [vmem:[#allocation36_spill] sm:$0xff] %v2497_v57 }
  0xf2   : > { %1373 = vperm.xlu0 %2109, %v2202_v8  }
  0xf3   : > { %2096 = vset.pattern.permute.xlu1 %v3411_v15 }
  0xf4   : > { %v2504_v47 = vpop.permute.xlu0 %1320  ;;  %921 = vperm.xlu1 %2096, %v2426_v63   ;;  %v2507_v33 = vpop.permute.xlu1 %494 }
  0xf5   : > { %3412 = vst [vmem:[#allocation37_spill] sm:$0xff] %v2504_v47  ;;  %3413 = vst [vmem:[#allocation38_spill] sm:$0xff] %v2507_v33 }
  0xf6   : > { %1381 = vperm.xlu0 %2109, %v2501_v62  }
  0xf8   : > { %v2511_v0 = vpop.permute.xlu0 %1475  ;;  %931 = vperm.xlu1 %2096, %v1999_v58   ;;  %v2513_v59 = vpop.permute.xlu1 %502 }
  0xf9   : > { %3414 = vst [vmem:[#allocation39_spill] sm:$0xff] %v2511_v0  ;;  %3415 = vst [vmem:[#allocation40_spill] sm:$0xff] %v2513_v59 }
  0xfa   : > { %1542 = vperm.xlu0 %2109, %v2267_v23  }
  0xfc   : > { %v2516_v57 = vpop.permute.xlu0 %1490  ;;  %936 = vperm.xlu1 %2096, %v2436_v36   ;;  %v2519_v51 = vpop.permute.xlu1 %510 }
  0xfd   : > { %3416 = vst [vmem:[#allocation41_spill] sm:$0xff] %v2516_v57  ;;  %3417 = vst [vmem:[#allocation42_spill] sm:$0xff] %v2519_v51 }
  0xfe   : > { %1554 = vperm.xlu0 %2109, %v2218_v12  }
 0x100   : > { %v2522_v47 = vpop.permute.xlu0 %1500  ;;  %946 = vperm.xlu1 %2096, %v2444_v2  }
 0x101   : > { %3418 = vst [vmem:[#allocation43_spill] sm:$0xff] %v2522_v47  ;;  %v2525_v33 = vpop.permute.xlu1 %551 }
 0x102   : > { %3419 = vst [vmem:[#allocation44_spill] sm:$0xff] %v2525_v33  ;;  %1562 = vperm.xlu0 %2109, %v2223_v13  }
 0x104   : > { %v2528_v0 = vpop.permute.xlu0 %1510  ;;  %956 = vperm.xlu1 %2096, %v2453_v56  }
 0x105   : > { %3420 = vst [vmem:[#allocation45_spill] sm:$0xff] %v2528_v0  ;;  %v2531_v57 = vpop.permute.xlu1 %561 }
 0x106   : > { %3421 = vst [vmem:[#allocation46_spill] sm:$0xff] %v2531_v57  ;;  %1722 = vperm.xlu0 %2109, %v2228_v14   ;;  %v2547_v57 = vld [vmem:[%s2172_s17 + $0x81] sm:$0xff] }
 0x107   : > { %3426 = vst [vmem:[#allocation51_spill] sm:$0xff] %v2547_v57 }
 0x108   : > { %v2534_v51 = vpop.permute.xlu0 %1664  ;;  %2097 = vset.pattern.permute.xlu1 %v3391_v60 }
 0x109   : > { %3422 = vst [vmem:[#allocation47_spill] sm:$0xff] %v2534_v51  ;;  %988 = vperm.xlu1 %2097, %v2270_v24   ;;  %v2538_v47 = vpop.permute.xlu1 %566 }
 0x10a   : > { %3423 = vst [vmem:[#allocation48_spill] sm:$0xff] %v2538_v47  ;;  %1734 = vperm.xlu0 %2109, %v2233_v16  }
 0x10c   : > { %v2541_v59 = vpop.permute.xlu0 %1679 }
 0x10d   : > { %3424 = vst [vmem:[#allocation49_spill] sm:$0xff] %v2541_v59  ;;  %992 = vperm.xlu1 %2097, %v1999_v58   ;;  %v2543_v0 = vpop.permute.xlu1 %576 }
 0x10e   : > { %3425 = vst [vmem:[#allocation50_spill] sm:$0xff] %v2543_v0  ;;  %1742 = vperm.xlu0 %2109, %v2238_v17  }
 0x110   : > { %v2549_v33 = vpop.permute.xlu0 %1689 }
 0x111   : > { %3427 = vst [vmem:[#allocation52_spill] sm:$0xff] %v2549_v33  ;;  %1000 = vperm.xlu1 %2097, %v2278_v26   ;;  %v2552_v51 = vpop.permute.xlu1 %586 }
 0x112   : > { %3428 = vst [vmem:[#allocation53_spill] sm:$0xff] %v2552_v51  ;;  %1750 = vperm.xlu0 %2109, %v2547_v57  }
 0x115   : > { %v2555_v47 = vpop.permute.xlu0 %245  ;;  %1008 = vperm.xlu1 %2097, %v2286_v28  }
 0x116   : > { %2111 = vset.pattern.permute.xlu0 %v3402_v10  ;;  %v2559_v59 = vpop.permute.xlu1 %618 }
 0x117   : > { %3429 = vst [vmem:[#allocation54_spill] sm:$0xff] %v2559_v59  ;;  %305 = vperm.xlu0 %2111, %v2186_v4  }
 0x119   : > { %v2562_v0 = vpop.permute.xlu0 %257  ;;  %2098 = vset.pattern.permute.xlu1 %v3402_v10 }
 0x11a   : > { %1040 = vperm.xlu1 %2098, %v2426_v63   ;;  %v2566_v33 = vpop.permute.xlu1 %622 }
 0x11b   : > { %317 = vperm.xlu0 %2111, %v2194_v6  }
 0x11d   : > { %v2569_v57 = vpop.permute.xlu0 %265 }
 0x11e   : > { %1048 = vperm.xlu1 %2098, %v1999_v58   ;;  %v2571_v51 = vpop.permute.xlu1 %630 }
 0x11f   : > { %3430 = vst [vmem:[#allocation55_spill] sm:$0xff] %v2571_v51  ;;  %325 = vperm.xlu0 %2111, %v2202_v8  }
 0x121   : > { %v2574_v59 = vpop.permute.xlu0 %273 }
 0x122   : > { %1052 = vperm.xlu1 %2098, %v2436_v36   ;;  %v2577_v55 = vpop.permute.xlu1 %638 }
 0x123   : > { %3431 = vst [vmem:[#allocation56_spill] sm:$0xff] %v2577_v55  ;;  %486 = vperm.xlu0 %2111, %v2207_v9  }
 0x125   : > { %v2580_v63 = vpop.permute.xlu0 %434 }
 0x126   : > { %1060 = vperm.xlu1 %2098, %v2444_v2   ;;  %v2013_v2 = vld [vmem:[%s2172_s17 + $0x141] sm:$0xff] }
 0x127   : > { %498 = vperm.xlu0 %2111, %v2213_v11   ;;  %v2584_v58 = vpop.permute.xlu1 %670 }
 0x128   : > { %3432 = vst [vmem:[#allocation57_spill] sm:$0xff] %v2584_v58 }
 0x129   : > { %v2586_v51 = vpop.permute.xlu0 %446 }
 0x12a   : > { %1068 = vperm.xlu1 %2098, %v2453_v56  }
 0x12b   : > { %506 = vperm.xlu0 %2111, %v2218_v12   ;;  %v2590_v36 = vpop.permute.xlu1 %678 }
 0x12c   : > { %3433 = vst [vmem:[#allocation58_spill] sm:$0xff] %v2590_v36 }
 0x12d   : > { %v2592_v55 = vpop.permute.xlu0 %454 }
 0x12e   : > { %3434 = vst [vmem:[#allocation59_spill] sm:$0xff] %v2592_v55  ;;  %2099 = vset.pattern.permute.xlu1 %v3411_v15 }
 0x12f   : > { %514 = vperm.xlu0 %2111, %v2223_v13   ;;  %1110 = vperm.xlu1 %2099, %v2460_v61   ;;  %v2597_v9 = vpop.permute.xlu1 %682 }
 0x130   : > { %3435 = vst [vmem:[#allocation60_spill] sm:$0xff] %v2597_v9 }
 0x131   : > { %v2599_v11 = vpop.permute.xlu0 %614 }
 0x133   : > { %674 = vperm.xlu0 %2111, %v2228_v14   ;;  %1115 = vperm.xlu1 %2099, %v2013_v2   ;;  %v2603_v56 = vpop.permute.xlu1 %690 }
 0x134   : > { %3436 = vst [vmem:[#allocation61_spill] sm:$0xff] %v2603_v56 }
 0x135   : > { %v2605_v58 = vpop.permute.xlu0 %626 }
 0x137   : > { %686 = vperm.xlu0 %2111, %v2233_v16   ;;  %1125 = vperm.xlu1 %2099, %v2469_v53   ;;  %v2609_v36 = vpop.permute.xlu1 %698 }
 0x138   : > { %3437 = vst [vmem:[#allocation62_spill] sm:$0xff] %v2609_v36 }
 0x139   : > { %v2611_v55 = vpop.permute.xlu0 %634 }
 0x13b   : > { %694 = vperm.xlu0 %2111, %v2238_v17   ;;  %1135 = vperm.xlu1 %2099, %v2478_v49  }
 0x13c   : > { %v2615_v9 = vpop.permute.xlu1 %741 }
 0x13d   : > { %v2617_v14 = vpop.permute.xlu0 %642 }
 0x13e   : > { %3438 = vst [vmem:[#allocation63_spill] sm:$0xff] %v2617_v14 }
 0x13f   : > { %855 = vperm.xlu0 %2111, %v2243_v18   ;;  %2100 = vset.pattern.permute.xlu1 %v3391_v60 }
 0x140   : > { %1168 = vperm.xlu1 %2100, %v2291_v29   ;;  %v2622_v16 = vpop.permute.xlu1 %746 }
 0x141   : > { %v2624_v56 = vpop.permute.xlu0 %803 }
 0x142   : > { %3439 = vst [vmem:[#allocation64_spill] sm:$0xff] %v2624_v56 }
 0x143   : > { %867 = vperm.xlu0 %2111, %v2248_v19  }
 0x144   : > { %1176 = vperm.xlu1 %2100, %v2013_v2   ;;  %v2627_v17 = vpop.permute.xlu1 %756 }
 0x145   : > { %3440 = vst [vmem:[#allocation65_spill] sm:$0xff] %v2627_v17  ;;  %v2629_v36 = vpop.permute.xlu0 %815  ;;  %v3510_v17 = vld [vmem:[#allocation24_spill] sm:$0xff] }
 0x146   : > { %3441 = vst [vmem:[#allocation66_spill] sm:$0xff] %v2629_v36 }
 0x147   : > { %875 = vperm.xlu0 %2111, %v2253_v20  }
 0x148   : > { %1180 = vperm.xlu1 %2100, %v2297_v30   ;;  %v2633_v18 = vpop.permute.xlu1 %766 }
 0x149   : > { %3442 = vst [vmem:[#allocation67_spill] sm:$0xff] %v2633_v18  ;;  %v2635_v14 = vpop.permute.xlu0 %823 }
 0x14a   : > { %3443 = vst [vmem:[#allocation68_spill] sm:$0xff] %v2635_v14 }
 0x14b   : > { %883 = vperm.xlu0 %2111, %v2261_v22  }
 0x14c   : > { %1188 = vperm.xlu1 %2100, %v2302_v31  }
 0x14d   : > { %v2639_v56 = vpop.permute.xlu0 %984  ;;  %v2641_v19 = vpop.permute.xlu1 %799 }
 0x14e   : > { %3444 = vst [vmem:[#allocation69_spill] sm:$0xff] %v2639_v56  ;;  %3445 = vst [vmem:[#allocation70_spill] sm:$0xff] %v2641_v19 }
 0x14f   : > { %1044 = vperm.xlu0 %2111, %v2270_v24  }
 0x150   : > { %1196 = vperm.xlu1 %2100, %v2307_v32  }
 0x151   : > { %v2645_v36 = vpop.permute.xlu0 %996  ;;  %v2647_v20 = vpop.permute.xlu1 %807 }
 0x152   : > { %3446 = vst [vmem:[#allocation71_spill] sm:$0xff] %v2645_v36  ;;  %3447 = vst [vmem:[#allocation72_spill] sm:$0xff] %v2647_v20  ;;  %v3507_v20 = vld [vmem:[#allocation21_spill] sm:$0xff] }
 0x153   : > { %1056 = vperm.xlu0 %2111, %v2278_v26  }
 0x154   : > { %2101 = vset.pattern.permute.xlu1 %v3402_v10 }
 0x155   : > { %v2651_v14 = vpop.permute.xlu0 %1004  ;;  %1228 = vperm.xlu1 %2101, %v2460_v61   ;;  %v2654_v22 = vpop.permute.xlu1 %811 }
 0x156   : > { %3448 = vst [vmem:[#allocation73_spill] sm:$0xff] %v2651_v14  ;;  %3449 = vst [vmem:[#allocation74_spill] sm:$0xff] %v2654_v22  ;;  %v2872_v14 = vld [vmem:[%s2172_s17 + $0xc0] sm:$0xff] }
 0x157   : > { %1064 = vperm.xlu0 %2111, %v2286_v28  }
 0x159   : > { %v2657_v56 = vpop.permute.xlu0 %1012  ;;  %1232 = vperm.xlu1 %2101, %v2013_v2   ;;  %v2659_v24 = vpop.permute.xlu1 %819 }
 0x15a   : > { %3450 = vst [vmem:[#allocation75_spill] sm:$0xff] %v2657_v56  ;;  %3451 = vst [vmem:[#allocation76_spill] sm:$0xff] %v2659_v24 }
 0x15b   : > { %1224 = vperm.xlu0 %2111, %v2291_v29  }
 0x15d   : > { %v2662_v36 = vpop.permute.xlu0 %1172  ;;  %1240 = vperm.xlu1 %2101, %v2469_v53   ;;  %v2665_v26 = vpop.permute.xlu1 %827 }
 0x15e   : > { %3452 = vst [vmem:[#allocation77_spill] sm:$0xff] %v2662_v36  ;;  %3453 = vst [vmem:[#allocation78_spill] sm:$0xff] %v2665_v26  ;;  %v3485_v26 = vld [vmem:[#allocation5_spill] sm:$0xff] }
 0x15f   : > { %1236 = vperm.xlu0 %2111, %v2297_v30  }
 0x161   : > { %v2668_v61 = vpop.permute.xlu0 %1184  ;;  %1248 = vperm.xlu1 %2101, %v2478_v49  }
 0x162   : > { %3454 = vst [vmem:[#allocation79_spill] sm:$0xff] %v2668_v61  ;;  %v2671_v28 = vpop.permute.xlu1 %859 }
 0x163   : > { %3455 = vst [vmem:[#allocation80_spill] sm:$0xff] %v2671_v28  ;;  %1244 = vperm.xlu0 %2111, %v2302_v31  }
 0x165   : > { %v2674_v2 = vpop.permute.xlu0 %1192  ;;  %2102 = vset.pattern.permute.xlu1 %v3411_v15 }
 0x166   : > { %3456 = vst [vmem:[#allocation81_spill] sm:$0xff] %v2674_v2  ;;  %1290 = vperm.xlu1 %2102, %v2186_v4   ;;  %v2678_v29 = vpop.permute.xlu1 %863 }
 0x167   : > { %3457 = vst [vmem:[#allocation82_spill] sm:$0xff] %v2678_v29  ;;  %1252 = vperm.xlu0 %2111, %v2307_v32  }
 0x169   : > { %v2681_v53 = vpop.permute.xlu0 %1353 }
 0x16a   : > { %3458 = vst [vmem:[#allocation83_spill] sm:$0xff] %v2681_v53  ;;  %1300 = vperm.xlu1 %2102, %v2183_v3   ;;  %v2684_v30 = vpop.permute.xlu1 %871 }
 0x16b   : > { %3459 = vst [vmem:[#allocation84_spill] sm:$0xff] %v2684_v30  ;;  %1413 = vperm.xlu0 %2111, %v2175_v1  }
 0x16d   : > { %v2687_v49 = vpop.permute.xlu0 %1365 }
 0x16e   : > { %3460 = vst [vmem:[#allocation85_spill] sm:$0xff] %v2687_v49  ;;  %1305 = vperm.xlu1 %2102, %v2194_v6   ;;  %v2690_v31 = vpop.permute.xlu1 %879 }
 0x16f   : > { %3461 = vst [vmem:[#allocation86_spill] sm:$0xff] %v2690_v31  ;;  %1425 = vperm.xlu0 %2111, %v2191_v5  }
 0x171   : > { %v2693_v2 = vpop.permute.xlu0 %1373 }
 0x172   : > { %3462 = vst [vmem:[#allocation87_spill] sm:$0xff] %v2693_v2  ;;  %1315 = vperm.xlu1 %2102, %v2202_v8  }
 0x173   : > { %1433 = vperm.xlu0 %2111, %v2199_v7   ;;  %v2697_v32 = vpop.permute.xlu1 %921 }
 0x174   : > { %3463 = vst [vmem:[#allocation88_spill] sm:$0xff] %v2697_v32  ;;  %v3505_v32 = vld [vmem:[#allocation20_spill] sm:$0xff] }
 0x175   : > { %v2699_v53 = vpop.permute.xlu0 %1381 }
 0x176   : > { %3464 = vst [vmem:[#allocation89_spill] sm:$0xff] %v2699_v53  ;;  %1325 = vperm.xlu1 %2102, %v2501_v62  }
 0x177   : > { %1594 = vperm.xlu0 %2111, %v2258_v21   ;;  %v2703_v49 = vpop.permute.xlu1 %931 }
 0x178   : > { %3465 = vst [vmem:[#allocation90_spill] sm:$0xff] %v2703_v49 }
 0x179   : > { %v2705_v61 = vpop.permute.xlu0 %1542 }
 0x17a   : > { %3466 = vst [vmem:[#allocation91_spill] sm:$0xff] %v2705_v61  ;;  %2103 = vset.pattern.permute.xlu1 %v3391_v60 }
 0x17b   : > { %1606 = vperm.xlu0 %2111, %v2275_v25   ;;  %1357 = vperm.xlu1 %2103, %v2175_v1   ;;  %v2710_v2 = vpop.permute.xlu1 %936 }
 0x17c   : > { %3467 = vst [vmem:[#allocation92_spill] sm:$0xff] %v2710_v2  ;;  %v3502_v2 = vld [vmem:[#allocation18_spill] sm:$0xff] }
 0x17d   : > { %v2712_v31 = vpop.permute.xlu0 %1554 }
 0x17e   : > { %3468 = vst [vmem:[#allocation93_spill] sm:$0xff] %v2712_v31 }
 0x17f   : > { %1614 = vperm.xlu0 %2111, %v2283_v27   ;;  %1361 = vperm.xlu1 %2103, %v2183_v3   ;;  %v2716_v53 = vpop.permute.xlu1 %946 }
 0x180   : > { %3469 = vst [vmem:[#allocation94_spill] sm:$0xff] %v2716_v53 }
 0x181   : > { %v2718_v30 = vpop.permute.xlu0 %1562 }
 0x182   : > { %3470 = vst [vmem:[#allocation95_spill] sm:$0xff] %v2718_v30 }
 0x183   : > { %1622 = vperm.xlu0 %2111, %v2326_v34   ;;  %1369 = vperm.xlu1 %2103, %v2191_v5   ;;  %v2722_v61 = vpop.permute.xlu1 %956 }
 0x184   : > { %3471 = vst [vmem:[#allocation96_spill] sm:$0xff] %v2722_v61 }
 0x185   : > { %v2724_v49 = vpop.permute.xlu0 %1722 }
 0x186   : > { %3472 = vst [vmem:[#allocation97_spill] sm:$0xff] %v2724_v49 }
 0x187   : > { %1782 = vperm.xlu0 %2111, %v2329_v35   ;;  %1377 = vperm.xlu1 %2103, %v2199_v7  }
 0x188   : > { %v2728_v1 = vpop.permute.xlu1 %988 }
 0x189   : > { %3473 = vst [vmem:[#allocation98_spill] sm:$0xff] %v2728_v1  ;;  %v2730_v27 = vpop.permute.xlu0 %1734  ;;  %v3483_v1 = vld [vmem:[#allocation3_spill] sm:$0xff] }
 0x18a   : > { %3474 = vst [vmem:[#allocation99_spill] sm:$0xff] %v2730_v27 }
 0x18b   : > { %1794 = vperm.xlu0 %2111, %v2336_v37   ;;  %2104 = vset.pattern.permute.xlu1 %v3402_v10 }
 0x18c   : > { %1409 = vperm.xlu1 %2104, %v2186_v4   ;;  %v2735_v34 = vpop.permute.xlu1 %992  ;;  %v2751_v4 = vld [vmem:[%s3362_s1 + $0x1] ss:$0 sm:$0xff] }
 0x18d   : > { %3475 = vst [vmem:[#allocation100_spill] sm:$0xff] %v2735_v34  ;;  %v2737_v5 = vpop.permute.xlu0 %1742  ;;  %v284_v30 = vmul.f32 %v2751_v4, %v2379_v50  ;;  %v286_v31 = vmul.f32 %v2751_v4, %v2384_v52  ;;  %v285_v52 = vmul.f32 %v2751_v4, %v2562_v0  ;;  %v2803_v0 = vld [vmem:[%s3362_s1 + $0x6] ss:$0 sm:$0xff] }
 0x18e   : > { %3476 = vst [vmem:[#allocation101_spill] sm:$0xff] %v2737_v5 }
 0x18f   : > { %1802 = vperm.xlu0 %2111, %v2340_v38   ;;  %v1958_v38 = vld [vmem:[%s3362_s1] ss:$0 sm:$0xff] }
 0x190   : > { %1417 = vperm.xlu1 %2104, %v2183_v3   ;;  %v2741_v35 = vpop.permute.xlu1 %1000  ;;  %v226_v3 = vmul.f32 %v1958_v38, %v2347_v40  ;;  %v227_v5 = vmul.f32 %v1958_v38, %v2355_v42  ;;  %v230_v49 = vmul.f32 %v1958_v38, %v2361_v44  ;;  %v228_v42 = vmul.f32 %v1958_v38, %v2345_v39  ;;  %v2778_v44 = vld [vmem:[%s3362_s1 + $0x2] ss:$0 sm:$0xff]  ;;  %v1972_v39 = vld [vmem:[%s3362_s1 + $0x3] ss:$0 sm:$0xff] }
 0x191   : > { %3477 = vst [vmem:[#allocation102_spill] sm:$0xff] %v2741_v35  ;;  %v2743_v7 = vpop.permute.xlu0 %1750  ;;  %v232_v35 = vmul.f32 %v1958_v38, %v2367_v46  ;;  %v2782_v50 = vmul.f32 %v1958_v38, %v2364_v45  ;;  %v414_v61 = vmul.f32 %v1972_v39, %v3483_v1  ;;  %v2798_v56 = vmul.f32 %v1972_v39, %v3485_v26 }
 0x192   : > { %3478 = vst [vmem:[#allocation103_spill] sm:$0xff] %v2743_v7  ;;  %v283_v7 = vmul.f32 %v2751_v4, %v2373_v48  ;;  %v229_v48 = vmul.f32 %v1958_v38, %v2352_v41  ;;  %v3481_v41 = vld [vmem:[#allocation9_spill] sm:$0xff]  ;;  %v294_v45 = vadd.f32 %v286_v31, %v230_v49  ;;  %v3489_v31 = vld [vmem:[#allocation8_spill] sm:$0xff]  ;;  %v415_v18 = vmul.f32 %v1972_v39, %v3507_v20 }
 0x193   : > { %v340_v46 = vmul.f32 %v2778_v44, %v3481_v41  ;;  %v2817_v26 = vmul.f32 %v2803_v0, %v3489_v31  ;;  %v2835_v31 = vld [vmem:[%s3362_s1 + $0xc] ss:$0 sm:$0xff]  ;;  %v3512_v20 = vld [vmem:[#allocation25_spill] sm:$0xff] }
 0x194   : > { %1421 = vperm.xlu1 %2104, %v2194_v6   ;;  %v2746_v27 = vpop.permute.xlu1 %1008  ;;  %v282_v6 = vmul.f32 %v2751_v4, %v2555_v47  ;;  %v231_v47 = vmul.f32 %v1958_v38, %v2358_v43  ;;  %v292_v43 = vadd.f32 %v284_v30, %v228_v42  ;;  %v3484_v38 = vld [vmem:[#allocation4_spill] sm:$0xff]  ;;  %v3488_v30 = vld [vmem:[#allocation7_spill] sm:$0xff]  ;;  %v3490_v42 = vld [vmem:[#allocation10_spill] sm:$0xff] }
 0x195   : > { %3479 = vst [vmem:[#allocation104_spill] sm:$0xff] %v2746_v27  ;;  %v2795_v36 = vmul.f32 %v1972_v39, %v3484_v38  ;;  %v338_v49 = vmul.f32 %v2778_v44, %v3488_v30  ;;  %v3491_v38 = vld [vmem:[#allocation11_spill] sm:$0xff] }
 0x196   : > { %v306_v37 = vpop.permute.xlu0 %305  ;;  %v290_v53 = vadd.f32 %v282_v6, %v226_v3  ;;  %v2822_v3 = vld [vmem:[%s3362_s1 + $0x9] ss:$0 sm:$0xff]  ;;  %v348_v6 = vadd.f32 %v340_v46, %v292_v43  ;;  %v287_v46 = vmul.f32 %v2751_v4, %v2569_v57  ;;  %v2855_v57 = vld [vmem:[%s3362_s1 + $0x4] ss:$0 sm:$0xff] }
 0x197   : > { %v339_v41 = vmul.f32 %v2778_v44, %v306_v37  ;;  %v3492_v30 = vld [vmem:[#allocation19_spill] sm:$0xff]  ;;  %v2867_v24 = vmul.f32 %v2822_v3, %v3502_v2 }
 0x198   : > { %1429 = vperm.xlu1 %2104, %v2202_v8   ;;  %v288_v8 = vmul.f32 %v2751_v4, %v2390_v54  ;;  %v291_v54 = vadd.f32 %v283_v7, %v227_v5  ;;  %v3487_v7 = vld [vmem:[#allocation6_spill] sm:$0xff]  ;;  %v346_v10 = vadd.f32 %v338_v49, %v290_v53 }
 0x199   : > { %v2768_v27 = vpop.permute.xlu1 %1040  ;;  %3503 = vst [vmem:[#allocation5_spill] sm:$0xff] %v2867_v24  ;;  %v295_v24 = vadd.f32 %v287_v46, %v231_v47  ;;  %v3513_v47 = vld [vmem:[#allocation28_spill] sm:$0xff] }
 0x19a   : > { %3480 = vst [vmem:[#allocation105_spill] sm:$0xff] %v2768_v27  ;;  %v318_v40 = vpop.permute.xlu0 %317  ;;  %v3482_v27 = vld [vmem:[#allocation2_spill] sm:$0xff]  ;;  %v2807_v1 = vadd.f32 %v288_v8, %v232_v35  ;;  %v2826_v35 = vmul.f32 %v2803_v0, %v3490_v42  ;;  %v293_v8 = vadd.f32 %v285_v52, %v229_v48  ;;  %v3493_v48 = vld [vmem:[#allocation12_spill] sm:$0xff]  ;;  %v3494_v52 = vld [vmem:[#allocation13_spill] sm:$0xff] }
 0x19b   : > { %v411_v34 = vmul.f32 %v1972_v39, %v3482_v27  ;;  %v2842_v37 = vmul.f32 %v2822_v3, %v3493_v48  ;;  %v343_v43 = vmul.f32 %v2778_v44, %v3494_v52  ;;  %v3495_v42 = vld [vmem:[#allocation14_spill] sm:$0xff]  ;;  %v3499_v48 = vld [vmem:[#allocation16_spill] sm:$0xff] }
 0x19c   : > { %1437 = vperm.xlu1 %2104, %v2501_v62   ;;  %v2811_v62 = vmul.f32 %v2803_v0, %v3487_v7  ;;  %v341_v7 = vmul.f32 %v2778_v44, %v3491_v38  ;;  %v2848_v38 = vmul.f32 %v2822_v3, %v3495_v42  ;;  %v2862_v52 = vmul.f32 %v2822_v3, %v3499_v48  ;;  %v2881_v48 = vld [vmem:[%s3362_s1 + $0xf] ss:$0 sm:$0xff] }
 0x19d   : > { %v2805_v5 = vpop.permute.xlu1 %1048  ;;  %v419_v22 = vadd.f32 %v411_v34, %v346_v10  ;;  %v467_v34 = vmul.f32 %v2855_v57, %v3512_v20  ;;  %v3515_v20 = vld [vmem:[#allocation30_spill] sm:$0xff] }
 0x19e   : > { %3486 = vst [vmem:[#allocation9_spill] sm:$0xff] %v2805_v5  ;;  %v326_v27 = vpop.permute.xlu0 %325  ;;  %v413_v5 = vmul.f32 %v1972_v39, %v3492_v30  ;;  %3496 = vst [vmem:[#allocation2_spill] sm:$0xff] %v2848_v38  ;;  %v3497_v30 = vld [vmem:[#allocation15_spill] sm:$0xff]  ;;  %v3508_v38 = vld [vmem:[#allocation22_spill] sm:$0xff] }
 0x19f   : > { %v345_v29 = vmul.f32 %v2778_v44, %v3497_v30  ;;  %3500 = vst [vmem:[#allocation4_spill] sm:$0xff] %v2862_v52  ;;  %v3504_v30 = vld [vmem:[#allocation27_spill] sm:$0xff]  ;;  %v342_v52 = vmul.f32 %v2778_v44, %v318_v40  ;;  %v2899_v40 = vld [vmem:[%s3362_s1 + $0x5] ss:$0 sm:$0xff] }
 0x1a0   : > { %2105 = vset.pattern.permute.xlu1 %v3411_v15  ;;  %v3501_v15 = vld [vmem:[#allocation17_spill] sm:$0xff]  ;;  %v469_v28 = vmul.f32 %v2855_v57, %v3504_v30  ;;  %v421_v2 = vadd.f32 %v413_v5, %v348_v6  ;;  %v289_v30 = vmul.f32 %v2751_v4, %v2574_v59  ;;  %v344_v6 = vmul.f32 %v2778_v44, %v326_v27  ;;  %v3517_v27 = vld [vmem:[#allocation31_spill] sm:$0xff] }
 0x1a1   : > { %1480 = vperm.xlu1 %2105, %v2267_v23   ;;  %v2858_v53 = vpop.permute.xlu1 %1052  ;;  %v412_v42 = vmul.f32 %v1972_v39, %v3501_v15  ;;  %v2876_v23 = vmul.f32 %v2835_v31, %v3505_v32  ;;  %v347_v15 = vadd.f32 %v339_v41, %v291_v54  ;;  %v2889_v32 = vmul.f32 %v2835_v31, %v3508_v38 }
 0x1a2   : > { %3498 = vst [vmem:[#allocation3_spill] sm:$0xff] %v2858_v53  ;;  %v487_v49 = vpop.permute.xlu0 %486  ;;  %v349_v53 = vadd.f32 %v341_v7, %v293_v8  ;;  %v2894_v8 = vmul.f32 %v2835_v31, %v3510_v17  ;;  %v477_v4 = vadd.f32 %v469_v28, %v421_v2  ;;  %v350_v5 = vadd.f32 %v342_v52, %v294_v45  ;;  %v3514_v7 = vld [vmem:[#allocation29_spill] sm:$0xff]  ;;  %v3516_v2 = vld [vmem:[#allocation38_spill] sm:$0xff] }
 0x1a3   : > { %3506 = vst [vmem:[#allocation6_spill] sm:$0xff] %v2876_v23  ;;  %v3509_v23 = vld [vmem:[#allocation23_spill] sm:$0xff]  ;;  %v523_v17 = vmul.f32 %v2899_v40, %v487_v49  ;;  %v420_v54 = vadd.f32 %v412_v42, %v347_v15  ;;  %v470_v46 = vmul.f32 %v2855_v57, %v3514_v7  ;;  %v351_v38 = vadd.f32 %v343_v43, %v295_v24 }
 0x1a4   : > { %v417_v19 = vmul.f32 %v1972_v39, %v3509_v23  ;;  %3511 = vst [vmem:[#allocation7_spill] sm:$0xff] %v2894_v8  ;;  %v2908_v39 = vmul.f32 %v2881_v48, %v3513_v47  ;;  %v422_v41 = vadd.f32 %v414_v61, %v349_v53  ;;  %v297_v23 = vadd.f32 %v289_v30, %v2782_v50  ;;  %v3518_v50 = vld [vmem:[#allocation32_spill] sm:$0xff]  ;;  %v3520_v53 = vld [vmem:[#allocation33_spill] sm:$0xff] }
 0x1a5   : > { %1485 = vperm.xlu1 %2105, %v2872_v14   ;;  %v2902_v10 = vpop.permute.xlu1 %1060  ;;  %v475_v8 = vadd.f32 %v467_v34, %v419_v22  ;;  %v2917_v28 = vmul.f32 %v2881_v48, %v3515_v20  ;;  %v525_v47 = vmul.f32 %v2899_v40, %v3516_v2  ;;  %v468_v45 = vmul.f32 %v2855_v57, %v2580_v63  ;;  %v3522_v34 = vld [vmem:[#allocation46_spill] sm:$0xff] }
 0x1a6   : > { %v499_v59 = vpop.permute.xlu0 %498  ;;  %v472_v22 = vmul.f32 %v2855_v57, %v3517_v27  ;;  %v2931_v43 = vmul.f32 %v2881_v48, %v3518_v50  ;;  %v474_v49 = vmul.f32 %v2855_v57, %v3520_v53  ;;  %v423_v63 = vadd.f32 %v415_v18, %v350_v5  ;;  %v3523_v27 = vld [vmem:[#allocation36_spill] sm:$0xff]  ;;  %v3525_v5 = vld [vmem:[#allocation42_spill] sm:$0xff] }
 0x1a7   : > { %v526_v44 = vmul.f32 %v2899_v40, %v499_v59  ;;  %v531_v52 = vadd.f32 %v523_v17, %v475_v8  ;;  %v476_v42 = vadd.f32 %v468_v45, %v420_v54  ;;  %v352_v15 = vadd.f32 %v344_v6, %v2807_v1  ;;  %v3524_v17 = vld [vmem:[#allocation40_spill] sm:$0xff] }
 0x1a8   : > { %3519 = vst [vmem:[#allocation8_spill] sm:$0xff] %v2931_v43  ;;  %v478_v30 = vadd.f32 %v470_v46, %v422_v41  ;;  %v597_v7 = vmul.f32 %v2803_v0, %v3522_v34  ;;  %v353_v20 = vadd.f32 %v345_v29, %v297_v23  ;;  %v424_v2 = vadd.f32 %v2795_v36, %v351_v38  ;;  %v3526_v46 = vld [vmem:[#allocation48_spill] sm:$0xff] }
 0x1a9   : > { %1495 = vperm.xlu1 %2105, %v2218_v12   ;;  %v2925_v61 = vpop.permute.xlu1 %1068  ;;  %v3521_v12 = vld [vmem:[#allocation44_spill] sm:$0xff]  ;;  %v524_v50 = vmul.f32 %v2899_v40, %v3523_v27  ;;  %v533_v43 = vadd.f32 %v525_v47, %v477_v4  ;;  %v471_v8 = vmul.f32 %v2855_v57, %v2586_v51  ;;  %v527_v54 = vmul.f32 %v2899_v40, %v3524_v17  ;;  %v1980_v51 = vld [vmem:[%s3362_s1 + $0x7] ss:$0 sm:$0xff] }
 0x1aa   : > { %v507_v24 = vpop.permute.xlu0 %506  ;;  %v595_v59 = vmul.f32 %v2803_v0, %v3521_v12  ;;  %v534_v18 = vadd.f32 %v526_v44, %v478_v30  ;;  %v529_v6 = vmul.f32 %v2899_v40, %v3525_v5  ;;  %v598_v4 = vmul.f32 %v2803_v0, %v3526_v46  ;;  %v1982_v12 = vld [vmem:[%s3362_s1 + $0x8] ss:$0 sm:$0xff]  ;;  %v3534_v46 = vld [vmem:[#allocation56_spill] sm:$0xff] }
 0x1ab   : > { %v528_v36 = vmul.f32 %v2899_v40, %v507_v24  ;;  %v425_v38 = vadd.f32 %v417_v19, %v352_v15  ;;  %v532_v23 = vadd.f32 %v524_v50, %v476_v42  ;;  %v605_v47 = vadd.f32 %v597_v7, %v533_v43  ;;  %v3531_v50 = vld [vmem:[#allocation57_spill] sm:$0xff] }
 0x1ac   : > { %v603_v29 = vadd.f32 %v595_v59, %v531_v52  ;;  %v651_v45 = vmul.f32 %v1980_v51, %v2599_v11  ;;  %v480_v44 = vadd.f32 %v472_v22, %v424_v2  ;;  %v426_v53 = vadd.f32 %v2798_v56, %v353_v20  ;;  %v3527_v52 = vld [vmem:[#allocation50_spill] sm:$0xff]  ;;  %v3528_v59 = vld [vmem:[#allocation59_spill] sm:$0xff]  ;;  %v3529_v11 = vld [vmem:[#allocation53_spill] sm:$0xff] }
 0x1ad   : > { %1505 = vperm.xlu1 %2105, %v2223_v13   ;;  %v479_v13 = vadd.f32 %v471_v8, %v423_v63  ;;  %v600_v24 = vmul.f32 %v2803_v0, %v3527_v52  ;;  %v653_v30 = vmul.f32 %v1980_v51, %v2566_v33  ;;  %v473_v63 = vmul.f32 %v2855_v57, %v3528_v59  ;;  %v3530_v2 = vld [vmem:[#allocation54_spill] sm:$0xff] }
 0x1ae   : > { %v515_v1 = vpop.permute.xlu0 %514  ;;  %v2951_v41 = vpop.permute.xlu1 %1110  ;;  %v606_v19 = vadd.f32 %v598_v4, %v534_v18  ;;  %v602_v22 = vmul.f32 %v2803_v0, %v3529_v11  ;;  %v659_v56 = vadd.f32 %v651_v45, %v603_v29  ;;  %v536_v42 = vadd.f32 %v528_v36, %v480_v44  ;;  %v3532_v18 = vld [vmem:[#allocation58_spill] sm:$0xff]  ;;  %v3533_v29 = vld [vmem:[#allocation55_spill] sm:$0xff] }
 0x1af   : > { %v530_v15 = vmul.f32 %v2899_v40, %v515_v1  ;;  %v654_v34 = vmul.f32 %v1980_v51, %v2605_v58  ;;  %v481_v7 = vadd.f32 %v473_v63, %v425_v38  ;;  %v604_v57 = vadd.f32 %v2811_v62, %v532_v23  ;;  %v3537_v59 = vld [vmem:[#allocation62_spill] sm:$0xff] }
 0x1b0   : > { %v535_v20 = vadd.f32 %v527_v54, %v479_v13  ;;  %v652_v27 = vmul.f32 %v1980_v51, %v3530_v2  ;;  %v707_v8 = vmul.f32 %v1982_v12, %v3531_v50  ;;  %v709_v0 = vmul.f32 %v1982_v12, %v3532_v18  ;;  %v3535_v13 = vld [vmem:[#allocation60_spill] sm:$0xff]  ;;  %v3542_v18 = vld [vmem:[#allocation70_spill] sm:$0xff] }
 0x1b1   : > { %2106 = vset.pattern.permute.xlu1 %v3391_v60  ;;  %v482_v17 = vadd.f32 %v474_v49, %v426_v53  ;;  %v661_v5 = vadd.f32 %v653_v30, %v605_v47  ;;  %v655_v40 = vmul.f32 %v1980_v51, %v3533_v29  ;;  %v662_v1 = vadd.f32 %v654_v34, %v606_v19  ;;  %v3536_v53 = vld [vmem:[#allocation61_spill] sm:$0xff]  ;;  %v2995_v19 = vld [vmem:[%s3362_s1 + $0xa] ss:$0 sm:$0xff] }
 0x1b2   : > { %v675_v43 = vpop.permute.xlu0 %674  ;;  %1538 = vperm.xlu1 %2106, %v2258_v21   ;;  %v2973_v33 = vpop.permute.xlu1 %1115  ;;  %v657_v4 = vmul.f32 %v1980_v51, %v3534_v46  ;;  %v608_v58 = vadd.f32 %v600_v24, %v536_v42  ;;  %v715_v54 = vadd.f32 %v707_v8, %v659_v56  ;;  %v710_v23 = vmul.f32 %v1982_v12, %v3535_v13  ;;  %v3538_v34 = vld [vmem:[#allocation63_spill] sm:$0xff]  ;;  %v3540_v8 = vld [vmem:[#allocation65_spill] sm:$0xff]  ;;  %v2113_v46 = vld [vmem:[%s2172_s17 + $0xf0] sm:$0xff] }
 0x1b3   : > { %v708_v21 = vmul.f32 %v1982_v12, %v675_v43  ;;  %v538_v38 = vadd.f32 %v530_v15, %v482_v17  ;;  %v660_v45 = vadd.f32 %v652_v27, %v604_v57  ;;  %v607_v49 = vadd.f32 %v2817_v26, %v535_v20  ;;  %v3539_v57 = vld [vmem:[#allocation64_spill] sm:$0xff]  ;;  %v3026_v13 = vld [vmem:[%s3362_s1 + $0xd] ss:$0 sm:$0xff] }
 0x1b4   : > { %v537_v47 = vadd.f32 %v529_v6, %v481_v7  ;;  %v717_v44 = vadd.f32 %v709_v0, %v661_v5  ;;  %v712_v52 = vmul.f32 %v1982_v12, %v3536_v53  ;;  %v656_v30 = vmul.f32 %v1980_v51, %v2611_v55  ;;  %v3547_v53 = vld [vmem:[#allocation68_spill] sm:$0xff] }
 0x1b5   : > { %v782_v24 = vmul.f32 %v2822_v3, %v2622_v16  ;;  %v714_v63 = vmul.f32 %v1982_v12, %v3537_v59  ;;  %v716_v43 = vadd.f32 %v708_v21, %v660_v45  ;;  %v718_v26 = vadd.f32 %v710_v23, %v662_v1  ;;  %v3545_v23 = vld [vmem:[#allocation72_spill] sm:$0xff]  ;;  %v3546_v45 = vld [vmem:[#allocation74_spill] sm:$0xff] }
 0x1b6   : > { %v687_v36 = vpop.permute.xlu0 %686  ;;  %1546 = vperm.xlu1 %2106, %v2872_v14   ;;  %v2983_v62 = vpop.permute.xlu1 %1125  ;;  %v781_v6 = vmul.f32 %v2822_v3, %v2615_v9  ;;  %v664_v42 = vadd.f32 %v656_v30, %v608_v58  ;;  %v610_v15 = vadd.f32 %v602_v22, %v538_v38  ;;  %v788_v16 = vadd.f32 %v2842_v37, %v715_v54  ;;  %v3541_v22 = vld [vmem:[#allocation66_spill] sm:$0xff]  ;;  %v3016_v37 = vld [vmem:[%s3362_s1 + $0xb] ss:$0 sm:$0xff]  ;;  %v3548_v30 = vld [vmem:[#allocation69_spill] sm:$0xff] }
 0x1b7   : > { %v711_v11 = vmul.f32 %v1982_v12, %v687_v36  ;;  %v658_v7 = vmul.f32 %v1980_v51, %v3538_v34  ;;  %v837_v20 = vmul.f32 %v2995_v19, %v3539_v57  ;;  %v663_v2 = vadd.f32 %v655_v40, %v607_v49  ;;  %v3544_v38 = vld [vmem:[#allocation67_spill] sm:$0xff]  ;;  %v3550_v34 = vld [vmem:[#allocation4_spill] sm:$0xff] }
 0x1b8   : > { %v609_v27 = vadd.f32 %v2826_v35, %v537_v47  ;;  %v790_v50 = vadd.f32 %v782_v24, %v717_v44  ;;  %v784_v9 = vmul.f32 %v2822_v3, %v3540_v8  ;;  %v836_v0 = vmul.f32 %v2995_v19, %v3542_v18  ;;  %v3543_v35 = vld [vmem:[#allocation2_spill] sm:$0xff]  ;;  %v3549_v24 = vld [vmem:[#allocation88_spill] sm:$0xff] }
 0x1b9   : > { %v789_v51 = vadd.f32 %v781_v6, %v716_v43  ;;  %v719_v17 = vadd.f32 %v711_v11, %v663_v2  ;;  %v791_v40 = vadd.f32 %v3543_v35, %v718_v26  ;;  %v666_v1 = vadd.f32 %v658_v7, %v610_v15 }
 0x1ba   : > { %v695_v56 = vpop.permute.xlu0 %694  ;;  %1550 = vperm.xlu1 %2106, %v2275_v25   ;;  %v3000_v55 = vpop.permute.xlu1 %1135  ;;  %v840_v25 = vmul.f32 %v2995_v19, %v3541_v22  ;;  %v844_v21 = vadd.f32 %v836_v0, %v788_v16  ;;  %v720_v58 = vadd.f32 %v712_v52, %v664_v42  ;;  %v786_v54 = vmul.f32 %v2822_v3, %v3544_v38  ;;  %v2114_v16 = vld [vmem:[%s2172_s17 + $0x110] sm:$0xff]  ;;  %v3552_v22 = vld [vmem:[#allocation73_spill] sm:$0xff] }
 0x1bb   : > { %v713_v5 = vmul.f32 %v1982_v12, %v695_v56  ;;  %v838_v12 = vmul.f32 %v2995_v19, %v3545_v23  ;;  %v839_v49 = vmul.f32 %v2995_v19, %v3546_v45  ;;  %v665_v47 = vadd.f32 %v657_v4, %v609_v27  ;;  %v3551_v27 = vld [vmem:[#allocation71_spill] sm:$0xff] }
 0x1bc   : > { %v842_v52 = vmul.f32 %v2995_v19, %v3547_v53  ;;  %v1021_v3 = vmul.f32 %v3026_v13, %v3548_v30  ;;  %v965_v59 = vmul.f32 %v2835_v31, %v3549_v24  ;;  %v845_v11 = vadd.f32 %v837_v20, %v789_v51  ;;  %v3553_v20 = vld [vmem:[#allocation80_spill] sm:$0xff]  ;;  %v3559_v53 = vld [vmem:[#allocation75_spill] sm:$0xff] }
 0x1bd   : > { %v792_v56 = vadd.f32 %v784_v9, %v719_v17  ;;  %v721_v26 = vadd.f32 %v713_v5, %v665_v47  ;;  %v847_v6 = vadd.f32 %v839_v49, %v791_v40  ;;  %v793_v7 = vadd.f32 %v3550_v34, %v720_v58  ;;  %v3554_v51 = vld [vmem:[#allocation76_spill] sm:$0xff]  ;;  %v3556_v40 = vld [vmem:[#allocation82_spill] sm:$0xff]  ;;  %v3558_v49 = vld [vmem:[#allocation5_spill] sm:$0xff] }
 0x1be   : > { %v856_v29 = vpop.permute.xlu0 %855  ;;  %1558 = vperm.xlu1 %2106, %v2113_v46   ;;  %v722_v57 = vadd.f32 %v714_v63, %v666_v1  ;;  %v846_v2 = vadd.f32 %v838_v12, %v790_v50  ;;  %v1024_v8 = vmul.f32 %v3026_v13, %v3551_v27  ;;  %v1026_v18 = vmul.f32 %v3026_v13, %v3552_v22  ;;  %v3056_v5 = vld [vmem:[%s3362_s1 + $0x10] ss:$0 sm:$0xff]  ;;  %v3565_v27 = vld [vmem:[#allocation6_spill] sm:$0xff] }
 0x1bf   : > { %v892_v36 = vmul.f32 %v3016_v37, %v856_v29  ;;  %v3032_v44 = vpop.permute.xlu1 %1168  ;;  %v893_v9 = vmul.f32 %v3016_v37, %v3553_v20  ;;  %v841_v17 = vmul.f32 %v2995_v19, %v3554_v51  ;;  %v3555_v63 = vld [vmem:[#allocation92_spill] sm:$0xff]  ;;  %v894_v1 = vmul.f32 %v3016_v37, %v3556_v40 }
 0x1c0   : > { %v968_v50 = vmul.f32 %v2835_v31, %v3555_v63  ;;  %v3557_v45 = vmov 2   ;;  %v795_v47 = vadd.f32 %v3558_v49, %v722_v57  ;;  %v1028_v30 = vmul.f32 %v3026_v13, %v3559_v53  ;;  %v3567_v40 = vld [vmem:[#allocation96_spill] sm:$0xff]  ;;  %v3568_v49 = vld [vmem:[#allocation98_spill] sm:$0xff] }
 0x1c1   : > { %v900_v43 = vadd.f32 %v892_v36, %v844_v21  ;;  %v848_v21 = vadd.f32 %v840_v25, %v792_v56  ;;  %v794_v36 = vadd.f32 %v786_v54, %v721_v26  ;;  %v901_v58 = vadd.f32 %v893_v9, %v845_v11  ;;  %v3562_v54 = vld [vmem:[#allocation84_spill] sm:$0xff]  ;;  %v3080_v11 = vld [vmem:[%s3362_s1 + $0xe] ss:$0 sm:$0xff] }
 0x1c2   : > { %v868_v42 = vpop.permute.xlu0 %867  ;;  %1566 = vperm.xlu1 %2106, %v2114_v16   ;;  %v849_v23 = vadd.f32 %v841_v17, %v793_v7  ;;  %v2115_v56 = vld [vmem:[%s2172_s17 + $0xb0] sm:$0xff]  ;;  %v902_v34 = vadd.f32 %v894_v1, %v846_v2 }
 0x1c3   : > { %v973_v15 = vadd.f32 %v965_v59, %v900_v43  ;;  %v895_v4 = vmul.f32 %v3016_v37, %v868_v42  ;;  %v3049_v0 = vpop.permute.xlu1 %1176  ;;  %v3561_v59 = vld [vmem:[#allocation77_spill] sm:$0xff]  ;;  %v896_v43 = vmul.f32 %v3016_v37, %v3562_v54  ;;  %v850_v7 = vadd.f32 %v842_v52, %v794_v36 }
 0x1c4   : > { %v3073_v25 = vmul.f32 %v3056_v5, %v3561_v59  ;;  %v974_v22 = vadd.f32 %v3565_v27, %v901_v58  ;;  %v1082_v52 = vmul.f32 %v3080_v11, %v2902_v10  ;;  %v3571_v59 = vld [vmem:[#allocation102_spill] sm:$0xff] }
 0x1c5   : > { %v3060_v29 = vadd.f32 %v1021_v3, %v973_v15  ;;  %v903_v35 = vadd.f32 %v895_v4, %v847_v6  ;;  %v3560_v3 = vld [vmem:[#allocation78_spill] sm:$0xff]  ;;  %v3564_v15 = vld [vmem:[#allocation3_spill] sm:$0xff]  ;;  %v904_v20 = vadd.f32 %v896_v43, %v848_v21  ;;  %v1025_v54 = vmul.f32 %v3026_v13, %v3571_v59  ;;  %v3578_v59 = vld [vmem:[#allocation81_spill] sm:$0xff] }
 0x1c6   : > { %v876_v46 = vpop.permute.xlu0 %875  ;;  %2107 = vset.pattern.permute.xlu1 %v3557_v45  ;;  %v843_v24 = vmul.f32 %v2995_v19, %v3560_v3  ;;  %v3563_v6 = vld [vmem:[#allocation94_spill] sm:$0xff]  ;;  %v1080_v19 = vmul.f32 %v3080_v11, %v3564_v15  ;;  %v1150_v43 = vmul.f32 %v2881_v48, %v2951_v41 }
 0x1c7   : > { %v976_v38 = vadd.f32 %v968_v50, %v903_v35  ;;  %v897_v12 = vmul.f32 %v3016_v37, %v876_v46  ;;  %1598 = vperm.xlu1 %2107, %v2115_v56   ;;  %v1181_v26 = vpop.permute.xlu1 %1180  ;;  %v970_v42 = vmul.f32 %v2835_v31, %v3563_v6  ;;  %v3566_v50 = vld [vmem:[#allocation86_spill] sm:$0xff]  ;;  %v972_v46 = vmul.f32 %v2835_v31, %v3567_v40 }
 0x1c8   : > { %v851_v17 = vadd.f32 %v843_v24, %v795_v47  ;;  %v898_v35 = vmul.f32 %v3016_v37, %v3566_v50  ;;  %v1208_v36 = vmul.f32 %v3056_v5, %v1181_v26  ;;  %v977_v47 = vadd.f32 %v2889_v32, %v904_v20  ;;  %v3570_v24 = vld [vmem:[#allocation100_spill] sm:$0xff]  ;;  %v2116_v32 = vld [vmem:[%s2172_s17 + $0xe0] sm:$0xff] }
 0x1c9   : > { %v1032_v4 = vadd.f32 %v1024_v8, %v976_v38  ;;  %v905_v16 = vadd.f32 %v897_v12, %v849_v23  ;;  %v1022_v8 = vmul.f32 %v3026_v13, %v3568_v49  ;;  %v2117_v50 = vld [vmem:[%s2172_s17 + $0x100] sm:$0xff] }
 0x1ca   : > { %v884_v57 = vpop.permute.xlu0 %883  ;;  %v906_v53 = vadd.f32 %v898_v35, %v850_v7  ;;  %v1033_v7 = vadd.f32 %v1025_v54, %v977_v47  ;;  %v3575_v35 = vld [vmem:[#allocation8_spill] sm:$0xff]  ;;  %v1155_v47 = vmul.f32 %v2881_v48, %v3000_v55  ;;  %v1211_v54 = vmul.f32 %v3056_v5, %v3578_v59 }
 0x1cb   : > { %v978_v9 = vadd.f32 %v970_v42, %v905_v16  ;;  %v1088_v51 = vadd.f32 %v1080_v19, %v1032_v4  ;;  %v899_v63 = vmul.f32 %v3016_v37, %v884_v57  ;;  %1602 = vperm.xlu1 %2107, %v2872_v14   ;;  %v1189_v2 = vpop.permute.xlu1 %1188  ;;  %v3569_v37 = vld [vmem:[#allocation90_spill] sm:$0xff]  ;;  %v1030_v23 = vadd.f32 %v1022_v8, %v974_v22  ;;  %v3572_v4 = vld [vmem:[#allocation9_spill] sm:$0xff] }
 0x1cc   : > { %v967_v38 = vmul.f32 %v2835_v31, %v3569_v37  ;;  %v1084_v31 = vmul.f32 %v3080_v11, %v2925_v61  ;;  %v1210_v42 = vmul.f32 %v3056_v5, %v1189_v2  ;;  %v1079_v16 = vmul.f32 %v3080_v11, %v3572_v4  ;;  %v3573_v61 = vld [vmem:[#allocation7_spill] sm:$0xff] }
 0x1cd   : > { %v1034_v1 = vadd.f32 %v1026_v18, %v978_v9  ;;  %v1160_v21 = vadd.f32 %v2908_v39, %v1088_v51  ;;  %v907_v58 = vadd.f32 %v899_v63, %v851_v17  ;;  %v1023_v39 = vmul.f32 %v3026_v13, %v3570_v24  ;;  %v3576_v2 = vld [vmem:[#allocation79_spill] sm:$0xff] }
 0x1ce   : > { %v1045_v12 = vpop.permute.xlu0 %1044  ;;  %v975_v19 = vadd.f32 %v967_v38, %v902_v34  ;;  %v979_v27 = vadd.f32 %v3573_v61, %v906_v53  ;;  %v3574_v34 = vld [vmem:[#allocation104_spill] sm:$0xff]  ;;  %v1151_v17 = vmul.f32 %v2881_v48, %v2973_v33  ;;  %v1153_v63 = vmul.f32 %v2881_v48, %v2983_v62 }
 0x1cf   : > { %v3103_v3 = vadd.f32 %v1208_v36, %v1160_v21  ;;  %v980_v10 = vadd.f32 %v972_v46, %v907_v58  ;;  %v1090_v14 = vadd.f32 %v1082_v52, %v1034_v1  ;;  %v1078_v18 = vmul.f32 %v3080_v11, %v1045_v12  ;;  %1610 = vperm.xlu1 %2107, %v2116_v32   ;;  %v1197_v56 = vpop.permute.xlu1 %1196 }
 0x1d0   : > { %v1031_v9 = vadd.f32 %v1023_v39, %v975_v19  ;;  %v1027_v51 = vmul.f32 %v3026_v13, %v3574_v34  ;;  %v1212_v46 = vmul.f32 %v3056_v5, %v1197_v56  ;;  %v1209_v13 = vmul.f32 %v3056_v5, %v3576_v2  ;;  %v3157_v39 = vld [vmem:[%s2172_s17 + $0x31] sm:$0xff]  ;;  %v3580_v19 = vld [vmem:[#allocation26_spill] sm:$0xff] }
 0x1d1   : > { %v1036_v26 = vadd.f32 %v1028_v30, %v980_v10  ;;  %v1162_v6 = vadd.f32 %v2917_v28, %v1090_v14  ;;  %v1086_v15 = vadd.f32 %v1078_v18, %v1030_v23  ;;  %v3126_v28 = vld [vmem:[%s3362_s1 + $0x11] ss:$0 sm:$0xff]  ;;  %v1207_v33 = vmul.f32 %v3056_v5, %v3049_v0  ;;  %v2036_v34 = vld [vmem:[%s3362_s1 + $0x13] ss:$0 sm:$0xff] }
 0x1d2   : > { %v1057_v57 = vpop.permute.xlu0 %1056  ;;  %v1087_v1 = vadd.f32 %v1079_v16, %v1031_v9  ;;  %v1035_v37 = vadd.f32 %v1027_v51, %v979_v27  ;;  %v3152_v0 = vld [vmem:[%s2172_s17 + $0x11] sm:$0xff]  ;;  %v1149_v4 = vmul.f32 %v2881_v48, %v3580_v19  ;;  %v1205_v61 = vmul.f32 %v3056_v5, %v3032_v44  ;;  %v3181_v48 = vld [vmem:[%s2172_s17 + $0x61] sm:$0xff] }
 0x1d3   : > { %v3120_v22 = vadd.f32 %v1210_v42, %v1162_v6  ;;  %v1158_v41 = vadd.f32 %v1150_v43, %v1086_v15  ;;  %v1092_v20 = vadd.f32 %v1084_v31, %v1036_v26  ;;  %v1081_v30 = vmul.f32 %v3080_v11, %v1057_v57  ;;  %1618 = vperm.xlu1 %2107, %v2117_v50   ;;  %v3579_v31 = vld [vmem:[#allocation105_spill] sm:$0xff]  ;;  %v3171_v57 = vld [vmem:[%s2172_s17 + $0x41] sm:$0xff]  ;;  %v2034_v9 = vld [vmem:[%s3362_s1 + $0x12] ss:$0 sm:$0xff] }
 0x1d4   : > { %v1229_v8 = vpop.permute.xlu1 %1228  ;;  %v1159_v23 = vadd.f32 %v1151_v17, %v1087_v1  ;;  %v1077_v43 = vmul.f32 %v3080_v11, %v3579_v31  ;;  %v3581_v17 = vld [vmem:[#allocation83_spill] sm:$0xff] }
 0x1d5   : > { %v1164_v40 = vadd.f32 %v3575_v35, %v1092_v20  ;;  %v1089_v49 = vadd.f32 %v1081_v30, %v1033_v7  ;;  %v1214_v52 = vadd.f32 %v3073_v25, %v1158_v41  ;;  %v1262_v62 = vmul.f32 %v3126_v28, %v1229_v8  ;;  %v3582_v35 = vld [vmem:[#allocation51_spill] sm:$0xff] }
 0x1d6   : > { %v1065_v21 = vpop.permute.xlu0 %1064  ;;  %v3577_v25 = vmov 0   ;;  %v1215_v18 = vadd.f32 %v1207_v33, %v1159_v23  ;;  %v1085_v56 = vadd.f32 %v1077_v43, %v3060_v29 }
 0x1d7   : > { %v3143_v36 = vadd.f32 %v1212_v46, %v1164_v40  ;;  %v1161_v58 = vadd.f32 %v1153_v63, %v1089_v49  ;;  %v1083_v38 = vmul.f32 %v3080_v11, %v1065_v21  ;;  %v3146_v12 = vadd.f32 %v1262_v62, %v1214_v52  ;;  %2108 = vset.pattern.permute.xlu1 %v3577_v25 }
 0x1d8   : > { %1659 = vperm.xlu1 %2108, %v3152_v0   ;;  %v1233_v10 = vpop.permute.xlu1 %1232  ;;  %v1157_v7 = vadd.f32 %v1149_v4, %v1085_v56  ;;  %v1390_v63 = vmul.f32 %v2036_v34, %v3581_v17 }
 0x1d9   : > { %v1091_v53 = vadd.f32 %v1083_v38, %v1035_v37  ;;  %v1217_v14 = vadd.f32 %v1209_v13, %v1161_v58  ;;  %v1263_v24 = vmul.f32 %v3126_v28, %v1233_v10  ;;  %v2121_v13 = vld [vmem:[%s2172_s17 + $0x21] sm:$0xff]  ;;  %v3583_v37 = vld [vmem:[#allocation85_spill] sm:$0xff] }
 0x1da   : > { %v1225_v42 = vpop.permute.xlu0 %1224  ;;  %v1213_v30 = vadd.f32 %v1205_v61, %v1157_v7  ;;  %v1393_v38 = vmul.f32 %v2036_v34, %v3583_v37 }
 0x1db   : > { %v1163_v55 = vadd.f32 %v1155_v47, %v1091_v53  ;;  %v1271_v32 = vadd.f32 %v1263_v24, %v1215_v18  ;;  %v1261_v27 = vmul.f32 %v3126_v28, %v1225_v42  ;;  %v2122_v24 = vld [vmem:[%s2172_s17 + $0x51] sm:$0xff] }
 0x1dc   : > { %1669 = vperm.xlu1 %2108, %v3157_v39   ;;  %v1241_v26 = vpop.permute.xlu1 %1240 }
 0x1dd   : > { %v1219_v6 = vadd.f32 %v1211_v54, %v1163_v55  ;;  %v1265_v15 = vmul.f32 %v3126_v28, %v1241_v26  ;;  %v1269_v5 = vadd.f32 %v1261_v27, %v1213_v30  ;;  %v3585_v55 = vld [vmem:[#allocation89_spill] sm:$0xff]  ;;  %v3586_v26 = vld [vmem:[#allocation34_spill] sm:$0xff] }
 0x1de   : > { %v1237_v41 = vpop.permute.xlu0 %1236 }
 0x1df   : > { %v3168_v16 = vadd.f32 %v1265_v15, %v1217_v14  ;;  %v1264_v49 = vmul.f32 %v3126_v28, %v1237_v41  ;;  %v3584_v14 = vld [vmem:[#allocation87_spill] sm:$0xff] }
 0x1e0   : > { %1674 = vperm.xlu1 %2108, %v3171_v57   ;;  %v1249_v11 = vpop.permute.xlu1 %1248  ;;  %v1395_v18 = vmul.f32 %v2036_v34, %v3584_v14 }
 0x1e1   : > { %v1267_v29 = vmul.f32 %v3126_v28, %v1249_v11  ;;  %v1272_v33 = vadd.f32 %v1264_v49, %v3103_v3  ;;  %v3587_v11 = vld [vmem:[#allocation35_spill] sm:$0xff] }
 0x1e2   : > { %v1245_v40 = vpop.permute.xlu0 %1244 }
 0x1e3   : > { %v3178_v20 = vadd.f32 %v1267_v29, %v1219_v6  ;;  %v1266_v62 = vmul.f32 %v3126_v28, %v1245_v40  ;;  %v1335_v6 = vmul.f32 %v2034_v9, %v3586_v26  ;;  %v1338_v29 = vmul.f32 %v2034_v9, %v3587_v11 }
 0x1e4   : > { %1684 = vperm.xlu1 %2108, %v3181_v48  }
 0x1e5   : > { %v1291_v44 = vpop.permute.xlu1 %1290  ;;  %v1274_v47 = vadd.f32 %v1266_v62, %v3120_v22  ;;  %v2123_v22 = vld [vmem:[%s2172_s17 + $0x71] sm:$0xff]  ;;  %v1343_v15 = vadd.f32 %v1335_v6, %v3146_v12  ;;  %v1346_v41 = vadd.f32 %v1338_v29, %v3168_v16 }
 0x1e6   : > { %v1334_v51 = vmul.f32 %v2034_v9, %v1291_v44  ;;  %v1253_v58 = vpop.permute.xlu0 %1252  ;;  %v3588_v44 = vld [vmem:[#allocation37_spill] sm:$0xff] }
 0x1e7   : > { %v1340_v12 = vmul.f32 %v2034_v9, %v3588_v44  ;;  %v3593_v44 = vld [vmem:[#allocation41_spill] sm:$0xff] }
 0x1e8   : > { %v1342_v50 = vadd.f32 %v1334_v51, %v1269_v5  ;;  %1694 = vperm.xlu1 %2108, %v3582_v35   ;;  %v2124_v35 = vld [vmem:[%s2172_s17 + $0x81] sm:$0xff] }
 0x1e9   : > { %v1301_v46 = vpop.permute.xlu1 %1300 }
 0x1ea   : > { %v1336_v8 = vmul.f32 %v2034_v9, %v1301_v46  ;;  %v1398_v52 = vadd.f32 %v1390_v63, %v1342_v50 }
 0x1ec   : > { %v1344_v2 = vadd.f32 %v1336_v8, %v1271_v32  ;;  %2110 = vset.pattern.permute.xlu1 %v3391_v60  ;;  %v1268_v60 = vmul.f32 %v3126_v28, %v1253_v58  ;;  %v1397_v32 = vmul.f32 %v2036_v34, %v3585_v55  ;;  %v3590_v55 = vld [vmem:[#allocation93_spill] sm:$0xff] }
 0x1ed   : > { %1726 = vperm.xlu1 %2110, %v2121_v13   ;;  %v1306_v1 = vpop.permute.xlu1 %1305 }
 0x1ee   : > { %v1337_v21 = vmul.f32 %v2034_v9, %v1306_v1  ;;  %v1276_v54 = vadd.f32 %v1268_v60, %v3143_v36 }
 0x1f0   : > { %v1345_v23 = vadd.f32 %v1337_v21, %v1272_v33  ;;  %v2050_v21 = vld [vmem:[%s3362_s1 + $0x16] ss:$0 sm:$0xff] }
 0x1f1   : > { %1730 = vperm.xlu1 %2110, %v3157_v39   ;;  %v1316_v25 = vpop.permute.xlu1 %1315 }
 0x1f2   : > { %v1339_v53 = vmul.f32 %v2034_v9, %v1316_v25  ;;  %v1401_v10 = vadd.f32 %v1393_v38, %v1345_v23  ;;  %v3589_v25 = vld [vmem:[#allocation91_spill] sm:$0xff] }
 0x1f4   : > { %v1347_v3 = vadd.f32 %v1339_v53, %v1274_v47  ;;  %v1576_v47 = vmul.f32 %v2050_v21, %v3589_v25  ;;  %v3596_v25 = vld [vmem:[#allocation97_spill] sm:$0xff] }
 0x1f5   : > { %1738 = vperm.xlu1 %2110, %v2122_v24   ;;  %v1326_v59 = vpop.permute.xlu1 %1325 }
 0x1f6   : > { %v1341_v31 = vmul.f32 %v2034_v9, %v1326_v59  ;;  %v1403_v43 = vadd.f32 %v1395_v18, %v1347_v3 }
 0x1f8   : > { %v1349_v56 = vadd.f32 %v1341_v31, %v1276_v54 }
 0x1f9   : > { %1746 = vperm.xlu1 %2110, %v2123_v22  }
 0x1fa   : > { %v1358_v28 = vpop.permute.xlu1 %1357  ;;  %v1405_v42 = vadd.f32 %v1397_v32, %v1349_v56  ;;  %v1579_v32 = vmul.f32 %v2050_v21, %v3590_v55 }
 0x1fb   : > { %v1391_v19 = vmul.f32 %v2036_v34, %v1358_v28 }
 0x1fd   : > { %v1399_v4 = vadd.f32 %v1391_v19, %v1343_v15  ;;  %2112 = vset.pattern.permute.xlu1 %v3557_v45 }
 0x1fe   : > { %1778 = vperm.xlu1 %2112, %v3152_v0   ;;  %v1362_v36 = vpop.permute.xlu1 %1361  ;;  %v1348_v0 = vadd.f32 %v1340_v12, %v3178_v20 }
 0x1ff   : > { %v1392_v7 = vmul.f32 %v2036_v34, %v1362_v36 }
 0x201   : > { %v1400_v61 = vadd.f32 %v1392_v7, %v1344_v2 }
 0x202   : > { %1786 = vperm.xlu1 %2112, %v3157_v39   ;;  %v1370_v27 = vpop.permute.xlu1 %1369  ;;  %v2038_v39 = vld [vmem:[%s3362_s1 + $0x14] ss:$0 sm:$0xff] }
 0x203   : > { %v1394_v30 = vmul.f32 %v2036_v34, %v1370_v27 }
 0x205   : > { %v1402_v5 = vadd.f32 %v1394_v30, %v1346_v41 }
 0x206   : > { %1790 = vperm.xlu1 %2112, %v3171_v57   ;;  %v1378_v45 = vpop.permute.xlu1 %1377 }
 0x207   : > { %v1396_v51 = vmul.f32 %v2036_v34, %v1378_v45 }
 0x209   : > { %v1404_v17 = vadd.f32 %v1396_v51, %v1348_v0 }
 0x20a   : > { %1798 = vperm.xlu1 %2112, %v3181_v48   ;;  %v1414_v48 = vpop.permute.xlu0 %1413 }
 0x20b   : > { %v1410_v63 = vpop.permute.xlu1 %1409  ;;  %v1447_v33 = vmul.f32 %v2038_v39, %v1414_v48 }
 0x20c   : > { %v1446_v50 = vmul.f32 %v2038_v39, %v1410_v63 }
 0x20d   : > { %v1455_v37 = vadd.f32 %v1447_v33, %v1399_v4  ;;  %v3592_v4 = vld [vmem:[#allocation39_spill] sm:$0xff] }
 0x20e   : > { %v1454_v16 = vadd.f32 %v1446_v50, %v1398_v52  ;;  %1806 = vperm.xlu1 %2112, %v2124_v35   ;;  %v2048_v52 = vld [vmem:[%s3362_s1 + $0x15] ss:$0 sm:$0xff]  ;;  %v1426_v23 = vpop.permute.xlu0 %1425 }
 0x20f   : > { %v1418_v9 = vpop.permute.xlu1 %1417  ;;  %v1519_v36 = vmul.f32 %v2048_v52, %v3592_v4  ;;  %v1522_v12 = vmul.f32 %v2048_v52, %v3593_v44  ;;  %v3599_v44 = vld [vmem:[#allocation103_spill] sm:$0xff] }
 0x210   : > { %v1448_v40 = vmul.f32 %v2038_v39, %v1418_v9 }
 0x211   : > { %v1527_v29 = vadd.f32 %v1519_v36, %v1454_v16 }
 0x212   : > { %v1456_v46 = vadd.f32 %v1448_v40, %v1400_v61  ;;  %v1434_v24 = vpop.permute.xlu0 %1433  ;;  %v3595_v40 = vld [vmem:[#allocation45_spill] sm:$0xff] }
 0x213   : > { %v1422_v57 = vpop.permute.xlu1 %1421  ;;  %v1452_v54 = vmul.f32 %v2038_v39, %v1434_v24 }
 0x214   : > { %v1449_v49 = vmul.f32 %v2038_v39, %v1422_v57 }
 0x215   : > { %v1460_v6 = vadd.f32 %v1452_v54, %v1404_v17  ;;  %v3594_v17 = vld [vmem:[#allocation43_spill] sm:$0xff] }
 0x216   : > { %v1457_v8 = vadd.f32 %v1449_v49, %v1401_v10  ;;  %v1450_v10 = vmul.f32 %v2038_v39, %v1426_v23 }
 0x217   : > { %v1430_v20 = vpop.permute.xlu1 %1429 }
 0x218   : > { %v1451_v34 = vmul.f32 %v2038_v39, %v1430_v20  ;;  %v1458_v31 = vadd.f32 %v1450_v10, %v1402_v5  ;;  %v1530_v0 = vadd.f32 %v1522_v12, %v1457_v8  ;;  %v3247_v8 = vld [vmem:[%s3362_s1 + $0x17] ss:$0 sm:$0xff] }
 0x21a   : > { %v1459_v2 = vadd.f32 %v1451_v34, %v1403_v43 }
 0x21b   : > { %v1438_v13 = vpop.permute.xlu1 %1437 }
 0x21c   : > { %v1453_v1 = vmul.f32 %v2038_v39, %v1438_v13  ;;  %v1524_v39 = vmul.f32 %v2048_v52, %v3594_v17  ;;  %v3290_v17 = vld [vmem:[%s3362_s1 + $0x1a] ss:$0 sm:$0xff] }
 0x21e   : > { %v1461_v62 = vadd.f32 %v1453_v1, %v1405_v42  ;;  %v3591_v42 = vld [vmem:[#allocation95_spill] sm:$0xff]  ;;  %v1532_v35 = vadd.f32 %v1524_v39, %v1459_v2 }
 0x21f   : > { %v1581_v15 = vmul.f32 %v2050_v21, %v3591_v42 }
 0x220   : > { %v1481_v58 = vpop.permute.xlu1 %1480 }
 0x221   : > { %v1520_v38 = vmul.f32 %v2048_v52, %v1481_v58  ;;  %v1595_v58 = vpop.permute.xlu0 %1594 }
 0x222   : > { %v1631_v2 = vmul.f32 %v3247_v8, %v1595_v58 }
 0x223   : > { %v1528_v60 = vadd.f32 %v1520_v38, %v1455_v37 }
 0x224   : > { %v1486_v53 = vpop.permute.xlu1 %1485 }
 0x225   : > { %v1521_v14 = vmul.f32 %v2048_v52, %v1486_v53  ;;  %v3228_v18 = vadd.f32 %v1576_v47, %v1528_v60  ;;  %v1607_v23 = vpop.permute.xlu0 %1606 }
 0x227   : > { %v1529_v3 = vadd.f32 %v1521_v14, %v1456_v46  ;;  %v1526_v46 = vmul.f32 %v2048_v52, %v3595_v40  ;;  %v1634_v14 = vmul.f32 %v3247_v8, %v1607_v23 }
 0x228   : > { %v1496_v59 = vpop.permute.xlu1 %1495 }
 0x229   : > { %v1523_v43 = vmul.f32 %v2048_v52, %v1496_v59  ;;  %v1534_v49 = vadd.f32 %v1526_v46, %v1461_v62  ;;  %v3258_v62 = vld [vmem:[%s3362_s1 + $0x19] ss:$0 sm:$0xff] }
 0x22a   : > { %v1759_v47 = vmul.f32 %v3258_v62, %v3596_v25  ;;  %v1766_v12 = vmul.f32 %v3258_v62, %v3599_v44 }
 0x22b   : > { %v1531_v56 = vadd.f32 %v1523_v43, %v1458_v31  ;;  %v3597_v31 = vld [vmem:[#allocation99_spill] sm:$0xff] }
 0x22c   : > { %v1506_v26 = vpop.permute.xlu1 %1505  ;;  %v1762_v43 = vmul.f32 %v3258_v62, %v3597_v31 }
 0x22d   : > { %v1525_v22 = vmul.f32 %v2048_v52, %v1506_v26  ;;  %v3231_v28 = vadd.f32 %v1579_v32, %v1531_v56  ;;  %v3253_v52 = vld [vmem:[%s3362_s1 + $0x18] ss:$0 sm:$0xff] }
 0x22f   : > { %v1533_v19 = vadd.f32 %v1525_v22, %v1460_v6 }
 0x231   : > { %v1539_v7 = vpop.permute.xlu1 %1538  ;;  %v3235_v11 = vadd.f32 %v1581_v15, %v1533_v19  ;;  %v3598_v19 = vld [vmem:[#allocation101_spill] sm:$0xff] }
 0x232   : > { %v1575_v61 = vmul.f32 %v2050_v21, %v1539_v7  ;;  %v1764_v4 = vmul.f32 %v3258_v62, %v3598_v19 }
 0x234   : > { %v1583_v27 = vadd.f32 %v1575_v61, %v1527_v29 }
 0x235   : > { %v1547_v41 = vpop.permute.xlu1 %1546 }
 0x236   : > { %v1577_v30 = vmul.f32 %v2050_v21, %v1547_v41  ;;  %v1639_v37 = vadd.f32 %v1631_v2, %v1583_v27 }
 0x238   : > { %v3238_v5 = vadd.f32 %v1577_v30, %v1529_v3  ;;  %v1615_v3 = vpop.permute.xlu0 %1614 }
 0x239   : > { %v1551_v45 = vpop.permute.xlu1 %1550  ;;  %v1636_v55 = vmul.f32 %v3247_v8, %v1615_v3 }
 0x23a   : > { %v1578_v51 = vmul.f32 %v2050_v21, %v1551_v45 }
 0x23c   : > { %v1586_v63 = vadd.f32 %v1578_v51, %v1530_v0  ;;  %v1623_v42 = vpop.permute.xlu0 %1622  ;;  %v3600_v0 = vld [vmem:[#allocation47_spill] sm:$0xff] }
 0x23d   : > { %v1559_v50 = vpop.permute.xlu1 %1558  ;;  %v1638_v36 = vmul.f32 %v3247_v8, %v1623_v42  ;;  %v1704_v51 = vmul.f32 %v3253_v52, %v3600_v0 }
 0x23e   : > { %v1580_v9 = vmul.f32 %v2050_v21, %v1559_v50  ;;  %v1642_v59 = vadd.f32 %v1634_v14, %v1586_v63 }
 0x240   : > { %v1588_v16 = vadd.f32 %v1580_v9, %v1532_v35  ;;  %v1783_v39 = vpop.permute.xlu0 %1782 }
 0x241   : > { %v1567_v57 = vpop.permute.xlu1 %1566  ;;  %v1816_v40 = vmul.f32 %v3290_v17, %v1783_v39 }
 0x242   : > { %v1582_v20 = vmul.f32 %v2050_v21, %v1567_v57  ;;  %v1644_v26 = vadd.f32 %v1636_v55, %v1588_v16  ;;  %v3300_v16 = vld [vmem:[%s3363_s2] ss:$0 sm:$0xff] }
 0x244   : > { %v1590_v34 = vadd.f32 %v1582_v20, %v1534_v49 }
 0x246   : > { %v1599_v13 = vpop.permute.xlu1 %1598  ;;  %v1646_v61 = vadd.f32 %v1638_v36, %v1590_v34 }
 0x247   : > { %v1632_v15 = vmul.f32 %v3247_v8, %v1599_v13  ;;  %v1795_v13 = vpop.permute.xlu0 %1794 }
 0x249   : > { %v1640_v30 = vadd.f32 %v1632_v15, %v3228_v18 }
 0x24a   : > { %v3242_v48 = vpop.permute.xlu1 %1602 }
 0x24b   : > { %v1712_v9 = vadd.f32 %v1704_v51, %v1640_v30  ;;  %v1803_v3 = vpop.permute.xlu0 %1802 }
 0x24c   : > { %v1821_v55 = vmul.f32 %v3290_v17, %v1803_v3 }
 0x24e   : > { %v1611_v1 = vpop.permute.xlu1 %1610 }
 0x24f   : > { %v1635_v35 = vmul.f32 %v3247_v8, %v1611_v1  ;;  %v3601_v1 = vld [vmem:[#allocation49_spill] sm:$0xff] }
 0x250   : > { %v1707_v58 = vmul.f32 %v3253_v52, %v3601_v1 }
 0x251   : > { %v1643_v49 = vadd.f32 %v1635_v35, %v3231_v28 }
 0x252   : > { %v1619_v33 = vpop.permute.xlu1 %1618 }
 0x253   : > { %v1637_v20 = vmul.f32 %v3247_v8, %v1619_v33  ;;  %v1715_v23 = vadd.f32 %v1707_v58, %v1643_v49  ;;  %v1819_v33 = vmul.f32 %v3290_v17, %v1795_v13 }
 0x257   : > { %v1660_v21 = vpop.permute.xlu1 %1659 }
 0x258   : > { %v1703_v38 = vmul.f32 %v3253_v52, %v1660_v21 }
 0x25a   : > { %v1711_v60 = vadd.f32 %v1703_v38, %v1639_v37  ;;  %v1645_v37 = vadd.f32 %v1637_v20, %v3235_v11  ;;  %v1633_v11 = vmul.f32 %v3247_v8, %v3242_v48 }
 0x25b   : > { %v3263_v53 = vpop.permute.xlu1 %1669 }
 0x25c   : > { %v3265_v10 = vadd.f32 %v1759_v47, %v1711_v60  ;;  %v3602_v47 = vld [vmem:[#allocation52_spill] sm:$0xff]  ;;  %v1641_v8 = vadd.f32 %v1633_v11, %v3238_v5 }
 0x25d   : > { %v1709_v28 = vmul.f32 %v3253_v52, %v3602_v47 }
 0x25f   : > { %v1675_v24 = vpop.permute.xlu1 %1674  ;;  %v1717_v31 = vadd.f32 %v1709_v28, %v1645_v37 }
 0x260   : > { %v1706_v54 = vmul.f32 %v3253_v52, %v1675_v24 }
 0x262   : > { %v1714_v32 = vadd.f32 %v1706_v54, %v1642_v59 }
 0x263   : > { %v1685_v56 = vpop.permute.xlu1 %1684 }
 0x264   : > { %v1708_v6 = vmul.f32 %v3253_v52, %v1685_v56  ;;  %v3273_v22 = vadd.f32 %v1762_v43, %v1714_v32 }
 0x266   : > { %v1716_v7 = vadd.f32 %v1708_v6, %v1644_v26  ;;  %v1705_v6 = vmul.f32 %v3253_v52, %v3263_v53 }
 0x267   : > { %v1695_v29 = vpop.permute.xlu1 %1694 }
 0x268   : > { %v1710_v27 = vmul.f32 %v3253_v52, %v1695_v29  ;;  %v3280_v41 = vadd.f32 %v1764_v4, %v1716_v7  ;;  %v1713_v7 = vadd.f32 %v1705_v6, %v1641_v8 }
 0x26a   : > { %v1718_v45 = vadd.f32 %v1710_v27, %v1646_v61 }
 0x26c   : > { %v1727_v63 = vpop.permute.xlu1 %1726  ;;  %v3292_v50 = vadd.f32 %v1766_v12, %v1718_v45 }
 0x26d   : > { %v1760_v18 = vmul.f32 %v3258_v62, %v1727_v63 }
 0x26f   : > { %v1768_v46 = vadd.f32 %v1760_v18, %v1712_v9 }
 0x270   : > { %v1731_v57 = vpop.permute.xlu1 %1730 }
 0x271   : > { %v1824_v34 = vadd.f32 %v1816_v40, %v1768_v46  ;;  %v1761_v4 = vmul.f32 %v3258_v62, %v1731_v57 }
 0x273   : > { %v1839_v2 = vadd.f32 %v3300_v16, %v1824_v34  ;;  %v1769_v44 = vadd.f32 %v1761_v4, %v1713_v7 }
 0x274   : > { %v1739_v21 = vpop.permute.xlu1 %1738 }
 0x275   : > { %v1847_v38 = vadd.f32 3.0, %v1839_v2  ;;  %v1763_v25 = vmul.f32 %v3258_v62, %v1739_v21 }
 0x277   : > { %v1855_v60 = vmax.f32 %v1847_v38, 0.0  ;;  %v1771_v14 = vadd.f32 %v1763_v25, %v1715_v23 }
 0x278   : > { %v1747_v24 = vpop.permute.xlu1 %1746 }
 0x279   : > { %v1863_v59 = vmin.f32 %v1855_v60, 6.0  ;;  %v1827_v54 = vadd.f32 %v1819_v33, %v1771_v14  ;;  %v1765_v43 = vmul.f32 %v3258_v62, %v1747_v24 }
 0x27b   : > { %v1871_v32 = vmul.f32 %v1863_v59, %v1839_v2  ;;  %v1842_v56 = vadd.f32 %v3300_v16, %v1827_v54  ;;  %v1773_v26 = vadd.f32 %v1765_v43, %v1717_v31 }
 0x27d   : > { %v1879_v42 = vmul.f32 0.16666667, %v1871_v32  ;;  %v1850_v15 = vadd.f32 3.0, %v1842_v56  ;;  %v1829_v19 = vadd.f32 %v1821_v55, %v1773_v26  ;;  %v1779_v48 = vpop.permute.xlu1 %1778 }
 0x27e   : > { %v1815_v36 = vmul.f32 %v3290_v17, %v1779_v48 }
 0x27f   : > { %1888 = vst.msk [vmem:[%s3323_s13 + $0x8] sm:$0xff] %vm1886_vm0, %v1879_v42  ;;  %v1858_v52 = vmax.f32 %v1850_v15, 0.0  ;;  %v1844_v53 = vadd.f32 %v3300_v16, %v1829_v19 }
 0x280   : > { %v1823_v29 = vadd.f32 %v1815_v36, %v3265_v10 }
 0x281   : > { %v1866_v61 = vmin.f32 %v1858_v52, 6.0  ;;  %v1852_v27 = vadd.f32 3.0, %v1844_v53  ;;  %v1787_v30 = vpop.permute.xlu1 %1786 }
 0x282   : > { %v1838_v12 = vadd.f32 %v3300_v16, %v1823_v29  ;;  %v1817_v5 = vmul.f32 %v3290_v17, %v1787_v30 }
 0x283   : > { %v1874_v62 = vmul.f32 %v1866_v61, %v1842_v56  ;;  %v1860_v45 = vmax.f32 %v1852_v27, 0.0 }
 0x284   : > { %v1846_v0 = vadd.f32 3.0, %v1838_v12  ;;  %v1825_v51 = vadd.f32 %v1817_v5, %v1769_v44 }
 0x285   : > { %v1882_v39 = vmul.f32 0.16666667, %v1874_v62  ;;  %v1868_v63 = vmin.f32 %v1860_v45, 6.0  ;;  %v1791_v35 = vpop.permute.xlu1 %1790 }
 0x286   : > { %v1854_v9 = vmax.f32 %v1846_v0, 0.0  ;;  %v1840_v10 = vadd.f32 %v3300_v16, %v1825_v51  ;;  %v1818_v18 = vmul.f32 %v3290_v17, %v1791_v35 }
 0x287   : > { %1891 = vst.msk [vmem:[%s3323_s13 + $0x20] sm:$0xff] %vm1886_vm0, %v1882_v39  ;;  %v1876_v40 = vmul.f32 %v1868_v63, %v1844_v53 }
 0x288   : > { %v1862_v46 = vmin.f32 %v1854_v9, 6.0  ;;  %v1848_v57 = vadd.f32 3.0, %v1840_v10  ;;  %v1826_v49 = vadd.f32 %v1818_v18, %v3273_v22 }
 0x289   : > { %v1884_v20 = vmul.f32 0.16666667, %v1876_v40  ;;  %v1799_v34 = vpop.permute.xlu1 %1798 }
 0x28a   : > { %v1870_v13 = vmul.f32 %v1862_v46, %v1838_v12  ;;  %v1856_v1 = vmax.f32 %v1848_v57, 0.0  ;;  %v1841_v58 = vadd.f32 %v3300_v16, %v1826_v49  ;;  %v1820_v2 = vmul.f32 %v3290_v17, %v1799_v34 }
 0x28b   : > { %1893 = vst.msk [vmem:[%s3323_s13 + $0x30] sm:$0xff] %vm1886_vm0, %v1884_v20 }
 0x28c   : > { %v1878_v21 = vmul.f32 0.16666667, %v1870_v13  ;;  %v1864_v37 = vmin.f32 %v1856_v1, 6.0  ;;  %v1849_v38 = vadd.f32 3.0, %v1841_v58  ;;  %v1828_v23 = vadd.f32 %v1820_v2, %v3280_v41 }
 0x28d   : > { %v1807_v25 = vpop.permute.xlu1 %1806 }
 0x28e   : > { %1887 = vst.msk [vmem:[%s3323_s13] sm:$0xff] %vm1886_vm0, %v1878_v21  ;;  %v1872_v22 = vmul.f32 %v1864_v37, %v1840_v10  ;;  %v1857_v47 = vmax.f32 %v1849_v38, 0.0  ;;  %v1843_v28 = vadd.f32 %v3300_v16, %v1828_v23  ;;  %v1822_v33 = vmul.f32 %v3290_v17, %v1807_v25 }
 0x290   : > { %v1880_v60 = vmul.f32 0.16666667, %v1872_v22  ;;  %v1865_v14 = vmin.f32 %v1857_v47, 6.0  ;;  %v1851_v3 = vadd.f32 3.0, %v1843_v28  ;;  %v1830_v24 = vadd.f32 %v1822_v33, %v3292_v50 }
 0x292   : > { %1889 = vst.msk [vmem:[%s3323_s13 + $0x10] sm:$0xff] %vm1886_vm0, %v1880_v60  ;;  %v1873_v41 = vmul.f32 %v1865_v14, %v1841_v58  ;;  %v1859_v59 = vmax.f32 %v1851_v3, 0.0  ;;  %v1845_v54 = vadd.f32 %v3300_v16, %v1830_v24 }
 0x294   : > { %v1881_v31 = vmul.f32 0.16666667, %v1873_v41  ;;  %v1867_v43 = vmin.f32 %v1859_v59, 6.0  ;;  %v1853_v11 = vadd.f32 3.0, %v1845_v54 }
 0x296   : > { %1890 = vst.msk [vmem:[%s3323_s13 + $0x18] sm:$0xff] %vm1886_vm0, %v1881_v31  ;;  %v1875_v55 = vmul.f32 %v1867_v43, %v1843_v28  ;;  %v1861_v17 = vmax.f32 %v1853_v11, 0.0 }
 0x298   : > { %v1883_v32 = vmul.f32 0.16666667, %v1875_v55  ;;  %v1869_v56 = vmin.f32 %v1861_v17, 6.0 }
 0x29a   : > { %1892 = vst.msk [vmem:[%s3323_s13 + $0x28] sm:$0xff] %vm1886_vm0, %v1883_v32  ;;  %v1877_v26 = vmul.f32 %v1869_v56, %v1845_v54 }
 0x29c   : > { %v1885_v50 = vmul.f32 0.16666667, %v1877_v26 }
 0x29e   : > { %1894 = vst.msk [vmem:[%s3323_s13 + $0x38] sm:$0xff] %vm1886_vm0, %v1885_v50 }
 0x29f PF: > { %s13_s12 = sadd.s32 1, %s2131_s12  }
 0x2a0   : > { %p10_p4 = scmp.ge.s32.totalorder %s13_s12, 4  }
 0x2a2   :  { %12 = sbr.rel (!%p10_p4) target bundleno = 1 (0x1), region = 93 }

// kernel: mobilenetv3_forward.6
= control target key start
LH: loop header
LB: loop body
LE: loop exit
PB: predicated region body
PF: predicated region fallthrough
CT: control target
= control target key end

     0   :  { %s1443_s13 = smov 0   ;;  %s1693_s0 = inlined_call_operand.vmem [shape: f32[2,20,5,16], index: 0, kind: input, shape index: {}]   ;;  %s1694_s1 = inlined_call_operand.vmem [shape: f32[20,5,1], index: 1, kind: input, shape index: {}]   ;;  %s1695_s2 = inlined_call_operand.vmem [shape: f32[9,1,16], index: 2, kind: input, shape index: {}]   ;;  %s1696_s3 = inlined_call_operand.vmem [shape: f32[1,16], index: 3, kind: input, shape index: {}]   ;;  %s1697_s4 = inlined_call_operand.vmem [shape: bf16[16,8], index: 4, kind: input, shape index: {}]   ;;  %s1698_s5 = inlined_call_operand.vmem [shape: f32[1,8], index: 5, kind: input, shape index: {}]   ;;  %s1699_s6 = inlined_call_operand.vmem [shape: bf16[8,16], index: 6, kind: input, shape index: {}]   ;;  %s1700_s7 = inlined_call_operand.vmem [shape: f32[1,16], index: 7, kind: input, shape index: {}]   ;;  %s1701_s8 = inlined_call_operand.vmem [shape: bf16[16,16], index: 8, kind: input, shape index: {}]   ;;  %s1702_s9 = inlined_call_operand.vmem [shape: f32[1,16], index: 9, kind: input, shape index: {}]   ;;  %s1703_s10 = inlined_call_operand.vmem [shape: f32[2,4,4,16], index: 10, kind: output, shape index: {}]  }
   0x1 LB: > { %s1225_s14 = sadd.s32 4294967295, %s1383_s13   ;;  %p1229_p0 = scmp.ge.s32.totalorder %s1383_s13, 1  ;;  %s1383_s13 = sphi %s1443_s13, %s20_s13  }
   0x2   : > { %p312_p1 = scmp.lt.s32.totalorder %s1383_s13, 3 }
   0x4   : > { %p313_p2 = pnand %p1229_p0, %p312_p1 }
   0x5   : > { %v1242_v0 = vld [vmem:[%s1694_s1 + $0x28] sm:$0x1f] (!%p313_p2)  ;;  %v362_v1 = vld [vmem:[%s1694_s1] sm:$0x1f] (!%p313_p2)  ;;  %v1385_v2 = vmov (!%p313_p2), 0   ;;  %v1386_v22 = vmov (!%p313_p2), 0.0  }
   0x6   : > { %316 = sbr.rel (%p313_p2) target bundleno = 880 (0x370), region = 60  ;;  %1371 = vset.pattern.permute.xlu1 (!%p313_p2), %v1385_v2  ;;  %1370 = vset.pattern.permute.xlu0 (!%p313_p2), %v1385_v2  ;;  %v1244_v3 = vld [vmem:[%s1694_s1 + $0x30] sm:$0x1f] (!%p313_p2)  ;;  %v1234_v4 = vld [vmem:[%s1694_s1 + $0x8] sm:$0x1f] (!%p313_p2)  ;;  %v1372_v21 = vld [vmem:[%s1697_s4] sm:$0xff] (!%p313_p2)  }
   0x7   : > { %425 = vperm.xlu1 (!%p313_p2), %1371, %v1242_v0   ;;  %365 = vperm.xlu0 (!%p313_p2), %1370, %v362_v1   ;;  %v1246_v5 = vld [vmem:[%s1694_s1 + $0x38] sm:$0x1f] (!%p313_p2)  ;;  %v1236_v6 = vld [vmem:[%s1694_s1 + $0x10] sm:$0x1f] (!%p313_p2)  ;;  %v1248_v7 = vld [vmem:[%s1694_s1 + $0x40] sm:$0x1f] (!%p313_p2) }
   0x8   : > { %v1238_v8 = vld [vmem:[%s1694_s1 + $0x18] sm:$0x1f] (!%p313_p2)  ;;  %v1252_v10 = vld [vmem:[%s1694_s1 + $0x50] sm:$0x1f] (!%p313_p2)  ;;  %v1256_v12 = vld [vmem:[%s1694_s1 + $0x60] sm:$0x1f] (!%p313_p2)  ;;  %1322 = vmatprep.subr.bf16.mxu0 (!%p313_p2), %v1386_v22  ;;  %1328 = vmatprep.subr.bf16.mxu1 (!%p313_p2), %v1386_v22 }
   0x9   : > { %v1254_v9 = vld [vmem:[%s1694_s1 + $0x58] sm:$0x1f] (!%p313_p2)  ;;  %v1258_v13 = vld [vmem:[%s1694_s1 + $0x68] sm:$0x1f] (!%p313_p2)  ;;  %v1264_v14 = vld [vmem:[%s1694_s1 + $0x80] sm:$0x1f] (!%p313_p2)  ;;  %1323 = vmatpush3.bf16.msra.mxu0 (!%p313_p2), %v1372_v21 }
   0xa   : > { %v1262_v11 = vld [vmem:[%s1694_s1 + $0x78] sm:$0x1f] (!%p313_p2)  ;;  %v1268_v15 = vld [vmem:[%s1694_s1 + $0x90] sm:$0x1f] (!%p313_p2)  ;;  %v1266_v16 = vld [vmem:[%s1694_s1 + $0x88] sm:$0x1f] (!%p313_p2)  ;;  %1334 = vmatprep.subr.bf16.mxu0 (!%p313_p2), %v1386_v22 }
   0xb   : > { %437 = vperm.xlu1 (!%p313_p2), %1371, %v1244_v3   ;;  %377 = vperm.xlu0 (!%p313_p2), %1370, %v1234_v4   ;;  %v1250_v17 = vld [vmem:[%s1694_s1 + $0x48] sm:$0x1f] (!%p313_p2)  ;;  %v1240_v18 = vld [vmem:[%s1694_s1 + $0x20] sm:$0x1f] (!%p313_p2)  ;;  %v1270_v19 = vld [vmem:[%s1694_s1 + $0x98] sm:$0x1f] (!%p313_p2) }
   0xc   : > { %v1260_v20 = vld [vmem:[%s1694_s1 + $0x70] sm:$0x1f] (!%p313_p2)  ;;  %vm1387_vm0 = vmmov (!%p313_p2), 0   ;;  %p350_p3 = scmp.lt.s32.totalorder (!%p313_p2), %s1225_s14, 1  ;;  %vm369_vm1 = vcmask (!%p313_p2), 126976   ;;  %vm793_vm2 = vcmask (!%p313_p2), 125952  }
   0xd   : > { %1324 = vmatprep.mubr.msk.bf16.mxu0 %vm1387_vm0, %v1386_v22  ;;  %1330 = vmatprep.mubr.msk.bf16.mxu1 %vm1387_vm0, %v1386_v22  ;;  %v1273_v51 = vld [vmem:[%s1695_s2 + $0x1] ss:$0 sm:$0xff]  ;;  %v1271_v52 = vld [vmem:[%s1695_s2] ss:$0 sm:$0xff]  ;;  %vm819_vm3 = vcmask 130048   ;;  %vm871_vm4 = vcmask 1043456  }
   0xe   : > { %s1705_s14 = smov (!%p350_p3, %s1225_s14), 1  ;;  %vm867_vm5 = vcmask 64512  }
   0xf   : > { %449 = vperm.xlu1 %1371, %v1246_v5   ;;  %389 = vperm.xlu0 %1370, %v1236_v6   ;;  %s1358_s21 = smul.u32 160, %s1705_s14  ;;  %v1566_v5 = vld [vmem:[%s1695_s2 + $0x2] ss:$0 sm:$0xff]  ;;  %s1309_s23 = sshll.u32 %s1705_s14, 4 }
  0x10   : > { %s359_s28 = scalar_lea.vmem %s1703_s10, %s1309_s23 }
  0x11   : > { %s1531_s24 = scalar_lea.vmem %s1693_s0, %s1358_s21 }
  0x12   : > { %v1241_v23 = vld [vmem:[%s1531_s24 + $0x28] sm:$0x1f]  ;;  %v361_v24 = vld [vmem:[%s1531_s24] sm:$0x1f]  ;;  %v1243_v29 = vld [vmem:[%s1531_s24 + $0x30] sm:$0x1f] }
  0x13   : > { %461 = vperm.xlu1 %1371, %v1248_v7   ;;  %401 = vperm.xlu0 %1370, %v1238_v8   ;;  %v1233_v30 = vld [vmem:[%s1531_s24 + $0x8] sm:$0x1f]  ;;  %v1245_v35 = vld [vmem:[%s1531_s24 + $0x38] sm:$0x1f]  ;;  %v1235_v36 = vld [vmem:[%s1531_s24 + $0x10] sm:$0x1f] }
  0x14   : > { %v1247_v41 = vld [vmem:[%s1531_s24 + $0x40] sm:$0x1f]  ;;  %v1237_v42 = vld [vmem:[%s1531_s24 + $0x18] sm:$0x1f]  ;;  %v1251_v48 = vld [vmem:[%s1531_s24 + $0x50] sm:$0x1f] }
  0x15   : > { %v1253_v47 = vld [vmem:[%s1531_s24 + $0x58] sm:$0x1f]  ;;  %v1255_v58 = vld [vmem:[%s1531_s24 + $0x60] sm:$0x1f]  ;;  %v1257_v3 = vld [vmem:[%s1531_s24 + $0x68] sm:$0x1f] }
  0x16   : > { %v1261_v55 = vld [vmem:[%s1531_s24 + $0x78] sm:$0x1f]  ;;  %v1263_v4 = vld [vmem:[%s1531_s24 + $0x80] sm:$0x1f]  ;;  %v1265_v21 = vld [vmem:[%s1531_s24 + $0x88] sm:$0x1f] }
  0x17   : > { %497 = vperm.xlu1 %1371, %v1254_v9   ;;  %485 = vperm.xlu0 %1370, %v1252_v10   ;;  %v1277_v10 = vld [vmem:[%s1695_s2 + $0x3] ss:$0 sm:$0xff] }
  0x1b   : > { %545 = vperm.xlu1 %1371, %v1262_v11   ;;  %509 = vperm.xlu0 %1370, %v1256_v12  }
  0x1f   : > { %521 = vperm.xlu1 %1371, %v1258_v13   ;;  %557 = vperm.xlu0 %1370, %v1264_v14  }
  0x23   : > { %581 = vperm.xlu1 %1371, %v1268_v15   ;;  %569 = vperm.xlu0 %1370, %v1266_v16  }
  0x27   : > { %473 = vperm.xlu1 %1371, %v1250_v17   ;;  %413 = vperm.xlu0 %1370, %v1240_v18  }
  0x2b   : > { %593 = vperm.xlu1 %1371, %v1270_v19   ;;  %533 = vperm.xlu0 %1370, %v1260_v20   ;;  %v1267_v20 = vld [vmem:[%s1531_s24 + $0x90] sm:$0x1f] }
  0x86   : > { %v426_v25 = vpop.permute.xlu1 %425  ;;  %v366_v26 = vpop.permute.xlu0 %365 }
  0x87   : > { %v428_v27 = vmul.f32 %v1241_v23, %v426_v25  ;;  %v368_v28 = vmul.f32 %v366_v26, %v361_v24 }
  0x89   : > { %430 = vst.msk [vmem:[#allocation2 + $0x28] sm:$0x1f] %vm369_vm1, %v428_v27  ;;  %370 = vst.msk [vmem:[#allocation2] sm:$0x1f] %vm369_vm1, %v368_v28 }
  0x8a   : > { %v438_v31 = vpop.permute.xlu1 %437  ;;  %v378_v32 = vpop.permute.xlu0 %377 }
  0x8b   : > { %v440_v33 = vmul.f32 %v1243_v29, %v438_v31  ;;  %v380_v34 = vmul.f32 %v1233_v30, %v378_v32 }
  0x8d   : > { %442 = vst.msk [vmem:[#allocation2 + $0x30] sm:$0x1f] %vm369_vm1, %v440_v33  ;;  %382 = vst.msk [vmem:[#allocation2 + $0x8] sm:$0x1f] %vm369_vm1, %v380_v34  ;;  %v1581_v34 = vld [vmem:[%s1695_s2 + $0x4] ss:$0 sm:$0xff] }
  0x8e   : > { %v450_v37 = vpop.permute.xlu1 %449  ;;  %v390_v38 = vpop.permute.xlu0 %389 }
  0x8f   : > { %v452_v39 = vmul.f32 %v1245_v35, %v450_v37  ;;  %v392_v40 = vmul.f32 %v1235_v36, %v390_v38  ;;  %v1249_v37 = vld [vmem:[%s1531_s24 + $0x48] sm:$0x1f] }
  0x90   : > { %v618_v56 = vld [vmem:[#allocation2 + $0x28] sm:$0xf]  ;;  %v599_v57 = vld [vmem:[#allocation2] sm:$0xf] }
  0x91   : > { %454 = vst.msk [vmem:[#allocation2 + $0x38] sm:$0x1f] %vm369_vm1, %v452_v39  ;;  %394 = vst.msk [vmem:[#allocation2 + $0x10] sm:$0x1f] %vm369_vm1, %v392_v40  ;;  %v630_v63 = vmul.f32 %v1273_v51, %v618_v56  ;;  %v610_v0 = vmul.f32 %v1271_v52, %v599_v57  ;;  %v638_v8 = vld [vmem:[#allocation2 + $0x1] sm:$0xf] }
  0x92   : > { %v462_v43 = vpop.permute.xlu1 %461  ;;  %v402_v44 = vpop.permute.xlu0 %401  ;;  %v650_v23 = vmul.f32 %v1566_v5, %v638_v8  ;;  %v1587_v39 = vld [vmem:[%s1695_s2 + $0x5] ss:$0 sm:$0xff] }
  0x93   : > { %v464_v45 = vmul.f32 %v1247_v41, %v462_v43  ;;  %v404_v46 = vmul.f32 %v1237_v42, %v402_v44  ;;  %v634_v13 = vadd.f32 %v630_v63, %v610_v0  ;;  %v1239_v42 = vld [vmem:[%s1531_s24 + $0x20] sm:$0x1f] }
  0x94   : > { %v619_v59 = vld [vmem:[#allocation2 + $0x30] sm:$0xf]  ;;  %v600_v60 = vld [vmem:[#allocation2 + $0x8] sm:$0xf] }
  0x95   : > { %466 = vst.msk [vmem:[#allocation2 + $0x40] sm:$0x1f] %vm369_vm1, %v464_v45  ;;  %406 = vst.msk [vmem:[#allocation2 + $0x18] sm:$0x1f] %vm369_vm1, %v404_v46  ;;  %v631_v6 = vmul.f32 %v1273_v51, %v619_v59  ;;  %v611_v7 = vmul.f32 %v1271_v52, %v600_v60  ;;  %v639_v25 = vld [vmem:[#allocation2 + $0x9] sm:$0xf]  ;;  %v654_v38 = vadd.f32 %v650_v23, %v634_v13 }
  0x96   : > { %v498_v49 = vpop.permute.xlu1 %497  ;;  %v486_v50 = vpop.permute.xlu0 %485  ;;  %v651_v40 = vmul.f32 %v1566_v5, %v639_v25  ;;  %v718_v60 = vld [vmem:[#allocation2 + $0x8] sm:$0xf] }
  0x97   : > { %v500_v53 = vmul.f32 %v1253_v47, %v498_v49  ;;  %v488_v54 = vmul.f32 %v1251_v48, %v486_v50  ;;  %v635_v24 = vadd.f32 %v631_v6, %v611_v7 }
  0x98   : > { %v620_v9 = vld [vmem:[#allocation2 + $0x38] sm:$0xf]  ;;  %v601_v14 = vld [vmem:[#allocation2 + $0x10] sm:$0xf] }
  0x99   : > { %502 = vst.msk [vmem:[#allocation2 + $0x58] sm:$0x1f] %vm369_vm1, %v500_v53  ;;  %490 = vst.msk [vmem:[#allocation2 + $0x50] sm:$0x1f] %vm369_vm1, %v488_v54  ;;  %v632_v27 = vmul.f32 %v1273_v51, %v620_v9  ;;  %v612_v28 = vmul.f32 %v1271_v52, %v601_v14  ;;  %v640_v44 = vld [vmem:[#allocation2 + $0x11] sm:$0xf]  ;;  %v655_v54 = vadd.f32 %v651_v40, %v635_v24 }
  0x9a   : > { %v546_v61 = vpop.permute.xlu1 %545  ;;  %v510_v62 = vpop.permute.xlu0 %509  ;;  %v719_v8 = vld [vmem:[#allocation2 + $0x10] sm:$0xf] }
  0x9b   : > { %v548_v1 = vmul.f32 %v1261_v55, %v546_v61  ;;  %v512_v2 = vmul.f32 %v1255_v58, %v510_v62  ;;  %v1283_v55 = vld [vmem:[%s1695_s2 + $0x6] ss:$0 sm:$0xff]  ;;  %v652_v61 = vmul.f32 %v1566_v5, %v640_v44  ;;  %v738_v9 = vld [vmem:[#allocation2 + $0x30] sm:$0xf] }
  0x9c   : > { %v621_v15 = vld [vmem:[#allocation2 + $0x40] sm:$0xf]  ;;  %v602_v16 = vld [vmem:[#allocation2 + $0x18] sm:$0xf]  ;;  %v731_v25 = vmul.f32 %v1283_v55, %v719_v8  ;;  %v759_v44 = vld [vmem:[#allocation2 + $0x11] sm:$0xf] }
  0x9d   : > { %550 = vst.msk [vmem:[#allocation2 + $0x78] sm:$0x1f] %vm369_vm1, %v548_v1  ;;  %514 = vst.msk [vmem:[#allocation2 + $0x60] sm:$0x1f] %vm369_vm1, %v512_v2  ;;  %v633_v29 = vmul.f32 %v1273_v51, %v621_v15  ;;  %v613_v30 = vmul.f32 %v1271_v52, %v602_v16  ;;  %v641_v45 = vld [vmem:[#allocation2 + $0x19] sm:$0xf]  ;;  %v636_v52 = vadd.f32 %v632_v27, %v612_v28 }
  0x9e   : > { %v522_v11 = vpop.permute.xlu1 %521  ;;  %v558_v12 = vpop.permute.xlu0 %557  ;;  %v653_v63 = vmul.f32 %v1566_v5, %v641_v45  ;;  %v730_v15 = vmul.f32 %v1283_v55, %v718_v60 }
  0x9f   : > { %v524_v17 = vmul.f32 %v1257_v3, %v522_v11  ;;  %v560_v18 = vmul.f32 %v1263_v4, %v558_v12  ;;  %v637_v53 = vadd.f32 %v633_v29, %v613_v30  ;;  %v1285_v11 = vld [vmem:[%s1695_s2 + $0x7] ss:$0 sm:$0xff]  ;;  %v656_v13 = vadd.f32 %v652_v61, %v636_v52 }
  0xa0   : > { %v658_v19 = vld [vmem:[#allocation2 + $0x50] sm:$0xf]  ;;  %v659_v31 = vld [vmem:[#allocation2 + $0x58] sm:$0xf]  ;;  %v750_v27 = vmul.f32 %v1285_v11, %v738_v9 }
  0xa1   : > { %v670_v26 = vmul.f32 %v1277_v10, %v658_v19  ;;  %526 = vst.msk [vmem:[#allocation2 + $0x68] sm:$0x1f] %vm369_vm1, %v524_v17  ;;  %562 = vst.msk [vmem:[#allocation2 + $0x80] sm:$0x1f] %vm369_vm1, %v560_v18  ;;  %v698_v43 = vld [vmem:[#allocation2 + $0x51] sm:$0xf]  ;;  %v671_v46 = vmul.f32 %v1277_v10, %v659_v31  ;;  %v657_v14 = vadd.f32 %v653_v63, %v637_v53 }
  0xa2   : > { %v582_v32 = vpop.permute.xlu1 %581  ;;  %v570_v33 = vpop.permute.xlu0 %569  ;;  %v710_v59 = vmul.f32 %v1587_v39, %v698_v43  ;;  %v699_v2 = vld [vmem:[#allocation2 + $0x59] sm:$0xf]  ;;  %v1287_v19 = vld [vmem:[%s1695_s2 + $0x8] ss:$0 sm:$0xff]  ;;  %v740_v43 = vld [vmem:[#allocation2 + $0x40] sm:$0xf] }
  0xa3   : > { %v584_v35 = vmul.f32 %v1267_v20, %v582_v32  ;;  %v572_v36 = vmul.f32 %v1265_v21, %v570_v33  ;;  %v674_v48 = vadd.f32 %v670_v26, %v654_v38  ;;  %v675_v4 = vadd.f32 %v671_v46, %v655_v54  ;;  %v739_v32 = vld [vmem:[#allocation2 + $0x38] sm:$0xf] }
  0xa4   : > { %v678_v41 = vld [vmem:[#allocation2 + $0x78] sm:$0xf]  ;;  %v660_v47 = vld [vmem:[#allocation2 + $0x60] sm:$0xf]  ;;  %v711_v18 = vmul.f32 %v1587_v39, %v699_v2  ;;  %v752_v53 = vmul.f32 %v1285_v11, %v740_v43  ;;  %v919_v43 = vlaneseq }
  0xa5   : > { %586 = vst.msk [vmem:[#allocation2 + $0x90] sm:$0x1f] %vm369_vm1, %v584_v35  ;;  %574 = vst.msk [vmem:[#allocation2 + $0x88] sm:$0x1f] %vm369_vm1, %v572_v36  ;;  %v690_v49 = vmul.f32 %v1581_v34, %v678_v41  ;;  %v672_v1 = vmul.f32 %v1277_v10, %v660_v47  ;;  %v700_v17 = vld [vmem:[#allocation2 + $0x61] sm:$0xf]  ;;  %v751_v47 = vmul.f32 %v1285_v11, %v739_v32 }
  0xa6   : > { %v474_v50 = vpop.permute.xlu1 %473  ;;  %v414_v51 = vpop.permute.xlu0 %413  ;;  %v712_v33 = vmul.f32 %v1587_v39, %v700_v17  ;;  %v720_v35 = vld [vmem:[#allocation2 + $0x18] sm:$0xf] }
  0xa7   : > { %v476_v56 = vmul.f32 %v1249_v37, %v474_v50  ;;  %v416_v57 = vmul.f32 %v1239_v42, %v414_v51  ;;  %v694_v58 = vadd.f32 %v690_v49, %v674_v48  ;;  %v676_v20 = vadd.f32 %v672_v1, %v656_v13 }
  0xa8   : > { %v679_v62 = vld [vmem:[#allocation2 + $0x80] sm:$0xf]  ;;  %v661_v0 = vld [vmem:[#allocation2 + $0x68] sm:$0xf]  ;;  %v732_v51 = vmul.f32 %v1283_v55, %v720_v35 }
  0xa9   : > { %478 = vst.msk [vmem:[#allocation2 + $0x48] sm:$0x1f] %vm369_vm1, %v476_v56  ;;  %418 = vst.msk [vmem:[#allocation2 + $0x20] sm:$0x1f] %vm369_vm1, %v416_v57  ;;  %v673_v3 = vmul.f32 %v1277_v10, %v661_v0  ;;  %v691_v6 = vmul.f32 %v1581_v34, %v679_v62  ;;  %v714_v7 = vadd.f32 %v710_v59, %v694_v58  ;;  %v758_v10 = vld [vmem:[#allocation2 + $0x9] sm:$0xf] }
  0xaa   : > { %v594_v12 = vpop.permute.xlu1 %593  ;;  %v534_v5 = vpop.permute.xlu0 %533  ;;  %v701_v24 = vld [vmem:[#allocation2 + $0x69] sm:$0xf]  ;;  %v770_v37 = vmul.f32 %v1287_v19, %v758_v10  ;;  %v760_v56 = vld [vmem:[#allocation2 + $0x19] sm:$0xf] }
  0xab   : > { %v695_v16 = vadd.f32 %v691_v6, %v675_v4  ;;  %v734_v26 = vadd.f32 %v730_v15, %v714_v7  ;;  %v677_v28 = vadd.f32 %v673_v3, %v657_v14  ;;  %v713_v41 = vmul.f32 %v1587_v39, %v701_v24 }
  0xac   : > { %v680_v21 = vld [vmem:[#allocation2 + $0x88] sm:$0xf]  ;;  %v681_v23 = vld [vmem:[#allocation2 + $0x90] sm:$0xf]  ;;  %v771_v39 = vmul.f32 %v1287_v19, %v759_v44  ;;  %v772_v1 = vmul.f32 %v1287_v19, %v760_v56 }
  0xad   : > { %v692_v29 = vmul.f32 %v1581_v34, %v680_v21  ;;  %v693_v30 = vmul.f32 %v1581_v34, %v681_v23  ;;  %v715_v31 = vadd.f32 %v711_v18, %v695_v16  ;;  %v754_v36 = vadd.f32 %v750_v27, %v734_v26  ;;  %v1288_v34 = vld [vmem:[%s1696_s3] ss:$0 sm:$0xff] }
  0xaf   : > { %v696_v38 = vadd.f32 %v692_v29, %v676_v20  ;;  %v697_v40 = vadd.f32 %v693_v30, %v677_v28  ;;  %v735_v42 = vadd.f32 %v731_v25, %v715_v31  ;;  %v774_v48 = vadd.f32 %v770_v37, %v754_v36  ;;  %v865_v28 = vld [vmem:[%s1699_s6] sm:$0xf] }
  0xb0   : > { %v721_v45 = vld [vmem:[#allocation2 + $0x20] sm:$0xf]  ;;  %v741_v46 = vld [vmem:[#allocation2 + $0x48] sm:$0xf]  ;;  %v873_v29 = vsel %vm871_vm4, %v865_v28, 0 }
  0xb1   : > { %v716_v49 = vadd.f32 %v712_v33, %v696_v38  ;;  %v717_v50 = vadd.f32 %v713_v41, %v697_v40  ;;  %v733_v52 = vmul.f32 %v1283_v55, %v721_v45  ;;  %v755_v54 = vadd.f32 %v751_v47, %v735_v42  ;;  %v761_v57 = vld [vmem:[#allocation2 + $0x21] sm:$0xf]  ;;  %1329 = vmatpush3.bf16.msra.mxu1 %v873_v29  ;;  %v812_v30 = vld [vmem:[%s1698_s5] sm:$0x1] }
  0xb2   : > { %v753_v60 = vmul.f32 %v1285_v11, %v741_v46  ;;  %v1617_v61 = vadd.f32 %v1288_v34, %v774_v48  ;;  %v773_v2 = vmul.f32 %v1287_v19, %v761_v57  ;;  %1340 = vmatprep.subr.bf16.mxu1 %v1386_v22  ;;  %v1373_v40 = vld [vmem:[%s1701_s8] sm:$0xff]  }
  0xb3   : > { %v736_v58 = vadd.f32 %v732_v51, %v716_v49  ;;  %v737_v59 = vadd.f32 %v733_v52, %v717_v50  ;;  %v775_v62 = vadd.f32 %v771_v39, %v755_v54  ;;  %v1374_v41 = vld [vmem:[%s1701_s8] sm:$0xff]  }
  0xb4   : > { %v789_v55 = vmax.f32 %v1617_v61, 0.0  ;;  %v866_v42 = vld [vmem:[%s1700_s7] sm:$0x1] }
  0xb5   : > { %v756_v63 = vadd.f32 %v752_v53, %v736_v58  ;;  %v757_v0 = vadd.f32 %v753_v60, %v737_v59  ;;  %v1619_v3 = vadd.f32 %v1288_v34, %v775_v62  ;;  %v1375_v39 = vld [vmem:[%s1701_s8] sm:$0xff]  }
  0xb6   : > { %v794_v13 = vsel %vm793_vm2, %v789_v55, 0.0  ;;  %v1376_v58 = vld [vmem:[%s1701_s8] sm:$0xff]  }
  0xb7   : > { %v776_v4 = vadd.f32 %v772_v1, %v756_v63  ;;  %v777_v6 = vadd.f32 %v773_v2, %v757_v0  ;;  %v790_v7 = vmax.f32 %v1619_v3, 0.0  ;;  %v1292_v1 = vld [vmem:[%s1702_s9] ss:$0 sm:$0xff] }
  0xb9   : > { %v1623_v8 = vadd.f32 %v1288_v34, %v776_v4  ;;  %v1625_v9 = vadd.f32 %v1288_v34, %v777_v6  ;;  %v795_v11 = vsel %vm793_vm2, %v790_v7, 0.0  ;;  %v920_v34 = vshrl.u32 %v919_v43, 7 }
  0xba   : > { %v796_v14 = vadd.f32 %v795_v11, %v794_v13 }
  0xbb   : > { %v791_v12 = vmax.f32 %v1623_v8, 0.0  ;;  %v792_v5 = vmax.f32 %v1625_v9, 0.0  ;;  %v921_v52 = vsub.s32 0, %v920_v34 }
  0xbd   : > { %v797_v15 = vsel %vm793_vm2, %v791_v12, 0.0  ;;  %v799_v17 = vsel %vm793_vm2, %v792_v5, 0.0 }
  0xbe   : > { %v798_v16 = vadd.f32 %v797_v15, %v796_v14 }
  0xc0   : > { %v800_v18 = vadd.f32 %v799_v17, %v798_v16 }
  0xc2   : > { %v801_v10 = vsel %vm793_vm2, %v800_v18, 0.0 }
  0xc3   : > { %v802_v19 = vrot.slane %v801_v10, 4 }
  0xc5   : > { %v803_v20 = vadd.f32 %v802_v19, %v801_v10 }
  0xc7   : > { %v804_v21 = vrot.slane %v803_v20, 2 }
  0xc9   : > { %v805_v23 = vadd.f32 %v804_v21, %v803_v20 }
  0xcb   : > { %v806_v24 = vrot.slane %v805_v23, 1 }
  0xcd   : > { %v807_v25 = vadd.f32 %v806_v24, %v805_v23 }
  0xcf   : > { %v808_v26 = vmul.f32 0.0625, %v807_v25 }
  0xd1   : > { %v809_v27 = vpack.c.bf16 %v808_v26, %v808_v26 }
  0xd3   : > { %1325 = vmatmul.mubr.msk.bf16.vlgmr.msra.gmra.mrb[0].mxu0 %vm819_vm3, %v809_v27 }
  0xd4   : > { %1336 = vmatprep.mubr.msk.bf16.mxu0 %vm1387_vm0, %v1386_v22  ;;  %1335 = vmatpush3.bf16.msra.mxu0 %v1373_v40 }
  0xd5   : > { %1346 = vmatprep.subr.bf16.mxu0 %v1386_v22 }
 0x1a6   : > { %v857_v31 = vpop.f32.mrb[0].mxu0 }
 0x1a7   : > { %v858_v32 = vadd.f32 %v857_v31, %v812_v30  ;;  %v1326_v33 = vpop.f32.mrb[1].mxu0 }
 0x1a8   : > { %v860_v35 = vpop.f32.mrb[2].mxu0 }
 0x1a9   : > { %v863_v36 = vmax.f32 %v858_v32, 0.0  ;;  %v1327_v37 = vpop.f32.mrb[3].mxu0 }
 0x1ab   : > { %v864_v38 = vpack.c.bf16 %v863_v36, %v863_v36 }
 0x1ad   : > { %1331 = vmatmul.mubr.msk.bf16.vlgmr.msra.gmra.mrb[0].mxu1 %vm867_vm5, %v864_v38 }
 0x1ae   : > { %1342 = vmatprep.mubr.msk.bf16.mxu1 %vm1387_vm0, %v1386_v22  ;;  %1341 = vmatpush3.bf16.msra.mxu1 %v1374_v41 }
 0x1af   : > { %1352 = vmatprep.subr.bf16.mxu1 %v1386_v22 }
 0x280   : > { %v909_v44 = vpop.f32.mrb[0].mxu1 }
 0x281   : > { %v910_v45 = vadd.f32 %v909_v44, %v866_v42  ;;  %v1332_v46 = vpop.f32.mrb[1].mxu1 }
 0x282   : > { %v912_v47 = vpop.f32.mrb[2].mxu1 }
 0x283   : > { %v915_v48 = vadd.f32 3.0, %v910_v45  ;;  %v1333_v49 = vpop.f32.mrb[3].mxu1 }
 0x285   : > { %v916_v50 = vmax.f32 %v915_v48, 0.0 }
 0x287   : > { %v917_v51 = vmin.f32 %v916_v50, 6.0 }
 0x289   : > { %v918_v53 = vmul.f32 0.16666667, %v917_v51 }
 0x28b   : > { %v922_v54 = vrot.slane %v918_v53, %v921_v52 }
 0x28d   : > { %v923_v56 = vmul.f32 %v922_v54, %v789_v55  ;;  %v924_v57 = vmul.f32 %v922_v54, %v790_v7  ;;  %v925_v61 = vmul.f32 %v922_v54, %v791_v12  ;;  %v926_v62 = vmul.f32 %v922_v54, %v792_v5 }
 0x28f   : > { %v927_v59 = vpack.c.bf16 %v923_v56, %v923_v56  ;;  %v987_v60 = vpack.c.bf16 %v924_v57, %v924_v57  ;;  %v1048_v63 = vpack.c.bf16 %v925_v61, %v925_v61  ;;  %v1109_v0 = vpack.c.bf16 %v926_v62, %v926_v62 }
 0x291   : > { %1337 = vmatmul.mubr.msk.bf16.vlgmr.msra.gmra.mrb[4].mxu0 %vm819_vm3, %v927_v59  ;;  %1343 = vmatmul.mubr.msk.bf16.vlgmr.msra.gmra.mrb[4].mxu1 %vm819_vm3, %v987_v60 }
 0x292   : > { %1347 = vmatpush3.bf16.msra.mxu0 %v1375_v39  ;;  %1353 = vmatpush3.bf16.msra.mxu1 %v1376_v58 }
 0x293   : > { %1348 = vmatprep.mubr.msk.bf16.mxu0 %vm1387_vm0, %v1386_v22  ;;  %1354 = vmatprep.mubr.msk.bf16.mxu1 %vm1387_vm0, %v1386_v22 }
 0x299   : > { %1349 = vmatmul.mubr.msk.bf16.vlgmr.msra.gmra.mrb[8].mxu0 %vm819_vm3, %v1048_v63  ;;  %1355 = vmatmul.mubr.msk.bf16.vlgmr.msra.gmra.mrb[8].mxu1 %vm819_vm3, %v1109_v0 }
 0x364   : > { %v980_v22 = vpop.f32.mrb[4].mxu0  ;;  %v1040_v2 = vpop.f32.mrb[4].mxu1 }
 0x365   : > { %v981_v3 = vadd.f32 %v1292_v1, %v980_v22  ;;  %v1041_v4 = vadd.f32 %v1292_v1, %v1040_v2  ;;  %v1338_v6 = vpop.f32.mrb[5].mxu0  ;;  %v1344_v55 = vpop.f32.mrb[5].mxu1 }
 0x366   : > { %v983_v7 = vpop.f32.mrb[6].mxu0  ;;  %v1043_v8 = vpop.f32.mrb[6].mxu1 }
 0x367   : > { %986 = vst.msk [vmem:[%s359_s28] sm:$0xf] %vm793_vm2, %v981_v3  ;;  %1298 = vst.msk [vmem:[%s359_s28 + $0x4] sm:$0xf] %vm793_vm2, %v1041_v4  ;;  %v1339_v9 = vpop.f32.mrb[7].mxu0  ;;  %v1345_v11 = vpop.f32.mrb[7].mxu1 }
 0x36c   : > { %v1101_v12 = vpop.f32.mrb[8].mxu0  ;;  %v1162_v5 = vpop.f32.mrb[8].mxu1 }
 0x36d   : > { %v1102_v13 = vadd.f32 %v1292_v1, %v1101_v12  ;;  %v1163_v14 = vadd.f32 %v1292_v1, %v1162_v5  ;;  %v1350_v15 = vpop.f32.mrb[9].mxu0  ;;  %v1356_v16 = vpop.f32.mrb[9].mxu1 }
 0x36e   : > { %v1104_v17 = vpop.f32.mrb[10].mxu0  ;;  %v1165_v18 = vpop.f32.mrb[10].mxu1 }
 0x36f   : > { %1302 = vst.msk [vmem:[%s359_s28 + $0x8] sm:$0xf] %vm793_vm2, %v1102_v13  ;;  %1306 = vst.msk [vmem:[%s359_s28 + $0xc] sm:$0xf] %vm793_vm2, %v1163_v14  ;;  %v1351_v10 = vpop.f32.mrb[11].mxu0  ;;  %v1357_v19 = vpop.f32.mrb[11].mxu1 }
 0x370 PF: > { %s20_s13 = sadd.s32 1, %s1383_s13  }
 0x371   : > { %p17_p4 = scmp.ge.s32.totalorder %s20_s13, 4  }
 0x373   :  { %19 = sbr.rel (!%p17_p4) target bundleno = 1 (0x1), region = 158 }

// kernel: mobilenetv3_forward.9
= control target key start
LH: loop header
LB: loop body
LE: loop exit
PB: predicated region body
PF: predicated region fallthrough
CT: control target
= control target key end

     0   :  { %12 = vsyncpa [#allocation3], 0  ;;  %s1180_s0 = inlined_call_operand.vmem [shape: f32[2,2,2,24], index: 0, kind: input, shape index: {}]   ;;  %s1181_s1 = inlined_call_operand.vmem [shape: bf16[24,144], index: 1, kind: input, shape index: {}]   ;;  %s1182_s2 = inlined_call_operand.vmem [shape: f32[1,144], index: 2, kind: input, shape index: {}]   ;;  %s1183_s3 = inlined_call_operand.vmem [shape: bf16[144,128], index: 3, kind: input, shape index: {}]   ;;  %s1184_s4 = inlined_call_operand.vmem [shape: f32[1,128], index: 4, kind: input, shape index: {}]   ;;  %s1185_s5 = inlined_call_operand.vmem [shape: bf16[128,10], index: 5, kind: input, shape index: {}]   ;;  %s1186_s6 = inlined_call_operand.vmem [shape: f32[1,10], index: 6, kind: input, shape index: {}]   ;;  %s1187_s7 = inlined_call_operand.hbm [shape: f32[2,1,10], index: 7, kind: output, shape index: {}]  }
   0x1   :  { %14 = vsyncpa [#allocation3 + $0x1], 0  ;;  %s1002_s24 = smov 0   ;;  %s1004_s25 = smov 0  }
   0x2   :  { %s1006_s26 = smov 0   ;;  %s1008_s27 = smov 0  }
   0x3 LB: > { %s1023_s28 = sadd.s32 4294967295, %s956_s27   ;;  %s764_s29 = sadd.s32 4294967294, %s956_s27   ;;  %s956_s27 = sphi %s1008_s27, %s1193_s27   ;;  %s952_s26 = sphi %s1006_s26, %s1192_s26   ;;  %s948_s25 = sphi %s1004_s25, %s1191_s25   ;;  %s944_s24 = sphi %s1002_s24, %s1190_s24  }
   0x4   : > { %s1027_s30 = sadd.s32 1, %s956_s27   ;;  %s179_s8 = sadd.s32 1, %s952_s26 }
   0x5   : > { %s176_s9 = ssub.s32 %s956_s27, %s1027_s30  ;;  %p189_p0 = scmp.ne.s32.totalorder %s952_s26, %s948_s25 }
   0x6   : > { %p177_p1 = scmp.eq.s32.totalorder %s176_s9, 0  ;;  %p190_p2 = scmp.eq.s32.totalorder %s1023_s28, 1 }
   0x7   : > { %p195_p3 = scmp.ne.s32.totalorder %s948_s25, %s944_s24  ;;  %p196_p4 = scmp.eq.s32.totalorder %s764_s29, 1 }
   0x8   : > { %s1038_s10 = scalar_select %p177_p1, %s952_s26, %s179_s8  }
   0x9   : > { %p1040_p5 = por %p190_p2, %p189_p0  ;;  %p1044_p6 = por %p196_p4, %p195_p3 }
   0xa   : > { %p767_p7 = scmp.ge.s32.totalorder %s956_s27, 1  ;;  %p240_p8 = scmp.lt.s32.totalorder %s956_s27, 3 }
   0xc   : > { %p241_p9 = pnand %p767_p7, %p240_p8 }
   0xd   : > { %v872_v0 = vld [vmem:[%s1181_s1 + $0x4] ss:$8 sps:$4 sm:$0xff] (!%p241_p9)   ;;  %v874_v1 = vld [vmem:[%s1181_s1] ss:$8 sps:$4 sm:$0xff] (!%p241_p9)   ;;  %v281_v2 = vld [vmem:[%s1181_s1 + $0x10] sm:$0xff] (!%p241_p9)  ;;  %vm313_vm0 = vcmask (!%p241_p9), 1043456   ;;  %v284_v25 = vlaneseq (!%p241_p9) }
   0xe   : > { %244 = sbr.rel (%p241_p9) target bundleno = 727 (0x2d7), region = 48  ;;  %v958_v3 = vmov (!%p241_p9), 0   ;;  %p271_p10 = scmp.lt.s32.totalorder (!%p241_p9), %s1023_s28, 1  ;;  %320 = vmatprep.subr.bf16.mxu0 (!%p241_p9), %v872_v0  ;;  %395 = vmatprep.subr.bf16.mxu1 (!%p241_p9), %v872_v0  ;;  %v773_v4 = vcombine.high (!%p241_p9), %v281_v2, %v281_v2  ;;  %v772_v5 = vcombine.low (!%p241_p9), %v281_v2, %v281_v2  ;;  %vm309_vm1 = vcmask (!%p241_p9), 195584   ;;  %v877_v7 = vld [vmem:[%s1183_s3] sm:$0xff] (!%p241_p9)   ;;  %v878_v12 = vld [vmem:[%s1183_s3 + $0x8] sm:$0xff] (!%p241_p9)  }
   0xf   : > { %352 = vmatprep.mubr.bf16.mxu0 (!%p241_p9), %v958_v3  ;;  %427 = vmatprep.mubr.bf16.mxu1 (!%p241_p9), %v958_v3  ;;  %v879_v13 = vld [vmem:[%s1183_s3 + $0x10] sm:$0xff] (!%p241_p9)   ;;  %v880_v14 = vld [vmem:[%s1183_s3 + $0x18] sm:$0xff] (!%p241_p9)   ;;  %v881_v15 = vld [vmem:[%s1183_s3 + $0x20] sm:$0xff] (!%p241_p9)   ;;  %v959_v21 = vmov (!%p241_p9), 0.0   ;;  %v285_v26 = vshrl.u32 (!%p241_p9), %v284_v25, 7  ;;  %vm371_vm2 = vcmask (!%p241_p9), 1041408  }
  0x10   : > { %321 = vmatpush1.bf16.msra.mxu0 (!%p241_p9), %v874_v1  ;;  %396 = vmatpush1.bf16.msra.mxu1 (!%p241_p9), %v874_v1  ;;  %v315_v6 = vsel (!%p241_p9), %vm313_vm0, %v772_v5, 0  ;;  %v882_v16 = vld [vmem:[%s1183_s3 + $0x28] sm:$0xff] (!%p241_p9)   ;;  %v883_v17 = vld [vmem:[%s1183_s3 + $0x30] sm:$0xff] (!%p241_p9)   ;;  %v884_v18 = vld [vmem:[%s1183_s3 + $0x38] sm:$0xff] (!%p241_p9)   ;;  %vm379_vm3 = vcmask (!%p241_p9), 123904   ;;  %vm539_vm4 = vcmask (!%p241_p9), 130048  }
  0x11   : > { %774 = vmatprep.subr.msk.bf16.mxu0 (!%p241_p9), %vm313_vm0, %v773_v4  ;;  %777 = vmatprep.subr.msk.bf16.mxu1 (!%p241_p9), %vm313_vm0, %v773_v4  ;;  %v885_v19 = vld [vmem:[%s1183_s3 + $0x40] sm:$0xff] (!%p241_p9)   ;;  %v887_v22 = vld [vmem:[%s1185_s5 + $0x8] sm:$0xff] (!%p241_p9)   ;;  %v888_v23 = vld [vmem:[%s1185_s5 + $0x10] sm:$0xff] (!%p241_p9)   ;;  %v286_v27 = vsub.s32 (!%p241_p9), 0, %v285_v26  ;;  %v290_v29 = vsub.s32 (!%p241_p9), 1, %v285_v26  ;;  %vm960_vm5 = vmmov (!%p241_p9), 0  }
  0x12   : > { %v886_v20 = vld [vmem:[%s1185_s5] sm:$0xff] (!%p241_p9)   ;;  %v889_v24 = vld [vmem:[%s1185_s5 + $0x18] sm:$0xff] (!%p241_p9)   ;;  %s797_s23 = sshll.u32 (!%p241_p9), %s1023_s28, 4  ;;  %vm694_vm6 = vcmask (!%p241_p9), 73728   ;;  %s961_s16 = smov (!%p241_p9), [#allocation2]  }
  0x13   : > { %v282_v28 = vld [vmem:[%s1182_s2] sm:$0x3] (!%p241_p9)  ;;  %s1138_s14 = scalar_lea.hbm (!%p241_p9), %s1187_s7, %s797_s23  ;;  %s898_s17 = sshll.u32 (!%p241_p9), %s961_s16, 4  ;;  %s899_s17 = int_to_ptr.vmem [resolvable:$false] %s898_s17 }
  0x14   : > { %323 = vmatpush1.bf16.msra.mxu0 (!%p241_p9), %v315_v6  ;;  %398 = vmatpush1.bf16.msra.mxu1 (!%p241_p9), %v315_v6  ;;  %v287_v30 = vrot.slane (!%p241_p9), %v282_v28, %v286_v27  ;;  %v291_v31 = vrot.slane (!%p241_p9), %v282_v28, %v290_v29  ;;  %s900_s18 = scalar_lea.vmem (!%p241_p9), %s899_s17, 32 }
  0x15   : > { %s272_s19 = scalar_select %p271_p10, %s1023_s28, 1  ;;  %543 = vmatprep.subr.bf16.mxu0 %v958_v3  ;;  %810 = vmatprep.subr.bf16.mxu1 %v959_v21 }
  0x17   : > { %s800_s20 = sshll.u32 %s272_s19, 2 }
  0x18   : > { %s275_s8 = scalar_lea.vmem %s1180_s0, %s800_s20  ;;  %s269_s20 = sand.u32 1, %s948_s25  }
  0x19   : > { %v277_v8 = vld [vmem:[%s275_s8] sm:$0x3]  ;;  %v776_v9 = vld [vmem:[%s275_s8 + $0x2] sm:$0x3]  ;;  %s270_s29 = scalar_lea.vmem [#allocation2], %s269_s20  ;;  %s697_s28 = scalar_lea.sflag [#allocation3], %s269_s20 }
  0x1a   : > { %v278_v10 = vpack.c.bf16 %v277_v8, %v277_v8  ;;  %v391_v11 = vpack.c.bf16 %v776_v9, %v776_v9  ;;  %s709_s8 = sshll.u32 %s270_s29, 4  ;;  %s1140_s8 = int_to_ptr.vmem [resolvable:$true] %s709_s8 }
  0x1b   : > { %s894_s15 = scalar_lea.vmem %s1140_s8, 16  ;;  %p901_p0 = scmp.lt.s32.totalorder %s1140_s8, %s899_s17 }
  0x1c   : > { %775 = vmatmul.mubr.msk.bf16.vlgmr.msra.gmra.mrb[0].mxu0 %vm309_vm1, %v278_v10  ;;  %778 = vmatmul.mubr.msk.bf16.vlgmr.msra.gmra.mrb[0].mxu1 %vm309_vm1, %v391_v11  ;;  %p895_p11 = scmp.ne.s32.totalorder %s1140_s8, %s894_s15  ;;  %p902_p1 = scmp.lt.s32.totalorder %s900_s18, %s894_s15 }
  0x1d   : > { %544 = vmatpush1.bf16.msra.mxu0 %v877_v7  ;;  %811 = vmatpush3.bf16.msra.mxu1 %v886_v20 }
  0x1e   : > { %545 = vmatprep.subr.bf16.mxu0 %v958_v3  ;;  %812 = vmatprep.subr.bf16.mxu1 %v959_v21  ;;  %p896_p12 = pnand %p895_p11, %p1040_p5  ;;  %p903_p2 = por %p902_p1, %p901_p0 }
  0x1f   : > { %826 = vmatprep.mubr.msk.bf16.mxu1 %vm960_vm5, %v959_v21 }
  0x20   : > { %p897_p13 = pneg %p896_p12 }
  0x21   : > { %546 = vmatpush1.bf16.msra.mxu0 %v878_v12  ;;  %813 = vmatpush3.bf16.msra.mxu1 %v887_v22 }
  0x22   : > { %547 = vmatprep.subr.bf16.mxu0 %v958_v3  ;;  %814 = vmatprep.subr.bf16.mxu1 %v959_v21  ;;  %p904_p3 = pnand %p903_p2, %p897_p13 }
  0x25   : > { %548 = vmatpush1.bf16.msra.mxu0 %v879_v13  ;;  %815 = vmatpush3.bf16.msra.mxu1 %v888_v23 }
  0x26   : > { %549 = vmatprep.subr.bf16.mxu0 %v958_v3  ;;  %816 = vmatprep.subr.bf16.mxu1 %v959_v21 }
  0x29   : > { %550 = vmatpush1.bf16.msra.mxu0 %v880_v14  ;;  %817 = vmatpush3.bf16.msra.mxu1 %v889_v24 }
  0x2a   : > { %551 = vmatprep.subr.bf16.mxu0 %v958_v3  ;;  %818 = vmatprep.subr.bf16.mxu1 %v959_v21 }
  0x2d   : > { %552 = vmatpush1.bf16.msra.mxu0 %v881_v15 }
  0x2e   : > { %553 = vmatprep.subr.bf16.mxu0 %v958_v3 }
  0x31   : > { %554 = vmatpush1.bf16.msra.mxu0 %v882_v16 }
  0x32   : > { %555 = vmatprep.subr.bf16.mxu0 %v958_v3 }
  0x35   : > { %556 = vmatpush1.bf16.msra.mxu0 %v883_v17 }
  0x36   : > { %557 = vmatprep.subr.bf16.mxu0 %v958_v3 }
  0x39   : > { %558 = vmatpush1.bf16.msra.mxu0 %v884_v18 }
  0x3a   : > { %559 = vmatprep.subr.bf16.mxu0 %v958_v3 }
  0x3d   : > { %560 = vmatpush1.bf16.msra.mxu0 %v885_v19 }
  0xef   : > { %v354_v32 = vpop.f32.mrb[0].mxu0  ;;  %v429_v33 = vpop.f32.mrb[0].mxu1 }
  0xf0   : > { %v355_v34 = vadd.f32 %v354_v32, %v287_v30  ;;  %v430_v35 = vadd.f32 %v429_v33, %v287_v30  ;;  %v356_v36 = vpop.f32.mrb[1].mxu0  ;;  %v431_v37 = vpop.f32.mrb[1].mxu1 }
  0xf1   : > { %v357_v38 = vadd.f32 %v356_v36, %v291_v31  ;;  %v432_v39 = vadd.f32 %v431_v37, %v291_v31  ;;  %v358_v40 = vpop.f32.mrb[2].mxu0  ;;  %v433_v41 = vpop.f32.mrb[2].mxu1  ;;  %v891_v36 = vld [vmem:[%s1185_s5 + $0x28] sm:$0xff]   ;;  %v892_v37 = vld [vmem:[%s1185_s5 + $0x30] sm:$0xff]  }
  0xf2   : > { %v361_v42 = vadd.f32 3.0, %v355_v34  ;;  %v436_v43 = vadd.f32 3.0, %v430_v35  ;;  %v359_v44 = vpop.f32.mrb[3].mxu0  ;;  %v434_v45 = vpop.f32.mrb[3].mxu1 }
  0xf3   : > { %v362_v46 = vadd.f32 3.0, %v357_v38  ;;  %v437_v47 = vadd.f32 3.0, %v432_v39 }
  0xf4   : > { %v363_v48 = vmax.f32 %v361_v42, 0.0  ;;  %v438_v49 = vmax.f32 %v436_v43, 0.0 }
  0xf5   : > { %v364_v50 = vmax.f32 %v362_v46, 0.0  ;;  %v439_v51 = vmax.f32 %v437_v47, 0.0 }
  0xf6   : > { %v365_v52 = vmin.f32 %v363_v48, 6.0  ;;  %v440_v53 = vmin.f32 %v438_v49, 6.0 }
  0xf7   : > { %v366_v54 = vmin.f32 %v364_v50, 6.0  ;;  %v441_v55 = vmin.f32 %v439_v51, 6.0 }
  0xf8   : > { %v367_v56 = vmul.f32 %v365_v52, %v355_v34  ;;  %v442_v57 = vmul.f32 %v440_v53, %v430_v35  ;;  %v890_v35 = vld [vmem:[%s1185_s5 + $0x20] sm:$0xff]  }
  0xf9   : > { %v368_v58 = vmul.f32 %v366_v54, %v357_v38  ;;  %v443_v59 = vmul.f32 %v441_v55, %v432_v39  ;;  %819 = vmatpush3.bf16.msra.mxu1 %v890_v35  ;;  %v893_v38 = vld [vmem:[%s1185_s5 + $0x38] sm:$0xff]   ;;  %v484_v39 = vld [vmem:[%s1184_s4] sm:$0x1] }
  0xfa   : > { %v369_v60 = vmul.f32 0.16666667, %v367_v56  ;;  %v444_v61 = vmul.f32 0.16666667, %v442_v57  ;;  %820 = vmatprep.subr.bf16.mxu1 %v959_v21 }
  0xfb   : > { %v370_v62 = vmul.f32 0.16666667, %v368_v58  ;;  %v445_v63 = vmul.f32 0.16666667, %v443_v59 }
  0xfc   : > { %v372_v0 = vsel %vm371_vm2, %v369_v60, 0.0  ;;  %v446_v1 = vsel %vm371_vm2, %v444_v61, 0.0 }
  0xfd   : > { %v373_v2 = vrot.slane %v372_v0, 4  ;;  %v447_v3 = vrot.slane %v446_v1, 4  ;;  %v380_v4 = vsel %vm379_vm3, %v370_v62, 0.0  ;;  %v453_v5 = vsel %vm379_vm3, %v445_v63, 0.0  ;;  %821 = vmatpush3.bf16.msra.mxu1 %v891_v36 }
  0xfe   : > { %v381_v6 = vrot.slane %v380_v4, 4  ;;  %v454_v7 = vrot.slane %v453_v5, 4  ;;  %822 = vmatprep.subr.bf16.mxu1 %v959_v21 }
  0xff   : > { %v374_v8 = vadd.f32 %v373_v2, %v372_v0  ;;  %v448_v9 = vadd.f32 %v447_v3, %v446_v1 }
 0x100   : > { %v382_v10 = vadd.f32 %v381_v6, %v380_v4  ;;  %v455_v11 = vadd.f32 %v454_v7, %v453_v5 }
 0x101   : > { %v375_v12 = vrot.slane %v374_v8, 2  ;;  %v449_v13 = vrot.slane %v448_v9, 2  ;;  %823 = vmatpush3.bf16.msra.mxu1 %v892_v37 }
 0x102   : > { %v383_v14 = vrot.slane %v382_v10, 2  ;;  %v456_v15 = vrot.slane %v455_v11, 2  ;;  %824 = vmatprep.subr.bf16.mxu1 %v959_v21  ;;  %v605_v21 = vld [vmem:[%s1186_s6] sm:$0x1] }
 0x103   : > { %v376_v16 = vadd.f32 %v375_v12, %v374_v8  ;;  %v450_v17 = vadd.f32 %v449_v13, %v448_v9 }
 0x104   : > { %v384_v18 = vadd.f32 %v383_v14, %v382_v10  ;;  %v457_v19 = vadd.f32 %v456_v15, %v455_v11 }
 0x105   : > { %v377_v20 = vrot.slane %v376_v16, 1  ;;  %v451_v22 = vrot.slane %v450_v17, 1  ;;  %825 = vmatpush3.bf16.msra.mxu1 %v893_v38 }
 0x106   : > { %v385_v23 = vrot.slane %v384_v18, 1  ;;  %v458_v24 = vrot.slane %v457_v19, 1 }
 0x107   : > { %v378_v25 = vadd.f32 %v377_v20, %v376_v16  ;;  %v452_v26 = vadd.f32 %v451_v22, %v450_v17 }
 0x108   : > { %v386_v27 = vadd.f32 %v385_v23, %v384_v18  ;;  %v459_v28 = vadd.f32 %v458_v24, %v457_v19 }
 0x109   : > { %v460_v29 = vadd.f32 %v452_v26, %v378_v25 }
 0x10a   : > { %v461_v30 = vadd.f32 %v459_v28, %v386_v27 }
 0x10b   : > { %v462_v31 = vmul.f32 0.25, %v460_v29 }
 0x10c   : > { %v463_v32 = vmul.f32 0.25, %v461_v30 }
 0x10d   : > { %v464_v34 = vpack.c.bf16 %v462_v31, %v462_v31 }
 0x10e   : > { %v465_v33 = vpack.c.bf16 %v463_v32, %v463_v32 }
 0x110   : > { %788 = vmatprep.mubr.msk.bf16.mxu0 %vm539_vm4, %v465_v33 }
 0x111   : > { %576 = vmatmul.mubr.bf16.vlgmr.msra.gmra.mrb[4].mxu0 %v464_v34 }
 0x1e4   : > { %v577_v40 = vpop.f32.mrb[4].mxu0 }
 0x1e5   : > { %v578_v41 = vadd.f32 %v577_v40, %v484_v39  ;;  %v579_v42 = vpop.f32.mrb[5].mxu0 }
 0x1e6   : > { %v580_v43 = vpop.f32.mrb[6].mxu0 }
 0x1e7   : > { %v583_v44 = vadd.f32 3.0, %v578_v41  ;;  %v581_v45 = vpop.f32.mrb[7].mxu0 }
 0x1e9   : > { %v584_v46 = vmax.f32 %v583_v44, 0.0 }
 0x1eb   : > { %v585_v47 = vmin.f32 %v584_v46, 6.0 }
 0x1ed   : > { %v586_v48 = vmul.f32 %v585_v47, %v578_v41 }
 0x1ef   : > { %v587_v49 = vmul.f32 0.16666667, %v586_v48 }
 0x1f1   : > { %v588_v50 = vpack.c.bf16 %v587_v49, %v587_v49 }
 0x1f3   : > { %827 = vmatmul.mubr.bf16.vlgmr.msra.gmra.mrb[4].mxu1 %v588_v50 }
 0x2c6   : > { %v688_v51 = vpop.f32.mrb[4].mxu1 }
 0x2c7   : > { %v689_v52 = vadd.f32 %v688_v51, %v605_v21  ;;  %v828_v53 = vpop.f32.mrb[5].mxu1 }
 0x2c8   : > { %v691_v54 = vpop.f32.mrb[6].mxu1 }
 0x2c9   : > { %v829_v55 = vpop.f32.mrb[7].mxu1  ;;  %695 = vst.msk [vmem:[%s270_s29] sm:$0x1] %vm694_vm6, %v689_v52 }
 0x2ca   : > { %907 = shalt.err (!%p904_p3)
}
 0x2cb   : > { %s908_s19 = scalar_lea.hbm %s1138_s14, 16  ;;  %s912_s22 = scalar_lea.hbm %s1187_s7, 32 }
 0x2cc   : > { %p909_p4 = scmp.ne.s32.totalorder %s1138_s14, %s908_s19  ;;  %p913_p9 = scmp.lt.u32.totalorder %s1138_s14, %s1187_s7 }
 0x2cd   : > { %p914_p10 = scmp.lt.u32.totalorder %s912_s22, %s908_s19  ;;  %p916_p12 = scmp.lt.u32.totalorder %s908_s19, %s1138_s14 }
 0x2ce   : > { %p910_p7 = pnand %p909_p4, %p1040_p5 }
 0x2cf   : > { %p915_p11 = por %p914_p10, %p913_p9 }
 0x2d0   : > { %p911_p8 = pneg %p910_p7 }
 0x2d1   : > { %p917_p13 = por %p916_p12, %p915_p11 }
 0x2d3   : > { %p918_p0 = pnand %p917_p13, %p911_p8 }
 0x2d5   : > { %921 = shalt.err (!%p918_p0)
}
 0x2d6   : > { %830 = dma.vmem_to_hbm [thread:$0]  (%p1040_p5), %s1140_s8, 16, %s1138_s14, %s697_s28  }
 0x2d7 PF: > { %p836_p1 = scmp.ge.s32.totalorder %s956_s27, 2  ;;  %s721_s9 = sand.u32 1, %s944_s24  }
 0x2d8   : > { %s722_s13 = scalar_lea.sflag [#allocation3], %s721_s9 }
 0x2d9   : > { %p833_p2 = pnand %p836_p1, %p1044_p6 }
 0x2db   : > { %939 = dma.done.wait (!%p833_p2), %s722_s13, 16  }
 0x2dc   : > { %941 = vsyncadd (!%p833_p2), %s722_s13, 4294967280  ;;  %p17_p3 = scmp.ge.s32.totalorder %s1027_s30, 4   ;;  %s1190_s24 = smov %s948_s25 }
 0x2dd   : > { %s1191_s25 = smov %s952_s26  ;;  %s1192_s26 = smov %s1038_s10 }
 0x2de   : > { %s1193_s27 = smov %s1027_s30  ;;  %19 = sbr.rel (!%p17_p3) target bundleno = 3 (0x3), region = 84 }
 0x2e5   :  { %726 = vsyncpa [#allocation3], 1 }
 0x2e6   :  { %728 = vsyncpa [#allocation3 + $0x1], 1 }

// kernel: mobilenetv3_forward.7
= control target key start
LH: loop header
LB: loop body
LE: loop exit
PB: predicated region body
PF: predicated region fallthrough
CT: control target
= control target key end

     0   :  { %s1877_s27 = smov 0   ;;  %s2146_s0 = inlined_call_operand.vmem [shape: f32[2,12,3,16], index: 0, kind: input, shape index: {}]   ;;  %s2147_s1 = inlined_call_operand.vmem [shape: f32[12,3,1], index: 1, kind: input, shape index: {}]   ;;  %s2148_s2 = inlined_call_operand.vmem [shape: bf16[16,72], index: 2, kind: input, shape index: {}]   ;;  %s2149_s3 = inlined_call_operand.vmem [shape: f32[1,72], index: 3, kind: input, shape index: {}]   ;;  %s2150_s4 = inlined_call_operand.vmem [shape: f32[9,1,72], index: 4, kind: input, shape index: {}]   ;;  %s2151_s5 = inlined_call_operand.vmem [shape: f32[1,72], index: 5, kind: input, shape index: {}]   ;;  %s2152_s6 = inlined_call_operand.vmem [shape: bf16[72,24], index: 6, kind: input, shape index: {}]   ;;  %s2153_s7 = inlined_call_operand.vmem [shape: f32[1,24], index: 7, kind: input, shape index: {}]   ;;  %s2154_s8 = inlined_call_operand.vmem [shape: f32[2,2,2,24], index: 8, kind: output, shape index: {}]  }
   0x1 LB: > { %s1547_s28 = sadd.s32 4294967295, %s1827_s27   ;;  %p1551_p0 = scmp.ge.s32.totalorder %s1827_s27, 1  ;;  %s1827_s27 = sphi %s1877_s27, %s18_s27  }
   0x2   : > { %p262_p1 = scmp.lt.s32.totalorder %s1827_s27, 3 }
   0x4   : > { %p263_p2 = pnand %p1551_p0, %p262_p1 }
   0x5   : > { %v1799_v0 = vld [vmem:[%s2148_s2] sm:$0xff] (!%p263_p2)   ;;  %v1829_v1 = vmov (!%p263_p2), 0.0   ;;  %vm1830_vm0 = vmmov (!%p263_p2), 0   ;;  %p296_p3 = scmp.lt.s32.totalorder (!%p263_p2), %s1547_s28, 1  ;;  %v1831_v3 = vmov (!%p263_p2), 0   ;;  %vm324_vm1 = vcmask (!%p263_p2), 130048  }
   0x6   : > { %266 = sbr.rel (%p263_p2) target bundleno = 519 (0x207), region = 52  ;;  %1685 = vmatprep.subr.bf16.mxu0 (!%p263_p2), %v1829_v1  ;;  %1691 = vmatprep.subr.bf16.mxu1 (!%p263_p2), %v1829_v1  ;;  %v1800_v2 = vld [vmem:[%s2148_s2] sm:$0xff] (!%p263_p2)   ;;  %v1572_v17 = vld [vmem:[%s2147_s1 + $0xc] sm:$0x7] (!%p263_p2)  ;;  %v1577_v21 = vld [vmem:[%s2147_s1 + $0x10] sm:$0x7] (!%p263_p2) }
   0x7   : > { %1686 = vmatpush3.bf16.msra.mxu0 (!%p263_p2), %v1799_v0  ;;  %1687 = vmatprep.mubr.msk.bf16.mxu0 (!%p263_p2), %vm1830_vm0, %v1829_v1  ;;  %v1801_v4 = vld [vmem:[%s2148_s2] sm:$0xff] (!%p263_p2)   ;;  %v1587_v28 = vld [vmem:[%s2147_s1 + $0x18] sm:$0x7] (!%p263_p2)  ;;  %v1592_v29 = vld [vmem:[%s2147_s1 + $0x1c] sm:$0x7] (!%p263_p2)  ;;  %vm1354_vm2 = vcmask (!%p263_p2), 1043456  }
   0x8   : > { %1692 = vmatpush3.bf16.msra.mxu1 (!%p263_p2), %v1800_v2  ;;  %1693 = vmatprep.mubr.msk.bf16.mxu1 (!%p263_p2), %vm1830_vm0, %v1829_v1  ;;  %v1802_v7 = vld [vmem:[%s2148_s2] sm:$0xff] (!%p263_p2)   ;;  %v1607_v37 = vld [vmem:[%s2147_s1 + $0x28] sm:$0x7] (!%p263_p2)  ;;  %v1582_v43 = vld [vmem:[%s2147_s1 + $0x14] sm:$0x7] (!%p263_p2)  ;;  %vm376_vm3 = vcmask (!%p263_p2), 583680  }
   0x9   : > { %1697 = vmatprep.subr.bf16.mxu0 (!%p263_p2), %v1829_v1  ;;  %1703 = vmatprep.subr.bf16.mxu1 (!%p263_p2), %v1829_v1  ;;  %v369_v14 = vld [vmem:[%s2147_s1] sm:$0x7] (!%p263_p2)  ;;  %v1562_v20 = vld [vmem:[%s2147_s1 + $0x4] sm:$0x7] (!%p263_p2)  ;;  %v1567_v42 = vld [vmem:[%s2147_s1 + $0x8] sm:$0x7] (!%p263_p2) }
   0xa   : > { %1797 = vset.pattern.permute.xlu0 (!%p263_p2), %v1831_v3  ;;  %1798 = vset.pattern.permute.xlu1 (!%p263_p2), %v1831_v3  ;;  %v1803_v15 = vld [vmem:[%s2148_s2] sm:$0xff] (!%p263_p2)   ;;  %v1612_v48 = vld [vmem:[%s2147_s1 + $0x2c] sm:$0x7] (!%p263_p2)  ;;  %v1813_v54 = vld [vmem:[%s2152_s6 + $0x10] sm:$0xff] (!%p263_p2)   ;;  %vm1350_vm4 = vcmask (!%p263_p2), 588800   ;;  %vm1398_vm5 = vcmask (!%p263_p2), 189440  }
   0xb   : > { %v1804_v16 = vld [vmem:[%s2148_s2] sm:$0xff] (!%p263_p2)   ;;  %372 = vperm.xlu0 (!%p263_p2), %1797, %v369_v14   ;;  %588 = vperm.xlu1 (!%p263_p2), %1798, %v1572_v17   ;;  %v1812_v51 = vld [vmem:[%s2152_s6 + $0x8] sm:$0xff] (!%p263_p2)   ;;  %v1818_v55 = vld [vmem:[%s2152_s6 + $0x10] sm:$0xff] (!%p263_p2)  }
   0xc   : > { %v1805_v22 = vld [vmem:[%s2148_s2] sm:$0xff] (!%p263_p2)   ;;  %v1816_v53 = vld [vmem:[%s2152_s6 + $0x8] sm:$0xff] (!%p263_p2)   ;;  %v1815_v56 = vld [vmem:[%s2152_s6 + $0x18] sm:$0xff] (!%p263_p2)  }
   0xd   : > { %s2156_s28 = smov (!%p296_p3, %s1547_s28), 1  ;;  %v1806_v23 = vld [vmem:[%s2148_s2] sm:$0xff]   ;;  %v1819_v59 = vld [vmem:[%s2152_s6 + $0x18] sm:$0xff]  }
   0xe   : > { %s1785_s11 = smul.u32 48, %s2156_s28  ;;  %v1807_v32 = vld [vmem:[%s2148_s2] sm:$0xff]   ;;  %s1648_s22 = sshll.u32 %s2156_s28, 2 }
   0xf   : > { %444 = vperm.xlu0 %1797, %v1562_v20   ;;  %660 = vperm.xlu1 %1798, %v1577_v21   ;;  %v1808_v33 = vld [vmem:[%s2148_s2] sm:$0xff]   ;;  %s305_s29 = scalar_lea.vmem %s2154_s8, %s1648_s22 }
  0x10   : > { %s1905_s14 = scalar_lea.vmem %s2146_s0, %s1785_s11  ;;  %v1602_v36 = vld [vmem:[%s2147_s1 + $0x24] sm:$0x7]  ;;  %v1597_v49 = vld [vmem:[%s2147_s1 + $0x20] sm:$0x7] }
  0x11   : > { %v307_v5 = vld [vmem:[%s1905_s14] sm:$0x7]  ;;  %v1558_v6 = vld [vmem:[%s1905_s14 + $0x4] sm:$0x7]  ;;  %v1563_v10 = vld [vmem:[%s1905_s14 + $0x8] sm:$0x7] }
  0x12   : > { %v308_v8 = vpack.c.bf16 %v307_v5, %v307_v5  ;;  %v380_v9 = vpack.c.bf16 %v1558_v6, %v1558_v6  ;;  %v1568_v11 = vld [vmem:[%s1905_s14 + $0xc] sm:$0x7]  ;;  %v452_v12 = vpack.c.bf16 %v1563_v10, %v1563_v10  ;;  %v1573_v18 = vld [vmem:[%s1905_s14 + $0x10] sm:$0x7]  ;;  %v1578_v19 = vld [vmem:[%s1905_s14 + $0x14] sm:$0x7] }
  0x13   : > { %v524_v13 = vpack.c.bf16 %v1568_v11, %v1568_v11  ;;  %v596_v24 = vpack.c.bf16 %v1573_v18, %v1573_v18  ;;  %v668_v25 = vpack.c.bf16 %v1578_v19, %v1578_v19  ;;  %v1583_v26 = vld [vmem:[%s1905_s14 + $0x18] sm:$0x7]  ;;  %v1588_v27 = vld [vmem:[%s1905_s14 + $0x1c] sm:$0x7]  ;;  %804 = vperm.xlu0 %1797, %v1587_v28   ;;  %876 = vperm.xlu1 %1798, %v1592_v29   ;;  %v1593_v34 = vld [vmem:[%s1905_s14 + $0x20] sm:$0x7] }
  0x14   : > { %1688 = vmatmul.mubr.msk.bf16.vlgmr.msra.gmra.mrb[0].mxu0 %vm324_vm1, %v308_v8  ;;  %1694 = vmatmul.mubr.msk.bf16.vlgmr.msra.gmra.mrb[0].mxu1 %vm324_vm1, %v380_v9  ;;  %v740_v30 = vpack.c.bf16 %v1583_v26, %v1583_v26  ;;  %v812_v31 = vpack.c.bf16 %v1588_v27, %v1588_v27  ;;  %v1598_v35 = vld [vmem:[%s1905_s14 + $0x24] sm:$0x7]  ;;  %v884_v38 = vpack.c.bf16 %v1593_v34, %v1593_v34  ;;  %v1603_v44 = vld [vmem:[%s1905_s14 + $0x28] sm:$0x7]  ;;  %v1608_v45 = vld [vmem:[%s1905_s14 + $0x2c] sm:$0x7] }
  0x15   : > { %1698 = vmatpush3.bf16.msra.mxu0 %v1801_v4  ;;  %1704 = vmatpush3.bf16.msra.mxu1 %v1802_v7  ;;  %v956_v39 = vpack.c.bf16 %v1598_v35, %v1598_v35  ;;  %v1809_v40 = vld [vmem:[%s2148_s2] sm:$0xff]   ;;  %v1028_v46 = vpack.c.bf16 %v1603_v44, %v1603_v44  ;;  %v1100_v47 = vpack.c.bf16 %v1608_v45, %v1608_v45 }
  0x16   : > { %1699 = vmatprep.mubr.msk.bf16.mxu0 %vm1830_vm0, %v1829_v1  ;;  %1705 = vmatprep.mubr.msk.bf16.mxu1 %vm1830_vm0, %v1829_v1  ;;  %v1810_v41 = vld [vmem:[%s2148_s2] sm:$0xff]  }
  0x17   : > { %1709 = vmatprep.subr.bf16.mxu0 %v1829_v1  ;;  %1715 = vmatprep.subr.bf16.mxu1 %v1829_v1  ;;  %v1811_v50 = vld [vmem:[%s2152_s6] sm:$0xff]  }
  0x18   : > { %1020 = vperm.xlu0 %1797, %v1602_v36   ;;  %1092 = vperm.xlu1 %1798, %v1607_v37   ;;  %v1814_v52 = vld [vmem:[%s2152_s6] sm:$0xff]  }
  0x19   : > { %v1817_v57 = vld [vmem:[%s2152_s6 + $0x20] ss:$0 sps:$4 sm:$0xff]  }
  0x1a   : > { %v1356_v58 = vsel %vm1354_vm2, %v1817_v57, 0  ;;  %v1820_v60 = vld [vmem:[%s2152_s6 + $0x20] ss:$0 sps:$4 sm:$0xff]  }
  0x1b   : > { %v1448_v61 = vsel %vm1354_vm2, %v1820_v60, 0  ;;  %v2074_v4 = vld [vmem:[%s2149_s3] ss:$0 sm:$0xff] }
  0x1c   : > { %1700 = vmatmul.mubr.msk.bf16.vlgmr.msra.gmra.mrb[4].mxu0 %vm324_vm1, %v452_v12  ;;  %1706 = vmatmul.mubr.msk.bf16.vlgmr.msra.gmra.mrb[4].mxu1 %vm324_vm1, %v524_v13 }
  0x1d   : > { %1710 = vmatpush3.bf16.msra.mxu0 %v1803_v15  ;;  %1716 = vmatpush3.bf16.msra.mxu1 %v1804_v16 }
  0x1e   : > { %1711 = vmatprep.mubr.msk.bf16.mxu0 %vm1830_vm0, %v1829_v1  ;;  %1717 = vmatprep.mubr.msk.bf16.mxu1 %vm1830_vm0, %v1829_v1 }
  0x1f   : > { %1721 = vmatprep.subr.bf16.mxu0 %v1829_v1  ;;  %1727 = vmatprep.subr.bf16.mxu1 %v1829_v1 }
  0x20   : > { %516 = vperm.xlu0 %1797, %v1567_v42   ;;  %732 = vperm.xlu1 %1798, %v1582_v43  }
  0x24   : > { %1712 = vmatmul.mubr.msk.bf16.vlgmr.msra.gmra.mrb[8].mxu0 %vm324_vm1, %v596_v24  ;;  %1718 = vmatmul.mubr.msk.bf16.vlgmr.msra.gmra.mrb[8].mxu1 %vm324_vm1, %v668_v25 }
  0x25   : > { %1722 = vmatpush3.bf16.msra.mxu0 %v1805_v22  ;;  %1728 = vmatpush3.bf16.msra.mxu1 %v1806_v23 }
  0x26   : > { %1723 = vmatprep.mubr.msk.bf16.mxu0 %vm1830_vm0, %v1829_v1  ;;  %1729 = vmatprep.mubr.msk.bf16.mxu1 %vm1830_vm0, %v1829_v1 }
  0x27   : > { %1733 = vmatprep.subr.bf16.mxu0 %v1829_v1  ;;  %1739 = vmatprep.subr.bf16.mxu1 %v1829_v1 }
  0x28   : > { %1164 = vperm.xlu1 %1798, %v1612_v48   ;;  %948 = vperm.xlu0 %1797, %v1597_v49  }
  0x2c   : > { %1724 = vmatmul.mubr.msk.bf16.vlgmr.msra.gmra.mrb[12].mxu0 %vm324_vm1, %v740_v30  ;;  %1730 = vmatmul.mubr.msk.bf16.vlgmr.msra.gmra.mrb[12].mxu1 %vm324_vm1, %v812_v31 }
  0x2d   : > { %1734 = vmatpush3.bf16.msra.mxu0 %v1807_v32  ;;  %1740 = vmatpush3.bf16.msra.mxu1 %v1808_v33 }
  0x2e   : > { %1735 = vmatprep.mubr.msk.bf16.mxu0 %vm1830_vm0, %v1829_v1  ;;  %1741 = vmatprep.mubr.msk.bf16.mxu1 %vm1830_vm0, %v1829_v1 }
  0x2f   : > { %1745 = vmatprep.subr.bf16.mxu0 %v1829_v1  ;;  %1751 = vmatprep.subr.bf16.mxu1 %v1829_v1 }
  0x34   : > { %1736 = vmatmul.mubr.msk.bf16.vlgmr.msra.gmra.mrb[16].mxu0 %vm324_vm1, %v884_v38  ;;  %1742 = vmatmul.mubr.msk.bf16.vlgmr.msra.gmra.mrb[16].mxu1 %vm324_vm1, %v956_v39 }
  0x35   : > { %1746 = vmatpush3.bf16.msra.mxu0 %v1809_v40  ;;  %1752 = vmatpush3.bf16.msra.mxu1 %v1810_v41 }
  0x36   : > { %1747 = vmatprep.mubr.msk.bf16.mxu0 %vm1830_vm0, %v1829_v1  ;;  %1753 = vmatprep.mubr.msk.bf16.mxu1 %vm1830_vm0, %v1829_v1 }
  0x37   : > { %1757 = vmatprep.subr.bf16.mxu0 %v1829_v1  ;;  %1771 = vmatprep.subr.bf16.mxu1 %v1829_v1 }
  0x3c   : > { %1748 = vmatmul.mubr.msk.bf16.vlgmr.msra.gmra.mrb[20].mxu0 %vm324_vm1, %v1028_v46  ;;  %1754 = vmatmul.mubr.msk.bf16.vlgmr.msra.gmra.mrb[20].mxu1 %vm324_vm1, %v1100_v47 }
  0x3d   : > { %1767 = vmatprep.mubr.msk.bf16.mxu0 %vm1830_vm0, %v1829_v1  ;;  %1781 = vmatprep.mubr.msk.bf16.mxu1 %vm1830_vm0, %v1829_v1 }
  0x3e   : > { %1758 = vmatpush3.bf16.msra.mxu0 %v1811_v50  ;;  %1772 = vmatpush3.bf16.msra.mxu1 %v1814_v52 }
  0x3f   : > { %1759 = vmatprep.subr.bf16.mxu0 %v1829_v1  ;;  %1773 = vmatprep.subr.bf16.mxu1 %v1829_v1 }
  0x42   : > { %1760 = vmatpush3.bf16.msra.mxu0 %v1812_v51  ;;  %1774 = vmatpush3.bf16.msra.mxu1 %v1816_v53 }
  0x43   : > { %1761 = vmatprep.subr.bf16.mxu0 %v1829_v1  ;;  %1775 = vmatprep.subr.bf16.mxu1 %v1829_v1 }
  0x46   : > { %1762 = vmatpush3.bf16.msra.mxu0 %v1813_v54  ;;  %1776 = vmatpush3.bf16.msra.mxu1 %v1818_v55 }
  0x47   : > { %1763 = vmatprep.subr.bf16.mxu0 %v1829_v1  ;;  %1777 = vmatprep.subr.bf16.mxu1 %v1829_v1 }
  0x4a   : > { %1764 = vmatpush3.bf16.msra.mxu0 %v1815_v56  ;;  %1778 = vmatpush3.bf16.msra.mxu1 %v1819_v59 }
  0x4b   : > { %1765 = vmatprep.subr.bf16.mxu0 %v1829_v1  ;;  %1779 = vmatprep.subr.bf16.mxu1 %v1829_v1 }
  0x4e   : > { %1766 = vmatpush3.bf16.msra.mxu0 %v1356_v58  ;;  %1780 = vmatpush3.bf16.msra.mxu1 %v1448_v61 }
  0x8a   : > { %v373_v62 = vpop.permute.xlu0 %372  ;;  %v589_v0 = vpop.permute.xlu1 %588 }
  0x8e   : > { %v445_v63 = vpop.permute.xlu0 %444  ;;  %v661_v3 = vpop.permute.xlu1 %660 }
  0x92   : > { %v2069_v2 = vpop.permute.xlu0 %804  ;;  %v2078_v6 = vpop.permute.xlu1 %876 }
  0x97   : > { %v2076_v5 = vpop.permute.xlu0 %1020  ;;  %v2084_v21 = vpop.permute.xlu1 %1092 }
  0x9f   : > { %v517_v20 = vpop.permute.xlu0 %516  ;;  %v733_v36 = vpop.permute.xlu1 %732 }
  0xe7   : > { %v362_v7 = vpop.f32.mrb[0].mxu0  ;;  %v433_v8 = vpop.f32.mrb[0].mxu1 }
  0xe8   : > { %v363_v1 = vadd.f32 %v2074_v4, %v362_v7  ;;  %v1689_v9 = vpop.f32.mrb[1].mxu0  ;;  %v434_v10 = vadd.f32 %v2074_v4, %v433_v8  ;;  %v1695_v11 = vpop.f32.mrb[1].mxu1 }
  0xe9   : > { %v365_v12 = vpop.f32.mrb[2].mxu0  ;;  %v436_v13 = vpop.f32.mrb[2].mxu1 }
  0xea   : > { %v368_v14 = vmax.f32 %v363_v1, 0.0  ;;  %v1690_v15 = vpop.f32.mrb[3].mxu0  ;;  %v439_v16 = vmax.f32 %v434_v10, 0.0  ;;  %v1696_v17 = vpop.f32.mrb[3].mxu1  ;;  %v1615_v13 = vld [vmem:[%s2150_s4 + $0x1] ss:$0 sm:$0xff] }
  0xeb   : > { %v949_v15 = vpop.permute.xlu0 %948  ;;  %v1613_v17 = vld [vmem:[%s2150_s4] ss:$0 sm:$0xff] }
  0xec   : > { %v375_v18 = vmul.f32 %v373_v62, %v368_v14  ;;  %v447_v19 = vmul.f32 %v445_v63, %v439_v16 }
  0xee   : > { %377 = vst.msk [vmem:[#allocation2] sm:$0x7] %vm376_vm3, %v375_v18  ;;  %449 = vst.msk [vmem:[#allocation2 + $0x4] sm:$0x7] %vm376_vm3, %v447_v19 }
  0xef   : > { %v505_v22 = vpop.f32.mrb[4].mxu0  ;;  %v577_v23 = vpop.f32.mrb[4].mxu1 }
  0xf0   : > { %v506_v24 = vadd.f32 %v2074_v4, %v505_v22  ;;  %v578_v25 = vadd.f32 %v2074_v4, %v577_v23  ;;  %v1701_v26 = vpop.f32.mrb[5].mxu0  ;;  %v1707_v27 = vpop.f32.mrb[5].mxu1  ;;  %v1617_v22 = vld [vmem:[%s2150_s4 + $0x2] ss:$0 sm:$0xff]  ;;  %v1619_v23 = vld [vmem:[%s2150_s4 + $0x3] ss:$0 sm:$0xff] }
  0xf1   : > { %v508_v28 = vpop.f32.mrb[6].mxu0  ;;  %v580_v29 = vpop.f32.mrb[6].mxu1 }
  0xf2   : > { %v511_v30 = vmax.f32 %v506_v24, 0.0  ;;  %v583_v31 = vmax.f32 %v578_v25, 0.0  ;;  %v1702_v32 = vpop.f32.mrb[7].mxu0  ;;  %v1708_v33 = vpop.f32.mrb[7].mxu1 }
  0xf4   : > { %v591_v34 = vmul.f32 %v589_v0, %v583_v31  ;;  %v519_v35 = vmul.f32 %v517_v20, %v511_v30 }
  0xf5   : > { %v1170_v16 = vld [vmem:[#allocation2] sm:$0x3] }
  0xf6   : > { %593 = vst.msk [vmem:[#allocation2 + $0xc] sm:$0x7] %vm376_vm3, %v591_v34  ;;  %521 = vst.msk [vmem:[#allocation2 + $0x8] sm:$0x7] %vm376_vm3, %v519_v35  ;;  %v1179_v20 = vmul.f32 %v1613_v17, %v1170_v16  ;;  %v1197_v26 = vld [vmem:[#allocation2 + $0x1] sm:$0x3] }
  0xf7   : > { %v649_v37 = vpop.f32.mrb[8].mxu0  ;;  %v721_v38 = vpop.f32.mrb[8].mxu1 }
  0xf8   : > { %v650_v39 = vadd.f32 %v2074_v4, %v649_v37  ;;  %v1713_v40 = vpop.f32.mrb[9].mxu0  ;;  %v722_v41 = vadd.f32 %v2074_v4, %v721_v38  ;;  %v1719_v42 = vpop.f32.mrb[9].mxu1 }
  0xf9   : > { %v652_v43 = vpop.f32.mrb[10].mxu0  ;;  %v724_v44 = vpop.f32.mrb[10].mxu1  ;;  %v1621_v40 = vld [vmem:[%s2150_s4 + $0x4] ss:$0 sm:$0xff] }
  0xfa   : > { %v655_v45 = vmax.f32 %v650_v39, 0.0  ;;  %v1714_v46 = vpop.f32.mrb[11].mxu0  ;;  %v727_v47 = vmax.f32 %v722_v41, 0.0  ;;  %v1720_v48 = vpop.f32.mrb[11].mxu1  ;;  %v1171_v41 = vld [vmem:[#allocation2 + $0x4] sm:$0x3] }
  0xfb   : > { %v1165_v39 = vpop.permute.xlu1 %1164  ;;  %v1623_v46 = vld [vmem:[%s2150_s4 + $0x5] ss:$0 sm:$0xff] }
  0xfc   : > { %v663_v49 = vmul.f32 %v661_v3, %v655_v45  ;;  %v735_v50 = vmul.f32 %v733_v36, %v727_v47  ;;  %v1207_v36 = vmul.f32 %v1617_v22, %v1197_v26 }
  0xfd   : > { %v1183_v12 = vld [vmem:[#allocation2 + $0xc] sm:$0x3] }
  0xfe   : > { %665 = vst.msk [vmem:[#allocation2 + $0x10] sm:$0x7] %vm376_vm3, %v663_v49  ;;  %737 = vst.msk [vmem:[#allocation2 + $0x14] sm:$0x7] %vm376_vm3, %v735_v50  ;;  %v1193_v19 = vmul.f32 %v1615_v13, %v1183_v12  ;;  %v1625_v49 = vld [vmem:[%s2150_s4 + $0x6] ss:$0 sm:$0xff]  ;;  %v1180_v50 = vmul.f32 %v1613_v17, %v1171_v41 }
  0xff   : > { %v793_v51 = vpop.f32.mrb[12].mxu0  ;;  %v865_v52 = vpop.f32.mrb[12].mxu1 }
 0x100   : > { %v794_v53 = vadd.f32 %v2074_v4, %v793_v51  ;;  %v866_v54 = vadd.f32 %v2074_v4, %v865_v52  ;;  %v1725_v55 = vpop.f32.mrb[13].mxu0  ;;  %v1731_v56 = vpop.f32.mrb[13].mxu1  ;;  %v1253_v51 = vld [vmem:[#allocation2 + $0x4] sm:$0x3] }
 0x101   : > { %v796_v57 = vpop.f32.mrb[14].mxu0  ;;  %v868_v58 = vpop.f32.mrb[14].mxu1  ;;  %v1198_v52 = vld [vmem:[#allocation2 + $0x5] sm:$0x3] }
 0x102   : > { %v799_v59 = vmax.f32 %v794_v53, 0.0  ;;  %v871_v60 = vmax.f32 %v866_v54, 0.0  ;;  %v1726_v61 = vpop.f32.mrb[15].mxu0  ;;  %v1732_v62 = vpop.f32.mrb[15].mxu1  ;;  %v1627_v57 = vld [vmem:[%s2150_s4 + $0x7] ss:$0 sm:$0xff] }
 0x103   : > { %v1281_v62 = vld [vmem:[#allocation2 + $0x5] sm:$0x3] }
 0x104   : > { %v807_v63 = vmul.f32 %v2069_v2, %v799_v59  ;;  %v879_v0 = vmul.f32 %v2078_v6, %v871_v60  ;;  %v1263_v59 = vmul.f32 %v1625_v49, %v1253_v51  ;;  %v1208_v60 = vmul.f32 %v1617_v22, %v1198_v52 }
 0x105   : > { %v1184_v32 = vld [vmem:[#allocation2 + $0x10] sm:$0x3]  ;;  %v1268_v16 = vld [vmem:[#allocation2 + $0x14] sm:$0x3] }
 0x106   : > { %809 = vst.msk [vmem:[#allocation2 + $0x18] sm:$0x7] %vm376_vm3, %v807_v63  ;;  %881 = vst.msk [vmem:[#allocation2 + $0x1c] sm:$0x7] %vm376_vm3, %v879_v0  ;;  %v1194_v43 = vmul.f32 %v1615_v13, %v1184_v32  ;;  %v1267_v56 = vld [vmem:[#allocation2 + $0x10] sm:$0x3] }
 0x107   : > { %v937_v3 = vpop.f32.mrb[16].mxu0  ;;  %v1009_v7 = vpop.f32.mrb[16].mxu1  ;;  %v1629_v63 = vld [vmem:[%s2150_s4 + $0x8] ss:$0 sm:$0xff]  ;;  %v1630_v13 = vld [vmem:[%s2151_s5] ss:$0 sm:$0xff] }
 0x108   : > { %v1010_v8 = vadd.f32 %v2074_v4, %v1009_v7  ;;  %v1737_v1 = vpop.f32.mrb[17].mxu0  ;;  %v1743_v9 = vpop.f32.mrb[17].mxu1  ;;  %v1196_v55 = vadd.f32 %v1194_v43, %v1180_v50  ;;  %v1277_v3 = vmul.f32 %v1627_v57, %v1267_v56 }
 0x109   : > { %v940_v10 = vpop.f32.mrb[18].mxu0  ;;  %v1012_v11 = vpop.f32.mrb[18].mxu1 }
 0x10a   : > { %v1015_v2 = vmax.f32 %v1010_v8, 0.0  ;;  %v1738_v14 = vpop.f32.mrb[19].mxu0  ;;  %v1744_v6 = vpop.f32.mrb[19].mxu1  ;;  %v1210_v7 = vadd.f32 %v1208_v60, %v1196_v55  ;;  %v1291_v10 = vmul.f32 %v1629_v63, %v1281_v62 }
 0x10c   : > { %v1023_v18 = vmul.f32 %v2076_v5, %v1015_v2  ;;  %v1195_v5 = vadd.f32 %v1193_v19, %v1179_v20  ;;  %v1254_v2 = vld [vmem:[#allocation2 + $0x8] sm:$0x3] }
 0x10d   : > { %v1211_v27 = vld [vmem:[#allocation2 + $0x18] sm:$0x3]  ;;  %v1240_v1 = vld [vmem:[#allocation2 + $0x1d] sm:$0x3]  ;;  %v1264_v19 = vmul.f32 %v1625_v49, %v1254_v2  ;;  %v1282_v20 = vld [vmem:[#allocation2 + $0x9] sm:$0x3] }
 0x10e   : > { %1025 = vst.msk [vmem:[#allocation2 + $0x24] sm:$0x7] %vm376_vm3, %v1023_v18  ;;  %v1221_v37 = vmul.f32 %v1619_v23, %v1211_v27  ;;  %v1239_v45 = vld [vmem:[#allocation2 + $0x19] sm:$0x3]  ;;  %v1250_v15 = vmul.f32 %v1623_v46, %v1240_v1  ;;  %v1292_v27 = vmul.f32 %v1629_v63, %v1282_v20 }
 0x10f   : > { %v1081_v24 = vpop.f32.mrb[20].mxu0  ;;  %v1153_v25 = vpop.f32.mrb[20].mxu1  ;;  %v1249_v54 = vmul.f32 %v1623_v46, %v1239_v45 }
 0x110   : > { %v1082_v28 = vadd.f32 %v2074_v4, %v1081_v24  ;;  %v1749_v29 = vpop.f32.mrb[21].mxu0  ;;  %v1755_v30 = vpop.f32.mrb[21].mxu1  ;;  %v1209_v4 = vadd.f32 %v1207_v36, %v1195_v5  ;;  %v1278_v24 = vmul.f32 %v1627_v57, %v1268_v16 }
 0x111   : > { %v1084_v31 = vpop.f32.mrb[22].mxu0  ;;  %v1156_v33 = vpop.f32.mrb[22].mxu1 }
 0x112   : > { %v1087_v34 = vmax.f32 %v1082_v28, 0.0  ;;  %v1750_v35 = vpop.f32.mrb[23].mxu0  ;;  %v1756_v38 = vpop.f32.mrb[23].mxu1  ;;  %v1223_v47 = vadd.f32 %v1221_v37, %v1209_v4  ;;  %v1631_v31 = vld [vmem:[%s2153_s7] ss:$0 sm:$0xff] }
 0x114   : > { %v1095_v42 = vmul.f32 %v2084_v21, %v1087_v34  ;;  %v1212_v21 = vld [vmem:[#allocation2 + $0x1c] sm:$0x3] }
 0x115   : > { %v1225_v44 = vld [vmem:[#allocation2 + $0x24] sm:$0x3]  ;;  %v1222_v61 = vmul.f32 %v1619_v23, %v1212_v21 }
 0x116   : > { %1097 = vst.msk [vmem:[#allocation2 + $0x28] sm:$0x7] %vm376_vm3, %v1095_v42  ;;  %v1235_v48 = vmul.f32 %v1621_v40, %v1225_v44 }
 0x117   : > { %v1224_v11 = vadd.f32 %v1222_v61, %v1210_v7 }
 0x118   : > { %v1237_v53 = vadd.f32 %v1235_v48, %v1223_v47 }
 0x11a   : > { %v1251_v58 = vadd.f32 %v1249_v54, %v1237_v53 }
 0x11c   : > { %v1265_v0 = vadd.f32 %v1263_v59, %v1251_v58 }
 0x11d   : > { %v1226_v8 = vld [vmem:[#allocation2 + $0x28] sm:$0x3] }
 0x11e   : > { %v1279_v9 = vadd.f32 %v1277_v3, %v1265_v0  ;;  %v1236_v12 = vmul.f32 %v1621_v40, %v1226_v8 }
 0x120   : > { %v1293_v14 = vadd.f32 %v1291_v10, %v1279_v9  ;;  %v1238_v6 = vadd.f32 %v1236_v12, %v1224_v11 }
 0x122   : > { %v1302_v17 = vadd.f32 %v1630_v13, %v1293_v14  ;;  %v1252_v18 = vadd.f32 %v1250_v15, %v1238_v6 }
 0x124   : > { %v1304_v22 = vmax.f32 %v1302_v17, 0.0  ;;  %v1266_v23 = vadd.f32 %v1264_v19, %v1252_v18 }
 0x126   : > { %v1306_v25 = vpack.c.bf16 %v1304_v22, %v1304_v22  ;;  %v1280_v26 = vadd.f32 %v1278_v24, %v1266_v23 }
 0x128   : > { %1768 = vmatmul.mubr.msk.bf16.vlgmr.msra.gmra.mrb[24].mxu0 %vm1350_vm4, %v1306_v25  ;;  %v1294_v28 = vadd.f32 %v1292_v27, %v1280_v26 }
 0x12a   : > { %v1303_v29 = vadd.f32 %v1630_v13, %v1294_v28 }
 0x12c   : > { %v1305_v5 = vmax.f32 %v1303_v29, 0.0 }
 0x12e   : > { %v1400_v30 = vpack.c.bf16 %v1305_v5, %v1305_v5 }
 0x130   : > { %1782 = vmatmul.mubr.msk.bf16.vlgmr.msra.gmra.mrb[24].mxu1 %vm1350_vm4, %v1400_v30 }
 0x1fb   : > { %v1392_v32 = vpop.f32.mrb[24].mxu0 }
 0x1fc   : > { %v1393_v33 = vadd.f32 %v1631_v31, %v1392_v32  ;;  %v1769_v34 = vpop.f32.mrb[25].mxu0 }
 0x1fd   : > { %v1395_v35 = vpop.f32.mrb[26].mxu0 }
 0x1fe   : > { %1399 = vst.msk [vmem:[%s305_s29] sm:$0x3] %vm1398_vm5, %v1393_v33  ;;  %v1770_v36 = vpop.f32.mrb[27].mxu0 }
 0x203   : > { %v1484_v37 = vpop.f32.mrb[24].mxu1 }
 0x204   : > { %v1485_v38 = vadd.f32 %v1631_v31, %v1484_v37  ;;  %v1783_v39 = vpop.f32.mrb[25].mxu1 }
 0x205   : > { %v1487_v40 = vpop.f32.mrb[26].mxu1 }
 0x206   : > { %1645 = vst.msk [vmem:[%s305_s29 + $0x2] sm:$0x3] %vm1398_vm5, %v1485_v38  ;;  %v1784_v41 = vpop.f32.mrb[27].mxu1 }
 0x207 PF: > { %s18_s27 = sadd.s32 1, %s1827_s27  }
 0x208   : > { %p15_p4 = scmp.ge.s32.totalorder %s18_s27, 4  }
 0x20a   :  { %17 = sbr.rel (!%p15_p4) target bundleno = 1 (0x1), region = 124 }

// kernel: mobilenetv3_forward.8
= control target key start
LH: loop header
LB: loop body
LE: loop exit
PB: predicated region body
PF: predicated region fallthrough
CT: control target
= control target key end

     0   :  { %s2111_s21 = smov 0   ;;  %s2437_s0 = inlined_call_operand.vmem [shape: f32[2,6,6,24], index: 0, kind: input, shape index: {}]   ;;  %s2438_s1 = inlined_call_operand.vmem [shape: f32[6,6,1], index: 1, kind: input, shape index: {}]   ;;  %s2439_s2 = inlined_call_operand.vmem [shape: bf16[24,96], index: 2, kind: input, shape index: {}]   ;;  %s2440_s3 = inlined_call_operand.vmem [shape: f32[1,96], index: 3, kind: input, shape index: {}]   ;;  %s2441_s4 = inlined_call_operand.vmem [shape: f32[25,1,96], index: 4, kind: input, shape index: {}]   ;;  %s2442_s5 = inlined_call_operand.vmem [shape: f32[1,96], index: 5, kind: input, shape index: {}]   ;;  %s2443_s6 = inlined_call_operand.vmem [shape: bf16[96,24], index: 6, kind: input, shape index: {}]   ;;  %s2444_s7 = inlined_call_operand.vmem [shape: f32[1,24], index: 7, kind: input, shape index: {}]   ;;  %s2445_s8 = inlined_call_operand.vmem [shape: bf16[24,96], index: 8, kind: input, shape index: {}]   ;;  %s2446_s9 = inlined_call_operand.vmem [shape: f32[1,96], index: 9, kind: input, shape index: {}]   ;;  %s2447_s10 = inlined_call_operand.vmem [shape: bf16[96,24], index: 10, kind: input, shape index: {}]   ;;  %s2448_s11 = inlined_call_operand.vmem [shape: f32[1,24], index: 11, kind: input, shape index: {}]   ;;  %s2449_s12 = inlined_call_operand.vmem [shape: f32[2,2,2,24], index: 12, kind: output, shape index: {}]  }
   0x1 LB: > { %s1719_s22 = sadd.s32 4294967295, %s2041_s21   ;;  %p1723_p0 = scmp.ge.s32.totalorder %s2041_s21, 1  ;;  %s2041_s21 = sphi %s2111_s21, %s22_s21  }
   0x2   : > { %p362_p1 = scmp.lt.s32.totalorder %s2041_s21, 3 }
   0x4   : > { %p363_p2 = pnand %p1723_p0, %p362_p1 }
   0x5   : > { %v2003_v0 = vld [vmem:[%s2439_s2] sm:$0xff] (!%p363_p2)   ;;  %v2043_v1 = vmov (!%p363_p2), 0.0   ;;  %vm440_vm0 = vcmask (!%p363_p2), 1043456   ;;  %v2005_v3 = vld [vmem:[%s2439_s2 + $0x8] ss:$0 sps:$4 sm:$0xff] (!%p363_p2)   ;;  %p404_p3 = scmp.lt.s32.totalorder (!%p363_p2), %s1719_s22, 1 }
   0x6   : > { %366 = sbr.rel (%p363_p2) target bundleno = 1008 (0x3f0), region = 68  ;;  %1885 = vmatprep.subr.bf16.mxu1 (!%p363_p2), %v2043_v1  ;;  %1901 = vmatprep.subr.bf16.mxu0 (!%p363_p2), %v2043_v1  ;;  %v2004_v2 = vld [vmem:[%s2439_s2] sm:$0xff] (!%p363_p2)   ;;  %v2006_v4 = vld [vmem:[%s2439_s2 + $0x8] ss:$0 sps:$4 sm:$0xff] (!%p363_p2)   ;;  %v442_v5 = vsel (!%p363_p2), %vm440_vm0, %v2005_v3, 0  ;;  %vm2044_vm1 = vmmov (!%p363_p2), 0  }
   0x7   : > { %1886 = vmatpush3.bf16.msra.mxu1 (!%p363_p2), %v2003_v0  ;;  %1902 = vmatpush3.bf16.msra.mxu0 (!%p363_p2), %v2004_v2  ;;  %v607_v6 = vsel (!%p363_p2), %vm440_vm0, %v2006_v4, 0  ;;  %v2007_v7 = vld [vmem:[%s2439_s2] sm:$0xff] (!%p363_p2)   ;;  %vm436_vm2 = vcmask (!%p363_p2), 195584   ;;  %v2045_v11 = vmov (!%p363_p2), 0   ;;  %v2009_v14 = vld [vmem:[%s2439_s2 + $0x8] ss:$0 sps:$4 sm:$0xff] (!%p363_p2)  }
   0x8   : > { %1887 = vmatprep.subr.bf16.mxu1 (!%p363_p2), %v2043_v1  ;;  %1903 = vmatprep.subr.bf16.mxu0 (!%p363_p2), %v2043_v1  ;;  %v2008_v10 = vld [vmem:[%s2439_s2] sm:$0xff] (!%p363_p2)   ;;  %v2010_v15 = vld [vmem:[%s2439_s2 + $0x8] ss:$0 sps:$4 sm:$0xff] (!%p363_p2)   ;;  %v1742_v20 = vld [vmem:[%s2438_s1 + $0x10] sm:$0x3f] (!%p363_p2)  ;;  %v524_v21 = vsel (!%p363_p2), %vm440_vm0, %v2009_v14, 0 }
   0x9   : > { %1889 = vmatprep.mubr.msk.bf16.mxu1 (!%p363_p2), %vm2044_vm1, %v2043_v1  ;;  %1905 = vmatprep.mubr.msk.bf16.mxu0 (!%p363_p2), %vm2044_vm1, %v2043_v1  ;;  %v2012_v16 = vld [vmem:[%s2439_s2 + $0x8] ss:$0 sps:$4 sm:$0xff] (!%p363_p2)   ;;  %v489_v19 = vld [vmem:[%s2438_s1] sm:$0x3f] (!%p363_p2)  ;;  %v773_v22 = vsel (!%p363_p2), %vm440_vm0, %v2010_v15, 0  ;;  %v2017_v40 = vld [vmem:[%s2443_s6 + $0x10] sm:$0xff] (!%p363_p2)  }
   0xa   : > { %2001 = vset.pattern.permute.xlu0 (!%p363_p2), %v2045_v11  ;;  %2002 = vset.pattern.permute.xlu1 (!%p363_p2), %v2045_v11  ;;  %v690_v23 = vsel (!%p363_p2), %vm440_vm0, %v2012_v16, 0  ;;  %v2011_v24 = vld [vmem:[%s2439_s2] sm:$0xff] (!%p363_p2)   ;;  %v1736_v27 = vld [vmem:[%s2438_s1 + $0x8] sm:$0x3f] (!%p363_p2)  ;;  %v1748_v28 = vld [vmem:[%s2438_s1 + $0x18] sm:$0x3f] (!%p363_p2) }
   0xb   : > { %1888 = vmatpush3.bf16.msra.mxu1 (!%p363_p2), %v442_v5  ;;  %1904 = vmatpush3.bf16.msra.mxu0 (!%p363_p2), %v607_v6  ;;  %v1754_v30 = vld [vmem:[%s2438_s1 + $0x20] sm:$0x3f] (!%p363_p2)  ;;  %v1760_v31 = vld [vmem:[%s2438_s1 + $0x28] sm:$0x3f] (!%p363_p2)  ;;  %v2018_v41 = vld [vmem:[%s2443_s6 + $0x18] sm:$0xff] (!%p363_p2)   ;;  %vm496_vm3 = vcmask (!%p363_p2), 783360  }
   0xc   : > { %1893 = vmatprep.subr.bf16.mxu1 (!%p363_p2), %v2043_v1  ;;  %1917 = vmatprep.subr.bf16.mxu0 (!%p363_p2), %v2043_v1  ;;  %v2013_v32 = vld [vmem:[%s2439_s2] sm:$0xff] (!%p363_p2)   ;;  %v2014_v34 = vld [vmem:[%s2439_s2 + $0x8] ss:$0 sps:$4 sm:$0xff] (!%p363_p2)   ;;  %vm1281_vm4 = vcmask (!%p363_p2), 779264   ;;  %vm1343_vm5 = vcmask (!%p363_p2), 785408   ;;  %vm1559_vm6 = vcmask (!%p363_p2), 189440  }
   0xd   : > { %s2451_s22 = smov (!%p404_p3, %s1719_s22), 1  ;;  %492 = vperm.xlu0 %2001, %v489_v19   ;;  %658 = vperm.xlu1 %2002, %v1742_v20   ;;  %v856_v36 = vsel %vm440_vm0, %v2014_v34, 0  ;;  %v2015_v38 = vld [vmem:[%s2443_s6] sm:$0xff]   ;;  %v2016_v39 = vld [vmem:[%s2443_s6 + $0x8] sm:$0xff]  }
   0xe   : > { %s1989_s13 = smul.u32 48, %s2451_s22  ;;  %v2019_v42 = vld [vmem:[%s2443_s6 + $0x20] sm:$0xff]   ;;  %v2020_v43 = vld [vmem:[%s2443_s6 + $0x28] sm:$0xff]   ;;  %s1842_s27 = sshll.u32 %s2451_s22, 2 }
   0xf   : > { %v2256_v44 = vld [vmem:[%s2440_s3] ss:$0 sm:$0xff]  ;;  %v1763_v34 = vld [vmem:[%s2441_s4 + $0x1] ss:$0 sm:$0xff]  ;;  %s413_s30 = scalar_lea.vmem %s2449_s12, %s1842_s27 }
  0x10   : > { %s2149_s16 = scalar_lea.vmem %s2437_s0, %s1989_s13 }
  0x11   : > { %v415_v8 = vld [vmem:[%s2149_s16] sm:$0x3f]  ;;  %v1737_v9 = vld [vmem:[%s2149_s16 + $0x10] sm:$0x3f]  ;;  %v1731_v17 = vld [vmem:[%s2149_s16 + $0x8] sm:$0x3f]  ;;  %575 = vperm.xlu0 %2001, %v1736_v27   ;;  %741 = vperm.xlu1 %2002, %v1748_v28  }
  0x12   : > { %v416_v12 = vpack.c.bf16 %v415_v8, %v415_v8  ;;  %v583_v13 = vpack.c.bf16 %v1737_v9, %v1737_v9  ;;  %v1749_v18 = vld [vmem:[%s2149_s16 + $0x20] sm:$0x3f]  ;;  %v500_v25 = vpack.c.bf16 %v1731_v17, %v1731_v17  ;;  %v1743_v29 = vld [vmem:[%s2149_s16 + $0x18] sm:$0x3f]  ;;  %v1755_v35 = vld [vmem:[%s2149_s16 + $0x28] sm:$0x3f] }
  0x13   : > { %v749_v26 = vpack.c.bf16 %v1749_v18, %v1749_v18  ;;  %v666_v33 = vpack.c.bf16 %v1743_v29, %v1743_v29  ;;  %v832_v37 = vpack.c.bf16 %v1755_v35, %v1755_v35 }
  0x14   : > { %1890 = vmatmul.mubr.msk.bf16.vlgmr.msra.gmra.mrb[0].mxu1 %vm436_vm2, %v416_v12  ;;  %1906 = vmatmul.mubr.msk.bf16.vlgmr.msra.gmra.mrb[0].mxu0 %vm436_vm2, %v583_v13 }
  0x15   : > { %1894 = vmatpush3.bf16.msra.mxu1 %v2007_v7  ;;  %1918 = vmatpush3.bf16.msra.mxu0 %v2008_v10 }
  0x16   : > { %1895 = vmatprep.subr.bf16.mxu1 %v2043_v1  ;;  %1919 = vmatprep.subr.bf16.mxu0 %v2043_v1 }
  0x17   : > { %1897 = vmatprep.mubr.msk.bf16.mxu1 %vm2044_vm1, %v2043_v1  ;;  %1921 = vmatprep.mubr.msk.bf16.mxu0 %vm2044_vm1, %v2043_v1 }
  0x18   : > { %824 = vperm.xlu0 %2001, %v1754_v30   ;;  %907 = vperm.xlu1 %2002, %v1760_v31  }
  0x19   : > { %1896 = vmatpush3.bf16.msra.mxu1 %v524_v21  ;;  %1920 = vmatpush3.bf16.msra.mxu0 %v773_v22 }
  0x1a   : > { %1909 = vmatprep.subr.bf16.mxu1 %v2043_v1  ;;  %1933 = vmatprep.subr.bf16.mxu0 %v2043_v1 }
  0x1c   : > { %1898 = vmatmul.mubr.msk.bf16.vlgmr.msra.gmra.mrb[4].mxu1 %vm436_vm2, %v500_v25  ;;  %1922 = vmatmul.mubr.msk.bf16.vlgmr.msra.gmra.mrb[4].mxu0 %vm436_vm2, %v749_v26 }
  0x1d   : > { %1910 = vmatpush3.bf16.msra.mxu1 %v2011_v24  ;;  %1913 = vmatprep.mubr.msk.bf16.mxu1 %vm2044_vm1, %v2043_v1 }
  0x1e   : > { %1911 = vmatprep.subr.bf16.mxu1 %v2043_v1  ;;  %1945 = vmatprep.mubr.msk.bf16.mxu0 %vm2044_vm1, %v2043_v1 }
  0x1f   : > { %1934 = vmatpush3.bf16.msra.mxu0 %v2015_v38 }
  0x20   : > { %1935 = vmatprep.subr.bf16.mxu0 %v2043_v1 }
  0x21   : > { %1912 = vmatpush3.bf16.msra.mxu1 %v690_v23 }
  0x22   : > { %1925 = vmatprep.subr.bf16.mxu1 %v2043_v1 }
  0x23   : > { %1936 = vmatpush3.bf16.msra.mxu0 %v2016_v39 }
  0x24   : > { %1914 = vmatmul.mubr.msk.bf16.vlgmr.msra.gmra.mrb[8].mxu1 %vm436_vm2, %v666_v33  ;;  %1937 = vmatprep.subr.bf16.mxu0 %v2043_v1  ;;  %v1761_v33 = vld [vmem:[%s2441_s4] ss:$0 sm:$0xff] }
  0x25   : > { %1926 = vmatpush3.bf16.msra.mxu1 %v2013_v32  ;;  %1929 = vmatprep.mubr.msk.bf16.mxu1 %vm2044_vm1, %v2043_v1 }
  0x26   : > { %1927 = vmatprep.subr.bf16.mxu1 %v2043_v1 }
  0x27   : > { %1938 = vmatpush3.bf16.msra.mxu0 %v2017_v40 }
  0x28   : > { %1939 = vmatprep.subr.bf16.mxu0 %v2043_v1 }
  0x29   : > { %1928 = vmatpush3.bf16.msra.mxu1 %v856_v36  ;;  %v1765_v36 = vld [vmem:[%s2441_s4 + $0x2] ss:$0 sm:$0xff] }
  0x2a   : > { %1949 = vmatprep.subr.bf16.mxu1 %v2043_v1 }
  0x2b   : > { %1940 = vmatpush3.bf16.msra.mxu0 %v2018_v41 }
  0x2c   : > { %1930 = vmatmul.mubr.msk.bf16.vlgmr.msra.gmra.mrb[12].mxu1 %vm436_vm2, %v832_v37  ;;  %1941 = vmatprep.subr.bf16.mxu0 %v2043_v1 }
  0x2d   : > { %1953 = vmatprep.mubr.msk.bf16.mxu1 %vm2044_vm1, %v2043_v1 }
  0x2f   : > { %1942 = vmatpush3.bf16.msra.mxu0 %v2019_v42 }
  0x30   : > { %1943 = vmatprep.subr.bf16.mxu0 %v2043_v1 }
  0x33   : > { %1944 = vmatpush3.bf16.msra.mxu0 %v2020_v43 }
  0x34   : > { %1973 = vmatprep.subr.bf16.mxu0 %v2043_v1 }
  0x8c   : > { %v493_v61 = vpop.permute.xlu0 %492  ;;  %v659_v18 = vpop.permute.xlu1 %658 }
  0x90   : > { %v576_v19 = vpop.permute.xlu0 %575 }
  0x97   : > { %v825_v35 = vpop.permute.xlu0 %824 }
  0xe7   : > { %v478_v45 = vpop.f32.mrb[0].mxu1  ;;  %v643_v46 = vpop.f32.mrb[0].mxu0 }
  0xe8   : > { %v479_v47 = vadd.f32 %v2256_v44, %v478_v45  ;;  %v1891_v48 = vpop.f32.mrb[1].mxu1  ;;  %v644_v49 = vadd.f32 %v2256_v44, %v643_v46  ;;  %v1907_v50 = vpop.f32.mrb[1].mxu0 }
  0xe9   : > { %v481_v51 = vpop.f32.mrb[2].mxu1  ;;  %v646_v52 = vpop.f32.mrb[2].mxu0 }
  0xea   : > { %v484_v53 = vadd.f32 3.0, %v479_v47  ;;  %v1892_v54 = vpop.f32.mrb[3].mxu1  ;;  %v649_v55 = vadd.f32 3.0, %v644_v49  ;;  %v1908_v56 = vpop.f32.mrb[3].mxu0  ;;  %v1769_v52 = vld [vmem:[%s2441_s4 + $0x4] ss:$0 sm:$0xff] }
  0xec   : > { %v485_v57 = vmax.f32 %v484_v53, 0.0  ;;  %v650_v58 = vmax.f32 %v649_v55, 0.0 }
  0xee   : > { %v486_v59 = vmin.f32 %v485_v57, 6.0  ;;  %v651_v60 = vmin.f32 %v650_v58, 6.0 }
  0xef   : > { %v560_v62 = vpop.f32.mrb[4].mxu1  ;;  %v809_v63 = vpop.f32.mrb[4].mxu0 }
  0xf0   : > { %v487_v0 = vmul.f32 %v486_v59, %v479_v47  ;;  %v652_v2 = vmul.f32 %v651_v60, %v644_v49  ;;  %v561_v3 = vadd.f32 %v2256_v44, %v560_v62  ;;  %v810_v4 = vadd.f32 %v2256_v44, %v809_v63  ;;  %v1899_v5 = vpop.f32.mrb[5].mxu1  ;;  %v1923_v6 = vpop.f32.mrb[5].mxu0  ;;  %v1767_v47 = vld [vmem:[%s2441_s4 + $0x3] ss:$0 sm:$0xff] }
  0xf1   : > { %v563_v7 = vpop.f32.mrb[6].mxu1  ;;  %v812_v8 = vpop.f32.mrb[6].mxu0  ;;  %v1773_v6 = vld [vmem:[%s2441_s4 + $0x6] ss:$0 sm:$0xff] }
  0xf2   : > { %v566_v9 = vadd.f32 3.0, %v561_v3  ;;  %v815_v10 = vadd.f32 3.0, %v810_v4  ;;  %v488_v11 = vmul.f32 0.16666667, %v487_v0  ;;  %v1900_v12 = vpop.f32.mrb[7].mxu1  ;;  %v1924_v13 = vpop.f32.mrb[7].mxu0 }
  0xf3   : > { %v653_v14 = vmul.f32 0.16666667, %v652_v2  ;;  %v742_v62 = vpop.permute.xlu1 %741 }
  0xf4   : > { %v567_v15 = vmax.f32 %v566_v9, 0.0  ;;  %v816_v16 = vmax.f32 %v815_v10, 0.0  ;;  %v495_v17 = vmul.f32 %v493_v61, %v488_v11  ;;  %v1771_v61 = vld [vmem:[%s2441_s4 + $0x5] ss:$0 sm:$0xff] }
  0xf5   : > { %v661_v20 = vmul.f32 %v659_v18, %v653_v14  ;;  %v1775_v14 = vld [vmem:[%s2441_s4 + $0x7] ss:$0 sm:$0xff] }
  0xf6   : > { %v568_v21 = vmin.f32 %v567_v15, 6.0  ;;  %v817_v22 = vmin.f32 %v816_v16, 6.0  ;;  %497 = vst.msk [vmem:[#allocation2] sm:$0x3f] %vm496_vm3, %v495_v17 }
  0xf7   : > { %v726_v23 = vpop.f32.mrb[8].mxu1  ;;  %663 = vst.msk [vmem:[#allocation2 + $0x10] sm:$0x3f] %vm496_vm3, %v661_v20 }
  0xf8   : > { %v569_v24 = vmul.f32 %v568_v21, %v561_v3  ;;  %v818_v25 = vmul.f32 %v817_v22, %v810_v4  ;;  %v727_v26 = vadd.f32 %v2256_v44, %v726_v23  ;;  %v1915_v27 = vpop.f32.mrb[9].mxu1  ;;  %v1777_v21 = vld [vmem:[%s2441_s4 + $0x8] ss:$0 sm:$0xff] }
  0xf9   : > { %v729_v28 = vpop.f32.mrb[10].mxu1 }
  0xfa   : > { %v570_v29 = vmul.f32 0.16666667, %v569_v24  ;;  %v819_v30 = vmul.f32 0.16666667, %v818_v25  ;;  %v732_v31 = vadd.f32 3.0, %v727_v26  ;;  %v1916_v32 = vpop.f32.mrb[11].mxu1 }
  0xfc   : > { %v578_v37 = vmul.f32 %v576_v19, %v570_v29  ;;  %v827_v38 = vmul.f32 %v825_v35, %v819_v30  ;;  %v733_v39 = vmax.f32 %v732_v31, 0.0  ;;  %v1779_v29 = vld [vmem:[%s2441_s4 + $0x9] ss:$0 sm:$0xff] }
  0xfd   : > { %v913_v40 = vld [vmem:[#allocation2] sm:$0x3]  ;;  %v940_v42 = vld [vmem:[#allocation2 + $0x2] sm:$0x3]  ;;  %v968_v53 = vld [vmem:[#allocation2 + $0x4] sm:$0x3] }
  0xfe   : > { %v926_v41 = vld [vmem:[#allocation2 + $0x1] sm:$0x3]  ;;  %v922_v43 = vmul.f32 %v1761_v33, %v913_v40  ;;  %580 = vst.msk [vmem:[#allocation2 + $0x8] sm:$0x3f] %vm496_vm3, %v578_v37  ;;  %829 = vst.msk [vmem:[#allocation2 + $0x20] sm:$0x3f] %vm496_vm3, %v827_v38  ;;  %v950_v50 = vmul.f32 %v1765_v36, %v940_v42  ;;  %v978_v60 = vmul.f32 %v1769_v52, %v968_v53 }
  0xff   : > { %v936_v45 = vmul.f32 %v1763_v34, %v926_v41  ;;  %v734_v46 = vmin.f32 %v733_v39, 6.0  ;;  %v954_v48 = vld [vmem:[#allocation2 + $0x3] sm:$0x3]  ;;  %v892_v56 = vpop.f32.mrb[12].mxu1  ;;  %v983_v27 = vld [vmem:[#allocation2 + $0x10] sm:$0x3] }
 0x100   : > { %v964_v55 = vmul.f32 %v1767_v47, %v954_v48  ;;  %v1931_v58 = vpop.f32.mrb[13].mxu1  ;;  %v893_v13 = vadd.f32 %v2256_v44, %v892_v56  ;;  %v997_v35 = vld [vmem:[#allocation2 + $0x11] sm:$0x3]  ;;  %v1781_v38 = vld [vmem:[%s2441_s4 + $0xa] ss:$0 sm:$0xff]  ;;  %v993_v39 = vmul.f32 %v1771_v61, %v983_v27 }
 0x101   : > { %v938_v49 = vadd.f32 %v936_v45, %v922_v43  ;;  %v735_v51 = vmul.f32 %v734_v46, %v727_v26  ;;  %v895_v63 = vpop.f32.mrb[14].mxu1  ;;  %v1052_v40 = vld [vmem:[#allocation2 + $0x10] sm:$0x3]  ;;  %v1011_v43 = vld [vmem:[#allocation2 + $0x12] sm:$0x3]  ;;  %v1007_v48 = vmul.f32 %v1773_v6, %v997_v35 }
 0x102   : > { %v1932_v44 = vpop.f32.mrb[15].mxu1  ;;  %v898_v28 = vadd.f32 3.0, %v893_v13  ;;  %v1783_v46 = vld [vmem:[%s2441_s4 + $0xb] ss:$0 sm:$0xff]  ;;  %v1021_v56 = vmul.f32 %v1775_v14, %v1011_v43  ;;  %v1039_v58 = vld [vmem:[#allocation2 + $0x14] sm:$0x3] }
 0x103   : > { %v952_v54 = vadd.f32 %v950_v50, %v938_v49  ;;  %v736_v57 = vmul.f32 0.16666667, %v735_v51  ;;  %v1066_v49 = vld [vmem:[#allocation2 + $0x11] sm:$0x3]  ;;  %v1025_v51 = vld [vmem:[#allocation2 + $0x13] sm:$0x3] }
 0x104   : > { %v1793_v27 = vld [vmem:[%s2441_s4 + $0x10] ss:$0 sm:$0xff] }
 0x105   : > { %v966_v59 = vadd.f32 %v964_v55, %v952_v54  ;;  %v914_v0 = vld [vmem:[#allocation2 + $0x8] sm:$0x3]  ;;  %v941_v3 = vld [vmem:[#allocation2 + $0xa] sm:$0x3]  ;;  %v744_v4 = vmul.f32 %v742_v62, %v736_v57  ;;  %v969_v18 = vld [vmem:[#allocation2 + $0xc] sm:$0x3] }
 0x106   : > { %v927_v2 = vld [vmem:[#allocation2 + $0x9] sm:$0x3]  ;;  %v923_v7 = vmul.f32 %v1761_v33, %v914_v0  ;;  %v955_v10 = vld [vmem:[#allocation2 + $0xb] sm:$0x3]  ;;  %v951_v16 = vmul.f32 %v1765_v36, %v941_v3  ;;  %v979_v31 = vmul.f32 %v1769_v52, %v969_v18  ;;  %v899_v36 = vmax.f32 %v898_v28, 0.0  ;;  %v908_v3 = vpop.permute.xlu1 %907 }
 0x107   : > { %v980_v5 = vadd.f32 %v978_v60, %v966_v59  ;;  %v937_v8 = vmul.f32 %v1763_v34, %v927_v2  ;;  %v982_v9 = vld [vmem:[#allocation2 + $0x8] sm:$0x3]  ;;  %746 = vst.msk [vmem:[#allocation2 + $0x18] sm:$0x3f] %vm496_vm3, %v744_v4  ;;  %v1010_v17 = vld [vmem:[#allocation2 + $0xa] sm:$0x3]  ;;  %v965_v23 = vmul.f32 %v1767_v47, %v955_v10  ;;  %v1062_v52 = vmul.f32 %v1781_v38, %v1052_v40 }
 0x108   : > { %v992_v11 = vmul.f32 %v1771_v61, %v982_v9  ;;  %v996_v12 = vld [vmem:[#allocation2 + $0x9] sm:$0x3]  ;;  %v1024_v24 = vld [vmem:[#allocation2 + $0xb] sm:$0x3]  ;;  %v1020_v26 = vmul.f32 %v1775_v14, %v1010_v17  ;;  %v900_v45 = vmin.f32 %v899_v36, 6.0  ;;  %v1076_v60 = vmul.f32 %v1783_v46, %v1066_v49 }
 0x109   : > { %v939_v15 = vadd.f32 %v937_v8, %v923_v7  ;;  %v1006_v20 = vmul.f32 %v1773_v6, %v996_v12  ;;  %v1038_v32 = vld [vmem:[#allocation2 + $0xc] sm:$0x3]  ;;  %v1034_v34 = vmul.f32 %v1777_v21, %v1024_v24  ;;  %v1080_v57 = vld [vmem:[#allocation2 + $0x12] sm:$0x3]  ;;  %v1035_v0 = vmul.f32 %v1777_v21, %v1025_v51  ;;  %v1789_v8 = vld [vmem:[%s2441_s4 + $0xe] ss:$0 sm:$0xff] }
 0x10a   : > { %v994_v19 = vadd.f32 %v992_v11, %v980_v5  ;;  %v1048_v42 = vmul.f32 %v1779_v29, %v1038_v32  ;;  %v901_v53 = vmul.f32 %v900_v45, %v893_v13  ;;  %v1785_v54 = vld [vmem:[%s2441_s4 + $0xc] ss:$0 sm:$0xff]  ;;  %v1787_v62 = vld [vmem:[%s2441_s4 + $0xd] ss:$0 sm:$0xff]  ;;  %v1094_v2 = vld [vmem:[#allocation2 + $0x13] sm:$0x3]  ;;  %v1049_v10 = vmul.f32 %v1779_v29, %v1039_v58 }
 0x10b   : > { %v953_v22 = vadd.f32 %v951_v16, %v939_v15  ;;  %v1090_v5 = vmul.f32 %v1785_v54, %v1080_v57  ;;  %v1108_v11 = vld [vmem:[#allocation2 + $0x14] sm:$0x3]  ;;  %v1104_v13 = vmul.f32 %v1787_v62, %v1094_v2  ;;  %v1791_v21 = vld [vmem:[%s2441_s4 + $0xf] ss:$0 sm:$0xff]  ;;  %v1799_v49 = vld [vmem:[%s2441_s4 + $0x13] ss:$0 sm:$0xff] }
 0x10c   : > { %v1008_v25 = vadd.f32 %v1006_v20, %v994_v19  ;;  %v902_v61 = vmul.f32 0.16666667, %v901_v53  ;;  %v1118_v19 = vmul.f32 %v1789_v8, %v1108_v11  ;;  %v1206_v58 = vld [vmem:[#allocation2 + $0x21] sm:$0x3]  ;;  %v1807_v11 = vld [vmem:[%s2441_s4 + $0x17] ss:$0 sm:$0xff] }
 0x10d   : > { %v967_v30 = vadd.f32 %v965_v23, %v953_v22 }
 0x10e   : > { %v1022_v33 = vadd.f32 %v1020_v26, %v1008_v25  ;;  %v1053_v6 = vld [vmem:[#allocation2 + $0x18] sm:$0x3]  ;;  %v910_v7 = vmul.f32 %v908_v3, %v902_v61  ;;  %v1081_v20 = vld [vmem:[#allocation2 + $0x1a] sm:$0x3]  ;;  %v1178_v45 = vld [vmem:[#allocation2 + $0x1c] sm:$0x3] }
 0x10f   : > { %v981_v37 = vadd.f32 %v979_v31, %v967_v30  ;;  %v1067_v14 = vld [vmem:[#allocation2 + $0x19] sm:$0x3]  ;;  %v1063_v16 = vmul.f32 %v1781_v38, %v1053_v6  ;;  %v1095_v25 = vld [vmem:[#allocation2 + $0x1b] sm:$0x3]  ;;  %v1091_v29 = vmul.f32 %v1785_v54, %v1081_v20  ;;  %v1123_v38 = vld [vmem:[#allocation2 + $0x20] sm:$0x3] }
 0x110   : > { %v1036_v41 = vadd.f32 %v1034_v34, %v1022_v33  ;;  %912 = vst.msk [vmem:[#allocation2 + $0x28] sm:$0x3f] %vm496_vm3, %v910_v7  ;;  %v1122_v17 = vld [vmem:[#allocation2 + $0x18] sm:$0x3]  ;;  %v1077_v23 = vmul.f32 %v1783_v46, %v1067_v14  ;;  %v1150_v30 = vld [vmem:[#allocation2 + $0x1a] sm:$0x3]  ;;  %v1105_v36 = vmul.f32 %v1787_v62, %v1095_v25  ;;  %v1133_v51 = vmul.f32 %v1791_v21, %v1123_v38 }
 0x111   : > { %v995_v47 = vadd.f32 %v993_v39, %v981_v37  ;;  %v1136_v24 = vld [vmem:[#allocation2 + $0x19] sm:$0x3]  ;;  %v1132_v26 = vmul.f32 %v1791_v21, %v1122_v17  ;;  %v1109_v31 = vld [vmem:[#allocation2 + $0x1c] sm:$0x3]  ;;  %v1795_v34 = vld [vmem:[%s2441_s4 + $0x11] ss:$0 sm:$0xff] }
 0x112   : > { %v1050_v50 = vadd.f32 %v1048_v42, %v1036_v41  ;;  %v1146_v33 = vmul.f32 %v1793_v27, %v1136_v24  ;;  %v1164_v37 = vld [vmem:[#allocation2 + $0x1b] sm:$0x3]  ;;  %v1160_v40 = vmul.f32 %v1795_v34, %v1150_v30  ;;  %v1797_v41 = vld [vmem:[%s2441_s4 + $0x12] ss:$0 sm:$0xff]  ;;  %v1119_v43 = vmul.f32 %v1789_v8, %v1109_v31  ;;  %v1137_v46 = vld [vmem:[#allocation2 + $0x21] sm:$0x3] }
 0x113   : > { %v1009_v55 = vadd.f32 %v1007_v48, %v995_v47  ;;  %v1174_v48 = vmul.f32 %v1797_v41, %v1164_v37  ;;  %v1151_v54 = vld [vmem:[#allocation2 + $0x22] sm:$0x3]  ;;  %v1147_v57 = vmul.f32 %v1793_v27, %v1137_v46  ;;  %v1248_v17 = vld [vmem:[#allocation2 + $0x24] sm:$0x3] }
 0x114   : > { %v1064_v59 = vadd.f32 %v1062_v52, %v1050_v50  ;;  %v1801_v50 = vld [vmem:[%s2441_s4 + $0x14] ss:$0 sm:$0xff]  ;;  %v1192_v52 = vld [vmem:[#allocation2 + $0x20] sm:$0x3]  ;;  %v1165_v61 = vld [vmem:[#allocation2 + $0x23] sm:$0x3] }
 0x115   : > { %v1023_v63 = vadd.f32 %v1021_v56, %v1009_v55  ;;  %v1188_v56 = vmul.f32 %v1799_v49, %v1178_v45  ;;  %v1202_v62 = vmul.f32 %v1801_v50, %v1192_v52  ;;  %v1220_v3 = vld [vmem:[#allocation2 + $0x22] sm:$0x3]  ;;  %v1175_v8 = vmul.f32 %v1797_v41, %v1165_v61 }
 0x116   : > { %v1078_v4 = vadd.f32 %v1076_v60, %v1064_v59  ;;  %v1803_v60 = vld [vmem:[%s2441_s4 + $0x15] ss:$0 sm:$0xff] }
 0x117   : > { %v1037_v9 = vadd.f32 %v1035_v0, %v1023_v63  ;;  %v1161_v0 = vmul.f32 %v1795_v34, %v1151_v54  ;;  %v1216_v7 = vmul.f32 %v1803_v60, %v1206_v58  ;;  %v1221_v24 = vld [vmem:[#allocation2 + $0x2a] sm:$0x3] }
 0x118   : > { %v1092_v12 = vadd.f32 %v1090_v5, %v1078_v4  ;;  %v1805_v4 = vld [vmem:[%s2441_s4 + $0x16] ss:$0 sm:$0xff]  ;;  %v1179_v5 = vld [vmem:[#allocation2 + $0x24] sm:$0x3] }
 0x119   : > { %v1051_v15 = vadd.f32 %v1049_v10, %v1037_v9  ;;  %v1234_v10 = vld [vmem:[#allocation2 + $0x23] sm:$0x3]  ;;  %v1230_v14 = vmul.f32 %v1805_v4, %v1220_v3 }
 0x11a   : > { %v1106_v18 = vadd.f32 %v1104_v13, %v1092_v12  ;;  %v1193_v12 = vld [vmem:[#allocation2 + $0x28] sm:$0x3]  ;;  %v1244_v21 = vmul.f32 %v1807_v11, %v1234_v10 }
 0x11b   : > { %v1065_v22 = vadd.f32 %v1063_v16, %v1051_v15  ;;  %v1189_v15 = vmul.f32 %v1799_v49, %v1179_v5  ;;  %v2026_v5 = vld [vmem:[%s2447_s10 + $0x8] sm:$0xff]  }
 0x11c   : > { %v1120_v44 = vadd.f32 %v1118_v19, %v1106_v18  ;;  %v1809_v18 = vld [vmem:[%s2441_s4 + $0x18] ss:$0 sm:$0xff]  ;;  %v1207_v19 = vld [vmem:[#allocation2 + $0x29] sm:$0x3] }
 0x11d   : > { %v1079_v28 = vadd.f32 %v1077_v23, %v1065_v22  ;;  %v1203_v22 = vmul.f32 %v1801_v50, %v1193_v12  ;;  %v1258_v25 = vmul.f32 %v1809_v18, %v1248_v17  ;;  %v1217_v27 = vmul.f32 %v1803_v60, %v1207_v19  ;;  %v2028_v17 = vld [vmem:[%s2447_s10 + $0x10] sm:$0xff]   ;;  %v2030_v19 = vld [vmem:[%s2447_s10 + $0x18] sm:$0xff]  }
 0x11e   : > { %v1134_v32 = vadd.f32 %v1132_v26, %v1120_v44 }
 0x11f   : > { %v1093_v35 = vadd.f32 %v1091_v29, %v1079_v28  ;;  %v1810_v28 = vld [vmem:[%s2442_s5] ss:$0 sm:$0xff]  ;;  %v1235_v29 = vld [vmem:[#allocation2 + $0x2b] sm:$0x3] }
 0x120   : > { %v1148_v39 = vadd.f32 %v1146_v33, %v1134_v32  ;;  %v1231_v32 = vmul.f32 %v1805_v4, %v1221_v24  ;;  %v1249_v33 = vld [vmem:[#allocation2 + $0x2c] sm:$0x3]  ;;  %v2024_v4 = vld [vmem:[%s2447_s10] sm:$0xff]  }
 0x121   : > { %v1107_v42 = vadd.f32 %v1105_v36, %v1093_v35  ;;  %v1245_v36 = vmul.f32 %v1807_v11, %v1235_v29  ;;  %v1392_v24 = vld [vmem:[%s2446_s9] sm:$0x1] }
 0x122   : > { %v1162_v47 = vadd.f32 %v1160_v40, %v1148_v39  ;;  %v1259_v39 = vmul.f32 %v1809_v18, %v1249_v33  ;;  %v2029_v18 = vld [vmem:[%s2447_s10 + $0x18] sm:$0xff]  }
 0x123   : > { %v1121_v53 = vadd.f32 %v1119_v43, %v1107_v42 }
 0x124   : > { %v1176_v55 = vadd.f32 %v1174_v48, %v1162_v47 }
 0x125   : > { %v1135_v59 = vadd.f32 %v1133_v51, %v1121_v53 }
 0x126   : > { %v1190_v63 = vadd.f32 %v1188_v56, %v1176_v55 }
 0x127   : > { %v1149_v2 = vadd.f32 %v1147_v57, %v1135_v59 }
 0x128   : > { %v1204_v6 = vadd.f32 %v1202_v62, %v1190_v63 }
 0x129   : > { %v1163_v9 = vadd.f32 %v1161_v0, %v1149_v2  ;;  %v2021_v0 = vld [vmem:[%s2445_s8] sm:$0xff]   ;;  %v2022_v2 = vld [vmem:[%s2445_s8 + $0x8] ss:$0 sps:$4 sm:$0xff]  }
 0x12a   : > { %v1218_v13 = vadd.f32 %v1216_v7, %v1204_v6  ;;  %1950 = vmatpush3.bf16.msra.mxu1 %v2021_v0  ;;  %v1406_v3 = vsel %vm440_vm0, %v2022_v2, 0  ;;  %v1306_v6 = vld [vmem:[%s2444_s7] sm:$0x1] }
 0x12b   : > { %v1177_v16 = vadd.f32 %v1175_v8, %v1163_v9  ;;  %1951 = vmatprep.subr.bf16.mxu1 %v2043_v1 }
 0x12c   : > { %v1232_v20 = vadd.f32 %v1230_v14, %v1218_v13  ;;  %v2023_v13 = vld [vmem:[%s2447_s10] sm:$0xff]  }
 0x12d   : > { %v1191_v23 = vadd.f32 %v1189_v15, %v1177_v16  ;;  %v2025_v15 = vld [vmem:[%s2447_s10 + $0x8] sm:$0xff]   ;;  %v2027_v16 = vld [vmem:[%s2447_s10 + $0x10] sm:$0xff]  }
 0x12e   : > { %v1246_v44 = vadd.f32 %v1244_v21, %v1232_v20  ;;  %1952 = vmatpush3.bf16.msra.mxu1 %v1406_v3  ;;  %v2031_v20 = vld [vmem:[%s2447_s10 + $0x20] sm:$0xff]  }
 0x12f   : > { %v1205_v26 = vadd.f32 %v1203_v22, %v1191_v23  ;;  %1957 = vmatprep.subr.bf16.mxu1 %v2043_v1  ;;  %v2032_v21 = vld [vmem:[%s2447_s10 + $0x20] sm:$0xff]   ;;  %v2033_v22 = vld [vmem:[%s2447_s10 + $0x28] sm:$0xff]  }
 0x130   : > { %v1260_v30 = vadd.f32 %v1258_v25, %v1246_v44  ;;  %v2034_v23 = vld [vmem:[%s2447_s10 + $0x28] sm:$0xff]   ;;  %v1452_v44 = vlaneseq }
 0x131   : > { %v1219_v31 = vadd.f32 %v1217_v27, %v1205_v26 }
 0x132   : > { %v1269_v34 = vadd.f32 %v1810_v28, %v1260_v30  ;;  %v1453_v30 = vshrl.u32 %v1452_v44, 7 }
 0x133   : > { %v1233_v35 = vadd.f32 %v1231_v32, %v1219_v31 }
 0x134   : > { %v1271_v37 = vadd.f32 3.0, %v1269_v34 }
 0x135   : > { %v1247_v38 = vadd.f32 %v1245_v36, %v1233_v35 }
 0x136   : > { %v1273_v40 = vmax.f32 %v1271_v37, 0.0 }
 0x137   : > { %v1261_v41 = vadd.f32 %v1259_v39, %v1247_v38 }
 0x138   : > { %v1275_v43 = vmin.f32 %v1273_v40, 6.0  ;;  %v1821_v40 = vld [vmem:[%s2448_s11] ss:$0 sm:$0xff] }
 0x139   : > { %v1270_v42 = vadd.f32 %v1810_v28, %v1261_v41 }
 0x13a   : > { %v1277_v47 = vmul.f32 %v1275_v43, %v1269_v34 }
 0x13b   : > { %v1272_v45 = vadd.f32 3.0, %v1270_v42 }
 0x13c   : > { %v2348_v50 = vmul.f32 0.16666667, %v1277_v47 }
 0x13d   : > { %v1274_v46 = vmax.f32 %v1272_v45, 0.0  ;;  %v1838_v45 = vld [vmem:[%s2149_s16 + $0x1a] sm:$0x3] }
 0x13e   : > { %v1282_v52 = vsel %vm1281_vm4, %v2348_v50, 0.0 }
 0x13f   : > { %v1276_v48 = vmin.f32 %v1274_v46, 6.0 }
 0x141   : > { %v1278_v49 = vmul.f32 %v1276_v48, %v1270_v42  ;;  %v1829_v42 = vld [vmem:[%s2149_s16 + $0x12] sm:$0x3] }
 0x143   : > { %v2350_v51 = vmul.f32 0.16666667, %v1278_v49 }
 0x145   : > { %v1283_v53 = vsel %vm1281_vm4, %v2350_v51, 0.0 }
 0x146   : > { %v1284_v54 = vadd.f32 %v1283_v53, %v1282_v52 }
 0x148   : > { %v1285_v55 = vsel %vm1281_vm4, %v1284_v54, 0.0 }
 0x149   : > { %v1286_v56 = vrot.slane %v1285_v55, 4 }
 0x14b   : > { %v1287_v57 = vadd.f32 %v1286_v56, %v1285_v55 }
 0x14d   : > { %v1288_v58 = vrot.slane %v1287_v57, 2 }
 0x14f   : > { %v1289_v59 = vadd.f32 %v1288_v58, %v1287_v57 }
 0x151   : > { %v1290_v60 = vrot.slane %v1289_v59, 1 }
 0x153   : > { %v1291_v61 = vadd.f32 %v1290_v60, %v1289_v59 }
 0x155   : > { %v1292_v62 = vmul.f32 0.25, %v1291_v61 }
 0x157   : > { %v1293_v63 = vpack.c.bf16 %v1292_v62, %v1292_v62 }
 0x159   : > { %1946 = vmatmul.mubr.msk.bf16.vlgmr.msra.gmra.mrb[8].mxu0 %vm1343_vm5, %v1293_v63 }
 0x15a   : > { %1985 = vmatprep.mubr.msk.bf16.mxu0 %vm2044_vm1, %v2043_v1  ;;  %1974 = vmatpush3.bf16.msra.mxu0 %v2024_v4 }
 0x15b   : > { %1975 = vmatprep.subr.bf16.mxu0 %v2043_v1 }
 0x15e   : > { %1976 = vmatpush3.bf16.msra.mxu0 %v2026_v5 }
 0x15f   : > { %1977 = vmatprep.subr.bf16.mxu0 %v2043_v1 }
 0x162   : > { %1978 = vmatpush3.bf16.msra.mxu0 %v2028_v17 }
 0x163   : > { %1979 = vmatprep.subr.bf16.mxu0 %v2043_v1 }
 0x166   : > { %1980 = vmatpush3.bf16.msra.mxu0 %v2030_v19 }
 0x167   : > { %1981 = vmatprep.subr.bf16.mxu0 %v2043_v1 }
 0x16a   : > { %1982 = vmatpush3.bf16.msra.mxu0 %v2032_v21 }
 0x16b   : > { %1983 = vmatprep.subr.bf16.mxu0 %v2043_v1 }
 0x16e   : > { %1984 = vmatpush3.bf16.msra.mxu0 %v2034_v23 }
 0x22c   : > { %v1381_v7 = vpop.f32.mrb[8].mxu0 }
 0x22d   : > { %v1382_v8 = vadd.f32 %v1381_v7, %v1306_v6  ;;  %v1947_v9 = vpop.f32.mrb[9].mxu0 }
 0x22e   : > { %v1384_v10 = vpop.f32.mrb[10].mxu0 }
 0x22f   : > { %v1387_v11 = vmax.f32 %v1382_v8, 0.0  ;;  %v1948_v12 = vpop.f32.mrb[11].mxu0 }
 0x231   : > { %v1388_v14 = vpack.c.bf16 %v1387_v11, %v1387_v11 }
 0x233   : > { %1954 = vmatmul.mubr.msk.bf16.vlgmr.msra.gmra.mrb[16].mxu1 %vm436_vm2, %v1388_v14 }
 0x234   : > { %1958 = vmatpush3.bf16.msra.mxu1 %v2023_v13  ;;  %1969 = vmatprep.mubr.msk.bf16.mxu1 %vm2044_vm1, %v2043_v1 }
 0x235   : > { %1959 = vmatprep.subr.bf16.mxu1 %v2043_v1 }
 0x238   : > { %1960 = vmatpush3.bf16.msra.mxu1 %v2025_v15 }
 0x239   : > { %1961 = vmatprep.subr.bf16.mxu1 %v2043_v1 }
 0x23c   : > { %1962 = vmatpush3.bf16.msra.mxu1 %v2027_v16 }
 0x23d   : > { %1963 = vmatprep.subr.bf16.mxu1 %v2043_v1 }
 0x240   : > { %1964 = vmatpush3.bf16.msra.mxu1 %v2029_v18 }
 0x241   : > { %1965 = vmatprep.subr.bf16.mxu1 %v2043_v1 }
 0x244   : > { %1966 = vmatpush3.bf16.msra.mxu1 %v2031_v20 }
 0x245   : > { %1967 = vmatprep.subr.bf16.mxu1 %v2043_v1  ;;  %v1454_v1 = vsub.s32 0, %v1453_v30 }
 0x248   : > { %1968 = vmatpush3.bf16.msra.mxu1 %v2033_v22 }
 0x306   : > { %v1442_v25 = vpop.f32.mrb[16].mxu1 }
 0x307   : > { %v1443_v26 = vadd.f32 %v1442_v25, %v1392_v24  ;;  %v1955_v27 = vpop.f32.mrb[17].mxu1 }
 0x308   : > { %v1445_v28 = vpop.f32.mrb[18].mxu1 }
 0x309   : > { %v1448_v29 = vadd.f32 3.0, %v1443_v26  ;;  %v1956_v31 = vpop.f32.mrb[19].mxu1 }
 0x30b   : > { %v1449_v32 = vmax.f32 %v1448_v29, 0.0 }
 0x30d   : > { %v1450_v33 = vmin.f32 %v1449_v32, 6.0 }
 0x30f   : > { %v1451_v34 = vmul.f32 0.16666667, %v1450_v33 }
 0x311   : > { %v1455_v35 = vrot.slane %v1451_v34, %v1454_v1 }
 0x313   : > { %v1456_v36 = vmul.f32 %v1455_v35, %v2348_v50  ;;  %v1457_v37 = vmul.f32 %v1455_v35, %v2350_v51 }
 0x315   : > { %v1458_v38 = vpack.c.bf16 %v1456_v36, %v1456_v36  ;;  %v1561_v39 = vpack.c.bf16 %v1457_v37, %v1457_v37 }
 0x317   : > { %1970 = vmatmul.mubr.msk.bf16.vlgmr.msra.gmra.mrb[20].mxu1 %vm1343_vm5, %v1458_v38  ;;  %1986 = vmatmul.mubr.msk.bf16.vlgmr.msra.gmra.mrb[12].mxu0 %vm1343_vm5, %v1561_v39 }
 0x3ea   : > { %v1551_v41 = vpop.f32.mrb[20].mxu1  ;;  %v1654_v43 = vpop.f32.mrb[12].mxu0 }
 0x3eb   : > { %v1552_v46 = vadd.f32 %v1821_v40, %v1551_v41  ;;  %v1655_v47 = vadd.f32 %v1821_v40, %v1654_v43  ;;  %v1971_v48 = vpop.f32.mrb[21].mxu1  ;;  %v1987_v49 = vpop.f32.mrb[13].mxu0 }
 0x3ec   : > { %v1554_v50 = vpop.f32.mrb[22].mxu1  ;;  %v1657_v51 = vpop.f32.mrb[14].mxu0 }
 0x3ed   : > { %v1558_v52 = vadd.f32 %v1829_v42, %v1552_v46  ;;  %v1661_v53 = vadd.f32 %v1838_v45, %v1655_v47  ;;  %v1972_v54 = vpop.f32.mrb[23].mxu1  ;;  %v1988_v55 = vpop.f32.mrb[15].mxu0 }
 0x3ef   : > { %1560 = vst.msk [vmem:[%s413_s30] sm:$0x3] %vm1559_vm6, %v1558_v52  ;;  %1839 = vst.msk [vmem:[%s413_s30 + $0x2] sm:$0x3] %vm1559_vm6, %v1661_v53 }
 0x3f0 PF: > { %s22_s21 = sadd.s32 1, %s2041_s21  }
 0x3f1   : > { %p19_p4 = scmp.ge.s32.totalorder %s22_s21, 4  }
 0x3f3   :  { %21 = sbr.rel (!%p19_p4) target bundleno = 1 (0x1), region = 138 }

</bundles_post_ra>
